<compile_context>
chip_gen: v7x
topology: tpu7x:2x2x1
jax: 0.10.0
libtpu: 0.0.40
codegen_flags: <defaults>
</compile_context>

<pallas_src>
import jax
import jax.numpy as jnp
from jax import lax
from jax.experimental import pallas as pl
from jax.experimental.pallas import tpu as pltpu

# ---------------------------------------------------------------------------
# Geometry (MNIST is mandated by fc1's 9216 = 64 * 12 * 12 input features).
# ---------------------------------------------------------------------------
H_IN = 28
NPIX = H_IN * H_IN                    # 784 flat pixels per image
IMGW = 896                            # lane width (7*128) of all wide buffers
PITCH = H_IN                          # row pitch inside the wide flat layout
C1, C2 = 32, 64                       # conv channel counts
HWP = 12                              # pooled spatial size
NPOOL = HWP * HWP                     # 144 pooled pixels
FEAT = C2 * NPOOL                     # 9216 (torch.flatten order: c-major)
HID = 128
NCLS = 10
NCLS_PAD = 128                        # lane-dense logits
NB_IMGS = 8                           # images per conv grid step
TAP_OFFS = tuple(dy * PITCH + dx for dy in range(3) for dx in range(3))


# ---------------------------------------------------------------------------
# Kernel A: conv1 -> relu -> conv2 -> relu -> 2x2 maxpool, NB images per step
# Layout: channels on sublanes, flat pixels (pitch 28, width 896) on lanes.
# ---------------------------------------------------------------------------
def _conv_pool_kernel(img_ref, w1_ref, b1_ref, w2_ref, b2_ref, sel_ref,
                      o_ref, col_ref):
    nb = img_ref.shape[0]
    b1 = b1_ref[...]                                   # (32, 1)  f32
    w2 = w2_ref[...]                                   # (64, 288) bf16
    b2 = b2_ref[...]                                   # (64, 1)  f32
    sel = sel_ref[...]                                 # (896, 144) bf16
    w1cols = [w1_ref[:, pl.ds(t, 1)] for t in range(9)]   # 9 x (32, 1) f32

    def one_image(i, carry):
        img = img_ref[pl.ds(i, 1), :]                  # (1, 896) f32

        # conv1 (1->32, 3x3): 9 rank-1 VPU updates over lane-rolled taps.
        h1 = jnp.zeros((C1, IMGW), jnp.float32)
        for t, off in enumerate(TAP_OFFS):
            tap = img if off == 0 else pltpu.roll(img, shift=IMGW - off, axis=1)
            h1 = h1 + w1cols[t] * tap
        h1 = jnp.maximum(h1 + b1, 0.0)                 # (32, 896) f32, relu

        # conv2 (32->64, 3x3): materialize the (288, 896) im2col in VMEM with
        # 32-aligned sublane writes (dy/dx shifts are XLU lane rolls), then a
        # single K=288 bf16 MXU dot with f32 accumulation.
        for t, off in enumerate(TAP_OFFS):
            blk = h1 if off == 0 else pltpu.roll(h1, shift=IMGW - off, axis=1)
            col_ref[pl.ds(t * C1, C1), :] = blk.astype(jnp.bfloat16)
        h2 = jnp.dot(w2, col_ref[...], preferred_element_type=jnp.float32)
        h2 = jnp.maximum(h2 + b2, 0.0)                 # (64, 896) f32, relu

        # 2x2 maxpool fused as epilogue: two lane-rolled VPU maxes gather the
        # 2x2 window, then a small 0/1 bf16 gather dot picks the 144 valid
        # window bases (junk/pad columns are multiplied by exact zeros) and
        # emits torch.flatten (c-major) order directly.
        hx = jnp.maximum(h2, pltpu.roll(h2, shift=IMGW - 1, axis=1))
        hp = jnp.maximum(hx, pltpu.roll(hx, shift=IMGW - PITCH, axis=1))
        pooled = jnp.dot(hp.astype(jnp.bfloat16), sel,
                         preferred_element_type=jnp.float32)   # (64, 144)
        o_ref[i] = pooled.astype(o_ref.dtype)
        return carry

    lax.fori_loop(0, nb, one_image, 0)


def conv_pool(imgs, w1, b1, w2, b2, sel):
    n = imgs.shape[0]
    nb = NB_IMGS if n >= NB_IMGS else n
    assert n % nb == 0
    return pl.pallas_call(
        _conv_pool_kernel,
        out_shape=jax.ShapeDtypeStruct((n, C2, NPOOL), jnp.bfloat16),
        grid_spec=pltpu.PrefetchScalarGridSpec(
            num_scalar_prefetch=0,
            grid=(n // nb,),
            in_specs=[
                pl.BlockSpec((nb, IMGW), lambda i: (i, 0)),        # images
                pl.BlockSpec((C1, 9), lambda i: (0, 0)),           # w1
                pl.BlockSpec((C1, 1), lambda i: (0, 0)),           # b1
                pl.BlockSpec((C2, 9 * C1), lambda i: (0, 0)),      # w2 (cols)
                pl.BlockSpec((C2, 1), lambda i: (0, 0)),           # b2
                pl.BlockSpec((IMGW, NPOOL), lambda i: (0, 0)),     # pool gather
            ],
            out_specs=pl.BlockSpec((nb, C2, NPOOL), lambda i: (i, 0, 0)),
            scratch_shapes=[pltpu.VMEM((9 * C1, IMGW), jnp.bfloat16)],
        ),
        compiler_params=pltpu.CompilerParams(
            dimension_semantics=("parallel",)),
    )(imgs, w1, b1, w2, b2, sel)


# ---------------------------------------------------------------------------
# Kernel B: fc1 -> relu -> fc2 (padded to 128 lanes) -> log_softmax
# ---------------------------------------------------------------------------
def _head_kernel(x_ref, wf1_ref, bf1_ref, wf2_ref, bf2_ref, o_ref):
    h = jnp.dot(x_ref[...], wf1_ref[...], preferred_element_type=jnp.float32)
    h = jnp.maximum(h + bf1_ref[...], 0.0)                    # (TM, 128) f32
    logits = jnp.dot(h.astype(jnp.bfloat16), wf2_ref[...],
                     preferred_element_type=jnp.float32) + bf2_ref[...]
    m = jnp.max(logits, axis=-1, keepdims=True)               # pad bias=-1e30
    s = logits - m
    lse = jnp.log(jnp.sum(jnp.exp(s), axis=-1, keepdims=True))
    o_ref[...] = s - lse


def fc_head(feats, wf1, bf1, wf2p, bf2p):
    n = feats.shape[0]
    tm = 256 if n >= 256 else n
    assert n % tm == 0
    return pl.pallas_call(
        _head_kernel,
        out_shape=jax.ShapeDtypeStruct((n, NCLS_PAD), jnp.float32),
        grid_spec=pltpu.PrefetchScalarGridSpec(
            num_scalar_prefetch=0,
            grid=(n // tm,),
            in_specs=[
                pl.BlockSpec((tm, FEAT), lambda i: (i, 0)),
                pl.BlockSpec((FEAT, HID), lambda i: (0, 0)),
                pl.BlockSpec((1, HID), lambda i: (0, 0)),
                pl.BlockSpec((HID, NCLS_PAD), lambda i: (0, 0)),
                pl.BlockSpec((1, NCLS_PAD), lambda i: (0, 0)),
            ],
            out_specs=pl.BlockSpec((tm, NCLS_PAD), lambda i: (i, 0)),
        ),
        compiler_params=pltpu.CompilerParams(
            dimension_semantics=("parallel",)),
    )(feats, wf1, bf1, wf2p, bf2p)


# ---------------------------------------------------------------------------
# Forward pass
# ---------------------------------------------------------------------------
def _round_up(x, m):
    return -(-x // m) * m


def net_forward(x_nchw, params):
    n = x_nchw.shape[0]
    imgs = x_nchw.astype(jnp.float32).reshape(n, NPIX)
    imgs = jnp.pad(imgs, ((0, 0), (0, IMGW - NPIX)))          # lane pad to 896
    nb = NB_IMGS if n >= NB_IMGS else n
    n1 = _round_up(n, nb)
    if n1 > n:                                                # zero-pad batch
        imgs = jnp.pad(imgs, ((0, n1 - n), (0, 0)))
    pooled = conv_pool(imgs, params["w1"], params["b1"], params["w2"],
                       params["b2"], params["pool_sel"])      # (n1, 64, 144)
    feats = pooled.reshape(n1, FEAT)     # c-major == torch.flatten(x, 1) order
    # dropout1 / dropout2: identity at inference (omitted)
    tm = 256 if n1 >= 256 else n1
    n2 = _round_up(n1, tm)
    if n2 > n1:                                               # zero rows only
        feats = jnp.pad(feats, ((0, n2 - n1), (0, 0)))
    logp = fc_head(feats, params["wf1"], params["bf1"],
                   params["wf2p"], params["bf2p"])            # (n2, 128) f32
    return logp[:n, :NCLS]


# ---------------------------------------------------------------------------
# Parameter preparation (one-time, host/XLA side)
# ---------------------------------------------------------------------------
def _build_pool_gather():
    """(896, 144) 0/1 matrix picking the 2x2-window base positions
    p = 56*py + 2*px of the wide (pitch-28) conv2 output; junk/pad columns
    are never selected (their rows are all-zero)."""
    q = jnp.arange(NPOOL)
    py, px = q // HWP, q % HWP
    rows = (2 * py) * PITCH + 2 * px
    sel = jnp.zeros((IMGW, NPOOL), jnp.float32).at[rows, q].set(1.0)
    return sel.astype(jnp.bfloat16)


def prepare_params(raw):
    """PyTorch-layout tensors -> kernel-ready (reordered / padded / cast)."""
    w1 = raw["conv1_w"].reshape(C1, 9).astype(jnp.float32)            # [c, t]
    b1 = raw["conv1_b"].reshape(C1, 1).astype(jnp.float32)
    w2 = (jnp.transpose(raw["conv2_w"], (0, 2, 3, 1))                 # (co,dy,dx,ci)
          .reshape(C2, 9 * C1).astype(jnp.bfloat16))                  # [co, t*32+ci]
    b2 = raw["conv2_b"].reshape(C2, 1).astype(jnp.float32)
    wf1 = raw["fc1_w"].T.astype(jnp.bfloat16)                         # (9216, 128)
    bf1 = raw["fc1_b"].reshape(1, HID).astype(jnp.float32)
    wf2p = (jnp.zeros((HID, NCLS_PAD), jnp.float32)
            .at[:, :NCLS].set(raw["fc2_w"].T)).astype(jnp.bfloat16)   # (128, 128)
    bf2p = jnp.full((1, NCLS_PAD), -1e30, jnp.float32).at[0, :NCLS].set(raw["fc2_b"])
    return {"w1": w1, "b1": b1, "w2": w2, "b2": b2,
            "pool_sel": _build_pool_gather(),
            "wf1": wf1, "bf1": bf1, "wf2p": wf2p, "bf2p": bf2p}


def init_raw_params(key):
    # TODO(synk): PyTorch's default Kaiming-uniform init is not replicated
    # (only matters when diffing raw outputs against a torch checkpoint).
    ks = jax.random.split(key, 8)

    def rnd(k, shape, fan_in):
        return jax.random.normal(k, shape, jnp.float32) / jnp.sqrt(fan_in)

    return {
        "conv1_w": rnd(ks[0], (C1, 1, 3, 3), 9.0),            # Conv2d(1, 32, 3)
        "conv1_b": rnd(ks[1], (C1,), 9.0),
        "conv2_w": rnd(ks[2], (C2, C1, 3, 3), 9.0 * C1),      # Conv2d(32, 64, 3)
        "conv2_b": rnd(ks[3], (C2,), 9.0 * C1),
        "fc1_w": rnd(ks[4], (HID, FEAT), float(FEAT)),        # Linear(9216, 128)
        "fc1_b": rnd(ks[5], (HID,), float(FEAT)),
        "fc2_w": rnd(ks[6], (NCLS, HID), float(HID)),         # Linear(128, 10)
        "fc2_b": rnd(ks[7], (NCLS,), float(HID)),
    }


if __name__ == "__main__":
    key = jax.random.PRNGKey(0)
    k_x, k_p = jax.random.split(key)
    # MNIST geometry is mandated by fc1's 9216 = 64 * 12 * 12 input features.
    x = jax.random.normal(k_x, (2, 1, 28, 28), jnp.float32)   # NCHW, batch=2
    params = prepare_params(init_raw_params(k_p))

    fwd = jax.jit(net_forward)
    out = jax.block_until_ready(fwd(x, params))

    assert out.shape == (2, NCLS) and out.dtype == jnp.float32
    assert bool(jnp.all(jnp.isfinite(out)))
    # log_softmax rows must exponentiate-sum to 1
    assert jnp.allclose(jnp.exp(out).sum(axis=-1), 1.0, atol=1e-3)
    print("KERNEL_OK")
</pallas_src>

<mosaic_0001>
module attributes {stable_mosaic.version = 11 : i64} {
  func.func @_conv_pool_kernel(%arg0: i32, %arg1: memref<2x896xf32, #tpu.memory_space<vmem>>, %arg2: memref<32x9xf32, #tpu.memory_space<vmem>>, %arg3: memref<32x1xf32, #tpu.memory_space<vmem>>, %arg4: memref<64x288xbf16, #tpu.memory_space<vmem>>, %arg5: memref<64x1xf32, #tpu.memory_space<vmem>>, %arg6: memref<896x144xbf16, #tpu.memory_space<vmem>>, %arg7: memref<2x64x144xbf16, #tpu.memory_space<vmem>>, %arg8: memref<288x896xbf16, #tpu.memory_space<vmem>>) attributes {dimension_semantics = [#tpu.dimension_semantics<parallel>], iteration_bounds = array<i64: 1>, scalar_prefetch = 0 : i64, scratch_operands = 1 : i64, tpu.core_type = #tpu.core_type<tc>, window_params = [{transform_indices = @transform_0, window_bounds = array<i64: 2, 896>}, {pipeline_mode = #tpu.pipeline_mode<synchronous>, transform_indices = @transform_1, window_bounds = array<i64: 32, 9>}, {pipeline_mode = #tpu.pipeline_mode<synchronous>, transform_indices = @transform_2, window_bounds = array<i64: 32, 1>}, {pipeline_mode = #tpu.pipeline_mode<synchronous>, transform_indices = @transform_3, window_bounds = array<i64: 64, 288>}, {pipeline_mode = #tpu.pipeline_mode<synchronous>, transform_indices = @transform_4, window_bounds = array<i64: 64, 1>}, {pipeline_mode = #tpu.pipeline_mode<synchronous>, transform_indices = @transform_5, window_bounds = array<i64: 896, 144>}, {transform_indices = @transform_6, window_bounds = array<i64: 2, 64, 144>}]} {
    %c0 = arith.constant 0 : index
    %c0_0 = arith.constant 0 : index
    %0 = vector.load %arg3[%c0, %c0_0] : memref<32x1xf32, #tpu.memory_space<vmem>>, vector<32x1xf32>
    %c0_1 = arith.constant 0 : index
    %c0_2 = arith.constant 0 : index
    %1 = vector.load %arg4[%c0_1, %c0_2] : memref<64x288xbf16, #tpu.memory_space<vmem>>, vector<64x288xbf16>
    %c0_3 = arith.constant 0 : index
    %c0_4 = arith.constant 0 : index
    %2 = vector.load %arg5[%c0_3, %c0_4] : memref<64x1xf32, #tpu.memory_space<vmem>>, vector<64x1xf32>
    %c0_5 = arith.constant 0 : index
    %c0_6 = arith.constant 0 : index
    %3 = vector.load %arg6[%c0_5, %c0_6] : memref<896x144xbf16, #tpu.memory_space<vmem>>, vector<896x144xbf16>
    %c0_7 = arith.constant 0 : index
    %c0_8 = arith.constant 0 : index
    %4 = vector.load %arg2[%c0_7, %c0_8] : memref<32x9xf32, #tpu.memory_space<vmem>>, vector<32x1xf32>
    %c0_9 = arith.constant 0 : index
    %c1 = arith.constant 1 : index
    %5 = vector.load %arg2[%c0_9, %c1] : memref<32x9xf32, #tpu.memory_space<vmem>>, vector<32x1xf32>
    %c0_10 = arith.constant 0 : index
    %c2 = arith.constant 2 : index
    %6 = vector.load %arg2[%c0_10, %c2] : memref<32x9xf32, #tpu.memory_space<vmem>>, vector<32x1xf32>
    %c0_11 = arith.constant 0 : index
    %c3 = arith.constant 3 : index
    %7 = vector.load %arg2[%c0_11, %c3] : memref<32x9xf32, #tpu.memory_space<vmem>>, vector<32x1xf32>
    %c0_12 = arith.constant 0 : index
    %c4 = arith.constant 4 : index
    %8 = vector.load %arg2[%c0_12, %c4] : memref<32x9xf32, #tpu.memory_space<vmem>>, vector<32x1xf32>
    %c0_13 = arith.constant 0 : index
    %c5 = arith.constant 5 : index
    %9 = vector.load %arg2[%c0_13, %c5] : memref<32x9xf32, #tpu.memory_space<vmem>>, vector<32x1xf32>
    %c0_14 = arith.constant 0 : index
    %c6 = arith.constant 6 : index
    %10 = vector.load %arg2[%c0_14, %c6] : memref<32x9xf32, #tpu.memory_space<vmem>>, vector<32x1xf32>
    %c0_15 = arith.constant 0 : index
    %c7 = arith.constant 7 : index
    %11 = vector.load %arg2[%c0_15, %c7] : memref<32x9xf32, #tpu.memory_space<vmem>>, vector<32x1xf32>
    %c0_16 = arith.constant 0 : index
    %c8 = arith.constant 8 : index
    %12 = vector.load %arg2[%c0_16, %c8] : memref<32x9xf32, #tpu.memory_space<vmem>>, vector<32x1xf32>
    %c0_i32 = arith.constant 0 : i32
    %c2_i32 = arith.constant 2 : i32
    %13 = arith.addi %c0_i32, %c2_i32 : i32
    %c1_i32 = arith.constant 1 : i32
    scf.for %arg9 = %c0_i32 to %13 step %c1_i32  : i32 {
      %14 = arith.index_cast %arg9 : i32 to index
      %c0_18 = arith.constant 0 : index
      %15 = vector.load %arg1[%14, %c0_18] : memref<2x896xf32, #tpu.memory_space<vmem>>, vector<1x896xf32>
      %cst = arith.constant 0.000000e+00 : f32
      %16 = vector.broadcast %cst : f32 to vector<32x896xf32>
      %17 = vector.broadcast %4 : vector<32x1xf32> to vector<32x896xf32>
      %18 = vector.broadcast %15 : vector<1x896xf32> to vector<32x896xf32>
      %19 = arith.mulf %17, %18 : vector<32x896xf32>
      %20 = arith.addf %16, %19 : vector<32x896xf32>
      %c895_i32 = arith.constant 895 : i32
      %21 = tpu.dynamic_rotate %15 by %c895_i32 dim 1 : vector<1x896xf32>, i32 -> vector<1x896xf32>
      %22 = vector.broadcast %5 : vector<32x1xf32> to vector<32x896xf32>
      %23 = vector.broadcast %21 : vector<1x896xf32> to vector<32x896xf32>
      %24 = arith.mulf %22, %23 : vector<32x896xf32>
      %25 = arith.addf %20, %24 : vector<32x896xf32>
      %c894_i32 = arith.constant 894 : i32
      %26 = tpu.dynamic_rotate %15 by %c894_i32 dim 1 : vector<1x896xf32>, i32 -> vector<1x896xf32>
      %27 = vector.broadcast %6 : vector<32x1xf32> to vector<32x896xf32>
      %28 = vector.broadcast %26 : vector<1x896xf32> to vector<32x896xf32>
      %29 = arith.mulf %27, %28 : vector<32x896xf32>
      %30 = arith.addf %25, %29 : vector<32x896xf32>
      %c868_i32 = arith.constant 868 : i32
      %31 = tpu.dynamic_rotate %15 by %c868_i32 dim 1 : vector<1x896xf32>, i32 -> vector<1x896xf32>
      %32 = vector.broadcast %7 : vector<32x1xf32> to vector<32x896xf32>
      %33 = vector.broadcast %31 : vector<1x896xf32> to vector<32x896xf32>
      %34 = arith.mulf %32, %33 : vector<32x896xf32>
      %35 = arith.addf %30, %34 : vector<32x896xf32>
      %c867_i32 = arith.constant 867 : i32
      %36 = tpu.dynamic_rotate %15 by %c867_i32 dim 1 : vector<1x896xf32>, i32 -> vector<1x896xf32>
      %37 = vector.broadcast %8 : vector<32x1xf32> to vector<32x896xf32>
      %38 = vector.broadcast %36 : vector<1x896xf32> to vector<32x896xf32>
      %39 = arith.mulf %37, %38 : vector<32x896xf32>
      %40 = arith.addf %35, %39 : vector<32x896xf32>
      %c866_i32 = arith.constant 866 : i32
      %41 = tpu.dynamic_rotate %15 by %c866_i32 dim 1 : vector<1x896xf32>, i32 -> vector<1x896xf32>
      %42 = vector.broadcast %9 : vector<32x1xf32> to vector<32x896xf32>
      %43 = vector.broadcast %41 : vector<1x896xf32> to vector<32x896xf32>
      %44 = arith.mulf %42, %43 : vector<32x896xf32>
      %45 = arith.addf %40, %44 : vector<32x896xf32>
      %c840_i32 = arith.constant 840 : i32
      %46 = tpu.dynamic_rotate %15 by %c840_i32 dim 1 : vector<1x896xf32>, i32 -> vector<1x896xf32>
      %47 = vector.broadcast %10 : vector<32x1xf32> to vector<32x896xf32>
      %48 = vector.broadcast %46 : vector<1x896xf32> to vector<32x896xf32>
      %49 = arith.mulf %47, %48 : vector<32x896xf32>
      %50 = arith.addf %45, %49 : vector<32x896xf32>
      %c839_i32 = arith.constant 839 : i32
      %51 = tpu.dynamic_rotate %15 by %c839_i32 dim 1 : vector<1x896xf32>, i32 -> vector<1x896xf32>
      %52 = vector.broadcast %11 : vector<32x1xf32> to vector<32x896xf32>
      %53 = vector.broadcast %51 : vector<1x896xf32> to vector<32x896xf32>
      %54 = arith.mulf %52, %53 : vector<32x896xf32>
      %55 = arith.addf %50, %54 : vector<32x896xf32>
      %c838_i32 = arith.constant 838 : i32
      %56 = tpu.dynamic_rotate %15 by %c838_i32 dim 1 : vector<1x896xf32>, i32 -> vector<1x896xf32>
      %57 = vector.broadcast %12 : vector<32x1xf32> to vector<32x896xf32>
      %58 = vector.broadcast %56 : vector<1x896xf32> to vector<32x896xf32>
      %59 = arith.mulf %57, %58 : vector<32x896xf32>
      %60 = arith.addf %55, %59 : vector<32x896xf32>
      %61 = vector.broadcast %0 : vector<32x1xf32> to vector<32x896xf32>
      %62 = arith.addf %60, %61 : vector<32x896xf32>
      %cst_19 = arith.constant 0.000000e+00 : f32
      %63 = vector.broadcast %cst_19 : f32 to vector<32x896xf32>
      %64 = arith.maximumf %62, %63 : vector<32x896xf32>
      %65 = arith.truncf %64 : vector<32x896xf32> to vector<32x896xbf16>
      %c0_20 = arith.constant 0 : index
      %c0_21 = arith.constant 0 : index
      %66 = vector.load %arg8[%c0_20, %c0_21] : memref<288x896xbf16, #tpu.memory_space<vmem>>, vector<32x896xbf16>
      tpu.vector_store %arg8[%c0_20, %c0_21], %65 {strides = array<i32>} : memref<288x896xbf16, #tpu.memory_space<vmem>>, vector<32x896xbf16>,
      %c895_i32_22 = arith.constant 895 : i32
      %67 = tpu.dynamic_rotate %64 by %c895_i32_22 dim 1 : vector<32x896xf32>, i32 -> vector<32x896xf32>
      %68 = arith.truncf %67 : vector<32x896xf32> to vector<32x896xbf16>
      %c32 = arith.constant 32 : index
      %c0_23 = arith.constant 0 : index
      %69 = vector.load %arg8[%c32, %c0_23] : memref<288x896xbf16, #tpu.memory_space<vmem>>, vector<32x896xbf16>
      tpu.vector_store %arg8[%c32, %c0_23], %68 {strides = array<i32>} : memref<288x896xbf16, #tpu.memory_space<vmem>>, vector<32x896xbf16>,
      %c894_i32_24 = arith.constant 894 : i32
      %70 = tpu.dynamic_rotate %64 by %c894_i32_24 dim 1 : vector<32x896xf32>, i32 -> vector<32x896xf32>
      %71 = arith.truncf %70 : vector<32x896xf32> to vector<32x896xbf16>
      %c64 = arith.constant 64 : index
      %c0_25 = arith.constant 0 : index
      %72 = vector.load %arg8[%c64, %c0_25] : memref<288x896xbf16, #tpu.memory_space<vmem>>, vector<32x896xbf16>
      tpu.vector_store %arg8[%c64, %c0_25], %71 {strides = array<i32>} : memref<288x896xbf16, #tpu.memory_space<vmem>>, vector<32x896xbf16>,
      %c868_i32_26 = arith.constant 868 : i32
      %73 = tpu.dynamic_rotate %64 by %c868_i32_26 dim 1 : vector<32x896xf32>, i32 -> vector<32x896xf32>
      %74 = arith.truncf %73 : vector<32x896xf32> to vector<32x896xbf16>
      %c96 = arith.constant 96 : index
      %c0_27 = arith.constant 0 : index
      %75 = vector.load %arg8[%c96, %c0_27] : memref<288x896xbf16, #tpu.memory_space<vmem>>, vector<32x896xbf16>
      tpu.vector_store %arg8[%c96, %c0_27], %74 {strides = array<i32>} : memref<288x896xbf16, #tpu.memory_space<vmem>>, vector<32x896xbf16>,
      %c867_i32_28 = arith.constant 867 : i32
      %76 = tpu.dynamic_rotate %64 by %c867_i32_28 dim 1 : vector<32x896xf32>, i32 -> vector<32x896xf32>
      %77 = arith.truncf %76 : vector<32x896xf32> to vector<32x896xbf16>
      %c128 = arith.constant 128 : index
      %c0_29 = arith.constant 0 : index
      %78 = vector.load %arg8[%c128, %c0_29] : memref<288x896xbf16, #tpu.memory_space<vmem>>, vector<32x896xbf16>
      tpu.vector_store %arg8[%c128, %c0_29], %77 {strides = array<i32>} : memref<288x896xbf16, #tpu.memory_space<vmem>>, vector<32x896xbf16>,
      %c866_i32_30 = arith.constant 866 : i32
      %79 = tpu.dynamic_rotate %64 by %c866_i32_30 dim 1 : vector<32x896xf32>, i32 -> vector<32x896xf32>
      %80 = arith.truncf %79 : vector<32x896xf32> to vector<32x896xbf16>
      %c160 = arith.constant 160 : index
      %c0_31 = arith.constant 0 : index
      %81 = vector.load %arg8[%c160, %c0_31] : memref<288x896xbf16, #tpu.memory_space<vmem>>, vector<32x896xbf16>
      tpu.vector_store %arg8[%c160, %c0_31], %80 {strides = array<i32>} : memref<288x896xbf16, #tpu.memory_space<vmem>>, vector<32x896xbf16>,
      %c840_i32_32 = arith.constant 840 : i32
      %82 = tpu.dynamic_rotate %64 by %c840_i32_32 dim 1 : vector<32x896xf32>, i32 -> vector<32x896xf32>
      %83 = arith.truncf %82 : vector<32x896xf32> to vector<32x896xbf16>
      %c192 = arith.constant 192 : index
      %c0_33 = arith.constant 0 : index
      %84 = vector.load %arg8[%c192, %c0_33] : memref<288x896xbf16, #tpu.memory_space<vmem>>, vector<32x896xbf16>
      tpu.vector_store %arg8[%c192, %c0_33], %83 {strides = array<i32>} : memref<288x896xbf16, #tpu.memory_space<vmem>>, vector<32x896xbf16>,
      %c839_i32_34 = arith.constant 839 : i32
      %85 = tpu.dynamic_rotate %64 by %c839_i32_34 dim 1 : vector<32x896xf32>, i32 -> vector<32x896xf32>
      %86 = arith.truncf %85 : vector<32x896xf32> to vector<32x896xbf16>
      %c224 = arith.constant 224 : index
      %c0_35 = arith.constant 0 : index
      %87 = vector.load %arg8[%c224, %c0_35] : memref<288x896xbf16, #tpu.memory_space<vmem>>, vector<32x896xbf16>
      tpu.vector_store %arg8[%c224, %c0_35], %86 {strides = array<i32>} : memref<288x896xbf16, #tpu.memory_space<vmem>>, vector<32x896xbf16>,
      %c838_i32_36 = arith.constant 838 : i32
      %88 = tpu.dynamic_rotate %64 by %c838_i32_36 dim 1 : vector<32x896xf32>, i32 -> vector<32x896xf32>
      %89 = arith.truncf %88 : vector<32x896xf32> to vector<32x896xbf16>
      %c256 = arith.constant 256 : index
      %c0_37 = arith.constant 0 : index
      %90 = vector.load %arg8[%c256, %c0_37] : memref<288x896xbf16, #tpu.memory_space<vmem>>, vector<32x896xbf16>
      tpu.vector_store %arg8[%c256, %c0_37], %89 {strides = array<i32>} : memref<288x896xbf16, #tpu.memory_space<vmem>>, vector<32x896xbf16>,
      %c0_38 = arith.constant 0 : index
      %c0_39 = arith.constant 0 : index
      %91 = vector.load %arg8[%c0_38, %c0_39] : memref<288x896xbf16, #tpu.memory_space<vmem>>, vector<288x896xbf16>
      %cst_40 = arith.constant dense<0.000000e+00> : vector<64x896xf32>
      %92 = tpu.matmul %1, %91, %cst_40 {dimension_numbers = #tpu.dot_dimension_numbers<[1], [0], [0], [1], [0, 0, 1, 1], [], []>} : vector<64x288xbf16>, vector<288x896xbf16>, vector<64x896xf32> -> vector<64x896xf32>
      %93 = vector.broadcast %2 : vector<64x1xf32> to vector<64x896xf32>
      %94 = arith.addf %92, %93 : vector<64x896xf32>
      %cst_41 = arith.constant 0.000000e+00 : f32
      %95 = vector.broadcast %cst_41 : f32 to vector<64x896xf32>
      %96 = arith.maximumf %94, %95 : vector<64x896xf32>
      %c895_i32_42 = arith.constant 895 : i32
      %97 = tpu.dynamic_rotate %96 by %c895_i32_42 dim 1 : vector<64x896xf32>, i32 -> vector<64x896xf32>
      %98 = arith.maximumf %96, %97 : vector<64x896xf32>
      %c868_i32_43 = arith.constant 868 : i32
      %99 = tpu.dynamic_rotate %98 by %c868_i32_43 dim 1 : vector<64x896xf32>, i32 -> vector<64x896xf32>
      %100 = arith.maximumf %98, %99 : vector<64x896xf32>
      %101 = arith.truncf %100 : vector<64x896xf32> to vector<64x896xbf16>
      %cst_44 = arith.constant dense<0.000000e+00> : vector<64x144xf32>
      %102 = tpu.matmul %101, %3, %cst_44 {dimension_numbers = #tpu.dot_dimension_numbers<[1], [0], [0], [1], [0, 0, 1, 1], [], []>} : vector<64x896xbf16>, vector<896x144xbf16>, vector<64x144xf32> -> vector<64x144xf32>
      %103 = arith.truncf %102 : vector<64x144xf32> to vector<64x144xbf16>
      %104 = arith.index_cast %arg9 : i32 to index
      %c0_45 = arith.constant 0 : index
      %c0_46 = arith.constant 0 : index
      %105 = vector.load %arg7[%104, %c0_45, %c0_46] : memref<2x64x144xbf16, #tpu.memory_space<vmem>>, vector<1x64x144xbf16>
      %106 = vector.shape_cast %105 : vector<1x64x144xbf16> to vector<64x144xbf16>
      %107 = vector.shape_cast %103 : vector<64x144xbf16> to vector<1x64x144xbf16>
      tpu.vector_store %arg7[%104, %c0_45, %c0_46], %107 {strides = array<i32>} : memref<2x64x144xbf16, #tpu.memory_space<vmem>>, vector<1x64x144xbf16>,
    }
    %c2_i32_17 = arith.constant 2 : i32
    return
  }
  func.func @transform_0(%arg0: i32) -> (i32, i32) {
    %c0_i32 = arith.constant 0 : i32
    %c0_i32_0 = arith.constant 0 : i32
    return %arg0, %c0_i32 : i32, i32
  }
  func.func @transform_1(%arg0: i32) -> (i32, i32) {
    %c0_i32 = arith.constant 0 : i32
    %c0_i32_0 = arith.constant 0 : i32
    %c0_i32_1 = arith.constant 0 : i32
    return %c0_i32, %c0_i32_0 : i32, i32
  }
  func.func @transform_2(%arg0: i32) -> (i32, i32) {
    %c0_i32 = arith.constant 0 : i32
    %c0_i32_0 = arith.constant 0 : i32
    %c0_i32_1 = arith.constant 0 : i32
    return %c0_i32, %c0_i32_0 : i32, i32
  }
  func.func @transform_3(%arg0: i32) -> (i32, i32) {
    %c0_i32 = arith.constant 0 : i32
    %c0_i32_0 = arith.constant 0 : i32
    %c0_i32_1 = arith.constant 0 : i32
    return %c0_i32, %c0_i32_0 : i32, i32
  }
  func.func @transform_4(%arg0: i32) -> (i32, i32) {
    %c0_i32 = arith.constant 0 : i32
    %c0_i32_0 = arith.constant 0 : i32
    %c0_i32_1 = arith.constant 0 : i32
    return %c0_i32, %c0_i32_0 : i32, i32
  }
  func.func @transform_5(%arg0: i32) -> (i32, i32) {
    %c0_i32 = arith.constant 0 : i32
    %c0_i32_0 = arith.constant 0 : i32
    %c0_i32_1 = arith.constant 0 : i32
    return %c0_i32, %c0_i32_0 : i32, i32
  }
  func.func @transform_6(%arg0: i32) -> (i32, i32, i32) {
    %c0_i32 = arith.constant 0 : i32
    %c0_i32_0 = arith.constant 0 : i32
    %c0_i32_1 = arith.constant 0 : i32
    return %arg0, %c0_i32, %c0_i32_0 : i32, i32, i32
  }
}

module attributes {stable_mosaic.version = 11 : i64} {
  func.func @_head_kernel(%arg0: i32, %arg1: memref<2x9216xbf16, #tpu.memory_space<vmem>>, %arg2: memref<9216x128xbf16, #tpu.memory_space<vmem>>, %arg3: memref<1x128xf32, #tpu.memory_space<vmem>>, %arg4: memref<128x128xbf16, #tpu.memory_space<vmem>>, %arg5: memref<1x128xf32, #tpu.memory_space<vmem>>, %arg6: memref<2x128xf32, #tpu.memory_space<vmem>>) attributes {dimension_semantics = [#tpu.dimension_semantics<parallel>], iteration_bounds = array<i64: 1>, scalar_prefetch = 0 : i64, scratch_operands = 0 : i64, tpu.core_type = #tpu.core_type<tc>, window_params = [{transform_indices = @transform_0, window_bounds = array<i64: 2, 9216>}, {pipeline_mode = #tpu.pipeline_mode<synchronous>, transform_indices = @transform_1, window_bounds = array<i64: 9216, 128>}, {pipeline_mode = #tpu.pipeline_mode<synchronous>, transform_indices = @transform_2, window_bounds = array<i64: 1, 128>}, {pipeline_mode = #tpu.pipeline_mode<synchronous>, transform_indices = @transform_3, window_bounds = array<i64: 128, 128>}, {pipeline_mode = #tpu.pipeline_mode<synchronous>, transform_indices = @transform_4, window_bounds = array<i64: 1, 128>}, {transform_indices = @transform_5, window_bounds = array<i64: 2, 128>}]} {
    %c0 = arith.constant 0 : index
    %c0_0 = arith.constant 0 : index
    %0 = vector.load %arg1[%c0, %c0_0] : memref<2x9216xbf16, #tpu.memory_space<vmem>>, vector<2x9216xbf16>
    %c0_1 = arith.constant 0 : index
    %c0_2 = arith.constant 0 : index
    %1 = vector.load %arg2[%c0_1, %c0_2] : memref<9216x128xbf16, #tpu.memory_space<vmem>>, vector<9216x128xbf16>
    %cst = arith.constant dense<0.000000e+00> : vector<2x128xf32>
    %2 = tpu.matmul %0, %1, %cst {dimension_numbers = #tpu.dot_dimension_numbers<[1], [0], [0], [1], [0, 0, 1, 1], [], []>} : vector<2x9216xbf16>, vector<9216x128xbf16>, vector<2x128xf32> -> vector<2x128xf32>
    %c0_3 = arith.constant 0 : index
    %c0_4 = arith.constant 0 : index
    %3 = vector.load %arg3[%c0_3, %c0_4] : memref<1x128xf32, #tpu.memory_space<vmem>>, vector<1x128xf32>
    %4 = vector.broadcast %3 : vector<1x128xf32> to vector<2x128xf32>
    %5 = arith.addf %2, %4 : vector<2x128xf32>
    %cst_5 = arith.constant 0.000000e+00 : f32
    %6 = vector.broadcast %cst_5 : f32 to vector<2x128xf32>
    %7 = arith.maximumf %5, %6 : vector<2x128xf32>
    %8 = arith.truncf %7 : vector<2x128xf32> to vector<2x128xbf16>
    %c0_6 = arith.constant 0 : index
    %c0_7 = arith.constant 0 : index
    %9 = vector.load %arg4[%c0_6, %c0_7] : memref<128x128xbf16, #tpu.memory_space<vmem>>, vector<128x128xbf16>
    %cst_8 = arith.constant dense<0.000000e+00> : vector<2x128xf32>
    %10 = tpu.matmul %8, %9, %cst_8 {dimension_numbers = #tpu.dot_dimension_numbers<[1], [0], [0], [1], [0, 0, 1, 1], [], []>} : vector<2x128xbf16>, vector<128x128xbf16>, vector<2x128xf32> -> vector<2x128xf32>
    %c0_9 = arith.constant 0 : index
    %c0_10 = arith.constant 0 : index
    %11 = vector.load %arg5[%c0_9, %c0_10] : memref<1x128xf32, #tpu.memory_space<vmem>>, vector<1x128xf32>
    %12 = vector.broadcast %11 : vector<1x128xf32> to vector<2x128xf32>
    %13 = arith.addf %10, %12 : vector<2x128xf32>
    %cst_11 = arith.constant dense<0xFF800000> : vector<2xf32>
    %14 = vector.multi_reduction <maximumf>, %13, %cst_11 [1] : vector<2x128xf32> to vector<2xf32>
    %15 = vector.shape_cast %14 : vector<2xf32> to vector<2x1xf32>
    %16 = vector.broadcast %15 : vector<2x1xf32> to vector<2x128xf32>
    %17 = arith.subf %13, %16 : vector<2x128xf32>
    %18 = math.exp %17 : vector<2x128xf32>
    %cst_12 = arith.constant dense<0.000000e+00> : vector<2xf32>
    %19 = vector.multi_reduction <add>, %18, %cst_12 [1] : vector<2x128xf32> to vector<2xf32>
    %20 = vector.shape_cast %19 : vector<2xf32> to vector<2x1xf32>
    %21 = math.log %20 : vector<2x1xf32>
    %22 = vector.broadcast %21 : vector<2x1xf32> to vector<2x128xf32>
    %23 = arith.subf %17, %22 : vector<2x128xf32>
    %c0_13 = arith.constant 0 : index
    %c0_14 = arith.constant 0 : index
    %24 = vector.load %arg6[%c0_13, %c0_14] : memref<2x128xf32, #tpu.memory_space<vmem>>, vector<2x128xf32>
    tpu.vector_store %arg6[%c0_13, %c0_14], %23 {strides = array<i32>} : memref<2x128xf32, #tpu.memory_space<vmem>>, vector<2x128xf32>,
    return
  }
  func.func @transform_0(%arg0: i32) -> (i32, i32) {
    %c0_i32 = arith.constant 0 : i32
    %c0_i32_0 = arith.constant 0 : i32
    return %arg0, %c0_i32 : i32, i32
  }
  func.func @transform_1(%arg0: i32) -> (i32, i32) {
    %c0_i32 = arith.constant 0 : i32
    %c0_i32_0 = arith.constant 0 : i32
    %c0_i32_1 = arith.constant 0 : i32
    return %c0_i32, %c0_i32_0 : i32, i32
  }
  func.func @transform_2(%arg0: i32) -> (i32, i32) {
    %c0_i32 = arith.constant 0 : i32
    %c0_i32_0 = arith.constant 0 : i32
    %c0_i32_1 = arith.constant 0 : i32
    return %c0_i32, %c0_i32_0 : i32, i32
  }
  func.func @transform_3(%arg0: i32) -> (i32, i32) {
    %c0_i32 = arith.constant 0 : i32
    %c0_i32_0 = arith.constant 0 : i32
    %c0_i32_1 = arith.constant 0 : i32
    return %c0_i32, %c0_i32_0 : i32, i32
  }
  func.func @transform_4(%arg0: i32) -> (i32, i32) {
    %c0_i32 = arith.constant 0 : i32
    %c0_i32_0 = arith.constant 0 : i32
    %c0_i32_1 = arith.constant 0 : i32
    return %c0_i32, %c0_i32_0 : i32, i32
  }
  func.func @transform_5(%arg0: i32) -> (i32, i32) {
    %c0_i32 = arith.constant 0 : i32
    %c0_i32_0 = arith.constant 0 : i32
    return %arg0, %c0_i32 : i32, i32
  }
}

</mosaic_0001>

<bundles_post_ra>
// kernel: net_forward.2
= control target key start
LH: loop header
LB: loop body
LE: loop exit
PB: predicated region body
PF: predicated region fallthrough
CT: control target
= control target key end

     0   :  { %11 = vsyncpa [#allocation4], 0  ;;  %s5845_s21 = smov [#allocation3]   ;;  %s10872_s0 = inlined_call_operand.vmem [shape: f32[2,896], index: 0, kind: input, shape index: {}]   ;;  %s10873_s1 = inlined_call_operand.vmem [shape: f32[32,9], index: 1, kind: input, shape index: {}]   ;;  %s10874_s2 = inlined_call_operand.vmem [shape: f32[32,1], index: 2, kind: input, shape index: {}]   ;;  %s10875_s3 = inlined_call_operand.hbm [shape: bf16[64,288], index: 3, kind: input, shape index: {}]   ;;  %s10876_s4 = inlined_call_operand.vmem [shape: f32[64,1], index: 4, kind: input, shape index: {}]   ;;  %s10877_s5 = inlined_call_operand.vmem [shape: bf16[896,144], index: 5, kind: input, shape index: {}]   ;;  %s10878_s6 = inlined_call_operand.vmem [shape: bf16[2,64,144], index: 6, kind: output, shape index: {}]  }
   0x1   :  { %s23_s22 = sshll.u32 %s5845_s21, 4  ;;  %s5813_s25 = scalar_lea.hbm %s10875_s3, 1536  ;;  %s24_s22 = int_to_ptr.vmem [resolvable:$true] %s23_s22 }
   0x2   :  { %p5814_p0 = scmp.ne.s32.totalorder %s10875_s3, %s5813_s25  ;;  %p5817_p1 = scmp.lt.u32.totalorder %s5813_s25, %s10875_s3 }
   0x4   :  { %p5819_p2 = pnand %p5817_p1, %p5814_p0 }
   0x6   :  { %5822 = shalt.err (!%p5819_p2)
}
   0x7   :  { %s5823_s30 = scalar_lea.vmem %s24_s22, 1536  ;;  %p5828_p4 = scmp.lt.s32.totalorder %s24_s22, %s24_s22 }
   0x8   :  { %p5824_p3 = scmp.ne.s32.totalorder %s24_s22, %s5823_s30  ;;  %p5829_p5 = scmp.lt.s32.totalorder %s5823_s30, %s5823_s30 }
   0xa   :  { %p5830_p6 = por %p5829_p5, %p5828_p4 }
   0xc   :  { %p5831_p7 = pnand %p5830_p6, %p5824_p3 }
   0xe   :  { %5834 = shalt.err (!%p5831_p7)
}
   0xf   :  { %s5846_s7 = smov 192   ;;  %s5847_s8 = smov 12  }
  0x10   :  { %29 = dma.hbm_to_vmem [thread:$0]  %s10875_s3, 1536, %s24_s22, [#allocation4], %s5846_s7, %s5846_s7, %s5847_s8  }
  0x11   :  { %5839 = dma.done.wait [#allocation4], 1536  }
  0x12   :  { %5840 = vsyncadd [#allocation4], 4294965760  ;;  %v5915_v0 = vld [vmem:[%s10874_s2] sm:$0xff]  ;;  %v5920_v1 = vld [vmem:[%s10874_s2 + $0x8] sm:$0xff] }
  0x13   :  { %11454 = vst [vmem:[#allocation6_spill] sm:$0xff] %v5915_v0  ;;  %11455 = vst [vmem:[#allocation7_spill] sm:$0xff] %v5920_v1  ;;  %v5925_v2 = vld [vmem:[%s10874_s2 + $0x10] sm:$0xff]  ;;  %v5930_v3 = vld [vmem:[%s10874_s2 + $0x18] sm:$0xff] }
  0x14   :  { %11456 = vst [vmem:[#allocation8_spill] sm:$0xff] %v5925_v2  ;;  %11457 = vst [vmem:[#allocation9_spill] sm:$0xff] %v5930_v3  ;;  %v5932_v4 = vld [vmem:[#allocation3] sm:$0xff]  ;;  %v5934_v5 = vld [vmem:[#allocation3 + $0x8] sm:$0xf] }
  0x15   :  { %11458 = vst [vmem:[#allocation10_spill] sm:$0xff] %v5932_v4  ;;  %11459 = vst [vmem:[#allocation11_spill] sm:$0xff] %v5934_v5  ;;  %v5936_v6 = vld [vmem:[#allocation3 + $0xc] sm:$0xff]  ;;  %v5938_v7 = vld [vmem:[#allocation3 + $0x14] sm:$0xf] }
  0x16   :  { %11460 = vst [vmem:[#allocation12_spill] sm:$0xff] %v5936_v6  ;;  %11461 = vst [vmem:[#allocation13_spill] sm:$0xff] %v5938_v7  ;;  %v5940_v8 = vld [vmem:[#allocation3 + $0x18] sm:$0xff]  ;;  %v5942_v9 = vld [vmem:[#allocation3 + $0x20] sm:$0xf] }
  0x17   :  { %11462 = vst [vmem:[#allocation14_spill] sm:$0xff] %v5940_v8  ;;  %11463 = vst [vmem:[#allocation15_spill] sm:$0xff] %v5942_v9  ;;  %v5944_v10 = vld [vmem:[#allocation3 + $0x24] sm:$0xff]  ;;  %v5946_v11 = vld [vmem:[#allocation3 + $0x2c] sm:$0xf] }
  0x18   :  { %11464 = vst [vmem:[#allocation16_spill] sm:$0xff] %v5944_v10  ;;  %11465 = vst [vmem:[#allocation17_spill] sm:$0xff] %v5946_v11  ;;  %v5948_v12 = vld [vmem:[#allocation3 + $0x30] sm:$0xff]  ;;  %v5950_v13 = vld [vmem:[#allocation3 + $0x38] sm:$0xf] }
  0x19   :  { %11466 = vst [vmem:[#allocation18_spill] sm:$0xff] %v5948_v12  ;;  %11467 = vst [vmem:[#allocation19_spill] sm:$0xff] %v5950_v13  ;;  %v5952_v14 = vld [vmem:[#allocation3 + $0x3c] sm:$0xff]  ;;  %v5954_v15 = vld [vmem:[#allocation3 + $0x44] sm:$0xf] }
  0x1a   :  { %11468 = vst [vmem:[#allocation20_spill] sm:$0xff] %v5952_v14  ;;  %11469 = vst [vmem:[#allocation21_spill] sm:$0xff] %v5954_v15  ;;  %v5956_v16 = vld [vmem:[#allocation3 + $0x48] sm:$0xff]  ;;  %v5958_v17 = vld [vmem:[#allocation3 + $0x50] sm:$0xf] }
  0x1b   :  { %11470 = vst [vmem:[#allocation22_spill] sm:$0xff] %v5956_v16  ;;  %11471 = vst [vmem:[#allocation23_spill] sm:$0xff] %v5958_v17  ;;  %v5960_v18 = vld [vmem:[#allocation3 + $0x54] sm:$0xff]  ;;  %v5962_v19 = vld [vmem:[#allocation3 + $0x5c] sm:$0xf] }
  0x1c   :  { %11472 = vst [vmem:[#allocation24_spill] sm:$0xff] %v5960_v18  ;;  %11473 = vst [vmem:[#allocation25_spill] sm:$0xff] %v5962_v19  ;;  %v5967_v20 = vld [vmem:[%s10876_s4] sm:$0xff]  ;;  %v5972_v21 = vld [vmem:[%s10876_s4 + $0x8] sm:$0xff] }
  0x1d   :  { %11474 = vst [vmem:[#allocation26_spill] sm:$0xff] %v5967_v20  ;;  %11475 = vst [vmem:[#allocation27_spill] sm:$0xff] %v5972_v21  ;;  %v5977_v22 = vld [vmem:[%s10876_s4 + $0x10] sm:$0xff]  ;;  %v5982_v23 = vld [vmem:[%s10876_s4 + $0x18] sm:$0xff] }
  0x1e   :  { %11476 = vst [vmem:[#allocation28_spill] sm:$0xff] %v5977_v22  ;;  %11477 = vst [vmem:[#allocation29_spill] sm:$0xff] %v5982_v23  ;;  %v5987_v24 = vld [vmem:[%s10876_s4 + $0x20] sm:$0xff]  ;;  %v5992_v25 = vld [vmem:[%s10876_s4 + $0x28] sm:$0xff] }
  0x1f   :  { %11478 = vst [vmem:[#allocation30_spill] sm:$0xff] %v5987_v24  ;;  %11479 = vst [vmem:[#allocation31_spill] sm:$0xff] %v5992_v25  ;;  %v5997_v26 = vld [vmem:[%s10876_s4 + $0x30] sm:$0xff]  ;;  %v6002_v27 = vld [vmem:[%s10876_s4 + $0x38] sm:$0xff] }
  0x20   :  { %11480 = vst [vmem:[#allocation32_spill] sm:$0xff] %v5997_v26  ;;  %11481 = vst [vmem:[#allocation33_spill] sm:$0xff] %v6002_v27  ;;  %v6007_v28 = vld [vmem:[%s10877_s5] sm:$0xff]  ;;  %v6012_v29 = vld [vmem:[%s10877_s5 + $0x8] sm:$0xff] }
  0x21   :  { %11482 = vst [vmem:[#allocation34_spill] sm:$0xff] %v6007_v28  ;;  %11483 = vst [vmem:[#allocation35_spill] sm:$0xff] %v6012_v29  ;;  %v6017_v30 = vld [vmem:[%s10877_s5 + $0x10] sm:$0xff]  ;;  %v6022_v31 = vld [vmem:[%s10877_s5 + $0x18] sm:$0xff] }
  0x22   :  { %11484 = vst [vmem:[#allocation36_spill] sm:$0xff] %v6017_v30  ;;  %11485 = vst [vmem:[#allocation37_spill] sm:$0xff] %v6022_v31  ;;  %v6027_v32 = vld [vmem:[%s10877_s5 + $0x20] sm:$0xff]  ;;  %v6032_v33 = vld [vmem:[%s10877_s5 + $0x28] sm:$0xff] }
  0x23   :  { %11486 = vst [vmem:[#allocation38_spill] sm:$0xff] %v6027_v32  ;;  %11487 = vst [vmem:[#allocation39_spill] sm:$0xff] %v6032_v33  ;;  %v6037_v34 = vld [vmem:[%s10877_s5 + $0x30] sm:$0xff]  ;;  %v6042_v35 = vld [vmem:[%s10877_s5 + $0x38] sm:$0xff] }
  0x24   :  { %11488 = vst [vmem:[#allocation40_spill] sm:$0xff] %v6037_v34  ;;  %11489 = vst [vmem:[#allocation41_spill] sm:$0xff] %v6042_v35  ;;  %v6047_v36 = vld [vmem:[%s10877_s5 + $0x40] sm:$0xff]  ;;  %v6052_v37 = vld [vmem:[%s10877_s5 + $0x48] sm:$0xff] }
  0x25   :  { %11490 = vst [vmem:[#allocation42_spill] sm:$0xff] %v6047_v36  ;;  %11491 = vst [vmem:[#allocation43_spill] sm:$0xff] %v6052_v37  ;;  %v6057_v38 = vld [vmem:[%s10877_s5 + $0x50] sm:$0xff]  ;;  %v6062_v39 = vld [vmem:[%s10877_s5 + $0x58] sm:$0xff] }
  0x26   :  { %11492 = vst [vmem:[#allocation44_spill] sm:$0xff] %v6057_v38  ;;  %11493 = vst [vmem:[#allocation45_spill] sm:$0xff] %v6062_v39  ;;  %v6067_v40 = vld [vmem:[%s10877_s5 + $0x60] sm:$0xff]  ;;  %v6072_v41 = vld [vmem:[%s10877_s5 + $0x68] sm:$0xff] }
  0x27   :  { %11494 = vst [vmem:[#allocation46_spill] sm:$0xff] %v6067_v40  ;;  %11495 = vst [vmem:[#allocation47_spill] sm:$0xff] %v6072_v41  ;;  %v6077_v42 = vld [vmem:[%s10877_s5 + $0x70] sm:$0xff]  ;;  %v6082_v43 = vld [vmem:[%s10877_s5 + $0x78] sm:$0xff] }
  0x28   :  { %11496 = vst [vmem:[#allocation48_spill] sm:$0xff] %v6077_v42  ;;  %11497 = vst [vmem:[#allocation49_spill] sm:$0xff] %v6082_v43  ;;  %v6087_v44 = vld [vmem:[%s10877_s5 + $0x80] sm:$0xff]  ;;  %v6092_v45 = vld [vmem:[%s10877_s5 + $0x88] sm:$0xff] }
  0x29   :  { %11498 = vst [vmem:[#allocation50_spill] sm:$0xff] %v6087_v44  ;;  %11499 = vst [vmem:[#allocation51_spill] sm:$0xff] %v6092_v45  ;;  %v6097_v46 = vld [vmem:[%s10877_s5 + $0x90] sm:$0xff]  ;;  %v6102_v47 = vld [vmem:[%s10877_s5 + $0x98] sm:$0xff] }
  0x2a   :  { %11500 = vst [vmem:[#allocation52_spill] sm:$0xff] %v6097_v46  ;;  %11501 = vst [vmem:[#allocation53_spill] sm:$0xff] %v6102_v47  ;;  %v6107_v48 = vld [vmem:[%s10877_s5 + $0xa0] sm:$0xff]  ;;  %v6112_v49 = vld [vmem:[%s10877_s5 + $0xa8] sm:$0xff] }
  0x2b   :  { %11502 = vst [vmem:[#allocation54_spill] sm:$0xff] %v6107_v48  ;;  %11503 = vst [vmem:[#allocation55_spill] sm:$0xff] %v6112_v49  ;;  %v6117_v50 = vld [vmem:[%s10877_s5 + $0xb0] sm:$0xff]  ;;  %v6122_v51 = vld [vmem:[%s10877_s5 + $0xb8] sm:$0xff] }
  0x2c   :  { %11504 = vst [vmem:[#allocation56_spill] sm:$0xff] %v6117_v50  ;;  %11505 = vst [vmem:[#allocation57_spill] sm:$0xff] %v6122_v51  ;;  %v6127_v52 = vld [vmem:[%s10877_s5 + $0xc0] sm:$0xff]  ;;  %v6132_v53 = vld [vmem:[%s10877_s5 + $0xc8] sm:$0xff] }
  0x2d   :  { %11506 = vst [vmem:[#allocation58_spill] sm:$0xff] %v6127_v52  ;;  %11507 = vst [vmem:[#allocation59_spill] sm:$0xff] %v6132_v53  ;;  %v6137_v54 = vld [vmem:[%s10877_s5 + $0xd0] sm:$0xff]  ;;  %v6142_v55 = vld [vmem:[%s10877_s5 + $0xd8] sm:$0xff] }
  0x2e   :  { %11508 = vst [vmem:[#allocation60_spill] sm:$0xff] %v6137_v54  ;;  %11509 = vst [vmem:[#allocation61_spill] sm:$0xff] %v6142_v55  ;;  %v6147_v56 = vld [vmem:[%s10877_s5 + $0xe0] sm:$0xff]  ;;  %v6152_v57 = vld [vmem:[%s10877_s5 + $0xe8] sm:$0xff] }
  0x2f   :  { %11510 = vst [vmem:[#allocation62_spill] sm:$0xff] %v6147_v56  ;;  %11511 = vst [vmem:[#allocation63_spill] sm:$0xff] %v6152_v57  ;;  %v6157_v58 = vld [vmem:[%s10877_s5 + $0xf0] sm:$0xff]  ;;  %v6162_v59 = vld [vmem:[%s10877_s5 + $0xf8] sm:$0xff] }
  0x30   :  { %11512 = vst [vmem:[#allocation64_spill] sm:$0xff] %v6157_v58  ;;  %11513 = vst [vmem:[#allocation65_spill] sm:$0xff] %v6162_v59  ;;  %v6167_v60 = vld [vmem:[%s10877_s5 + $0x100] sm:$0xff]  ;;  %v6172_v61 = vld [vmem:[%s10877_s5 + $0x108] sm:$0xff] }
  0x31   :  { %11514 = vst [vmem:[#allocation66_spill] sm:$0xff] %v6167_v60  ;;  %11515 = vst [vmem:[#allocation67_spill] sm:$0xff] %v6172_v61  ;;  %v6177_v62 = vld [vmem:[%s10877_s5 + $0x110] sm:$0xff]  ;;  %v6182_v63 = vld [vmem:[%s10877_s5 + $0x118] sm:$0xff] }
  0x32   :  { %11516 = vst [vmem:[#allocation68_spill] sm:$0xff] %v6177_v62  ;;  %11517 = vst [vmem:[#allocation69_spill] sm:$0xff] %v6182_v63  ;;  %v6187_v58 = vld [vmem:[%s10877_s5 + $0x120] sm:$0xff]  ;;  %v6192_v60 = vld [vmem:[%s10877_s5 + $0x128] sm:$0xff] }
  0x33   :  { %11518 = vst [vmem:[#allocation70_spill] sm:$0xff] %v6187_v58  ;;  %11519 = vst [vmem:[#allocation71_spill] sm:$0xff] %v6192_v60  ;;  %v6197_v61 = vld [vmem:[%s10877_s5 + $0x130] sm:$0xff]  ;;  %v6202_v62 = vld [vmem:[%s10877_s5 + $0x138] sm:$0xff] }
  0x34   :  { %11520 = vst [vmem:[#allocation72_spill] sm:$0xff] %v6197_v61  ;;  %11521 = vst [vmem:[#allocation73_spill] sm:$0xff] %v6202_v62  ;;  %v6207_v63 = vld [vmem:[%s10877_s5 + $0x140] sm:$0xff]  ;;  %v6212_v58 = vld [vmem:[%s10877_s5 + $0x148] sm:$0xff] }
  0x35   :  { %11522 = vst [vmem:[#allocation74_spill] sm:$0xff] %v6207_v63  ;;  %11523 = vst [vmem:[#allocation75_spill] sm:$0xff] %v6212_v58  ;;  %v6217_v60 = vld [vmem:[%s10877_s5 + $0x150] sm:$0xff]  ;;  %v6222_v61 = vld [vmem:[%s10877_s5 + $0x158] sm:$0xff] }
  0x36   :  { %11524 = vst [vmem:[#allocation76_spill] sm:$0xff] %v6217_v60  ;;  %11525 = vst [vmem:[#allocation77_spill] sm:$0xff] %v6222_v61  ;;  %v6227_v62 = vld [vmem:[%s10877_s5 + $0x160] sm:$0xff]  ;;  %v6232_v63 = vld [vmem:[%s10877_s5 + $0x168] sm:$0xff] }
  0x37   :  { %11526 = vst [vmem:[#allocation78_spill] sm:$0xff] %v6227_v62  ;;  %11527 = vst [vmem:[#allocation79_spill] sm:$0xff] %v6232_v63  ;;  %v6237_v58 = vld [vmem:[%s10877_s5 + $0x170] sm:$0xff]  ;;  %v6242_v60 = vld [vmem:[%s10877_s5 + $0x178] sm:$0xff] }
  0x38   :  { %11528 = vst [vmem:[#allocation80_spill] sm:$0xff] %v6237_v58  ;;  %11529 = vst [vmem:[#allocation81_spill] sm:$0xff] %v6242_v60  ;;  %v6247_v61 = vld [vmem:[%s10877_s5 + $0x180] sm:$0xff]  ;;  %v6252_v62 = vld [vmem:[%s10877_s5 + $0x188] sm:$0xff] }
  0x39   :  { %11530 = vst [vmem:[#allocation82_spill] sm:$0xff] %v6247_v61  ;;  %11531 = vst [vmem:[#allocation83_spill] sm:$0xff] %v6252_v62  ;;  %v6257_v63 = vld [vmem:[%s10877_s5 + $0x190] sm:$0xff]  ;;  %v6262_v58 = vld [vmem:[%s10877_s5 + $0x198] sm:$0xff] }
  0x3a   :  { %11532 = vst [vmem:[#allocation84_spill] sm:$0xff] %v6257_v63  ;;  %11533 = vst [vmem:[#allocation85_spill] sm:$0xff] %v6262_v58  ;;  %v6267_v60 = vld [vmem:[%s10877_s5 + $0x1a0] sm:$0xff]  ;;  %v6272_v61 = vld [vmem:[%s10877_s5 + $0x1a8] sm:$0xff] }
  0x3b   :  { %11534 = vst [vmem:[#allocation86_spill] sm:$0xff] %v6267_v60  ;;  %11535 = vst [vmem:[#allocation87_spill] sm:$0xff] %v6272_v61  ;;  %v6277_v62 = vld [vmem:[%s10877_s5 + $0x1b0] sm:$0xff]  ;;  %v6282_v63 = vld [vmem:[%s10877_s5 + $0x1b8] sm:$0xff] }
  0x3c   :  { %11536 = vst [vmem:[#allocation88_spill] sm:$0xff] %v6277_v62  ;;  %11537 = vst [vmem:[#allocation89_spill] sm:$0xff] %v6282_v63  ;;  %v6287_v58 = vld [vmem:[%s10877_s5 + $0x1c0] sm:$0xff]  ;;  %v6292_v60 = vld [vmem:[%s10877_s5 + $0x1c8] sm:$0xff] }
  0x3d   :  { %11538 = vst [vmem:[#allocation90_spill] sm:$0xff] %v6287_v58  ;;  %11539 = vst [vmem:[#allocation91_spill] sm:$0xff] %v6292_v60  ;;  %v6297_v61 = vld [vmem:[%s10877_s5 + $0x1d0] sm:$0xff]  ;;  %v6302_v62 = vld [vmem:[%s10877_s5 + $0x1d8] sm:$0xff] }
  0x3e   :  { %11540 = vst [vmem:[#allocation92_spill] sm:$0xff] %v6297_v61  ;;  %11541 = vst [vmem:[#allocation93_spill] sm:$0xff] %v6302_v62  ;;  %v6307_v63 = vld [vmem:[%s10877_s5 + $0x1e0] sm:$0xff]  ;;  %v6312_v58 = vld [vmem:[%s10877_s5 + $0x1e8] sm:$0xff] }
  0x3f   :  { %11542 = vst [vmem:[#allocation94_spill] sm:$0xff] %v6307_v63  ;;  %11543 = vst [vmem:[#allocation95_spill] sm:$0xff] %v6312_v58  ;;  %v6317_v60 = vld [vmem:[%s10877_s5 + $0x1f0] sm:$0xff]  ;;  %v6322_v61 = vld [vmem:[%s10877_s5 + $0x1f8] sm:$0xff] }
  0x40   :  { %11544 = vst [vmem:[#allocation96_spill] sm:$0xff] %v6317_v60  ;;  %11545 = vst [vmem:[#allocation97_spill] sm:$0xff] %v6322_v61  ;;  %v6327_v62 = vld [vmem:[%s10877_s5 + $0x200] sm:$0xff]  ;;  %v6332_v63 = vld [vmem:[%s10877_s5 + $0x208] sm:$0xff] }
  0x41   :  { %11546 = vst [vmem:[#allocation98_spill] sm:$0xff] %v6327_v62  ;;  %11547 = vst [vmem:[#allocation99_spill] sm:$0xff] %v6332_v63  ;;  %v6337_v58 = vld [vmem:[%s10877_s5 + $0x210] sm:$0xff]  ;;  %v6342_v60 = vld [vmem:[%s10877_s5 + $0x218] sm:$0xff] }
  0x42   :  { %11548 = vst [vmem:[#allocation100_spill] sm:$0xff] %v6337_v58  ;;  %11549 = vst [vmem:[#allocation101_spill] sm:$0xff] %v6342_v60  ;;  %v6347_v61 = vld [vmem:[%s10877_s5 + $0x220] sm:$0xff]  ;;  %v6352_v62 = vld [vmem:[%s10877_s5 + $0x228] sm:$0xff] }
  0x43   :  { %11550 = vst [vmem:[#allocation102_spill] sm:$0xff] %v6347_v61  ;;  %11551 = vst [vmem:[#allocation103_spill] sm:$0xff] %v6352_v62  ;;  %v6357_v63 = vld [vmem:[%s10877_s5 + $0x230] sm:$0xff]  ;;  %v6362_v58 = vld [vmem:[%s10877_s5 + $0x238] sm:$0xff] }
  0x44   :  { %11552 = vst [vmem:[#allocation104_spill] sm:$0xff] %v6357_v63  ;;  %11553 = vst [vmem:[#allocation105_spill] sm:$0xff] %v6362_v58  ;;  %v6367_v60 = vld [vmem:[%s10877_s5 + $0x240] sm:$0xff]  ;;  %v6372_v61 = vld [vmem:[%s10877_s5 + $0x248] sm:$0xff] }
  0x45   :  { %11554 = vst [vmem:[#allocation106_spill] sm:$0xff] %v6367_v60  ;;  %11555 = vst [vmem:[#allocation107_spill] sm:$0xff] %v6372_v61  ;;  %v6377_v62 = vld [vmem:[%s10877_s5 + $0x250] sm:$0xff]  ;;  %v6382_v63 = vld [vmem:[%s10877_s5 + $0x258] sm:$0xff] }
  0x46   :  { %11556 = vst [vmem:[#allocation108_spill] sm:$0xff] %v6377_v62  ;;  %11557 = vst [vmem:[#allocation109_spill] sm:$0xff] %v6382_v63  ;;  %v6387_v58 = vld [vmem:[%s10877_s5 + $0x260] sm:$0xff]  ;;  %v6392_v60 = vld [vmem:[%s10877_s5 + $0x268] sm:$0xff] }
  0x47   :  { %11558 = vst [vmem:[#allocation110_spill] sm:$0xff] %v6387_v58  ;;  %11559 = vst [vmem:[#allocation111_spill] sm:$0xff] %v6392_v60  ;;  %v6397_v61 = vld [vmem:[%s10877_s5 + $0x270] sm:$0xff]  ;;  %v6402_v62 = vld [vmem:[%s10877_s5 + $0x278] sm:$0xff] }
  0x48   :  { %11560 = vst [vmem:[#allocation112_spill] sm:$0xff] %v6397_v61  ;;  %11561 = vst [vmem:[#allocation113_spill] sm:$0xff] %v6402_v62  ;;  %v6407_v63 = vld [vmem:[%s10877_s5 + $0x280] sm:$0xff]  ;;  %v6412_v58 = vld [vmem:[%s10877_s5 + $0x288] sm:$0xff] }
  0x49   :  { %11562 = vst [vmem:[#allocation114_spill] sm:$0xff] %v6407_v63  ;;  %11563 = vst [vmem:[#allocation115_spill] sm:$0xff] %v6412_v58  ;;  %v6417_v60 = vld [vmem:[%s10877_s5 + $0x290] sm:$0xff]  ;;  %v6422_v61 = vld [vmem:[%s10877_s5 + $0x298] sm:$0xff] }
  0x4a   :  { %11564 = vst [vmem:[#allocation116_spill] sm:$0xff] %v6417_v60  ;;  %11565 = vst [vmem:[#allocation117_spill] sm:$0xff] %v6422_v61  ;;  %v6427_v62 = vld [vmem:[%s10877_s5 + $0x2a0] sm:$0xff]  ;;  %v6432_v63 = vld [vmem:[%s10877_s5 + $0x2a8] sm:$0xff] }
  0x4b   :  { %11566 = vst [vmem:[#allocation118_spill] sm:$0xff] %v6427_v62  ;;  %11567 = vst [vmem:[#allocation119_spill] sm:$0xff] %v6432_v63  ;;  %v6437_v58 = vld [vmem:[%s10877_s5 + $0x2b0] sm:$0xff]  ;;  %v6442_v60 = vld [vmem:[%s10877_s5 + $0x2b8] sm:$0xff] }
  0x4c   :  { %11568 = vst [vmem:[#allocation120_spill] sm:$0xff] %v6437_v58  ;;  %11569 = vst [vmem:[#allocation121_spill] sm:$0xff] %v6442_v60  ;;  %v6447_v61 = vld [vmem:[%s10877_s5 + $0x2c0] sm:$0xff]  ;;  %v6452_v62 = vld [vmem:[%s10877_s5 + $0x2c8] sm:$0xff] }
  0x4d   :  { %11570 = vst [vmem:[#allocation122_spill] sm:$0xff] %v6447_v61  ;;  %11571 = vst [vmem:[#allocation123_spill] sm:$0xff] %v6452_v62  ;;  %v6457_v63 = vld [vmem:[%s10877_s5 + $0x2d0] sm:$0xff]  ;;  %v6462_v58 = vld [vmem:[%s10877_s5 + $0x2d8] sm:$0xff] }
  0x4e   :  { %11572 = vst [vmem:[#allocation124_spill] sm:$0xff] %v6457_v63  ;;  %11573 = vst [vmem:[#allocation125_spill] sm:$0xff] %v6462_v58  ;;  %v6467_v60 = vld [vmem:[%s10877_s5 + $0x2e0] sm:$0xff]  ;;  %v6472_v61 = vld [vmem:[%s10877_s5 + $0x2e8] sm:$0xff] }
  0x4f   :  { %11574 = vst [vmem:[#allocation126_spill] sm:$0xff] %v6467_v60  ;;  %11575 = vst [vmem:[#allocation127_spill] sm:$0xff] %v6472_v61  ;;  %v6477_v62 = vld [vmem:[%s10877_s5 + $0x2f0] sm:$0xff]  ;;  %v6482_v63 = vld [vmem:[%s10877_s5 + $0x2f8] sm:$0xff] }
  0x50   :  { %11576 = vst [vmem:[#allocation128_spill] sm:$0xff] %v6477_v62  ;;  %11577 = vst [vmem:[#allocation129_spill] sm:$0xff] %v6482_v63  ;;  %v6487_v58 = vld [vmem:[%s10877_s5 + $0x300] sm:$0xff]  ;;  %v6492_v60 = vld [vmem:[%s10877_s5 + $0x308] sm:$0xff] }
  0x51   :  { %11578 = vst [vmem:[#allocation130_spill] sm:$0xff] %v6487_v58  ;;  %11579 = vst [vmem:[#allocation131_spill] sm:$0xff] %v6492_v60  ;;  %v6497_v61 = vld [vmem:[%s10877_s5 + $0x310] sm:$0xff]  ;;  %v6502_v62 = vld [vmem:[%s10877_s5 + $0x318] sm:$0xff] }
  0x52   :  { %11580 = vst [vmem:[#allocation132_spill] sm:$0xff] %v6497_v61  ;;  %11581 = vst [vmem:[#allocation133_spill] sm:$0xff] %v6502_v62  ;;  %v6507_v63 = vld [vmem:[%s10877_s5 + $0x320] sm:$0xff]  ;;  %v6512_v58 = vld [vmem:[%s10877_s5 + $0x328] sm:$0xff] }
  0x53   :  { %11582 = vst [vmem:[#allocation134_spill] sm:$0xff] %v6507_v63  ;;  %11583 = vst [vmem:[#allocation135_spill] sm:$0xff] %v6512_v58  ;;  %v6517_v60 = vld [vmem:[%s10877_s5 + $0x330] sm:$0xff]  ;;  %v6522_v61 = vld [vmem:[%s10877_s5 + $0x338] sm:$0xff] }
  0x54   :  { %11584 = vst [vmem:[#allocation136_spill] sm:$0xff] %v6517_v60  ;;  %11585 = vst [vmem:[#allocation137_spill] sm:$0xff] %v6522_v61  ;;  %v6527_v62 = vld [vmem:[%s10877_s5 + $0x340] sm:$0xff]  ;;  %v6532_v63 = vld [vmem:[%s10877_s5 + $0x348] sm:$0xff] }
  0x55   :  { %11586 = vst [vmem:[#allocation138_spill] sm:$0xff] %v6527_v62  ;;  %11587 = vst [vmem:[#allocation139_spill] sm:$0xff] %v6532_v63  ;;  %v6537_v58 = vld [vmem:[%s10877_s5 + $0x350] sm:$0xff]  ;;  %v6542_v60 = vld [vmem:[%s10877_s5 + $0x358] sm:$0xff] }
  0x56   :  { %11588 = vst [vmem:[#allocation140_spill] sm:$0xff] %v6537_v58  ;;  %11589 = vst [vmem:[#allocation141_spill] sm:$0xff] %v6542_v60  ;;  %v6547_v61 = vld [vmem:[%s10877_s5 + $0x360] sm:$0xff]  ;;  %v6552_v62 = vld [vmem:[%s10877_s5 + $0x368] sm:$0xff] }
  0x57   :  { %11590 = vst [vmem:[#allocation142_spill] sm:$0xff] %v6547_v61  ;;  %11591 = vst [vmem:[#allocation143_spill] sm:$0xff] %v6552_v62  ;;  %v6557_v63 = vld [vmem:[%s10877_s5 + $0x370] sm:$0xff]  ;;  %v6562_v58 = vld [vmem:[%s10877_s5 + $0x378] sm:$0xff]  ;;  %s6584_s5 = smov 0  }
  0x58   :  { %11592 = vst [vmem:[#allocation144_spill] sm:$0xff] %v6557_v63  ;;  %11593 = vst [vmem:[#allocation145_spill] sm:$0xff] %v6562_v58  ;;  %v6567_v60 = vld [vmem:[%s10873_s1] sm:$0xff]  ;;  %v6572_v61 = vld [vmem:[%s10873_s1 + $0x8] sm:$0xff] }
  0x59   :  { %11594 = vst [vmem:[#allocation146_spill] sm:$0xff] %v6567_v60  ;;  %11595 = vst [vmem:[#allocation147_spill] sm:$0xff] %v6572_v61  ;;  %v6577_v62 = vld [vmem:[%s10873_s1 + $0x10] sm:$0xff]  ;;  %v6582_v63 = vld [vmem:[%s10873_s1 + $0x18] sm:$0xff] }
  0x5a   :  { %11596 = vst [vmem:[#allocation148_spill] sm:$0xff] %v6577_v62  ;;  %11597 = vst [vmem:[#allocation149_spill] sm:$0xff] %v6582_v63 }
  0x5b LB: > { %v10967_v58 = vlaneseq  ;;  %v5848_v59 = vmov 1   ;;  %v10974_v56 = vmov 0   ;;  %s188_s1 = sshra.s32 %s5843_s5, 1  ;;  %s191_s22 = sand.u32 1, %s5843_s5  ;;  %v5850_v52 = vmov 2   ;;  %v11607_v3 = vld [vmem:[#allocation9_spill] sm:$0xff]  ;;  %s5843_s5 = sphi %s6584_s5, %s187_s5  }
  0x5c   : > { %4946 = vset.pattern.permute.xlu1 %v5848_v59  ;;  %4945 = vset.pattern.permute.xlu0 %v10974_v56  ;;  %s4555_s23 = smul.u32 14, %s188_s1  ;;  %s5851_s28 = smov 127   ;;  %v11618_v0 = vld [vmem:[#allocation6_spill] sm:$0xff]  ;;  %v11620_v1 = vld [vmem:[#allocation7_spill] sm:$0xff]  ;;  %v11622_v2 = vld [vmem:[#allocation8_spill] sm:$0xff]  ;;  %v11638_v11 = vlaneseq  ;;  %vm2513_vm8 = vcmask 261120  }
  0x5d   : > { %v219_v57 = vshrl.u32 %v10967_v58, 7  ;;  %2777 = vmatprep.mubr.bf16.mxu1 %v10974_v56  ;;  %s5852_s29 = smov 126   ;;  %s5854_s30 = smov 100   ;;  %vm4529_vm9 = vcmask 1043456   ;;  %vm4530_vm10 = vcmask 130052  }
  0x5e   : > { %s194_s24 = sadd.s32 %s4555_s23, %s191_s22  ;;  %s5856_s7 = smov 99   ;;  %v6808_v5 = vand.u32 127, %v11638_v11  ;;  %vm10841_vm11 = vmor %vm4530_vm10, %vm4529_vm9 }
  0x5f   : > { %s195_s27 = scalar_lea.vmem %s10872_s0, %s194_s24  ;;  %v232_v54 = vsub.s32 3, %v219_v57  ;;  %v224_v58 = vsub.s32 1, %v219_v57  ;;  %v228_v51 = vsub.s32 2, %v219_v57  ;;  %v240_v48 = vsub.s32 5, %v219_v57  ;;  %s5858_s8 = smov 98  }
  0x60   : > { %v11600_v60 = vld [vmem:[#allocation146_spill] sm:$0xff]  ;;  %v11601_v61 = vld [vmem:[#allocation147_spill] sm:$0xff]  ;;  %v236_v49 = vsub.s32 4, %v219_v57  ;;  %v6616_v47 = vsub.s32 0, %v219_v57  ;;  %s5860_s9 = smov 72   ;;  %s5862_s10 = smov 71  }
  0x61   : > { %v11598_v62 = vld [vmem:[#allocation148_spill] sm:$0xff]  ;;  %v11599_v63 = vld [vmem:[#allocation149_spill] sm:$0xff]  ;;  %334 = vperm.xlu1 %4946, %v11600_v60   ;;  %199 = vperm.xlu0 %4945, %v11600_v60   ;;  %v196_v55 = vld [vmem:[%s195_s27] ss:$2 sm:$0xff]  ;;  %s5864_s11 = smov 70   ;;  %vm325_vm0 = vcmp.lt.s32.totalorder %v6808_v5, 127 }
  0x62   : > { %v6602_v53 = vrot.slane %v196_v55, %v232_v54  ;;  %v6609_v50 = vrot.slane %v196_v55, %v224_v58  ;;  %v6612_v54 = vrot.slane %v196_v55, %v240_v48  ;;  %v6614_v46 = vrot.slane %v196_v55, %v236_v49  ;;  %s4714_s12 = sshll.u32 %s5843_s5, 6  ;;  %s187_s5 = sadd.s32 1, %s5843_s5  }
  0x63   : > { %v6624_v58 = vrot.slane %v196_v55, %v6616_v47  ;;  %v244_v48 = vsub.s32 6, %v219_v57  ;;  %v5859_v57 = vmov 6   ;;  %vm447_vm1 = vcmp.lt.s32.totalorder %v6808_v5, 126  ;;  %s10839_s15 = scalar_lea.vmem %s10878_s6, %s4714_s12  ;;  %p184_p8 = scmp.ge.s32.totalorder %s187_s5, 2  }
  0x64   : > { %11602 = vst [vmem:[#allocation150_spill] sm:$0xff] %v6602_v53  ;;  %11603 = vst [vmem:[#allocation151_spill] sm:$0xff] %v6612_v54  ;;  %vm569_vm2 = vcmp.lt.s32.totalorder %v6808_v5, 100  ;;  %vm691_vm3 = vcmp.lt.s32.totalorder %v6808_v5, 99  ;;  %vm813_vm4 = vcmp.lt.s32.totalorder %v6808_v5, 98  ;;  %vm935_vm5 = vcmp.lt.s32.totalorder %v6808_v5, 72 }
  0x65   : > { %338 = vperm.xlu1 %4946, %v11601_v61   ;;  %204 = vperm.xlu0 %4945, %v11601_v61   ;;  %11604 = vst [vmem:[#allocation152_spill] sm:$0xff] %v6614_v46  ;;  %v6628_v49 = vrot.slane %v196_v55, %v244_v48  ;;  %v5863_v48 = vmov 8   ;;  %vm1179_vm6 = vcmp.lt.s32.totalorder %v6808_v5, 70  ;;  %vm1057_vm7 = vcmp.lt.s32.totalorder %v6808_v5, 71 }
  0x67   : > { %11605 = vst [vmem:[#allocation153_spill] sm:$0xff] %v6628_v49 }
  0x69   : > { %4947 = vset.pattern.permute.xlu1 %v5850_v52  ;;  %214 = vperm.xlu0 %4945, %v11599_v63  }
  0x6a   : > { %460 = vperm.xlu1 %4947, %v11601_v61  }
  0x6d   : > { %315 = vrot.lane.b32.xlu0 %v6602_v53, %s5851_s28 }
  0x6e   : > { %4948 = vset.pattern.permute.xlu1 %v10974_v56  ;;  %4950 = vset.pattern.permute.xlu0 %v5848_v59  ;;  %v6620_v56 = vrot.slane %v196_v55, %v228_v51  ;;  %v5853_v51 = vmov 3   ;;  %v5855_v55 = vmov 4  }
  0x6f   : > { %209 = vperm.xlu1 %4948, %v11598_v62  }
  0x71   : > { %346 = vperm.xlu0 %4950, %v11599_v63  }
  0x73   : > { %311 = vrot.lane.b32.xlu1 %v6609_v50, %s5851_s28 }
  0x74   : > { %4949 = vset.pattern.permute.xlu1 %v5848_v59  ;;  %v5861_v59 = vmov 7  }
  0x75   : > { %4951 = vset.pattern.permute.xlu0 %v5850_v52 }
  0x76   : > { %456 = vperm.xlu0 %4951, %v11600_v60  }
  0x77   : > { %313 = vrot.lane.b32.xlu1 %v6620_v56, %s5851_s28 }
  0x7a   : > { %309 = vrot.lane.b32.xlu0 %v6624_v58, %s5851_s28 }
  0x7b   : > { %342 = vperm.xlu1 %4949, %v11598_v62  }
  0x7e   : > { %437 = vrot.lane.b32.xlu0 %v6620_v56, %s5852_s29 }
  0x7f   : > { %4952 = vset.pattern.permute.xlu1 %v5853_v51 }
  0x80   : > { %578 = vperm.xlu1 %4952, %v11600_v60  }
  0x82   : > { %464 = vperm.xlu0 %4951, %v11598_v62  }
  0x84   : > { %582 = vperm.xlu1 %4952, %v11601_v61  }
  0x86   : > { %559 = vrot.lane.b32.xlu0 %v6620_v56, %s5854_s30 }
  0x87   : > { %4955 = vset.pattern.permute.xlu0 %v5853_v51 }
  0x88   : > { %435 = vrot.lane.b32.xlu1 %v6609_v50, %s5852_s29 }
  0x89   : > { %4953 = vset.pattern.permute.xlu1 %v5850_v52  ;;  %v5857_v52 = vmov 5  }
  0x8a   : > { %586 = vperm.xlu0 %4955, %v11598_v62  }
  0x8c   : > { %439 = vrot.lane.b32.xlu1 %v6602_v53, %s5852_s29 }
  0x8e   : > { %4956 = vset.pattern.permute.xlu0 %v5855_v55 }
  0x8f   : > { %704 = vperm.xlu0 %4956, %v11601_v61  }
  0x90   : > { %468 = vperm.xlu1 %4953, %v11599_v63  }
  0x93   : > { %681 = vrot.lane.b32.xlu0 %v6620_v56, %s5856_s7 }
  0x94   : > { %4954 = vset.pattern.permute.xlu1 %v5855_v55 }
  0x95   : > { %700 = vperm.xlu1 %4954, %v11600_v60  }
  0x97   : > { %708 = vperm.xlu0 %4956, %v11598_v62  }
  0x99   : > { %433 = vrot.lane.b32.xlu1 %v6624_v58, %s5852_s29 }
  0x9a   : > { %4957 = vset.pattern.permute.xlu1 %v5853_v51  ;;  %v11606_v51 = vmov 0  }
  0x9b   : > { %4959 = vset.pattern.permute.xlu0 %v5857_v52 }
  0x9c   : > { %826 = vperm.xlu0 %4959, %v11601_v61  }
  0x9d   : > { %557 = vrot.lane.b32.xlu1 %v6609_v50, %s5854_s30 }
  0xa0   : > { %803 = vrot.lane.b32.xlu0 %v6620_v56, %s5858_s8 }
  0xa1   : > { %561 = vrot.lane.b32.xlu1 %v6602_v53, %s5854_s30 }
  0xa4   : > { %830 = vperm.xlu0 %4959, %v11598_v62  }
  0xa5   : > { %590 = vperm.xlu1 %4957, %v11599_v63  }
  0xa8   : > { %4962 = vset.pattern.permute.xlu0 %v5859_v57 }
  0xa9   : > { %4958 = vset.pattern.permute.xlu1 %v5857_v52  ;;  %948 = vperm.xlu0 %4962, %v11601_v61  }
  0xaa   : > { %822 = vperm.xlu1 %4958, %v11600_v60  }
  0xad   : > { %925 = vrot.lane.b32.xlu0 %v6620_v56, %s5860_s9 }
  0xae   : > { %555 = vrot.lane.b32.xlu1 %v6624_v58, %s5854_s30 }
  0xaf   : > { %4960 = vset.pattern.permute.xlu1 %v5855_v55 }
  0xb1   : > { %952 = vperm.xlu0 %4962, %v11598_v62  }
  0xb2   : > { %679 = vrot.lane.b32.xlu1 %v6609_v50, %s5856_s7 }
  0xb5   : > { %4965 = vset.pattern.permute.xlu0 %v5861_v59 }
  0xb6   : > { %683 = vrot.lane.b32.xlu1 %v6602_v53, %s5856_s7  ;;  %1070 = vperm.xlu0 %4965, %v11601_v61  }
  0xba   : > { %712 = vperm.xlu1 %4960, %v11599_v63   ;;  %1047 = vrot.lane.b32.xlu0 %v6620_v56, %s5862_s10 }
  0xbe   : > { %4961 = vset.pattern.permute.xlu1 %v5859_v57  ;;  %1074 = vperm.xlu0 %4965, %v11598_v62  }
  0xbf   : > { %944 = vperm.xlu1 %4961, %v11600_v60  }
  0xc2   : > { %4968 = vset.pattern.permute.xlu0 %v5863_v48 }
  0xc3   : > { %677 = vrot.lane.b32.xlu1 %v6624_v58, %s5856_s7  ;;  %1192 = vperm.xlu0 %4968, %v11601_v61  }
  0xc4   : > { %4963 = vset.pattern.permute.xlu1 %v5857_v52 }
  0xc7   : > { %801 = vrot.lane.b32.xlu1 %v6609_v50, %s5858_s8  ;;  %1167 = vrot.lane.b32.xlu0 %v6609_v50, %s5864_s11 }
  0xcb   : > { %805 = vrot.lane.b32.xlu1 %v6602_v53, %s5858_s8  ;;  %1171 = vrot.lane.b32.xlu0 %v6602_v53, %s5864_s11 }
  0xcf   : > { %834 = vperm.xlu1 %4963, %v11599_v63   ;;  %1200 = vperm.xlu0 %4968, %v11599_v63  }
  0xd3   : > { %4964 = vset.pattern.permute.xlu1 %v5861_v59  ;;  %1165 = vrot.lane.b32.xlu0 %v6624_v58, %s5864_s11 }
  0xd4   : > { %1066 = vperm.xlu1 %4964, %v11600_v60   ;;  %4972 = vset.pattern.permute.xlu0 %v11606_v51 }
  0xd7   : > { %1304 = vperm.xlu0 %4972, %v11607_v3  }
  0xd8   : > { %799 = vrot.lane.b32.xlu1 %v6624_v58, %s5858_s8 }
  0xd9   : > { %4966 = vset.pattern.permute.xlu1 %v5859_v57 }
  0xdc   : > { %923 = vrot.lane.b32.xlu1 %v6609_v50, %s5860_s9 }
  0xe0   : > { %v6701_v55 = vpop.permute.xlu1 %334  ;;  %927 = vrot.lane.b32.xlu1 %v6602_v53, %s5860_s9  ;;  %v6705_v52 = vpop.permute.xlu0 %199 }
  0xe1   : > { %11608 = vst [vmem:[#allocation154_spill] sm:$0xff] %v6701_v55  ;;  %11609 = vst [vmem:[#allocation155_spill] sm:$0xff] %v6705_v52 }
  0xe4   : > { %v6707_v61 = vpop.permute.xlu1 %338  ;;  %956 = vperm.xlu1 %4966, %v11599_v63   ;;  %v6710_v44 = vpop.permute.xlu0 %204 }
  0xe5   : > { %11610 = vst [vmem:[#allocation156_spill] sm:$0xff] %v6707_v61  ;;  %11611 = vst [vmem:[#allocation157_spill] sm:$0xff] %v6710_v44  ;;  %v261_v4 = vmul.f32 %v6609_v50, %v6710_v44 }
  0xe8   : > { %4967 = vset.pattern.permute.xlu1 %v5863_v48  ;;  %v6712_v3 = vpop.permute.xlu0 %214 }
  0xe9   : > { %11612 = vst [vmem:[#allocation158_spill] sm:$0xff] %v6712_v3  ;;  %v6714_v57 = vpop.permute.xlu1 %460  ;;  %1188 = vperm.xlu1 %4967, %v11600_v60   ;;  %v275_v6 = vmul.f32 %v6609_v50, %v6712_v3 }
  0xec   : > { %v6717_v45 = vpop.permute.xlu0 %315 }
  0xed   : > { %11613 = vst [vmem:[#allocation159_spill] sm:$0xff] %v6717_v45  ;;  %921 = vrot.lane.b32.xlu1 %v6624_v58, %s5860_s9 }
  0xee   : > { %v6721_v42 = vpop.permute.xlu1 %209  ;;  %4969 = vset.pattern.permute.xlu1 %v5861_v59 }
  0xef   : > { %11614 = vst [vmem:[#allocation160_spill] sm:$0xff] %v6721_v42 }
  0xf0   : > { %v6723_v43 = vpop.permute.xlu0 %346 }
  0xf1   : > { %11615 = vst [vmem:[#allocation161_spill] sm:$0xff] %v6723_v43  ;;  %1045 = vrot.lane.b32.xlu1 %v6609_v50, %s5862_s10 }
  0xf2   : > { %v6727_v40 = vpop.permute.xlu1 %311 }
  0xf5   : > { %v6729_v41 = vpop.permute.xlu0 %456  ;;  %1049 = vrot.lane.b32.xlu1 %v6602_v53, %s5862_s10  ;;  %v255_v53 = vmul.f32 %v6620_v56, %v6705_v52 }
  0xf6   : > { %v314_v60 = vpop.permute.xlu1 %313 }
  0xf7   : > { %v329_v18 = vsel %vm325_vm0, %v314_v60, %v6717_v45  ;;  %v330_v12 = vsel %vm325_vm0, %v6727_v40, %v314_v60  ;;  %v262_v45 = vmul.f32 %v6620_v56, %v6710_v44  ;;  %v254_v60 = vmul.f32 %v6609_v50, %v6705_v52 }
  0xf8   : > { %v356_v11 = vrot.slane %v330_v12, %v6616_v47  ;;  %v360_v8 = vrot.slane %v329_v18, %v6616_v47  ;;  %v253_v12 = vmul.f32 %v6624_v58, %v6705_v52  ;;  %v276_v18 = vmul.f32 %v6620_v56, %v6712_v3 }
  0xf9   : > { %1078 = vperm.xlu1 %4969, %v11599_v63   ;;  %v6734_v38 = vpop.permute.xlu0 %309 }
  0xfa   : > { %11616 = vst [vmem:[#allocation162_spill] sm:$0xff] %v6734_v38  ;;  %v6736_v39 = vpop.permute.xlu1 %342  ;;  %v331_v49 = vsel %vm325_vm0, %v6734_v38, %v6727_v40  ;;  %v378_v46 = vmul.f32 %v356_v11, %v6701_v55  ;;  %v379_v54 = vmul.f32 %v360_v8, %v6701_v55  ;;  %v385_v52 = vmul.f32 %v356_v11, %v6707_v61 }
  0xfb   : > { %11617 = vst [vmem:[#allocation163_spill] sm:$0xff] %v6736_v39 }
  0xfd   : > { %1043 = vrot.lane.b32.xlu1 %v6624_v58, %s5862_s10  ;;  %v6740_v59 = vpop.permute.xlu0 %437 }
  0xfe   : > { %4970 = vset.pattern.permute.xlu1 %v5863_v48 }
  0xff   : > { %v6742_v36 = vpop.permute.xlu1 %578 }
 0x101   : > { %1169 = vrot.lane.b32.xlu1 %v6620_v56, %s5864_s11  ;;  %v6746_v37 = vpop.permute.xlu0 %464 }
 0x103   : > { %v6748_v34 = vpop.permute.xlu1 %582 }
 0x105   : > { %1196 = vperm.xlu1 %4970, %v11598_v62   ;;  %v6751_v63 = vpop.permute.xlu0 %559 }
 0x107   : > { %v6753_v35 = vpop.permute.xlu1 %435 }
 0x109   : > { %4971 = vset.pattern.permute.xlu1 %v11606_v51  ;;  %v6759_v32 = vpop.permute.xlu0 %586 }
 0x10a   : > { %1289 = vperm.xlu1 %4971, %v11618_v0  }
 0x10b   : > { %v6757_v48 = vpop.permute.xlu1 %439 }
 0x10c   : > { %11619 = vst [vmem:[#allocation164_spill] sm:$0xff] %v6757_v48  ;;  %v451_v40 = vsel %vm447_vm1, %v6740_v59, %v6757_v48  ;;  %v267_v48 = vmul.f32 %v6624_v58, %v6721_v42 }
 0x10e   : > { %1294 = vperm.xlu1 %4971, %v11620_v1   ;;  %v6764_v30 = vpop.permute.xlu0 %704 }
 0x10f   : > { %v6762_v33 = vpop.permute.xlu1 %468  ;;  %11621 = vst [vmem:[#allocation165_spill] sm:$0xff] %v6764_v30 }
 0x112   : > { %1299 = vperm.xlu1 %4971, %v11622_v2   ;;  %v6769_v31 = vpop.permute.xlu0 %681 }
 0x114   : > { %v6767_v62 = vpop.permute.xlu1 %700 }
 0x115   : > { %11623 = vst [vmem:[#allocation166_spill] sm:$0xff] %v6767_v62 }
 0x116   : > { %v6775_v0 = vpop.permute.xlu0 %708 }
 0x117   : > { %11625 = vst [vmem:[#allocation168_spill] sm:$0xff] %v6775_v0 }
 0x118   : > { %v6771_v28 = vpop.permute.xlu1 %433 }
 0x119   : > { %11624 = vst [vmem:[#allocation167_spill] sm:$0xff] %v6771_v28 }
 0x11b   : > { %v6779_v26 = vpop.permute.xlu0 %826 }
 0x11c   : > { %v6773_v29 = vpop.permute.xlu1 %557  ;;  %11627 = vst [vmem:[#allocation170_spill] sm:$0xff] %v6779_v26  ;;  %v392_v26 = vmul.f32 %v356_v11, %v6736_v39 }
 0x11f   : > { %v6783_v25 = vpop.permute.xlu0 %803 }
 0x120   : > { %v6777_v27 = vpop.permute.xlu1 %561 }
 0x121   : > { %11626 = vst [vmem:[#allocation169_spill] sm:$0xff] %v6777_v27 }
 0x123   : > { %v6789_v23 = vpop.permute.xlu0 %830 }
 0x124   : > { %v6781_v1 = vpop.permute.xlu1 %590  ;;  %11630 = vst [vmem:[#allocation173_spill] sm:$0xff] %v6789_v23  ;;  %v352_v23 = vrot.slane %v331_v49, %v6616_v47  ;;  %v413_v49 = vadd.f32 %v385_v52, %v261_v4 }
 0x128   : > { %v6793_v21 = vpop.permute.xlu0 %948 }
 0x129   : > { %v6785_v24 = vpop.permute.xlu1 %822  ;;  %11631 = vst [vmem:[#allocation174_spill] sm:$0xff] %v6793_v21  ;;  %v399_v21 = vmul.f32 %v356_v11, %v6723_v43 }
 0x12a   : > { %11628 = vst [vmem:[#allocation171_spill] sm:$0xff] %v6785_v24 }
 0x12c   : > { %v6799_v19 = vpop.permute.xlu0 %925 }
 0x12d   : > { %v6787_v2 = vpop.permute.xlu1 %555  ;;  %11634 = vst [vmem:[#allocation177_spill] sm:$0xff] %v6799_v19  ;;  %v260_v19 = vmul.f32 %v6624_v58, %v6710_v44 }
 0x12e   : > { %11629 = vst [vmem:[#allocation172_spill] sm:$0xff] %v6787_v2 }
 0x130   : > { %v6803_v15 = vpop.permute.xlu0 %952 }
 0x131   : > { %v6791_v22 = vpop.permute.xlu1 %679  ;;  %11636 = vst [vmem:[#allocation179_spill] sm:$0xff] %v6803_v15  ;;  %v386_v15 = vmul.f32 %v360_v8, %v6707_v61 }
 0x133   : > { %v414_v11 = vadd.f32 %v386_v15, %v262_v45 }
 0x135   : > { %v6795_v20 = vpop.permute.xlu1 %683  ;;  %v6812_v51 = vpop.permute.xlu0 %1070 }
 0x136   : > { %11632 = vst [vmem:[#allocation175_spill] sm:$0xff] %v6795_v20  ;;  %11639 = vst [vmem:[#allocation181_spill] sm:$0xff] %v6812_v51  ;;  %v452_v51 = vsel %vm447_vm1, %v6753_v35, %v6740_v59  ;;  %v269_v59 = vmul.f32 %v6620_v56, %v6721_v42  ;;  %v377_v56 = vmul.f32 %v352_v23, %v6701_v55 }
 0x137   : > { %v478_v24 = vrot.slane %v452_v51, %v6616_v47  ;;  %v427_v51 = vadd.f32 %v399_v21, %v275_v6 }
 0x139   : > { %v6797_v17 = vpop.permute.xlu1 %712  ;;  %v6823_v14 = vpop.permute.xlu0 %1047  ;;  %v514_v15 = vmul.f32 %v478_v24, %v6746_v37 }
 0x13a   : > { %11633 = vst [vmem:[#allocation176_spill] sm:$0xff] %v6797_v17  ;;  %11641 = vst [vmem:[#allocation183_spill] sm:$0xff] %v6823_v14  ;;  %v482_v17 = vrot.slane %v451_v40, %v6616_v47 }
 0x13c   : > { %v501_v21 = vmul.f32 %v482_v17, %v6729_v41  ;;  %v508_v45 = vmul.f32 %v482_v17, %v6714_v57  ;;  %v515_v52 = vmul.f32 %v482_v17, %v6746_v37 }
 0x13d   : > { %v6856_v14 = vpop.permute.xlu0 %1074 }
 0x13e   : > { %v6801_v13 = vpop.permute.xlu1 %944  ;;  %11643 = vst [vmem:[#allocation185_spill] sm:$0xff] %v6856_v14  ;;  %v274_v14 = vmul.f32 %v6624_v58, %v6712_v3  ;;  %v453_v3 = vsel %vm447_vm1, %v6771_v28, %v6753_v35  ;;  %v500_v35 = vmul.f32 %v478_v24, %v6729_v41 }
 0x13f   : > { %11635 = vst [vmem:[#allocation178_spill] sm:$0xff] %v6801_v13  ;;  %v400_v13 = vmul.f32 %v360_v8, %v6723_v43  ;;  %v474_v4 = vrot.slane %v453_v3, %v6616_v47  ;;  %v573_v3 = vsel %vm569_vm2, %v6751_v63, %v6777_v27 }
 0x141   : > { %v428_v44 = vadd.f32 %v400_v13, %v276_v18  ;;  %v507_v13 = vmul.f32 %v478_v24, %v6714_v57 }
 0x142   : > { %v6805_v9 = vpop.permute.xlu1 %677  ;;  %v6892_v58 = vpop.permute.xlu0 %1192 }
 0x143   : > { %11637 = vst [vmem:[#allocation180_spill] sm:$0xff] %v6805_v9  ;;  %11646 = vst [vmem:[#allocation188_spill] sm:$0xff] %v6892_v58  ;;  %v535_v55 = vadd.f32 %v507_v13, %v413_v49  ;;  %v604_v58 = vrot.slane %v573_v3, %v6616_v47 }
 0x146   : > { %v6810_v7 = vpop.permute.xlu1 %801  ;;  %v6918_v27 = vpop.permute.xlu0 %1167 }
 0x14a   : > { %v6815_v16 = vpop.permute.xlu1 %805 }
 0x14b   : > { %11640 = vst [vmem:[#allocation182_spill] sm:$0xff] %v6815_v16 }
 0x14e   : > { %v6827_v10 = vpop.permute.xlu1 %834 }
 0x14f   : > { %11642 = vst [vmem:[#allocation184_spill] sm:$0xff] %v6827_v10  ;;  %v268_v10 = vmul.f32 %v6609_v50, %v6721_v42  ;;  %v407_v50 = vadd.f32 %v379_v54, %v255_v53  ;;  %v398_v53 = vmul.f32 %v352_v23, %v6723_v43  ;;  %v393_v54 = vmul.f32 %v360_v8, %v6736_v39 }
 0x150   : > { %v574_v8 = vsel %vm569_vm2, %v6773_v29, %v6751_v63  ;;  %v522_v43 = vmul.f32 %v482_v17, %v6762_v33  ;;  %v499_v42 = vmul.f32 %v474_v4, %v6729_v41  ;;  %v506_v17 = vmul.f32 %v474_v4, %v6714_v57 }
 0x151   : > { %v420_v6 = vadd.f32 %v392_v26, %v268_v10  ;;  %v405_v26 = vadd.f32 %v377_v56, %v253_v12  ;;  %v426_v40 = vadd.f32 %v398_v53, %v274_v14  ;;  %v421_v28 = vadd.f32 %v393_v54, %v269_v59 }
 0x152   : > { %v529_v12 = vadd.f32 %v501_v21, %v407_v50  ;;  %v550_v49 = vadd.f32 %v522_v43, %v428_v44  ;;  %v695_v43 = vsel %vm691_vm3, %v6769_v31, %v6795_v20  ;;  %v6948_v21 = vpop.permute.xlu0 %1171 }
 0x153   : > { %v6865_v38 = vpop.permute.xlu1 %1066  ;;  %v542_v63 = vadd.f32 %v514_v15, %v420_v6  ;;  %v543_v14 = vadd.f32 %v515_v52, %v421_v28  ;;  %v527_v53 = vadd.f32 %v499_v42, %v405_v26  ;;  %v644_v15 = vmul.f32 %v604_v58, %v6781_v1  ;;  %11649 = vst [vmem:[#allocation191_spill] sm:$0xff] %v6948_v21 }
 0x154   : > { %11644 = vst [vmem:[#allocation186_spill] sm:$0xff] %v6865_v38  ;;  %v406_v38 = vadd.f32 %v378_v46, %v254_v60  ;;  %v384_v46 = vmul.f32 %v352_v23, %v6707_v61  ;;  %v391_v60 = vmul.f32 %v352_v23, %v6736_v39  ;;  %v521_v23 = vmul.f32 %v478_v24, %v6762_v33 }
 0x155   : > { %v600_v61 = vrot.slane %v574_v8, %v6616_v47  ;;  %v697_v52 = vsel %vm691_vm3, %v6805_v9, %v6791_v22 }
 0x156   : > { %v412_v18 = vadd.f32 %v384_v46, %v260_v19  ;;  %v419_v39 = vadd.f32 %v391_v60, %v267_v48  ;;  %v528_v24 = vadd.f32 %v500_v35, %v406_v38  ;;  %v536_v19 = vadd.f32 %v508_v45, %v414_v11 }
 0x157   : > { %v6886_v16 = vpop.permute.xlu1 %799  ;;  %v549_v59 = vadd.f32 %v521_v23, %v427_v51  ;;  %v513_v48 = vmul.f32 %v474_v4, %v6746_v37  ;;  %v520_v46 = vmul.f32 %v474_v4, %v6762_v33  ;;  %v575_v38 = vsel %vm569_vm2, %v6787_v2, %v6773_v29 }
 0x158   : > { %11645 = vst [vmem:[#allocation187_spill] sm:$0xff] %v6886_v16  ;;  %v622_v50 = vmul.f32 %v600_v61, %v6742_v36  ;;  %v629_v28 = vmul.f32 %v600_v61, %v6748_v34  ;;  %v623_v11 = vmul.f32 %v604_v58, %v6742_v36  ;;  %v630_v51 = vmul.f32 %v604_v58, %v6748_v34 }
 0x159   : > { %v636_v54 = vmul.f32 %v600_v61, %v6759_v32  ;;  %v696_v35 = vsel %vm691_vm3, %v6791_v22, %v6769_v31  ;;  %v637_v60 = vmul.f32 %v604_v58, %v6759_v32  ;;  %v643_v29 = vmul.f32 %v600_v61, %v6781_v1 }
 0x15a   : > { %v596_v42 = vrot.slane %v575_v38, %v6616_v47  ;;  %v534_v4 = vadd.f32 %v506_v17, %v412_v18  ;;  %v541_v6 = vadd.f32 %v513_v48, %v419_v39  ;;  %v548_v13 = vadd.f32 %v520_v46, %v426_v40 }
 0x15b   : > { %v6911_v10 = vpop.permute.xlu1 %923  ;;  %v650_v8 = vadd.f32 %v622_v50, %v528_v24  ;;  %v657_v45 = vadd.f32 %v629_v28, %v535_v55  ;;  %v722_v61 = vrot.slane %v696_v35, %v6616_v47  ;;  %v651_v31 = vadd.f32 %v623_v11, %v529_v12  ;;  %v6979_v28 = vpop.permute.xlu0 %1200 }
 0x15c   : > { %v658_v23 = vadd.f32 %v630_v51, %v536_v19  ;;  %v664_v3 = vadd.f32 %v636_v54, %v542_v63  ;;  %v726_v39 = vrot.slane %v695_v43, %v6616_v47  ;;  %v665_v26 = vadd.f32 %v637_v60, %v543_v14  ;;  %11652 = vst [vmem:[#allocation193_spill] sm:$0xff] %v6979_v28  ;;  %v11653_v54 = vld [vmem:[#allocation176_spill] sm:$0xff] }
 0x15d   : > { %v671_v58 = vadd.f32 %v643_v29, %v549_v59  ;;  %v621_v18 = vmul.f32 %v596_v42, %v6742_v36  ;;  %v628_v55 = vmul.f32 %v596_v42, %v6748_v34  ;;  %v672_v40 = vadd.f32 %v644_v15, %v550_v49  ;;  %v11651_v49 = vld [vmem:[#allocation182_spill] sm:$0xff] }
 0x15e   : > { %v635_v24 = vmul.f32 %v596_v42, %v6759_v32  ;;  %v642_v22 = vmul.f32 %v596_v42, %v6781_v1  ;;  %v718_v17 = vrot.slane %v697_v52, %v6616_v47  ;;  %v744_v63 = vmul.f32 %v722_v61, %v6767_v62 }
 0x15f   : > { %v6920_v56 = vpop.permute.xlu1 %927  ;;  %v751_v19 = vmul.f32 %v722_v61, %v6764_v30  ;;  %v758_v14 = vmul.f32 %v722_v61, %v6775_v0  ;;  %v818_v59 = vsel %vm813_vm4, %v6810_v7, %v6783_v25  ;;  %v745_v48 = vmul.f32 %v726_v39, %v6767_v62 }
 0x160   : > { %11647 = vst [vmem:[#allocation189_spill] sm:$0xff] %v6920_v56  ;;  %v752_v46 = vmul.f32 %v726_v39, %v6764_v30  ;;  %v759_v38 = vmul.f32 %v726_v39, %v6775_v0  ;;  %v817_v50 = vsel %vm813_vm4, %v6783_v25, %v11651_v49  ;;  %v649_v11 = vadd.f32 %v621_v18, %v527_v53 }
 0x161   : > { %v656_v51 = vadd.f32 %v628_v55, %v534_v4  ;;  %v765_v35 = vmul.f32 %v722_v61, %v11653_v54  ;;  %v766_v60 = vmul.f32 %v726_v39, %v11653_v54  ;;  %v663_v29 = vadd.f32 %v635_v24, %v541_v6  ;;  %v11655_v55 = vld [vmem:[#allocation171_spill] sm:$0xff] }
 0x162   : > { %v670_v42 = vadd.f32 %v642_v22, %v548_v13  ;;  %v743_v43 = vmul.f32 %v718_v17, %v6767_v62  ;;  %v844_v15 = vrot.slane %v818_v59, %v6616_v47  ;;  %v772_v9 = vadd.f32 %v744_v63, %v650_v8  ;;  %v11656_v22 = vld [vmem:[#allocation170_spill] sm:$0xff]  ;;  %v11658_v63 = vld [vmem:[#allocation173_spill] sm:$0xff] }
 0x163   : > { %v6945_v44 = vpop.permute.xlu1 %956  ;;  %v779_v2 = vadd.f32 %v751_v19, %v657_v45  ;;  %v786_v20 = vadd.f32 %v758_v14, %v664_v3  ;;  %v848_v25 = vrot.slane %v817_v50, %v6616_v47  ;;  %v773_v53 = vadd.f32 %v745_v48, %v651_v31  ;;  %v11659_v14 = vld [vmem:[#allocation177_spill] sm:$0xff]  ;;  %v11660_v50 = vld [vmem:[#allocation184_spill] sm:$0xff] }
 0x164   : > { %11648 = vst [vmem:[#allocation190_spill] sm:$0xff] %v6945_v44  ;;  %v780_v4 = vadd.f32 %v752_v46, %v658_v23  ;;  %v787_v61 = vadd.f32 %v759_v38, %v665_v26  ;;  %v750_v39 = vmul.f32 %v718_v17, %v6764_v30  ;;  %v793_v6 = vadd.f32 %v765_v35, %v671_v58  ;;  %v6998_v23 = vpop.permute.xlu0 %1165 }
 0x165   : > { %v794_v13 = vadd.f32 %v766_v60, %v672_v40  ;;  %v757_v18 = vmul.f32 %v718_v17, %v6775_v0  ;;  %v819_v8 = vsel %vm813_vm4, %v6886_v16, %v6810_v7  ;;  %v764_v45 = vmul.f32 %v718_v17, %v11653_v54  ;;  %11657 = vst [vmem:[#allocation195_spill] sm:$0xff] %v6998_v23 }
 0x166   : > { %v771_v3 = vadd.f32 %v743_v43, %v649_v11  ;;  %v866_v24 = vmul.f32 %v844_v15, %v11655_v55  ;;  %v873_v31 = vmul.f32 %v844_v15, %v11656_v22  ;;  %v880_v58 = vmul.f32 %v844_v15, %v11658_v63 }
 0x167   : > { %v867_v40 = vmul.f32 %v848_v25, %v11655_v55  ;;  %v874_v19 = vmul.f32 %v848_v25, %v11656_v22  ;;  %v940_v7 = vsel %vm935_vm5, %v6911_v10, %v11659_v14  ;;  %v778_v17 = vadd.f32 %v750_v39, %v656_v51 }
 0x168   : > { %v6963_v12 = vpop.permute.xlu1 %1188  ;;  %v881_v59 = vmul.f32 %v848_v25, %v11658_v63  ;;  %v840_v48 = vrot.slane %v819_v8, %v6616_v47  ;;  %v939_v46 = vsel %vm935_vm5, %v11659_v14, %v6920_v56  ;;  %v785_v38 = vadd.f32 %v757_v18, %v663_v29 }
 0x169   : > { %11650 = vst [vmem:[#allocation192_spill] sm:$0xff] %v6963_v12  ;;  %v887_v11 = vmul.f32 %v844_v15, %v11660_v50  ;;  %v888_v35 = vmul.f32 %v848_v25, %v11660_v50  ;;  %v1185_v60 = vsel %vm1179_vm6, %v6998_v23, %v6918_v27  ;;  %v792_v51 = vadd.f32 %v764_v45, %v670_v42  ;;  %v11662_v45 = vld [vmem:[#allocation174_spill] sm:$0xff] }
 0x16a   : > { %v894_v43 = vadd.f32 %v866_v24, %v772_v9  ;;  %v901_v39 = vadd.f32 %v873_v31, %v779_v2  ;;  %v966_v8 = vrot.slane %v940_v7, %v6616_v47  ;;  %v908_v49 = vadd.f32 %v880_v58, %v786_v20  ;;  %v11663_v31 = vld [vmem:[#allocation188_spill] sm:$0xff] }
 0x16b   : > { %v895_v54 = vadd.f32 %v867_v40, %v773_v53  ;;  %v902_v14 = vadd.f32 %v874_v19, %v780_v4  ;;  %v970_v29 = vrot.slane %v939_v46, %v6616_v47  ;;  %v909_v15 = vadd.f32 %v881_v59, %v787_v61  ;;  %v11661_v4 = vld [vmem:[#allocation178_spill] sm:$0xff]  ;;  %v11664_v19 = vld [vmem:[#allocation179_spill] sm:$0xff] }
 0x16c   : > { %v6985_v52 = vpop.permute.xlu1 %921  ;;  %v865_v25 = vmul.f32 %v840_v48, %v11655_v55  ;;  %v872_v18 = vmul.f32 %v840_v48, %v11656_v22  ;;  %v7026_v56 = vrot.slane %v1185_v60, %v6616_v47  ;;  %v879_v9 = vmul.f32 %v840_v48, %v11658_v63 }
 0x16d   : > { %11654 = vst [vmem:[#allocation194_spill] sm:$0xff] %v6985_v52  ;;  %v941_v2 = vsel %vm935_vm5, %v6985_v52, %v6911_v10  ;;  %v915_v20 = vadd.f32 %v887_v11, %v793_v6  ;;  %v916_v42 = vadd.f32 %v888_v35, %v794_v13  ;;  %v886_v53 = vmul.f32 %v840_v48, %v11660_v50  ;;  %v11665_v6 = vld [vmem:[#allocation183_spill] sm:$0xff] }
 0x16e   : > { %v988_v61 = vmul.f32 %v966_v8, %v11661_v4  ;;  %v995_v24 = vmul.f32 %v966_v8, %v11662_v45  ;;  %v7038_v58 = vmul.f32 %v7026_v56, %v11663_v31  ;;  %v1002_v7 = vmul.f32 %v966_v8, %v11664_v19 }
 0x16f   : > { %v989_v59 = vmul.f32 %v970_v29, %v11661_v4  ;;  %v7046_v10 = vmul.f32 %v7026_v56, %v6979_v28  ;;  %v893_v48 = vadd.f32 %v865_v25, %v771_v3  ;;  %v900_v46 = vadd.f32 %v872_v18, %v778_v17 }
 0x170   : > { %v1046_v26 = vpop.permute.xlu1 %1045  ;;  %v996_v11 = vmul.f32 %v970_v29, %v11662_v45  ;;  %v962_v35 = vrot.slane %v941_v2, %v6616_v47  ;;  %v907_v60 = vadd.f32 %v879_v9, %v785_v38  ;;  %v1003_v23 = vmul.f32 %v970_v29, %v11664_v19 }
 0x171   : > { %v1062_v13 = vsel %vm1057_vm7, %v1046_v26, %v11665_v6  ;;  %v1009_v52 = vmul.f32 %v966_v8, %v6945_v44  ;;  %v1010_v50 = vmul.f32 %v970_v29, %v6945_v44  ;;  %v914_v63 = vadd.f32 %v886_v53, %v792_v51  ;;  %v11667_v53 = vld [vmem:[#allocation186_spill] sm:$0xff] }
 0x172   : > { %v1016_v22 = vadd.f32 %v988_v61, %v894_v43  ;;  %v1023_v55 = vadd.f32 %v995_v24, %v901_v39  ;;  %v1088_v0 = vrot.slane %v1062_v13, %v6616_v47  ;;  %v1030_v3 = vadd.f32 %v1002_v7, %v908_v49  ;;  %v11668_v24 = vld [vmem:[#allocation181_spill] sm:$0xff] }
 0x173   : > { %v1017_v17 = vadd.f32 %v989_v59, %v895_v54  ;;  %v1024_v25 = vadd.f32 %v996_v11, %v902_v14  ;;  %v987_v51 = vmul.f32 %v962_v35, %v11661_v4  ;;  %v1008_v43 = vmul.f32 %v962_v35, %v6945_v44 }
 0x174   : > { %v7020_v16 = vpop.permute.xlu1 %1049  ;;  %v7069_v29 = vadd.f32 %v1003_v23, %v909_v15  ;;  %v1231_v49 = vmul.f32 %v7026_v56, %v6963_v12  ;;  %v1037_v54 = vadd.f32 %v1009_v52, %v915_v20  ;;  %v1038_v18 = vadd.f32 %v1010_v50, %v916_v42  ;;  %v11669_v20 = vld [vmem:[#allocation185_spill] sm:$0xff] }
 0x175   : > { %v1061_v38 = vsel %vm1057_vm7, %v11665_v6, %v7020_v16  ;;  %v994_v9 = vmul.f32 %v962_v35, %v11662_v45  ;;  %v1001_v2 = vmul.f32 %v962_v35, %v11664_v19  ;;  %v1117_v7 = vmul.f32 %v1088_v0, %v11668_v24 }
 0x176   : > { %v1092_v14 = vrot.slane %v1061_v38, %v6616_v47  ;;  %v1015_v50 = vadd.f32 %v987_v51, %v893_v48  ;;  %v1036_v15 = vadd.f32 %v1008_v43, %v914_v63  ;;  %v1124_v42 = vmul.f32 %v1088_v0, %v11669_v20 }
 0x177   : > { %v1145_v63 = vadd.f32 %v1117_v7, %v1023_v55 }
 0x178   : > { %v7040_v40 = vpop.permute.xlu1 %1078  ;;  %v1111_v44 = vmul.f32 %v1092_v14, %v11667_v53  ;;  %v1118_v48 = vmul.f32 %v1092_v14, %v11668_v24 }
 0x179   : > { %v1131_v11 = vmul.f32 %v1088_v0, %v7040_v40  ;;  %v1132_v43 = vmul.f32 %v1092_v14, %v7040_v40 }
 0x17a   : > { %v1139_v55 = vadd.f32 %v1111_v44, %v1017_v17 }
 0x17c   : > { %v7057_v30 = vpop.permute.xlu1 %1043 }
 0x17d   : > { %11666 = vst [vmem:[#allocation177_spill] sm:$0xff] %v7057_v30  ;;  %v1063_v8 = vsel %vm1057_vm7, %v7057_v30, %v1046_v26  ;;  %v1110_v26 = vmul.f32 %v1088_v0, %v11667_v53  ;;  %v1029_v30 = vadd.f32 %v1001_v2, %v907_v60  ;;  %v1125_v2 = vmul.f32 %v1092_v14, %v11669_v20 }
 0x17e   : > { %v1084_v39 = vrot.slane %v1063_v8, %v6616_v47  ;;  %v1022_v8 = vadd.f32 %v994_v9, %v900_v46  ;;  %v1152_v46 = vadd.f32 %v1124_v42, %v1030_v3  ;;  %v1146_v3 = vadd.f32 %v1118_v48, %v1024_v25 }
 0x17f   : > { %v1153_v48 = vadd.f32 %v1125_v2, %v7069_v29 }
 0x180   : > { %v1170_v61 = vpop.permute.xlu1 %1169  ;;  %v1130_v59 = vmul.f32 %v1084_v39, %v7040_v40  ;;  %v1109_v6 = vmul.f32 %v1084_v39, %v11667_v53  ;;  %v1116_v13 = vmul.f32 %v1084_v39, %v11668_v24 }
 0x181   : > { %v1183_v23 = vsel %vm1179_vm6, %v1170_v61, %v6948_v21  ;;  %v1184_v52 = vsel %vm1179_vm6, %v6918_v27, %v1170_v61  ;;  %v1138_v21 = vadd.f32 %v1110_v26, %v1016_v22  ;;  %v1123_v61 = vmul.f32 %v1084_v39, %v11669_v20 }
 0x182   : > { %v1210_v35 = vrot.slane %v1184_v52, %v6616_v47  ;;  %v1214_v38 = vrot.slane %v1183_v23, %v6616_v47  ;;  %v1158_v51 = vadd.f32 %v1130_v59, %v1036_v15  ;;  %v1137_v0 = vadd.f32 %v1109_v6, %v1015_v50 }
 0x183   : > { %v1144_v60 = vadd.f32 %v1116_v13, %v1022_v8  ;;  %v1159_v22 = vadd.f32 %v1131_v11, %v1037_v54  ;;  %v1160_v39 = vadd.f32 %v1132_v43, %v1038_v18  ;;  %v1151_v42 = vadd.f32 %v1123_v61, %v1029_v30  ;;  %v7107_v11 = vpop.permute.xlu0 %1304 }
 0x184   : > { %v7092_v27 = vpop.permute.xlu1 %1196  ;;  %v1232_v52 = vmul.f32 %v1210_v35, %v6963_v12  ;;  %v1253_v23 = vmul.f32 %v1210_v35, %v6979_v28  ;;  %v1254_v9 = vmul.f32 %v1214_v38, %v6979_v28  ;;  %v1239_v26 = vmul.f32 %v1210_v35, %v11663_v31  ;;  %11672 = vst [vmem:[#allocation179_spill] sm:$0xff] %v7107_v11 }
 0x185   : > { %11670 = vst [vmem:[#allocation178_spill] sm:$0xff] %v7092_v27  ;;  %v1240_v7 = vmul.f32 %v1214_v38, %v11663_v31  ;;  %v1280_v59 = vadd.f32 %v7046_v10, %v1158_v51  ;;  %v1233_v50 = vmul.f32 %v1214_v38, %v6963_v12  ;;  %v1259_v54 = vadd.f32 %v1231_v49, %v1137_v0 }
 0x186   : > { %v1281_v15 = vadd.f32 %v1253_v23, %v1159_v22  ;;  %v1260_v13 = vadd.f32 %v1232_v52, %v1138_v21  ;;  %v1266_v44 = vadd.f32 %v7038_v58, %v1144_v60  ;;  %v1282_v17 = vadd.f32 %v1254_v9, %v1160_v39 }
 0x187   : > { %v1245_v14 = vmul.f32 %v7026_v56, %v7092_v27  ;;  %v1246_v10 = vmul.f32 %v1210_v35, %v7092_v27  ;;  %v1267_v18 = vadd.f32 %v1239_v26, %v1145_v63  ;;  %v1268_v8 = vadd.f32 %v1240_v7, %v1146_v3 }
 0x188   : > { %v1247_v51 = vmul.f32 %v1214_v38, %v7092_v27  ;;  %v1261_v25 = vadd.f32 %v1233_v50, %v1139_v55  ;;  %v1328_v30 = vadd.f32 %v7107_v11, %v1280_v59  ;;  %v1329_v21 = vadd.f32 %v7107_v11, %v1281_v15 }
 0x189   : > { %v7105_v6 = vpop.permute.xlu1 %1289  ;;  %v1330_v38 = vadd.f32 %v7107_v11, %v1282_v17  ;;  %v1273_v0 = vadd.f32 %v1245_v14, %v1151_v42  ;;  %v1274_v52 = vadd.f32 %v1246_v10, %v1152_v46 }
 0x18a   : > { %11671 = vst [vmem:[#allocation174_spill] sm:$0xff] %v7105_v6  ;;  %v1308_v43 = vadd.f32 %v7105_v6, %v1260_v13  ;;  %v1307_v49 = vadd.f32 %v7105_v6, %v1259_v54  ;;  %v1309_v61 = vadd.f32 %v7105_v6, %v1261_v25  ;;  %v1275_v9 = vadd.f32 %v1247_v51, %v1153_v48  ;;  %v11678_v48 = vld [vmem:[#allocation152_spill] sm:$0xff] }
 0x18b   : > { %v1356_v55 = vmax.f32 %v1328_v30, 0.0  ;;  %v1357_v26 = vmax.f32 %v1329_v21, 0.0  ;;  %v1358_v3 = vmax.f32 %v1330_v38, 0.0 }
 0x18c   : > { %v1336_v23 = vmax.f32 %v1308_v43, 0.0  ;;  %v1335_v7 = vmax.f32 %v1307_v49, 0.0  ;;  %v1337_v13 = vmax.f32 %v1309_v61, 0.0  ;;  %v11677_v49 = vld [vmem:[#allocation151_spill] sm:$0xff] }
 0x18d   : > { %v7118_v58 = vpop.permute.xlu1 %1294 }
 0x18e   : > { %11673 = vst [vmem:[#allocation183_spill] sm:$0xff] %v7118_v58  ;;  %v1314_v56 = vadd.f32 %v7118_v58, %v1266_v44  ;;  %v1315_v35 = vadd.f32 %v7118_v58, %v1267_v18  ;;  %v1316_v63 = vadd.f32 %v7118_v58, %v1268_v8 }
 0x190   : > { %v1342_v60 = vmax.f32 %v1314_v56, 0.0  ;;  %v1343_v22 = vmax.f32 %v1315_v35, 0.0  ;;  %v1344_v29 = vmax.f32 %v1316_v63, 0.0  ;;  %v11679_v56 = vld [vmem:[#allocation153_spill] sm:$0xff] }
 0x191   : > { %v7126_v2 = vpop.permute.xlu1 %1299 }
 0x192   : > { %11674 = vst [vmem:[#allocation186_spill] sm:$0xff] %v7126_v2  ;;  %v1321_v59 = vadd.f32 %v7126_v2, %v1273_v0  ;;  %v1322_v39 = vadd.f32 %v7126_v2, %v1274_v52  ;;  %v1323_v50 = vadd.f32 %v7126_v2, %v1275_v9  ;;  %v7131_v15 = vpack.i.bf16 %v1343_v22, %v1336_v23 }
 0x193   : > { %v1364_v46 = vpack.c.bf16 %v1343_v22, %v1336_v23  ;;  %v7133_v42 = vpack.i.bf16 %v1342_v60, %v1335_v7  ;;  %v1363_v54 = vpack.c.bf16 %v1342_v60, %v1335_v7  ;;  %v7139_v10 = vpack.i.bf16 %v1344_v29, %v1337_v13 }
 0x194   : > { %v1349_v44 = vmax.f32 %v1321_v59, 0.0  ;;  %v1350_v17 = vmax.f32 %v1322_v39, 0.0  ;;  %v1351_v14 = vmax.f32 %v1323_v50, 0.0  ;;  %4974 = vrot.lane.b32.xlu1 %v7131_v15, %s5851_s28  ;;  %v7159_v30 = vpack.c.bf16 %v1344_v29, %v1337_v13  ;;  %v11683_v59 = vld [vmem:[#allocation12_spill] sm:$0xff]  ;;  %v11684_v39 = vld [vmem:[#allocation10_spill] sm:$0xff] }
 0x195   : > { %2526 = vmatprep.subr.bf16.mxu0 %v1364_v46  ;;  %4984 = vrot.lane.b32.xlu0 %v7133_v42, %s5851_s28  ;;  %v7299_v50 = vcombine.high %v11684_v39, %v11683_v59 }
 0x196   : > { %2527 = vmatpush1.bf16.msra.mxu0 %v1363_v54  ;;  %v7141_v18 = vpack.i.bf16 %v1358_v3, %v1351_v14  ;;  %v1371_v8 = vpack.c.bf16 %v1357_v26, %v1350_v17  ;;  %v1370_v51 = vpack.c.bf16 %v1356_v55, %v1349_v44  ;;  %v7147_v43 = vpack.i.bf16 %v1357_v26, %v1350_v17 }
 0x197   : > { %v7149_v25 = vpack.i.bf16 %v1356_v55, %v1349_v44  ;;  %11675 = vst [vmem:[#allocation181_spill] sm:$0xff] %v7159_v30  ;;  %v7161_v21 = vpack.c.bf16 %v1358_v3, %v1351_v14  ;;  %11685 = vst [vmem:[#allocation198_spill] sm:$0xff] %v7299_v50  ;;  %2558 = vmatprep.mubr.bf16.mxu0 %v7299_v50 }
 0x198   : > { %4979 = vrot.lane.b32.xlu1 %v7139_v10, %s5851_s28  ;;  %2528 = vmatprep.subr.bf16.mxu0 %v1371_v8 }
 0x199   : > { %4994 = vrot.lane.b32.xlu0 %v7141_v18, %s5851_s28  ;;  %11676 = vst [vmem:[#allocation185_spill] sm:$0xff] %v7161_v21  ;;  %v11703_v21 = vld [vmem:[#allocation160_spill] sm:$0xff] }
 0x19a   : > { %2529 = vmatpush1.bf16.msra.mxu0 %v1370_v51 }
 0x19c   : > { %4989 = vrot.lane.b32.xlu1 %v7147_v43, %s5851_s28 }
 0x19d   : > { %5004 = vrot.lane.b32.xlu0 %v7131_v15, %s5852_s29 }
 0x1a0   : > { %4999 = vrot.lane.b32.xlu1 %v7149_v25, %s5851_s28 }
 0x1a1   : > { %5014 = vrot.lane.b32.xlu0 %v7133_v42, %s5852_s29 }
 0x1a4   : > { %5009 = vrot.lane.b32.xlu1 %v7139_v10, %s5852_s29 }
 0x1a5   : > { %319 = vrot.lane.b32.xlu0 %v11677_v49, %s5851_s28 }
 0x1a8   : > { %317 = vrot.lane.b32.xlu1 %v11678_v48, %s5851_s28 }
 0x1a9   : > { %5024 = vrot.lane.b32.xlu0 %v7141_v18, %s5852_s29 }
 0x1ac   : > { %5019 = vrot.lane.b32.xlu1 %v7147_v43, %s5852_s29 }
 0x1ad   : > { %441 = vrot.lane.b32.xlu0 %v11678_v48, %s5852_s29 }
 0x1b0   : > { %5029 = vrot.lane.b32.xlu1 %v7149_v25, %s5852_s29 }
 0x1b1   : > { %563 = vrot.lane.b32.xlu0 %v11678_v48, %s5854_s30 }
 0x1b4   : > { %443 = vrot.lane.b32.xlu1 %v11677_v49, %s5852_s29 }
 0x1b5   : > { %5034 = vrot.lane.b32.xlu0 %v7131_v15, %s5854_s30 }
 0x1b8   : > { %565 = vrot.lane.b32.xlu1 %v11677_v49, %s5854_s30 }
 0x1b9   : > { %5044 = vrot.lane.b32.xlu0 %v7133_v42, %s5854_s30 }
 0x1bc   : > { %5039 = vrot.lane.b32.xlu1 %v7139_v10, %s5854_s30 }
 0x1bd   : > { %687 = vrot.lane.b32.xlu0 %v11677_v49, %s5856_s7 }
 0x1c0   : > { %685 = vrot.lane.b32.xlu1 %v11678_v48, %s5856_s7 }
 0x1c1   : > { %809 = vrot.lane.b32.xlu0 %v11677_v49, %s5858_s8 }
 0x1c4   : > { %807 = vrot.lane.b32.xlu1 %v11678_v48, %s5858_s8 }
 0x1c5   : > { %5054 = vrot.lane.b32.xlu0 %v7141_v18, %s5854_s30 }
 0x1c8   : > { %5049 = vrot.lane.b32.xlu1 %v7147_v43, %s5854_s30 }
 0x1c9   : > { %929 = vrot.lane.b32.xlu0 %v11678_v48, %s5860_s9 }
 0x1cc   : > { %5059 = vrot.lane.b32.xlu1 %v7149_v25, %s5854_s30 }
 0x1cd   : > { %1051 = vrot.lane.b32.xlu0 %v11678_v48, %s5862_s10 }
 0x1d0   : > { %931 = vrot.lane.b32.xlu1 %v11677_v49, %s5860_s9 }
 0x1d1   : > { %5064 = vrot.lane.b32.xlu0 %v7131_v15, %s5856_s7 }
 0x1d4   : > { %1053 = vrot.lane.b32.xlu1 %v11677_v49, %s5862_s10 }
 0x1d5   : > { %5074 = vrot.lane.b32.xlu0 %v7133_v42, %s5856_s7 }
 0x1d8   : > { %5069 = vrot.lane.b32.xlu1 %v7139_v10, %s5856_s7 }
 0x1d9   : > { %1175 = vrot.lane.b32.xlu0 %v11677_v49, %s5864_s11  ;;  %v11707_v49 = vld [vmem:[#allocation161_spill] sm:$0xff] }
 0x1dc   : > { %1173 = vrot.lane.b32.xlu1 %v11678_v48, %s5864_s11 }
 0x1dd   : > { %5084 = vrot.lane.b32.xlu0 %v7141_v18, %s5856_s7 }
 0x1e0   : > { %5079 = vrot.lane.b32.xlu1 %v7147_v43, %s5856_s7 }
 0x1e1   : > { %5094 = vrot.lane.b32.xlu0 %v7131_v15, %s5858_s8 }
 0x1e4   : > { %5089 = vrot.lane.b32.xlu1 %v7149_v25, %s5856_s7 }
 0x1e5   : > { %5104 = vrot.lane.b32.xlu0 %v7133_v42, %s5858_s8 }
 0x1e8   : > { %5099 = vrot.lane.b32.xlu1 %v7139_v10, %s5858_s8 }
 0x1e9   : > { %5114 = vrot.lane.b32.xlu0 %v7141_v18, %s5858_s8 }
 0x1ec   : > { %5109 = vrot.lane.b32.xlu1 %v7147_v43, %s5858_s8 }
 0x1ed   : > { %5124 = vrot.lane.b32.xlu0 %v7131_v15, %s5860_s9 }
 0x1f0   : > { %5119 = vrot.lane.b32.xlu1 %v7149_v25, %s5858_s8 }
 0x1f1   : > { %5134 = vrot.lane.b32.xlu0 %v7133_v42, %s5860_s9 }
 0x1f4   : > { %5129 = vrot.lane.b32.xlu1 %v7139_v10, %s5860_s9 }
 0x1f5   : > { %5144 = vrot.lane.b32.xlu0 %v7141_v18, %s5860_s9 }
 0x1f8   : > { %5139 = vrot.lane.b32.xlu1 %v7147_v43, %s5860_s9 }
 0x1f9   : > { %5154 = vrot.lane.b32.xlu0 %v7131_v15, %s5862_s10 }
 0x1fc   : > { %5149 = vrot.lane.b32.xlu1 %v7149_v25, %s5860_s9 }
 0x1fd   : > { %5164 = vrot.lane.b32.xlu0 %v7133_v42, %s5862_s10 }
 0x200   : > { %5159 = vrot.lane.b32.xlu1 %v7139_v10, %s5862_s10 }
 0x201   : > { %5174 = vrot.lane.b32.xlu0 %v7141_v18, %s5862_s10 }
 0x204   : > { %5169 = vrot.lane.b32.xlu1 %v7147_v43, %s5862_s10 }
 0x205   : > { %321 = vrot.lane.b32.xlu0 %v11679_v56, %s5851_s28 }
 0x206   : > { %v4975_v35 = vpop.permute.xlu1 %4974 }
 0x207   : > { %v4977_v63 = vunpack.i.h.bf16 %v4975_v35  ;;  %v4976_v38 = vunpack.i.l.bf16 %v4975_v35  ;;  %v7263_v61 = vpop.permute.xlu0 %4984 }
 0x208   : > { %11680 = vst [vmem:[#allocation152_spill] sm:$0xff] %v7263_v61  ;;  %v11072_v0 = vunpack.i.h.bf16 %v7263_v61  ;;  %v11073_v52 = vunpack.i.l.bf16 %v7263_v61  ;;  %5179 = vrot.lane.b32.xlu1 %v7149_v25, %s5862_s10 }
 0x209   : > { %5184 = vrot.lane.b32.xlu0 %v7131_v15, %s5864_s11 }
 0x20a   : > { %v7271_v23 = vpop.permute.xlu1 %4979  ;;  %v1467_v55 = vsel %vm325_vm0, %v11073_v52, %v4976_v38  ;;  %v1468_v26 = vsel %vm325_vm0, %v11072_v0, %v4977_v63 }
 0x20b   : > { %11681 = vst [vmem:[#allocation196_spill] sm:$0xff] %v7271_v23  ;;  %v11079_v60 = vunpack.i.h.bf16 %v7271_v23  ;;  %v11078_v22 = vunpack.i.l.bf16 %v7271_v23  ;;  %v7275_v9 = vpop.permute.xlu0 %4994  ;;  %v1475_v46 = vpack.c.bf16 %v1468_v26, %v1467_v55  ;;  %v11702_v23 = vld [vmem:[#allocation156_spill] sm:$0xff] }
 0x20c   : > { %11682 = vst [vmem:[#allocation197_spill] sm:$0xff] %v7275_v9  ;;  %445 = vrot.lane.b32.xlu1 %v11679_v56, %s5852_s29  ;;  %v11076_v54 = vunpack.i.h.bf16 %v7275_v9  ;;  %v11077_v13 = vunpack.i.l.bf16 %v7275_v9 }
 0x20d   : > { %567 = vrot.lane.b32.xlu0 %v11679_v56, %s5854_s30  ;;  %v1463_v7 = vsel %vm325_vm0, %v4976_v38, %v11078_v22  ;;  %v1464_v29 = vsel %vm325_vm0, %v4977_v63, %v11079_v60  ;;  %v11697_v60 = vld [vmem:[#allocation158_spill] sm:$0xff] }
 0x20e   : > { %v4990_v15 = vpop.permute.xlu1 %4989  ;;  %v1476_v3 = vpack.c.bf16 %v1464_v29, %v1463_v7 }
 0x20f   : > { %v4992_v44 = vunpack.i.h.bf16 %v4990_v15  ;;  %v4991_v17 = vunpack.i.l.bf16 %v4990_v15  ;;  %v5005_v14 = vpop.permute.xlu0 %5004 }
 0x210   : > { %5189 = vrot.lane.b32.xlu1 %v7139_v10, %s5864_s11  ;;  %2530 = vmatprep.subr.bf16.mxu0 %v1476_v3  ;;  %v5007_v3 = vunpack.i.h.bf16 %v5005_v14 }
 0x211   : > { %689 = vrot.lane.b32.xlu0 %v11679_v56, %s5856_s7  ;;  %2531 = vmatpush1.bf16.msra.mxu0 %v1475_v46  ;;  %v1465_v8 = vsel %vm325_vm0, %v4991_v17, %v11077_v13  ;;  %v1466_v51 = vsel %vm325_vm0, %v4992_v44, %v11076_v54  ;;  %v5006_v46 = vunpack.i.l.bf16 %v5005_v14 }
 0x212   : > { %v7316_v35 = vpop.permute.xlu1 %4999  ;;  %v1483_v63 = vpack.c.bf16 %v1466_v51, %v1465_v8 }
 0x213   : > { %11686 = vst [vmem:[#allocation199_spill] sm:$0xff] %v7316_v35  ;;  %v11071_v10 = vunpack.i.h.bf16 %v7316_v35  ;;  %v11070_v38 = vunpack.i.l.bf16 %v7316_v35  ;;  %v7320_v55 = vpop.permute.xlu0 %5014 }
 0x214   : > { %11687 = vst [vmem:[#allocation200_spill] sm:$0xff] %v7320_v55  ;;  %v11069_v26 = vunpack.i.h.bf16 %v7320_v55  ;;  %v11068_v7 = vunpack.i.l.bf16 %v7320_v55  ;;  %5194 = vrot.lane.b32.xlu1 %v7133_v42, %s5864_s11  ;;  %2532 = vmatprep.subr.bf16.mxu0 %v1483_v63 }
 0x215   : > { %5204 = vrot.lane.b32.xlu0 %v7141_v18, %s5864_s11  ;;  %v1469_v29 = vsel %vm325_vm0, %v11070_v38, %v4991_v17  ;;  %v1470_v15 = vsel %vm325_vm0, %v11071_v10, %v4992_v44 }
 0x216   : > { %v7336_v8 = vpop.permute.xlu1 %5009  ;;  %v1482_v51 = vpack.c.bf16 %v1470_v15, %v1469_v29  ;;  %v1579_v44 = vsel %vm447_vm1, %v11068_v7, %v5006_v46  ;;  %v1580_v17 = vsel %vm447_vm1, %v11069_v26, %v5007_v3  ;;  %v11692_v26 = vld [vmem:[#allocation155_spill] sm:$0xff] }
 0x217   : > { %11688 = vst [vmem:[#allocation201_spill] sm:$0xff] %v7336_v8  ;;  %v11075_v42 = vunpack.i.h.bf16 %v7336_v8  ;;  %v11074_v63 = vunpack.i.l.bf16 %v7336_v8  ;;  %v7340_v18 = vpop.permute.xlu0 %319  ;;  %v1587_v7 = vpack.c.bf16 %v1580_v17, %v1579_v44  ;;  %v11693_v44 = vld [vmem:[#allocation150_spill] sm:$0xff] }
 0x218   : > { %11689 = vst [vmem:[#allocation202_spill] sm:$0xff] %v7340_v18  ;;  %5199 = vrot.lane.b32.xlu1 %v7147_v43, %s5864_s11  ;;  %2533 = vmatpush1.bf16.msra.mxu0 %v1482_v51  ;;  %v256_v17 = vmul.f32 %v11693_v44, %v11692_v26  ;;  %v270_v30 = vmul.f32 %v11693_v44, %v11703_v21 }
 0x219   : > { %5209 = vrot.lane.b32.xlu0 %v7149_v25, %s5864_s11  ;;  %v1575_v14 = vsel %vm447_vm1, %v5006_v46, %v11074_v63  ;;  %v1576_v43 = vsel %vm447_vm1, %v5007_v3, %v11075_v42  ;;  %v11691_v46 = vld [vmem:[#allocation159_spill] sm:$0xff]  ;;  %v11695_v42 = vld [vmem:[#allocation164_spill] sm:$0xff] }
 0x21a   : > { %v318_v29 = vpop.permute.xlu1 %317  ;;  %v1588_v15 = vpack.c.bf16 %v1576_v43, %v1575_v14 }
 0x21b   : > { %v7362_v51 = vpop.permute.xlu0 %5024  ;;  %v327_v25 = vsel %vm325_vm0, %v318_v29, %v7340_v18  ;;  %v328_v3 = vsel %vm325_vm0, %v11691_v46, %v318_v29  ;;  %v11701_v29 = vld [vmem:[#allocation154_spill] sm:$0xff] }
 0x21c   : > { %11690 = vst [vmem:[#allocation203_spill] sm:$0xff] %v7362_v51  ;;  %811 = vrot.lane.b32.xlu1 %v11679_v56, %s5858_s8  ;;  %2534 = vmatprep.subr.bf16.mxu0 %v1588_v15  ;;  %v257_v15 = vmul.f32 %v11678_v48, %v11692_v26  ;;  %v364_v10 = vrot.slane %v328_v3, %v6616_v47  ;;  %v11700_v8 = vunpack.i.h.bf16 %v7362_v51 }
 0x21d   : > { %1055 = vrot.lane.b32.xlu0 %v11679_v56, %s5862_s10  ;;  %2535 = vmatpush1.bf16.msra.mxu0 %v1587_v7  ;;  %v11694_v7 = vld [vmem:[#allocation157_spill] sm:$0xff]  ;;  %v368_v0 = vrot.slane %v327_v25, %v6616_v47  ;;  %v277_v3 = vmul.f32 %v11693_v44, %v11697_v60 }
 0x21e   : > { %v5020_v14 = vpop.permute.xlu1 %5019  ;;  %v263_v38 = vmul.f32 %v11693_v44, %v11694_v7  ;;  %v264_v22 = vmul.f32 %v11678_v48, %v11694_v7  ;;  %v380_v9 = vmul.f32 %v364_v10, %v11701_v29  ;;  %v387_v50 = vmul.f32 %v364_v10, %v11702_v23 }
 0x21f   : > { %v442_v43 = vpop.permute.xlu0 %441  ;;  %v5022_v52 = vunpack.i.h.bf16 %v5020_v14  ;;  %v5021_v63 = vunpack.i.l.bf16 %v5020_v14  ;;  %v11698_v14 = vld [vmem:[#allocation169_spill] sm:$0xff]  ;;  %v401_v26 = vmul.f32 %v364_v10, %v11707_v49 }
 0x220   : > { %933 = vrot.lane.b32.xlu1 %v11679_v56, %s5860_s9  ;;  %v450_v54 = vsel %vm447_vm1, %v11695_v42, %v442_v43  ;;  %v11699_v42 = vunpack.i.l.bf16 %v7362_v51 }
 0x221   : > { %v486_v46 = vrot.slane %v450_v54, %v6616_v47  ;;  %v1578_v25 = vsel %vm447_vm1, %v5022_v52, %v11700_v8  ;;  %v278_v54 = vmul.f32 %v11678_v48, %v11697_v60  ;;  %v11706_v60 = vld [vmem:[#allocation163_spill] sm:$0xff] }
 0x222   : > { %v7389_v13 = vpop.permute.xlu1 %5029  ;;  %v1577_v61 = vsel %vm447_vm1, %v5021_v63, %v11699_v42  ;;  %v394_v7 = vmul.f32 %v364_v10, %v11706_v60 }
 0x223   : > { %11696 = vst [vmem:[#allocation159_spill] sm:$0xff] %v7389_v13  ;;  %v564_v55 = vpop.permute.xlu0 %563  ;;  %v1595_v18 = vpack.c.bf16 %v1578_v25, %v1577_v61  ;;  %v11704_v42 = vunpack.i.l.bf16 %v7389_v13  ;;  %v11705_v51 = vunpack.i.h.bf16 %v7389_v13  ;;  %v271_v25 = vmul.f32 %v11678_v48, %v11703_v21 }
 0x224   : > { %v572_v35 = vsel %vm569_vm2, %v11698_v14, %v564_v55  ;;  %1177 = vrot.lane.b32.xlu1 %v11679_v56, %s5864_s11  ;;  %v381_v14 = vmul.f32 %v368_v0, %v11701_v29  ;;  %v388_v29 = vmul.f32 %v368_v0, %v11702_v23  ;;  %v395_v56 = vmul.f32 %v368_v0, %v11706_v60 }
 0x225   : > { %v1581_v8 = vsel %vm447_vm1, %v11704_v42, %v5021_v63  ;;  %v1582_v59 = vsel %vm447_vm1, %v11705_v51, %v5022_v52  ;;  %v608_v61 = vrot.slane %v572_v35, %v6616_v47  ;;  %v402_v63 = vmul.f32 %v368_v0, %v11707_v49  ;;  %2536 = vmatprep.subr.bf16.mxu0 %v1595_v18 }
 0x226   : > { %v7418_v39 = vpop.permute.xlu1 %443  ;;  %v502_v42 = vmul.f32 %v486_v46, %v6729_v41  ;;  %v408_v52 = vadd.f32 %v380_v9, %v256_v17  ;;  %v409_v51 = vadd.f32 %v381_v14, %v257_v15  ;;  %v415_v13 = vadd.f32 %v387_v50, %v263_v38 }
 0x227   : > { %v5035_v44 = vpop.permute.xlu0 %5034  ;;  %v1594_v23 = vpack.c.bf16 %v1582_v59, %v1581_v8  ;;  %v509_v11 = vmul.f32 %v486_v46, %v6714_v57  ;;  %v516_v60 = vmul.f32 %v486_v46, %v6746_v37  ;;  %v523_v35 = vmul.f32 %v486_v46, %v6762_v33 }
 0x228   : > { %v449_v48 = vsel %vm447_vm1, %v442_v43, %v7418_v39  ;;  %v416_v0 = vadd.f32 %v388_v29, %v264_v22  ;;  %v422_v49 = vadd.f32 %v394_v7, %v270_v30  ;;  %v423_v21 = vadd.f32 %v395_v56, %v271_v25 }
 0x229   : > { %v624_v9 = vmul.f32 %v608_v61, %v6742_v36  ;;  %2537 = vmatpush1.bf16.msra.mxu0 %v1594_v23  ;;  %v429_v59 = vadd.f32 %v401_v26, %v277_v3  ;;  %v530_v38 = vadd.f32 %v502_v42, %v408_v52  ;;  %v631_v18 = vmul.f32 %v608_v61, %v6748_v34 }
 0x22a   : > { %v7443_v10 = vpop.permute.xlu1 %565  ;;  %v638_v17 = vmul.f32 %v608_v61, %v6759_v32  ;;  %v490_v15 = vrot.slane %v449_v48, %v6616_v47  ;;  %v430_v22 = vadd.f32 %v402_v63, %v278_v54  ;;  %v537_v23 = vadd.f32 %v509_v11, %v415_v13 }
 0x22b   : > { %v7446_v50 = vpop.permute.xlu0 %5044  ;;  %v571_v43 = vsel %vm569_vm2, %v564_v55, %v7443_v10  ;;  %v544_v7 = vadd.f32 %v516_v60, %v422_v49  ;;  %v551_v29 = vadd.f32 %v523_v35, %v429_v59  ;;  %v645_v46 = vmul.f32 %v608_v61, %v6781_v1 }
 0x22c   : > { %11708 = vst [vmem:[#allocation150_spill] sm:$0xff] %v7446_v50  ;;  %v11111_v30 = vunpack.i.h.bf16 %v7446_v50  ;;  %v11112_v56 = vunpack.i.l.bf16 %v7446_v50  ;;  %v652_v3 = vadd.f32 %v624_v9, %v530_v38  ;;  %v5037_v14 = vunpack.i.h.bf16 %v5035_v44  ;;  %v11711_v38 = vld [vmem:[#allocation175_spill] sm:$0xff] }
 0x22d   : > { %v5036_v8 = vunpack.i.l.bf16 %v5035_v44  ;;  %v659_v42 = vadd.f32 %v631_v18, %v537_v23  ;;  %v612_v55 = vrot.slane %v571_v43, %v6616_v47  ;;  %v666_v54 = vadd.f32 %v638_v17, %v544_v7 }
 0x22e   : > { %v7456_v26 = vpop.permute.xlu1 %5039  ;;  %v503_v11 = vmul.f32 %v490_v15, %v6729_v41  ;;  %v1692_v60 = vsel %vm569_vm2, %v11111_v30, %v5037_v14  ;;  %v510_v13 = vmul.f32 %v490_v15, %v6714_v57  ;;  %v517_v61 = vmul.f32 %v490_v15, %v6746_v37 }
 0x22f   : > { %11709 = vst [vmem:[#allocation164_spill] sm:$0xff] %v7456_v26  ;;  %v7459_v25 = vpop.permute.xlu0 %687  ;;  %v11114_v52 = vunpack.i.h.bf16 %v7456_v26  ;;  %v11113_v48 = vunpack.i.l.bf16 %v7456_v26  ;;  %v1691_v49 = vsel %vm569_vm2, %v11112_v56, %v5036_v8  ;;  %v524_v9 = vmul.f32 %v490_v15, %v6762_v33  ;;  %v11715_v26 = vld [vmem:[#allocation168_spill] sm:$0xff] }
 0x230   : > { %11710 = vst [vmem:[#allocation169_spill] sm:$0xff] %v7459_v25  ;;  %v625_v23 = vmul.f32 %v612_v55, %v6742_v36  ;;  %v673_v30 = vadd.f32 %v645_v46, %v551_v29  ;;  %v632_v15 = vmul.f32 %v612_v55, %v6748_v34  ;;  %v639_v56 = vmul.f32 %v612_v55, %v6759_v32 }
 0x231   : > { %v1687_v63 = vsel %vm569_vm2, %v5036_v8, %v11113_v48  ;;  %v1688_v35 = vsel %vm569_vm2, %v5037_v14, %v11114_v52  ;;  %v1699_v14 = vpack.c.bf16 %v1692_v60, %v1691_v49  ;;  %v646_v48 = vmul.f32 %v612_v55, %v6781_v1 }
 0x232   : > { %v686_v44 = vpop.permute.xlu1 %685  ;;  %v1700_v43 = vpack.c.bf16 %v1688_v35, %v1687_v63  ;;  %v531_v52 = vadd.f32 %v503_v11, %v409_v51  ;;  %v552_v50 = vadd.f32 %v524_v9, %v430_v22  ;;  %v11717_v9 = vld [vmem:[#allocation182_spill] sm:$0xff] }
 0x233   : > { %v693_v59 = vsel %vm691_vm3, %v686_v44, %v7459_v25  ;;  %v694_v18 = vsel %vm691_vm3, %v11711_v38, %v686_v44  ;;  %v7490_v17 = vpop.permute.xlu0 %809  ;;  %v538_v44 = vadd.f32 %v510_v13, %v416_v0  ;;  %v11716_v0 = vld [vmem:[#allocation176_spill] sm:$0xff] }
 0x234   : > { %11712 = vst [vmem:[#allocation175_spill] sm:$0xff] %v7490_v17  ;;  %v730_v7 = vrot.slane %v694_v18, %v6616_v47  ;;  %v734_v8 = vrot.slane %v693_v59, %v6616_v47  ;;  %2538 = vmatprep.subr.bf16.mxu0 %v1700_v43  ;;  %v545_v18 = vadd.f32 %v517_v61, %v423_v21  ;;  %v11713_v59 = vld [vmem:[#allocation165_spill] sm:$0xff] }
 0x235   : > { %2539 = vmatpush1.bf16.msra.mxu0 %v1699_v14  ;;  %v653_v60 = vadd.f32 %v625_v23, %v531_v52  ;;  %v660_v13 = vadd.f32 %v632_v15, %v538_v44  ;;  %v11718_v44 = vld [vmem:[#allocation171_spill] sm:$0xff] }
 0x236   : > { %v746_v38 = vmul.f32 %v730_v7, %v6767_v62  ;;  %v747_v63 = vmul.f32 %v734_v8, %v6767_v62  ;;  %v808_v35 = vpop.permute.xlu1 %807  ;;  %v753_v49 = vmul.f32 %v730_v7, %v11713_v59  ;;  %v754_v29 = vmul.f32 %v734_v8, %v11713_v59 }
 0x237   : > { %v7502_v46 = vpop.permute.xlu0 %5054  ;;  %v760_v55 = vmul.f32 %v730_v7, %v11715_v26  ;;  %v761_v51 = vmul.f32 %v734_v8, %v11715_v26  ;;  %v767_v11 = vmul.f32 %v730_v7, %v11716_v0  ;;  %v667_v43 = vadd.f32 %v639_v56, %v545_v18  ;;  %v11719_v18 = vld [vmem:[#allocation170_spill] sm:$0xff] }
 0x238   : > { %11714 = vst [vmem:[#allocation204_spill] sm:$0xff] %v7502_v46  ;;  %v674_v62 = vadd.f32 %v646_v48, %v552_v50  ;;  %v768_v14 = vmul.f32 %v734_v8, %v11716_v0  ;;  %v774_v21 = vadd.f32 %v746_v38, %v652_v3  ;;  %v775_v22 = vadd.f32 %v747_v63, %v653_v60 }
 0x239   : > { %v815_v61 = vsel %vm813_vm4, %v808_v35, %v7490_v17  ;;  %v816_v52 = vsel %vm813_vm4, %v11717_v9, %v808_v35  ;;  %v781_v26 = vadd.f32 %v753_v49, %v659_v42  ;;  %v782_v59 = vadd.f32 %v754_v29, %v660_v13  ;;  %v11720_v42 = vld [vmem:[#allocation173_spill] sm:$0xff] }
 0x23a   : > { %v7514_v23 = vpop.permute.xlu1 %5049  ;;  %v852_v7 = vrot.slane %v816_v52, %v6616_v47  ;;  %v856_v50 = vrot.slane %v815_v61, %v6616_v47  ;;  %v788_v48 = vadd.f32 %v760_v55, %v666_v54  ;;  %v789_v3 = vadd.f32 %v761_v51, %v667_v43  ;;  %v11721_v61 = vld [vmem:[#allocation189_spill] sm:$0xff]  ;;  %v11723_v51 = vld [vmem:[#allocation184_spill] sm:$0xff] }
 0x23b   : > { %v930_v56 = vpop.permute.xlu0 %929  ;;  %v795_v8 = vadd.f32 %v767_v11, %v673_v30  ;;  %v5052_v15 = vunpack.i.h.bf16 %v7514_v23  ;;  %v5051_v13 = vunpack.i.l.bf16 %v7514_v23  ;;  %v796_v55 = vadd.f32 %v768_v14, %v674_v62 }
 0x23c   : > { %v868_v38 = vmul.f32 %v852_v7, %v11718_v44  ;;  %v869_v63 = vmul.f32 %v856_v50, %v11718_v44  ;;  %v875_v35 = vmul.f32 %v852_v7, %v11719_v18  ;;  %v876_v60 = vmul.f32 %v856_v50, %v11719_v18 }
 0x23d   : > { %v882_v49 = vmul.f32 %v852_v7, %v11720_v42  ;;  %v883_v29 = vmul.f32 %v856_v50, %v11720_v42  ;;  %v938_v30 = vsel %vm935_vm5, %v11721_v61, %v930_v56  ;;  %v889_v11 = vmul.f32 %v852_v7, %v11723_v51 }
 0x23e   : > { %v7529_v54 = vpop.permute.xlu1 %5059  ;;  %v11129_v43 = vunpack.i.h.bf16 %v7502_v46  ;;  %v11130_v9 = vunpack.i.l.bf16 %v7502_v46  ;;  %v890_v18 = vmul.f32 %v856_v50, %v11723_v51  ;;  %v896_v44 = vadd.f32 %v868_v38, %v774_v21  ;;  %v11724_v50 = vld [vmem:[#allocation190_spill] sm:$0xff] }
 0x23f   : > { %11722 = vst [vmem:[#allocation182_spill] sm:$0xff] %v7529_v54  ;;  %v1052_v52 = vpop.permute.xlu0 %1051  ;;  %v897_v42 = vadd.f32 %v869_v63, %v775_v22  ;;  %v903_v17 = vadd.f32 %v875_v35, %v781_v26  ;;  %v904_v23 = vadd.f32 %v876_v60, %v782_v59  ;;  %v910_v0 = vadd.f32 %v882_v49, %v788_v48 }
 0x240   : > { %v974_v25 = vrot.slane %v938_v30, %v6616_v47  ;;  %v1060_v62 = vsel %vm1057_vm7, %v7020_v16, %v1052_v52  ;;  %v911_v14 = vadd.f32 %v883_v29, %v789_v3  ;;  %v1689_v61 = vsel %vm569_vm2, %v5051_v13, %v11130_v9 }
 0x241   : > { %v1096_v7 = vrot.slane %v1060_v62, %v6616_v47  ;;  %v1690_v26 = vsel %vm569_vm2, %v5052_v15, %v11129_v43  ;;  %v917_v38 = vadd.f32 %v889_v11, %v795_v8  ;;  %v918_v63 = vadd.f32 %v890_v18, %v796_v55 }
 0x242   : > { %v7548_v59 = vpop.permute.xlu1 %931  ;;  %v990_v21 = vmul.f32 %v974_v25, %v11661_v4  ;;  %v997_v22 = vmul.f32 %v974_v25, %v11662_v45  ;;  %v1004_v16 = vmul.f32 %v974_v25, %v11664_v19  ;;  %v1011_v48 = vmul.f32 %v974_v25, %v11724_v50 }
 0x243   : > { %v5065_v3 = vpop.permute.xlu0 %5064  ;;  %v1112_v49 = vmul.f32 %v1096_v7, %v11667_v53  ;;  %v1119_v29 = vmul.f32 %v1096_v7, %v11668_v24  ;;  %v1126_v30 = vmul.f32 %v1096_v7, %v11669_v20  ;;  %v1133_v62 = vmul.f32 %v1096_v7, %v7040_v40 }
 0x244   : > { %v1018_v43 = vadd.f32 %v990_v21, %v896_v44  ;;  %v1025_v9 = vadd.f32 %v997_v22, %v903_v17  ;;  %v1707_v46 = vpack.c.bf16 %v1690_v26, %v1689_v61  ;;  %v937_v25 = vsel %vm935_vm5, %v930_v56, %v7548_v59 }
 0x245   : > { %v1032_v18 = vadd.f32 %v1004_v16, %v910_v0  ;;  %v1039_v55 = vadd.f32 %v1011_v48, %v917_v38  ;;  %v5067_v11 = vunpack.i.h.bf16 %v5065_v3  ;;  %v5066_v35 = vunpack.i.l.bf16 %v5065_v3 }
 0x246   : > { %v7563_v8 = vpop.permute.xlu1 %1053  ;;  %2540 = vmatprep.subr.bf16.mxu0 %v1707_v46  ;;  %v978_v51 = vrot.slane %v937_v25, %v6616_v47  ;;  %v11726_v7 = vunpack.i.l.bf16 %v7529_v54  ;;  %v11727_v44 = vunpack.i.h.bf16 %v7529_v54  ;;  %v1140_v3 = vadd.f32 %v1112_v49, %v1018_v43 }
 0x247   : > { %v7565_v60 = vpop.permute.xlu0 %5074  ;;  %v1059_v0 = vsel %vm1057_vm7, %v1052_v52, %v7563_v8  ;;  %v1147_v38 = vadd.f32 %v1119_v29, %v1025_v9  ;;  %v1154_v52 = vadd.f32 %v1126_v30, %v1032_v18  ;;  %v1161_v25 = vadd.f32 %v1133_v62, %v1039_v55 }
 0x248   : > { %11725 = vst [vmem:[#allocation189_spill] sm:$0xff] %v7565_v60  ;;  %v1693_v17 = vsel %vm569_vm2, %v11726_v7, %v5051_v13  ;;  %v1694_v56 = vsel %vm569_vm2, %v11727_v44, %v5052_v15  ;;  %v1100_v26 = vrot.slane %v1059_v0, %v6616_v47  ;;  %v991_v22 = vmul.f32 %v978_v51, %v11661_v4 }
 0x249   : > { %v1706_v61 = vpack.c.bf16 %v1694_v56, %v1693_v17  ;;  %v998_v13 = vmul.f32 %v978_v51, %v11662_v45  ;;  %v1005_v16 = vmul.f32 %v978_v51, %v11664_v19  ;;  %v1012_v48 = vmul.f32 %v978_v51, %v11724_v50 }
 0x24a   : > { %v7586_v15 = vpop.permute.xlu1 %5069  ;;  %v1113_v17 = vmul.f32 %v1100_v26, %v11667_v53  ;;  %v1120_v44 = vmul.f32 %v1100_v26, %v11668_v24  ;;  %v1127_v56 = vmul.f32 %v1100_v26, %v11669_v20  ;;  %v1134_v0 = vmul.f32 %v1100_v26, %v7040_v40 }
 0x24b   : > { %11728 = vst [vmem:[#allocation205_spill] sm:$0xff] %v7586_v15  ;;  %2541 = vmatpush1.bf16.msra.mxu0 %v1706_v61  ;;  %v7588_v7 = vpop.permute.xlu0 %1175  ;;  %v1019_v46 = vadd.f32 %v991_v22, %v897_v42  ;;  %v1026_v21 = vadd.f32 %v998_v13, %v904_v23  ;;  %v11141_v51 = vunpack.i.h.bf16 %v7586_v15  ;;  %v11138_v43 = vunpack.i.l.bf16 %v7586_v15  ;;  %v11731_v23 = vld [vmem:[#allocation191_spill] sm:$0xff] }
 0x24c   : > { %v1033_v9 = vadd.f32 %v1005_v16, %v911_v14  ;;  %v1040_v49 = vadd.f32 %v1012_v48, %v918_v63  ;;  %v11729_v30 = vunpack.i.l.bf16 %v7565_v60  ;;  %v11730_v18 = vunpack.i.h.bf16 %v7565_v60 }
 0x24d   : > { %v1799_v61 = vsel %vm691_vm3, %v5066_v35, %v11138_v43  ;;  %v1800_v26 = vsel %vm691_vm3, %v5067_v11, %v11141_v51  ;;  %v1141_v22 = vadd.f32 %v1113_v17, %v1019_v46  ;;  %v1148_v13 = vadd.f32 %v1120_v44, %v1026_v21 }
 0x24e   : > { %v1174_v29 = vpop.permute.xlu1 %1173  ;;  %v1803_v62 = vsel %vm691_vm3, %v11729_v30, %v5066_v35  ;;  %v1804_v55 = vsel %vm691_vm3, %v11730_v18, %v5067_v11  ;;  %v1155_v30 = vadd.f32 %v1127_v56, %v1033_v9  ;;  %v1812_v18 = vpack.c.bf16 %v1800_v26, %v1799_v61 }
 0x24f   : > { %v1181_v42 = vsel %vm1179_vm6, %v1174_v29, %v7588_v7  ;;  %v1182_v14 = vsel %vm1179_vm6, %v11731_v23, %v1174_v29  ;;  %v7610_v63 = vpop.permute.xlu0 %5084  ;;  %v1162_v29 = vadd.f32 %v1134_v0, %v1040_v49  ;;  %v1811_v23 = vpack.c.bf16 %v1804_v55, %v1803_v62 }
 0x250   : > { %11732 = vst [vmem:[#allocation191_spill] sm:$0xff] %v7610_v63  ;;  %v1218_v16 = vrot.slane %v1182_v14, %v6616_v47  ;;  %v1222_v48 = vrot.slane %v1181_v42, %v6616_v47  ;;  %2542 = vmatprep.subr.bf16.mxu0 %v1812_v18  ;;  %v11737_v18 = vld [vmem:[#allocation151_spill] sm:$0xff] }
 0x251   : > { %2543 = vmatpush1.bf16.msra.mxu0 %v1811_v23 }
 0x252   : > { %v1234_v54 = vmul.f32 %v1218_v16, %v6963_v12  ;;  %v1235_v60 = vmul.f32 %v1222_v48, %v6963_v12  ;;  %v1241_v35 = vmul.f32 %v1218_v16, %v11663_v31  ;;  %v1242_v43 = vmul.f32 %v1222_v48, %v11663_v31  ;;  %v5080_v15 = vpop.permute.xlu1 %5079  ;;  %v11768_v31 = vld [vmem:[#allocation20_spill] sm:$0xff]  ;;  %v11769_v12 = vld [vmem:[#allocation18_spill] sm:$0xff] }
 0x253   : > { %v1248_v11 = vmul.f32 %v1218_v16, %v7092_v27  ;;  %v1249_v46 = vmul.f32 %v1222_v48, %v7092_v27  ;;  %v1255_v21 = vmul.f32 %v1218_v16, %v6979_v28  ;;  %v1256_v17 = vmul.f32 %v1222_v48, %v6979_v28  ;;  %v7630_v44 = vpop.permute.xlu0 %5094 }
 0x254   : > { %v1262_v56 = vadd.f32 %v1234_v54, %v1140_v3  ;;  %v1263_v0 = vadd.f32 %v1235_v60, %v1141_v22  ;;  %v1269_v9 = vadd.f32 %v1241_v35, %v1147_v38  ;;  %v1270_v49 = vadd.f32 %v1242_v43, %v1148_v13  ;;  %v11734_v38 = vld [vmem:[#allocation179_spill] sm:$0xff] }
 0x255   : > { %v1276_v62 = vadd.f32 %v1248_v11, %v1154_v52  ;;  %v1277_v55 = vadd.f32 %v1249_v46, %v1155_v30  ;;  %v1283_v42 = vadd.f32 %v1255_v21, %v1161_v25  ;;  %v1284_v14 = vadd.f32 %v1256_v17, %v1162_v29  ;;  %v11736_v29 = vld [vmem:[#allocation155_spill] sm:$0xff] }
 0x256   : > { %v7633_v61 = vadd.f32 %v7105_v6, %v1262_v56  ;;  %v7636_v26 = vadd.f32 %v7105_v6, %v1263_v0  ;;  %v7639_v16 = vadd.f32 %v7118_v58, %v1269_v9  ;;  %v7642_v48 = vadd.f32 %v7118_v58, %v1270_v49  ;;  %v7644_v54 = vpop.permute.xlu1 %5089 }
 0x257   : > { %11733 = vst [vmem:[#allocation206_spill] sm:$0xff] %v7644_v54  ;;  %v7647_v60 = vadd.f32 %v7126_v2, %v1276_v62  ;;  %v7650_v3 = vadd.f32 %v7126_v2, %v1277_v55  ;;  %v7653_v52 = vadd.f32 %v11734_v38, %v1283_v42  ;;  %v7656_v25 = vadd.f32 %v11734_v38, %v1284_v14  ;;  %v7658_v43 = vpop.permute.xlu0 %5104 }
 0x258   : > { %11735 = vst [vmem:[#allocation207_spill] sm:$0xff] %v7658_v43  ;;  %v11145_v22 = vmax.f32 %v7633_v61, 0.0  ;;  %v11143_v13 = vunpack.i.h.bf16 %v7610_v63  ;;  %v11142_v30 = vunpack.i.l.bf16 %v7610_v63  ;;  %v7665_v23 = vmul.f32 %v11737_v18, %v11736_v29 }
 0x259   : > { %v11146_v35 = vmax.f32 %v7636_v26, 0.0  ;;  %v11144_v11 = vmax.f32 %v7639_v16, 0.0  ;;  %v5082_v0 = vunpack.i.h.bf16 %v5080_v15  ;;  %v5081_v9 = vunpack.i.l.bf16 %v5080_v15 }
 0x25a   : > { %v7673_v49 = vpop.permute.xlu1 %5099  ;;  %v5097_v55 = vunpack.i.h.bf16 %v7630_v44  ;;  %v11741_v56 = vunpack.i.l.bf16 %v7644_v54 }
 0x25b   : > { %11738 = vst [vmem:[#allocation155_spill] sm:$0xff] %v7673_v49  ;;  %v7679_v51 = vpop.permute.xlu0 %5114  ;;  %v1801_v17 = vsel %vm691_vm3, %v5081_v9, %v11142_v30  ;;  %v1802_v15 = vsel %vm691_vm3, %v5082_v0, %v11143_v13  ;;  %v7697_v46 = vpack.i.bf16 %v11144_v11, %v11145_v22  ;;  %v5096_v30 = vunpack.i.l.bf16 %v7630_v44 }
 0x25c   : > { %11739 = vst [vmem:[#allocation151_spill] sm:$0xff] %v7679_v51  ;;  %v1819_v14 = vpack.c.bf16 %v1802_v15, %v1801_v17  ;;  %v11740_v13 = vmax.f32 %v7642_v48, 0.0  ;;  %v1805_v21 = vsel %vm691_vm3, %v11741_v56, %v5081_v9  ;;  %v11742_v17 = vunpack.i.h.bf16 %v7644_v54 }
 0x25d   : > { %5214 = vrot.lane.b32.xlu0 %v7697_v46, %s5851_s28  ;;  %v11748_v9 = vunpack.i.l.bf16 %v7658_v43 }
 0x25e   : > { %v7704_v62 = vpack.i.bf16 %v11740_v13, %v11146_v35  ;;  %v1806_v15 = vsel %vm691_vm3, %v11742_v17, %v5082_v0  ;;  %v5110_v11 = vpop.permute.xlu1 %5109  ;;  %2544 = vmatprep.subr.bf16.mxu0 %v1819_v14  ;;  %v11743_v35 = vld [vmem:[#allocation153_spill] sm:$0xff]  ;;  %v11744_v0 = vunpack.i.l.bf16 %v7673_v49  ;;  %v11747_v17 = vmax.f32 %v7653_v52, 0.0 }
 0x25f   : > { %v1818_v44 = vpack.c.bf16 %v1806_v15, %v1805_v21  ;;  %v5112_v22 = vunpack.i.h.bf16 %v5110_v11  ;;  %v5111_v42 = vunpack.i.l.bf16 %v5110_v11  ;;  %v5125_v13 = vpop.permute.xlu0 %5124  ;;  %v7718_v63 = vmul.f32 %v11743_v35, %v11736_v29 }
 0x260   : > { %5219 = vrot.lane.b32.xlu1 %v7704_v62, %s5851_s28  ;;  %v1911_v14 = vsel %vm813_vm4, %v5096_v30, %v11744_v0  ;;  %v11745_v21 = vunpack.i.h.bf16 %v7673_v49  ;;  %v11746_v29 = vmax.f32 %v7647_v60, 0.0  ;;  %v1915_v54 = vsel %vm813_vm4, %v11748_v9, %v5096_v30 }
 0x261   : > { %2545 = vmatpush1.bf16.msra.mxu0 %v1818_v44  ;;  %v11749_v0 = vunpack.i.h.bf16 %v7658_v43  ;;  %v11751_v44 = vmax.f32 %v7656_v25, 0.0  ;;  %v11754_v30 = vunpack.i.h.bf16 %v7679_v51  ;;  %v5127_v43 = vunpack.i.h.bf16 %v5125_v13 }
 0x262   : > { %v1912_v11 = vsel %vm813_vm4, %v5097_v55, %v11745_v21  ;;  %v7736_v15 = vpack.i.bf16 %v11747_v17, %v11746_v29  ;;  %v11750_v21 = vmax.f32 %v7650_v3, 0.0  ;;  %v7752_v2 = vpop.permute.xlu1 %5119  ;;  %v11755_v29 = vld [vmem:[#allocation157_spill] sm:$0xff] }
 0x263   : > { %v1924_v56 = vpack.c.bf16 %v1912_v11, %v1911_v14  ;;  %v1916_v49 = vsel %vm813_vm4, %v11749_v0, %v5097_v55  ;;  %11752 = vst [vmem:[#allocation153_spill] sm:$0xff] %v7752_v2  ;;  %v11753_v14 = vunpack.i.l.bf16 %v7679_v51  ;;  %v1914_v9 = vsel %vm813_vm4, %v5112_v22, %v11754_v30  ;;  %v11758_v30 = vld [vmem:[#allocation158_spill] sm:$0xff] }
 0x264   : > { %v7750_v38 = vpack.i.bf16 %v11751_v44, %v11750_v21  ;;  %v7764_v55 = vmul.f32 %v11737_v18, %v11755_v29  ;;  %5224 = vrot.lane.b32.xlu0 %v7736_v15, %s5851_s28  ;;  %v1923_v17 = vpack.c.bf16 %v1916_v49, %v1915_v54  ;;  %v11162_v0 = vunpack.i.h.bf16 %v7752_v2  ;;  %v7770_v44 = vpop.permute.xlu0 %5134 }
 0x265   : > { %v1913_v11 = vsel %vm813_vm4, %v5111_v42, %v11753_v14  ;;  %2546 = vmatprep.subr.bf16.mxu0 %v1924_v56  ;;  %v11163_v21 = vunpack.i.l.bf16 %v7752_v2  ;;  %11756 = vst [vmem:[#allocation157_spill] sm:$0xff] %v7770_v44  ;;  %v11166_v51 = vunpack.i.l.bf16 %v7770_v44  ;;  %v7778_v58 = vmul.f32 %v11743_v35, %v11755_v29 }
 0x266   : > { %v1931_v14 = vpack.c.bf16 %v1914_v9, %v1913_v11  ;;  %5229 = vrot.lane.b32.xlu1 %v7750_v38, %s5851_s28  ;;  %v5126_v54 = vunpack.i.l.bf16 %v5125_v13  ;;  %2547 = vmatpush1.bf16.msra.mxu0 %v1923_v17  ;;  %v1918_v56 = vsel %vm813_vm4, %v11162_v0, %v5112_v22  ;;  %v7788_v11 = vpop.permute.xlu1 %5129  ;;  %v7792_v29 = vmul.f32 %v11737_v18, %v11758_v30  ;;  %v11763_v17 = vld [vmem:[#allocation10_spill] sm:$0xff] }
 0x267   : > { %v1917_v49 = vsel %vm813_vm4, %v11163_v21, %v5111_v42  ;;  %11757 = vst [vmem:[#allocation208_spill] sm:$0xff] %v7788_v11  ;;  %v7796_v13 = vmul.f32 %v11743_v35, %v11758_v30  ;;  %v11762_v42 = vld [vmem:[#allocation12_spill] sm:$0xff] }
 0x268   : > { %2548 = vmatprep.subr.bf16.mxu0 %v1931_v14  ;;  %v1930_v9 = vpack.c.bf16 %v1918_v56, %v1917_v49  ;;  %5234 = vrot.lane.b32.xlu0 %v7697_v46, %s5852_s29  ;;  %v7802_v22 = vpop.permute.xlu0 %5144  ;;  %v2027_v14 = vsel %vm935_vm5, %v11166_v51, %v5126_v54  ;;  %v11760_v49 = vunpack.i.h.bf16 %v7770_v44  ;;  %v11761_v56 = vld [vmem:[#allocation160_spill] sm:$0xff]  ;;  %v7824_v2 = vcombine.low %v11763_v17, %v11762_v42  ;;  %v11765_v44 = vld [vmem:[#allocation14_spill] sm:$0xff] }
 0x269   : > { %11759 = vst [vmem:[#allocation158_spill] sm:$0xff] %v7802_v22  ;;  %v7816_v0 = vmul.f32 %v11737_v18, %v11761_v56  ;;  %v7820_v21 = vmul.f32 %v11743_v35, %v11761_v56  ;;  %v11764_v51 = vld [vmem:[#allocation16_spill] sm:$0xff]  ;;  %v11767_v18 = vunpack.i.h.bf16 %v7788_v11 }
 0x26a   : > { %v2028_v30 = vsel %vm935_vm5, %v11760_v49, %v5127_v43  ;;  %5239 = vrot.lane.b32.xlu1 %v7704_v62, %s5852_s29  ;;  %v7828_v6 = vcombine.high %v11765_v44, %v11764_v51  ;;  %2549 = vmatpush1.bf16.msra.mxu0 %v1930_v9  ;;  %v11766_v49 = vunpack.i.l.bf16 %v7788_v11  ;;  %v7840_v56 = vcombine.low %v11765_v44, %v11764_v51  ;;  %v5140_v42 = vpop.permute.xlu1 %5139 }
 0x26b   : > { %v2024_v35 = vsel %vm935_vm5, %v5127_v43, %v11767_v18  ;;  %v2035_v27 = vpack.c.bf16 %v2028_v30, %v2027_v14  ;;  %v7844_v9 = vcombine.high %v11769_v12, %v11768_v31  ;;  %v5141_v43 = vunpack.i.l.bf16 %v5140_v42  ;;  %v11770_v14 = vld [vmem:[#allocation24_spill] sm:$0xff]  ;;  %v11771_v30 = vld [vmem:[#allocation22_spill] sm:$0xff] }
 0x26c   : > { %v2023_v28 = vsel %vm935_vm5, %v5126_v54, %v11766_v49  ;;  %v11185_v54 = vunpack.i.l.bf16 %v7802_v22  ;;  %5244 = vrot.lane.b32.xlu0 %v7736_v15, %s5852_s29  ;;  %v5142_v49 = vunpack.i.h.bf16 %v5140_v42  ;;  %v5155_v18 = vpop.permute.xlu0 %5154  ;;  %v11772_v42 = vunpack.i.h.bf16 %v7802_v22 }
 0x26d   : > { %v2036_v17 = vpack.c.bf16 %v2024_v35, %v2023_v28  ;;  %v7854_v28 = vcombine.low %v11769_v12, %v11768_v31  ;;  %v7858_v35 = vcombine.high %v11771_v30, %v11770_v14  ;;  %v5156_v51 = vunpack.i.l.bf16 %v5155_v18 }
 0x26e   : > { %5249 = vrot.lane.b32.xlu1 %v7750_v38, %s5852_s29  ;;  %v2025_v50 = vsel %vm935_vm5, %v5141_v43, %v11185_v54  ;;  %v2026_v44 = vsel %vm935_vm5, %v5142_v49, %v11772_v42  ;;  %v7868_v11 = vpop.permute.xlu1 %5149  ;;  %v11774_v31 = vmax.f32 %v7633_v61, 0.0  ;;  %v11775_v30 = vmax.f32 %v7639_v16, 0.0 }
 0x26f   : > { %2550 = vmatprep.subr.bf16.mxu0 %v2036_v17  ;;  %v5157_v17 = vunpack.i.h.bf16 %v5155_v18  ;;  %11773 = vst [vmem:[#allocation160_spill] sm:$0xff] %v7868_v11  ;;  %v2043_v12 = vpack.c.bf16 %v2026_v44, %v2025_v50  ;;  %v11188_v54 = vunpack.i.h.bf16 %v7868_v11  ;;  %v11189_v22 = vunpack.i.l.bf16 %v7868_v11 }
 0x270   : > { %2551 = vmatpush1.bf16.msra.mxu0 %v2035_v27  ;;  %v7874_v27 = vpack.c.bf16 %v11775_v30, %v11774_v31  ;;  %5254 = vrot.lane.b32.xlu0 %v7697_v46, %s5854_s30  ;;  %v7880_v14 = vpop.permute.xlu0 %5164  ;;  %v11777_v18 = vmax.f32 %v7647_v60, 0.0  ;;  %v11778_v42 = vmax.f32 %v7653_v52, 0.0  ;;  %v11779_v52 = vmax.f32 %v7636_v26, 0.0 }
 0x271   : > { %11776 = vst [vmem:[#allocation209_spill] sm:$0xff] %v7880_v14  ;;  %2552 = vmatprep.subr.bf16.mxu0 %v2043_v12  ;;  %v2029_v16 = vsel %vm935_vm5, %v11189_v22, %v5141_v43  ;;  %v2030_v60 = vsel %vm935_vm5, %v11188_v54, %v5142_v49  ;;  %v11780_v44 = vmax.f32 %v7642_v48, 0.0  ;;  %v11783_v12 = vmax.f32 %v7650_v3, 0.0 }
 0x272   : > { %v7886_v50 = vpack.c.bf16 %v11778_v42, %v11777_v18  ;;  %5259 = vrot.lane.b32.xlu1 %v7704_v62, %s5854_s30  ;;  %v7906_v18 = vpop.permute.xlu1 %5159  ;;  %v2042_v42 = vpack.c.bf16 %v2030_v60, %v2029_v16  ;;  %v11784_v31 = vmax.f32 %v7656_v25, 0.0  ;;  %v11787_v48 = vunpack.i.l.bf16 %v7880_v14 }
 0x273   : > { %v7904_v30 = vpack.c.bf16 %v11780_v44, %v11779_v52  ;;  %11782 = vst [vmem:[#allocation211_spill] sm:$0xff] %v7906_v18  ;;  %v11191_v49 = vunpack.i.h.bf16 %v7906_v18  ;;  %v11190_v26 = vunpack.i.l.bf16 %v7906_v18  ;;  %v11788_v3 = vunpack.i.h.bf16 %v7880_v14 }
 0x274   : > { %v7912_v61 = vpack.c.bf16 %v11784_v31, %v11783_v12  ;;  %5264 = vrot.lane.b32.xlu0 %v7736_v15, %s5854_s30  ;;  %v7918_v43 = vpop.permute.xlu0 %5174  ;;  %v2139_v16 = vsel %vm1057_vm7, %v11787_v48, %v5156_v51  ;;  %2553 = vmatpush1.bf16.msra.mxu0 %v2042_v42 }
 0x275   : > { %11781 = vst [vmem:[#allocation210_spill] sm:$0xff] %v7904_v30  ;;  %11786 = vst [vmem:[#allocation213_spill] sm:$0xff] %v7918_v43  ;;  %v2140_v25 = vsel %vm1057_vm7, %v11788_v3, %v5157_v17  ;;  %v2135_v31 = vsel %vm1057_vm7, %v5156_v51, %v11190_v26  ;;  %v2136_v60 = vsel %vm1057_vm7, %v5157_v17, %v11191_v49  ;;  %v11198_v48 = vunpack.i.h.bf16 %v7918_v43  ;;  %v11789_v17 = vld [vmem:[#allocation202_spill] sm:$0xff] }
 0x276   : > { %11785 = vst [vmem:[#allocation212_spill] sm:$0xff] %v7912_v61  ;;  %5269 = vrot.lane.b32.xlu1 %v7750_v38, %s5854_s30  ;;  %v7938_v52 = vpop.permute.xlu1 %5169  ;;  %v2148_v44 = vpack.c.bf16 %v2136_v60, %v2135_v31  ;;  %v2147_v12 = vpack.c.bf16 %v2140_v25, %v2139_v16  ;;  %v11194_v3 = vunpack.i.l.bf16 %v7918_v43  ;;  %v11790_v16 = vld [vmem:[#allocation162_spill] sm:$0xff] }
 0x277   : > { %v11199_v42 = vunpack.i.h.bf16 %v7938_v52  ;;  %v11195_v51 = vunpack.i.l.bf16 %v7938_v52 }
 0x278   : > { %5274 = vrot.lane.b32.xlu0 %v7697_v46, %s5856_s7  ;;  %v322_v54 = vpop.permute.xlu0 %321  ;;  %2554 = vmatprep.subr.bf16.mxu0 %v2148_v44 }
 0x279   : > { %v326_v31 = vsel %vm325_vm0, %v11789_v17, %v322_v54  ;;  %v332_v25 = vsel %vm325_vm0, %v322_v54, %v11790_v16  ;;  %2555 = vmatpush1.bf16.msra.mxu0 %v2147_v12  ;;  %v2137_v26 = vsel %vm1057_vm7, %v11195_v51, %v11194_v3  ;;  %v2138_v54 = vsel %vm1057_vm7, %v11199_v42, %v11198_v48  ;;  %v11793_v51 = vld [vmem:[#allocation163_spill] sm:$0xff]  ;;  %v11794_v42 = vld [vmem:[#allocation161_spill] sm:$0xff] }
 0x27a   : > { %5279 = vrot.lane.b32.xlu1 %v7704_v62, %s5856_s7  ;;  %v372_v60 = vrot.slane %v326_v31, %v6616_v47  ;;  %v376_v22 = vrot.slane %v332_v25, %v6616_v47  ;;  %v7968_v44 = vpop.permute.xlu1 %5179  ;;  %v2155_v17 = vpack.c.bf16 %v2138_v54, %v2137_v26  ;;  %v11791_v31 = vld [vmem:[#allocation154_spill] sm:$0xff]  ;;  %v11792_v25 = vld [vmem:[#allocation156_spill] sm:$0xff] }
 0x27c   : > { %v382_v16 = vmul.f32 %v372_v60, %v11791_v31  ;;  %v383_v12 = vmul.f32 %v376_v22, %v11791_v31  ;;  %v389_v49 = vmul.f32 %v372_v60, %v11792_v25  ;;  %v390_v14 = vmul.f32 %v376_v22, %v11792_v25  ;;  %5284 = vrot.lane.b32.xlu0 %v7736_v15, %s5856_s7  ;;  %v7976_v3 = vpop.permute.xlu0 %5184 }
 0x27d   : > { %v396_v11 = vmul.f32 %v372_v60, %v11793_v51  ;;  %v397_v48 = vmul.f32 %v376_v22, %v11793_v51  ;;  %v403_v61 = vmul.f32 %v372_v60, %v11794_v42  ;;  %v404_v26 = vmul.f32 %v376_v22, %v11794_v42  ;;  %2556 = vmatprep.subr.bf16.mxu0 %v2155_v17 }
 0x27e   : > { %5289 = vrot.lane.b32.xlu1 %v7750_v38, %s5856_s7  ;;  %v410_v54 = vadd.f32 %v382_v16, %v7665_v23  ;;  %v411_v31 = vadd.f32 %v383_v12, %v7718_v63  ;;  %v417_v25 = vadd.f32 %v389_v49, %v7764_v55  ;;  %v418_v30 = vadd.f32 %v390_v14, %v7778_v58  ;;  %v446_v43 = vpop.permute.xlu1 %445  ;;  %v11795_v63 = vld [vmem:[#allocation167_spill] sm:$0xff] }
 0x27f   : > { %v424_v18 = vadd.f32 %v396_v11, %v7816_v0  ;;  %v425_v51 = vadd.f32 %v397_v48, %v7820_v21  ;;  %v431_v60 = vadd.f32 %v403_v61, %v7792_v29  ;;  %v432_v22 = vadd.f32 %v404_v26, %v7796_v13  ;;  %v11796_v0 = vld [vmem:[#allocation172_spill] sm:$0xff] }
 0x280   : > { %5294 = vrot.lane.b32.xlu0 %v7697_v46, %s5858_s8  ;;  %v568_v42 = vpop.permute.xlu0 %567  ;;  %v448_v58 = vsel %vm447_vm1, %v7418_v39, %v446_v43  ;;  %v454_v23 = vsel %vm447_vm1, %v446_v43, %v11795_v63  ;;  %v11204_v11 = vunpack.i.h.bf16 %v7968_v44  ;;  %v11205_v29 = vunpack.i.l.bf16 %v7968_v44 }
 0x281   : > { %v570_v55 = vsel %vm569_vm2, %v7443_v10, %v568_v42  ;;  %v576_v21 = vsel %vm569_vm2, %v568_v42, %v11796_v0  ;;  %v494_v13 = vrot.slane %v448_v58, %v6616_v47  ;;  %v498_v39 = vrot.slane %v454_v23, %v6616_v47 }
 0x282   : > { %5299 = vrot.lane.b32.xlu1 %v7704_v62, %s5858_s8  ;;  %v616_v49 = vrot.slane %v570_v55, %v6616_v47  ;;  %v620_v10 = vrot.slane %v576_v21, %v6616_v47  ;;  %v8016_v43 = vpop.permute.xlu1 %5189  ;;  %v11797_v0 = vunpack.i.l.bf16 %v7938_v52  ;;  %v11798_v21 = vunpack.i.h.bf16 %v7938_v52 }
 0x283   : > { %v504_v48 = vmul.f32 %v494_v13, %v6729_v41  ;;  %v505_v17 = vmul.f32 %v498_v39, %v6729_v41  ;;  %v511_v16 = vmul.f32 %v494_v13, %v6714_v57  ;;  %v512_v12 = vmul.f32 %v498_v39, %v6714_v57 }
 0x284   : > { %5304 = vrot.lane.b32.xlu0 %v7736_v15, %s5858_s8  ;;  %v690_v26 = vpop.permute.xlu0 %689  ;;  %v518_v42 = vmul.f32 %v494_v13, %v6746_v37  ;;  %v519_v58 = vmul.f32 %v498_v39, %v6746_v37  ;;  %v525_v63 = vmul.f32 %v494_v13, %v6762_v33  ;;  %v526_v23 = vmul.f32 %v498_v39, %v6762_v33 }
 0x285   : > { %v532_v41 = vadd.f32 %v504_v48, %v410_v54  ;;  %v533_v55 = vadd.f32 %v505_v17, %v411_v31  ;;  %v2141_v57 = vsel %vm1057_vm7, %v11205_v29, %v11797_v0  ;;  %v2142_v37 = vsel %vm1057_vm7, %v11204_v11, %v11798_v21 }
 0x286   : > { %5309 = vrot.lane.b32.xlu1 %v7750_v38, %s5858_s8  ;;  %v539_v33 = vadd.f32 %v511_v16, %v417_v25  ;;  %v540_v13 = vadd.f32 %v512_v12, %v418_v30  ;;  %v546_v39 = vadd.f32 %v518_v42, %v424_v18  ;;  %v547_v14 = vadd.f32 %v519_v58, %v425_v51  ;;  %v8042_v54 = vpop.permute.xlu1 %5194 }
 0x287   : > { %v553_v31 = vadd.f32 %v525_v63, %v431_v60  ;;  %v554_v48 = vadd.f32 %v526_v23, %v432_v22  ;;  %v626_v17 = vmul.f32 %v616_v49, %v6742_v36  ;;  %v627_v61 = vmul.f32 %v620_v10, %v6742_v36 }
 0x288   : > { %5314 = vrot.lane.b32.xlu0 %v7697_v46, %s5860_s9  ;;  %v8048_v52 = vpop.permute.xlu0 %5204  ;;  %v633_v0 = vmul.f32 %v616_v49, %v6748_v34  ;;  %v634_v25 = vmul.f32 %v620_v10, %v6748_v34  ;;  %v640_v30 = vmul.f32 %v616_v49, %v6759_v32  ;;  %v641_v18 = vmul.f32 %v620_v10, %v6759_v32  ;;  %v11799_v32 = vld [vmem:[#allocation169_spill] sm:$0xff] }
 0x289   : > { %v647_v51 = vmul.f32 %v616_v49, %v6781_v1  ;;  %v648_v36 = vmul.f32 %v620_v10, %v6781_v1  ;;  %v654_v60 = vadd.f32 %v626_v17, %v532_v41  ;;  %v655_v22 = vadd.f32 %v627_v61, %v533_v55  ;;  %v11801_v10 = vld [vmem:[#allocation180_spill] sm:$0xff] }
 0x28a   : > { %5319 = vrot.lane.b32.xlu1 %v7704_v62, %s5860_s9  ;;  %v661_v16 = vadd.f32 %v633_v0, %v539_v33  ;;  %v662_v12 = vadd.f32 %v634_v25, %v540_v13  ;;  %v668_v42 = vadd.f32 %v640_v30, %v546_v39  ;;  %v669_v58 = vadd.f32 %v641_v18, %v547_v14  ;;  %v8058_v63 = vpop.permute.xlu1 %5199  ;;  %v11802_v13 = vld [vmem:[#allocation166_spill] sm:$0xff]  ;;  %v11804_v17 = vld [vmem:[#allocation168_spill] sm:$0xff] }
 0x28b   : > { %v675_v34 = vadd.f32 %v647_v51, %v553_v31  ;;  %v2154_v23 = vpack.c.bf16 %v2142_v37, %v2141_v57  ;;  %v11206_v21 = vunpack.i.l.bf16 %v8016_v43  ;;  %v692_v11 = vsel %vm691_vm3, %v11799_v32, %v690_v26  ;;  %v11803_v31 = vld [vmem:[#allocation165_spill] sm:$0xff]  ;;  %v11805_v0 = vld [vmem:[#allocation176_spill] sm:$0xff] }
 0x28c   : > { %5324 = vrot.lane.b32.xlu0 %v7736_v15, %s5860_s9  ;;  %v8066_v1 = vpop.permute.xlu0 %5209  ;;  %v676_v61 = vadd.f32 %v648_v36, %v554_v48  ;;  %v11211_v49 = vunpack.i.h.bf16 %v8016_v43  ;;  %v698_v14 = vsel %vm691_vm3, %v690_v26, %v11801_v10  ;;  %v738_v41 = vrot.slane %v692_v11, %v6616_v47 }
 0x28d   : > { %11800 = vst [vmem:[#allocation202_spill] sm:$0xff] %v8066_v1  ;;  %2557 = vmatpush1.bf16.msra.mxu0 %v2154_v23  ;;  %v742_v55 = vrot.slane %v698_v14, %v6616_v47  ;;  %v11209_v57 = vunpack.i.h.bf16 %v8042_v54  ;;  %v11210_v37 = vunpack.i.l.bf16 %v8042_v54  ;;  %v11806_v51 = vunpack.i.l.bf16 %v7976_v3 }
 0x28e   : > { %5329 = vrot.lane.b32.xlu1 %v7750_v38, %s5860_s9  ;;  %v748_v39 = vmul.f32 %v738_v41, %v11802_v13  ;;  %v755_v48 = vmul.f32 %v738_v41, %v11803_v31  ;;  %v762_v26 = vmul.f32 %v738_v41, %v11804_v17  ;;  %v769_v11 = vmul.f32 %v738_v41, %v11805_v0  ;;  %v812_v23 = vpop.permute.xlu1 %811 }
 0x28f   : > { %v749_v25 = vmul.f32 %v742_v55, %v11802_v13  ;;  %v756_v30 = vmul.f32 %v742_v55, %v11803_v31  ;;  %v763_v18 = vmul.f32 %v742_v55, %v11804_v17  ;;  %v2247_v36 = vsel %vm1179_vm6, %v11806_v51, %v11206_v21 }
 0x290   : > { %5334 = vrot.lane.b32.xlu0 %v7697_v46, %s5862_s10  ;;  %v770_v32 = vmul.f32 %v742_v55, %v11805_v0  ;;  %v776_v10 = vadd.f32 %v748_v39, %v654_v60  ;;  %v783_v14 = vadd.f32 %v755_v48, %v661_v16  ;;  %v790_v41 = vadd.f32 %v762_v26, %v668_v42  ;;  %v1056_v33 = vpop.permute.xlu0 %1055  ;;  %v11810_v0 = vld [vmem:[#allocation187_spill] sm:$0xff] }
 0x291   : > { %2559 = vmatmul.mubr.bf16.vlgmr.msra.gmra.mrb[0].mxu0 %v7824_v2  ;;  %v777_v13 = vadd.f32 %v749_v25, %v655_v22  ;;  %v784_v31 = vadd.f32 %v756_v30, %v662_v12  ;;  %v791_v17 = vadd.f32 %v763_v18, %v669_v58  ;;  %v797_v29 = vadd.f32 %v769_v11, %v675_v34 }
 0x292   : > { %2568 = vmatprep.mubr.bf16.mxu0 %v7828_v6  ;;  %v2251_v21 = vsel %vm1179_vm6, %v11210_v37, %v11806_v51  ;;  %v11807_v60 = vunpack.i.h.bf16 %v7976_v3  ;;  %v5202_v42 = vunpack.i.h.bf16 %v8058_v63  ;;  %5339 = vrot.lane.b32.xlu1 %v7704_v62, %s5862_s10  ;;  %v5201_v34 = vunpack.i.l.bf16 %v8058_v63  ;;  %v11809_v3 = vld [vmem:[#allocation175_spill] sm:$0xff] }
 0x293   : > { %v11207_v55 = vunpack.i.h.bf16 %v8066_v1  ;;  %v11208_v39 = vunpack.i.l.bf16 %v8066_v1  ;;  %v814_v26 = vsel %vm813_vm4, %v11809_v3, %v812_v23  ;;  %v820_v11 = vsel %vm813_vm4, %v812_v23, %v11810_v0 }
 0x294   : > { %v2252_v22 = vsel %vm1179_vm6, %v11209_v57, %v11807_v60  ;;  %v11808_v16 = vmov %v11807_v60  ;;  %5344 = vrot.lane.b32.xlu0 %v7736_v15, %s5862_s10  ;;  %v1058_v63 = vsel %vm1057_vm7, %v7563_v8, %v1056_v33  ;;  %v798_v25 = vadd.f32 %v770_v32, %v676_v61  ;;  %v11811_v8 = vld [vmem:[#allocation177_spill] sm:$0xff]  ;;  %v11812_v60 = vld [vmem:[#allocation171_spill] sm:$0xff] }
 0x295   : > { %v2248_v12 = vsel %vm1179_vm6, %v11808_v16, %v11211_v49  ;;  %v2259_v48 = vpack.c.bf16 %v2252_v22, %v2251_v21  ;;  %v2254_v30 = vsel %vm1179_vm6, %v11207_v55, %v5202_v42  ;;  %v860_v21 = vrot.slane %v814_v26, %v6616_v47 }
 0x296   : > { %v2260_v58 = vpack.c.bf16 %v2248_v12, %v2247_v36  ;;  %v864_v18 = vrot.slane %v820_v11, %v6616_v47  ;;  %v934_v36 = vpop.permute.xlu1 %933  ;;  %v11222_v51 = vunpack.i.l.bf16 %v8048_v52  ;;  %v2253_v23 = vsel %vm1179_vm6, %v11208_v39, %v5201_v34  ;;  %5349 = vrot.lane.b32.xlu1 %v7750_v38, %s5862_s10  ;;  %v11813_v12 = vld [vmem:[#allocation170_spill] sm:$0xff] }
 0x297   : > { %v1064_v61 = vsel %vm1057_vm7, %v1056_v33, %v11811_v8  ;;  %v1104_v32 = vrot.slane %v1058_v63, %v6616_v47  ;;  %v870_v22 = vmul.f32 %v860_v21, %v11812_v60  ;;  %v11815_v33 = vld [vmem:[#allocation184_spill] sm:$0xff] }
 0x298   : > { %2599 = vmatprep.subr.bf16.mxu0 %v2260_v58  ;;  %v871_v16 = vmul.f32 %v864_v18, %v11812_v60  ;;  %v877_v58 = vmul.f32 %v860_v21, %v11813_v12  ;;  %v878_v3 = vmul.f32 %v864_v18, %v11813_v12  ;;  %v891_v11 = vmul.f32 %v860_v21, %v11815_v33 }
 0x299   : > { %2600 = vmatpush1.bf16.msra.mxu0 %v2259_v48  ;;  %v11814_v48 = vld [vmem:[#allocation173_spill] sm:$0xff]  ;;  %v892_v63 = vmul.f32 %v864_v18, %v11815_v33  ;;  %v898_v8 = vadd.f32 %v870_v22, %v776_v10  ;;  %v2249_v60 = vsel %vm1179_vm6, %v5201_v34, %v11222_v51  ;;  %v1121_v10 = vmul.f32 %v1104_v32, %v11668_v24 }
 0x29a   : > { %2569 = vmatmul.mubr.bf16.gmra.mrb[4].mxu0 %v7840_v56  ;;  %v884_v26 = vmul.f32 %v860_v21, %v11814_v48  ;;  %v885_v0 = vmul.f32 %v864_v18, %v11814_v48  ;;  %v899_v55 = vadd.f32 %v871_v16, %v777_v13  ;;  %v905_v39 = vadd.f32 %v877_v58, %v783_v14  ;;  %v1178_v13 = vpop.permute.xlu1 %1177  ;;  %v11817_v16 = vld [vmem:[#allocation194_spill] sm:$0xff] }
 0x29b   : > { %2578 = vmatprep.mubr.bf16.mxu0 %v7844_v9  ;;  %v906_v12 = vadd.f32 %v878_v3, %v784_v31  ;;  %v919_v49 = vadd.f32 %v891_v11, %v797_v29  ;;  %v920_v1 = vadd.f32 %v892_v63, %v798_v25  ;;  %v1108_v48 = vrot.slane %v1064_v61, %v6616_v47  ;;  %v11818_v3 = vld [vmem:[#allocation195_spill] sm:$0xff] }
 0x29c   : > { %v912_v57 = vadd.f32 %v884_v26, %v790_v41  ;;  %v913_v37 = vadd.f32 %v885_v0, %v791_v17  ;;  %v1114_v21 = vmul.f32 %v1104_v32, %v11667_v53  ;;  %v1128_v14 = vmul.f32 %v1104_v32, %v11669_v20  ;;  %v11819_v26 = vld [vmem:[#allocation190_spill] sm:$0xff] }
 0x29d   : > { %v1135_v18 = vmul.f32 %v1104_v32, %v7040_v40  ;;  %v11816_v34 = vunpack.i.h.bf16 %v8048_v52  ;;  %v936_v29 = vsel %vm935_vm5, %v7548_v59, %v934_v36  ;;  %v1115_v41 = vmul.f32 %v1108_v48, %v11667_v53 }
 0x29e   : > { %v1122_v17 = vmul.f32 %v1108_v48, %v11668_v24  ;;  %v1129_v25 = vmul.f32 %v1108_v48, %v11669_v20  ;;  %v2266_v61 = vpack.c.bf16 %v2254_v30, %v2253_v23  ;;  %v942_v32 = vsel %vm935_vm5, %v934_v36, %v11817_v16 }
 0x29f   : > { %v2250_v31 = vsel %vm1179_vm6, %v5202_v42, %v11816_v34  ;;  %v982_v58 = vrot.slane %v936_v29, %v6616_v47  ;;  %v1180_v42 = vsel %vm1179_vm6, %v7588_v7, %v1178_v13  ;;  %v1136_v59 = vmul.f32 %v1108_v48, %v7040_v40 }
 0x2a0   : > { %v2267_v22 = vpack.c.bf16 %v2250_v31, %v2249_v60  ;;  %v986_v53 = vrot.slane %v942_v32, %v6616_v47  ;;  %v1186_v24 = vsel %vm1179_vm6, %v1178_v13, %v11818_v3  ;;  %v1226_v20 = vrot.slane %v1180_v42, %v6616_v47 }
 0x2a1   : > { %v992_v30 = vmul.f32 %v982_v58, %v11661_v4  ;;  %v999_v36 = vmul.f32 %v982_v58, %v11662_v45  ;;  %v1006_v23 = vmul.f32 %v982_v58, %v11664_v19  ;;  %v1013_v0 = vmul.f32 %v982_v58, %v11819_v26  ;;  %v11823_v58 = vld [vmem:[#allocation193_spill] sm:$0xff] }
 0x2a2   : > { %2601 = vmatprep.subr.bf16.mxu0 %v2267_v22  ;;  %v993_v40 = vmul.f32 %v986_v53, %v11661_v4  ;;  %v1000_v7 = vmul.f32 %v986_v53, %v11662_v45  ;;  %v1007_v33 = vmul.f32 %v986_v53, %v11664_v19  ;;  %v1014_v11 = vmul.f32 %v986_v53, %v11819_v26 }
 0x2a3   : > { %2602 = vmatpush1.bf16.msra.mxu0 %v2266_v61  ;;  %v1020_v63 = vadd.f32 %v992_v30, %v898_v8  ;;  %v1027_v60 = vadd.f32 %v999_v36, %v905_v39  ;;  %v1034_v48 = vadd.f32 %v1006_v23, %v912_v57  ;;  %v1041_v13 = vadd.f32 %v1013_v0, %v919_v49  ;;  %v11820_v57 = vld [vmem:[#allocation192_spill] sm:$0xff]  ;;  %v11826_v23 = vld [vmem:[#allocation174_spill] sm:$0xff]  ;;  %v11827_v0 = vld [vmem:[#allocation183_spill] sm:$0xff] }
 0x2a4   : > { %2672 = vmatprep.subr.bf16.mxu0 %v7874_v27  ;;  %v1021_v34 = vadd.f32 %v993_v40, %v899_v55  ;;  %v1028_v31 = vadd.f32 %v1000_v7, %v906_v12  ;;  %v1035_v29 = vadd.f32 %v1007_v33, %v913_v37  ;;  %v1042_v22 = vadd.f32 %v1014_v11, %v920_v1  ;;  %v11821_v55 = vld [vmem:[#allocation188_spill] sm:$0xff]  ;;  %v11822_v37 = vld [vmem:[#allocation178_spill] sm:$0xff]  ;;  %v11829_v11 = vld [vmem:[#allocation179_spill] sm:$0xff] }
 0x2a5   : > { %2579 = vmatmul.mubr.bf16.gmra.mrb[8].mxu0 %v7854_v28  ;;  %v1142_v61 = vadd.f32 %v1114_v21, %v1020_v63  ;;  %v1149_v4 = vadd.f32 %v1121_v10, %v1027_v60  ;;  %v1156_v16 = vadd.f32 %v1128_v14, %v1034_v48  ;;  %v1163_v45 = vadd.f32 %v1135_v18, %v1041_v13  ;;  %v11824_v21 = vld [vmem:[#allocation24_spill] sm:$0xff]  ;;  %v11825_v10 = vld [vmem:[#allocation22_spill] sm:$0xff] }
 0x2a6   : > { %2588 = vmatprep.mubr.bf16.mxu0 %v7858_v35  ;;  %v1143_v19 = vadd.f32 %v1115_v41, %v1021_v34  ;;  %v1150_v32 = vadd.f32 %v1122_v17, %v1028_v31  ;;  %v1157_v8 = vadd.f32 %v1129_v25, %v1035_v29  ;;  %v1164_v39 = vadd.f32 %v1136_v59, %v1042_v22  ;;  %v11828_v7 = vld [vmem:[#allocation186_spill] sm:$0xff] }
 0x2a7   : > { %v1230_v49 = vrot.slane %v1186_v24, %v6616_v47  ;;  %v1236_v27 = vmul.f32 %v1226_v20, %v11820_v57  ;;  %v1243_v12 = vmul.f32 %v1226_v20, %v11821_v55  ;;  %v1250_v1 = vmul.f32 %v1226_v20, %v11822_v37 }
 0x2a8   : > { %v1257_v42 = vmul.f32 %v1226_v20, %v11823_v58  ;;  %v8209_v14 = vcombine.low %v11825_v10, %v11824_v21  ;;  %v11830_v31 = vmov 0  }
 0x2a9   : > { %v1237_v18 = vmul.f32 %v1230_v49, %v11820_v57  ;;  %v1244_v41 = vmul.f32 %v1230_v49, %v11821_v55  ;;  %v1251_v17 = vmul.f32 %v1230_v49, %v11822_v37  ;;  %v1258_v47 = vmul.f32 %v1230_v49, %v11823_v58  ;;  %v11835_v58 = vld [vmem:[#allocation15_spill] sm:$0xff] }
 0x2aa   : > { %v1264_v25 = vadd.f32 %v1236_v27, %v1142_v61  ;;  %v1271_v59 = vadd.f32 %v1243_v12, %v1149_v4  ;;  %v1278_v53 = vadd.f32 %v1250_v1, %v1156_v16  ;;  %v1285_v3 = vadd.f32 %v1257_v42, %v1163_v45  ;;  %v11833_v12 = vld [vmem:[#allocation181_spill] sm:$0xff] }
 0x2ab   : > { %v1265_v24 = vadd.f32 %v1237_v18, %v1143_v19  ;;  %v1272_v30 = vadd.f32 %v1244_v41, %v1150_v32  ;;  %v1279_v36 = vadd.f32 %v1251_v17, %v1157_v8  ;;  %v1286_v20 = vadd.f32 %v1258_v47, %v1164_v39  ;;  %v11831_v19 = vld [vmem:[#allocation13_spill] sm:$0xff]  ;;  %v11832_v32 = vld [vmem:[#allocation11_spill] sm:$0xff] }
 0x2ac   : > { %v1312_v26 = vadd.f32 %v11826_v23, %v1264_v25  ;;  %v1319_v40 = vadd.f32 %v11827_v0, %v1271_v59  ;;  %v1326_v33 = vadd.f32 %v11828_v7, %v1278_v53  ;;  %v1333_v63 = vadd.f32 %v11829_v11, %v1285_v3  ;;  %v11834_v1 = vld [vmem:[#allocation17_spill] sm:$0xff]  ;;  %v11838_v47 = vld [vmem:[#allocation19_spill] sm:$0xff] }
 0x2ad   : > { %2589 = vmatmul.mubr.bf16.gmra.mrb[12].mxu0 %v8209_v14  ;;  %v1313_v60 = vadd.f32 %v11826_v23, %v1265_v24  ;;  %v1320_v48 = vadd.f32 %v11827_v0, %v1272_v30  ;;  %v1327_v13 = vadd.f32 %v11828_v7, %v1279_v36  ;;  %v1334_v34 = vadd.f32 %v11829_v11, %v1286_v20  ;;  %v11836_v18 = vld [vmem:[#allocation185_spill] sm:$0xff]  ;;  %v11840_v53 = vld [vmem:[#allocation23_spill] sm:$0xff]  ;;  %v11841_v24 = vld [vmem:[#allocation198_spill] sm:$0xff] }
 0x2ae   : > { %2631 = vmatprep.mubr.bf16.mxu0 %v11830_v31  ;;  %v1340_v29 = vmax.f32 %v1312_v26, 0.0  ;;  %v1347_v22 = vmax.f32 %v1319_v40, 0.0  ;;  %v1354_v16 = vmax.f32 %v1326_v33, 0.0  ;;  %v1361_v45 = vmax.f32 %v1333_v63, 0.0  ;;  %v11839_v59 = vld [vmem:[#allocation25_spill] sm:$0xff]  ;;  %v11842_v26 = vld [vmem:[#allocation196_spill] sm:$0xff] }
 0x2af   : > { %v1341_v61 = vmax.f32 %v1313_v60, 0.0  ;;  %v1348_v4 = vmax.f32 %v1320_v48, 0.0  ;;  %v8227_v8 = vcombine.low %v11832_v32, %v11831_v19  ;;  %v1355_v49 = vmax.f32 %v1327_v13, 0.0 }
 0x2b0   : > { %v8229_v39 = vpack.i.bf16 %v1347_v22, %v1340_v29  ;;  %v1362_v57 = vmax.f32 %v1334_v34, 0.0  ;;  %v8239_v55 = vpack.i.bf16 %v1361_v45, %v1354_v16  ;;  %v8252_v42 = vcombine.low %v11835_v58, %v11834_v1 }
 0x2b1   : > { %v8231_v27 = vpack.i.bf16 %v1348_v4, %v1341_v61  ;;  %v8254_v21 = vpack.c.bf16 %v1347_v22, %v1340_v29  ;;  %v8256_v10 = vpack.c.bf16 %v1361_v45, %v1354_v16  ;;  %v8259_v41 = vpack.c.bf16 %v1348_v4, %v1341_v61  ;;  %v11845_v61 = vld [vmem:[#allocation197_spill] sm:$0xff] }
 0x2b2   : > { %5354 = vrot.lane.b32.xlu0 %v8229_v39, %s5851_s28  ;;  %v8242_v37 = vpack.i.bf16 %v1362_v57, %v1355_v49  ;;  %v8261_v17 = vpack.c.bf16 %v1362_v57, %v1355_v49  ;;  %v8291_v3 = vcombine.low %v11840_v53, %v11839_v59  ;;  %v11844_v0 = vunpack.i.l.bf16 %v11842_v26  ;;  %v11848_v53 = vld [vmem:[#allocation201_spill] sm:$0xff] }
 0x2b3   : > { %5359 = vrot.lane.b32.xlu1 %v8231_v27, %s5851_s28  ;;  %v11846_v4 = vunpack.i.l.bf16 %v11845_v61  ;;  %v11847_v45 = vunpack.i.h.bf16 %v11845_v61 }
 0x2b5   : > { %4568 = vmatmul.mubr.msk.bf16.vlgmr.msra.gmra.mrb[0].mxu0 %vm2513_vm8, %v8227_v8 }
 0x2b6   : > { %2673 = vmatpush1.bf16.msra.mxu0 %v11833_v12  ;;  %2641 = vmatprep.mubr.bf16.mxu0 %v11830_v31 }
 0x2b7   : > { %2674 = vmatprep.subr.bf16.mxu0 %v7886_v50  ;;  %5364 = vrot.lane.b32.xlu0 %v8239_v55, %s5851_s28  ;;  %v11837_v50 = vld [vmem:[#allocation21_spill] sm:$0xff] }
 0x2b8   : > { %5369 = vrot.lane.b32.xlu1 %v8242_v37, %s5851_s28  ;;  %v8276_v25 = vcombine.low %v11838_v47, %v11837_v50 }
 0x2ba   : > { %2675 = vmatpush1.bf16.msra.mxu0 %v11836_v18 }
 0x2bb   : > { %5374 = vrot.lane.b32.xlu0 %v8229_v39, %s5852_s29 }
 0x2bc   : > { %5379 = vrot.lane.b32.xlu1 %v8231_v27, %s5852_s29 }
 0x2bd   : > { %4569 = vmatmul.mubr.msk.bf16.gmra.mrb[4].mxu0 %vm2513_vm8, %v8252_v42 }
 0x2be   : > { %2651 = vmatprep.mubr.bf16.mxu0 %v11830_v31 }
 0x2bf   : > { %5384 = vrot.lane.b32.xlu0 %v8239_v55, %s5852_s29 }
 0x2c0   : > { %5389 = vrot.lane.b32.xlu1 %v8242_v37, %s5852_s29 }
 0x2c3   : > { %5394 = vrot.lane.b32.xlu0 %v8229_v39, %s5854_s30 }
 0x2c4   : > { %5399 = vrot.lane.b32.xlu1 %v8231_v27, %s5854_s30 }
 0x2c5   : > { %4570 = vmatmul.mubr.msk.bf16.gmra.mrb[8].mxu0 %vm2513_vm8, %v8276_v25 }
 0x2c6   : > { %2661 = vmatprep.mubr.bf16.mxu0 %v11830_v31 }
 0x2c7   : > { %5404 = vrot.lane.b32.xlu0 %v7697_v46, %s5864_s11 }
 0x2c8   : > { %5409 = vrot.lane.b32.xlu1 %v7704_v62, %s5864_s11 }
 0x2cb   : > { %5414 = vrot.lane.b32.xlu0 %v8239_v55, %s5854_s30 }
 0x2cc   : > { %5419 = vrot.lane.b32.xlu1 %v8242_v37, %s5854_s30 }
 0x2cd   : > { %4571 = vmatmul.mubr.msk.bf16.gmra.mrb[12].mxu0 %vm2513_vm8, %v8291_v3 }
 0x2ce   : > { %2704 = vmatprep.mubr.bf16.mxu0 %v11841_v24 }
 0x2cf   : > { %5424 = vrot.lane.b32.xlu0 %v7736_v15, %s5864_s11  ;;  %v5215_v46 = vpop.permute.xlu0 %5214  ;;  %v11843_v15 = vunpack.i.h.bf16 %v11842_v26 }
 0x2d0   : > { %5429 = vrot.lane.b32.xlu1 %v7750_v38, %s5864_s11  ;;  %v5217_v30 = vunpack.i.h.bf16 %v5215_v46  ;;  %v5216_v36 = vunpack.i.l.bf16 %v5215_v46  ;;  %v11849_v46 = vunpack.i.h.bf16 %v11848_v53 }
 0x2d2   : > { %v8308_v62 = vpop.permute.xlu1 %5219  ;;  %v1460_v38 = vsel %vm325_vm0, %v11843_v15, %v5217_v30  ;;  %v1459_v40 = vsel %vm325_vm0, %v11844_v0, %v5216_v36 }
 0x2d3   : > { %5434 = vrot.lane.b32.xlu0 %v8229_v39, %s5856_s7  ;;  %v5222_v20 = vunpack.i.h.bf16 %v8308_v62  ;;  %v5221_v23 = vunpack.i.l.bf16 %v8308_v62  ;;  %v1477_v63 = vpack.c.bf16 %v1460_v38, %v1459_v40 }
 0x2d4   : > { %5439 = vrot.lane.b32.xlu1 %v8231_v27, %s5856_s7 }
 0x2d5   : > { %v1455_v33 = vsel %vm325_vm0, %v5216_v36, %v5221_v23  ;;  %v1456_v11 = vsel %vm325_vm0, %v5217_v30, %v5222_v20  ;;  %v11850_v36 = vunpack.i.l.bf16 %v11848_v53 }
 0x2d6   : > { %v5225_v7 = vpop.permute.xlu0 %5224  ;;  %v1478_v34 = vpack.c.bf16 %v1456_v11, %v1455_v33 }
 0x2d7   : > { %5444 = vrot.lane.b32.xlu0 %v8239_v55, %s5856_s7  ;;  %v5227_v48 = vunpack.i.h.bf16 %v5225_v7  ;;  %v5226_v13 = vunpack.i.l.bf16 %v5225_v7 }
 0x2d8   : > { %5449 = vrot.lane.b32.xlu1 %v8242_v37, %s5856_s7  ;;  %v8332_v60 = vpop.permute.xlu1 %5229  ;;  %2676 = vmatprep.subr.bf16.mxu0 %v1478_v34  ;;  %v11851_v34 = vld [vmem:[#allocation203_spill] sm:$0xff] }
 0x2d9   : > { %v5232_v29 = vunpack.i.h.bf16 %v8332_v60  ;;  %v5231_v22 = vunpack.i.l.bf16 %v8332_v60  ;;  %v1461_v16 = vsel %vm325_vm0, %v11846_v4, %v5226_v13  ;;  %v1462_v19 = vsel %vm325_vm0, %v11847_v45, %v5227_v48  ;;  %2677 = vmatpush1.bf16.msra.mxu0 %v1477_v63 }
 0x2da   : > { %v5235_v32 = vpop.permute.xlu0 %5234  ;;  %v1484_v12 = vpack.c.bf16 %v1462_v19, %v1461_v16  ;;  %v11852_v61 = vunpack.i.l.bf16 %v11851_v34  ;;  %v11853_v16 = vunpack.i.h.bf16 %v11851_v34 }
 0x2db   : > { %5454 = vrot.lane.b32.xlu0 %v8229_v39, %s5858_s8  ;;  %v1457_v49 = vsel %vm325_vm0, %v5226_v13, %v5231_v22  ;;  %v1458_v57 = vsel %vm325_vm0, %v5227_v48, %v5232_v29  ;;  %v5237_v58 = vunpack.i.h.bf16 %v5235_v32  ;;  %v5236_v18 = vunpack.i.l.bf16 %v5235_v32 }
 0x2dc   : > { %5459 = vrot.lane.b32.xlu1 %v8231_v27, %s5858_s8  ;;  %v8356_v1 = vpop.permute.xlu1 %5239  ;;  %v1485_v50 = vpack.c.bf16 %v1458_v57, %v1457_v49 }
 0x2dd   : > { %v5242_v47 = vunpack.i.h.bf16 %v8356_v1  ;;  %v5241_v59 = vunpack.i.l.bf16 %v8356_v1  ;;  %v1572_v30 = vsel %vm447_vm1, %v11849_v46, %v5237_v58  ;;  %v1571_v26 = vsel %vm447_vm1, %v11850_v36, %v5236_v18 }
 0x2de   : > { %2678 = vmatprep.subr.bf16.mxu0 %v1485_v50  ;;  %v5245_v15 = vpop.permute.xlu0 %5244  ;;  %v1589_v40 = vpack.c.bf16 %v1572_v30, %v1571_v26  ;;  %v11854_v30 = vld [vmem:[#allocation164_spill] sm:$0xff] }
 0x2df   : > { %5464 = vrot.lane.b32.xlu0 %v8239_v55, %s5858_s8  ;;  %2679 = vmatpush1.bf16.msra.mxu0 %v1484_v12  ;;  %v1567_v38 = vsel %vm447_vm1, %v5236_v18, %v5241_v59  ;;  %v1568_v0 = vsel %vm447_vm1, %v5237_v58, %v5242_v47  ;;  %v5247_v33 = vunpack.i.h.bf16 %v5245_v15  ;;  %v5246_v11 = vunpack.i.l.bf16 %v5245_v15 }
 0x2e0   : > { %5469 = vrot.lane.b32.xlu1 %v8242_v37, %s5858_s8  ;;  %v8380_v7 = vpop.permute.xlu1 %5249  ;;  %v1590_v63 = vpack.c.bf16 %v1568_v0, %v1567_v38  ;;  %v11855_v36 = vunpack.i.h.bf16 %v11854_v30  ;;  %v11856_v15 = vunpack.i.l.bf16 %v11854_v30 }
 0x2e1   : > { %v5252_v48 = vunpack.i.h.bf16 %v8380_v7  ;;  %v5251_v13 = vunpack.i.l.bf16 %v8380_v7  ;;  %v1573_v4 = vsel %vm447_vm1, %v11852_v61, %v5246_v11  ;;  %v1574_v45 = vsel %vm447_vm1, %v11853_v16, %v5247_v33 }
 0x2e2   : > { %2680 = vmatprep.subr.bf16.mxu0 %v1590_v63  ;;  %v5255_v19 = vpop.permute.xlu0 %5254  ;;  %v1596_v57 = vpack.c.bf16 %v1574_v45, %v1573_v4 }
 0x2e3   : > { %5474 = vrot.lane.b32.xlu0 %v8229_v39, %s5860_s9  ;;  %2681 = vmatpush1.bf16.msra.mxu0 %v1589_v40  ;;  %v1569_v32 = vsel %vm447_vm1, %v5246_v11, %v5251_v13  ;;  %v1570_v49 = vsel %vm447_vm1, %v5247_v33, %v5252_v48  ;;  %v5257_v58 = vunpack.i.h.bf16 %v5255_v19  ;;  %v5256_v18 = vunpack.i.l.bf16 %v5255_v19  ;;  %v11857_v19 = vld [vmem:[#allocation204_spill] sm:$0xff] }
 0x2e4   : > { %5479 = vrot.lane.b32.xlu1 %v8231_v27, %s5860_s9  ;;  %v8404_v12 = vpop.permute.xlu1 %5259  ;;  %v1597_v50 = vpack.c.bf16 %v1570_v49, %v1569_v32  ;;  %v11858_v32 = vunpack.i.l.bf16 %v11857_v19 }
 0x2e5   : > { %v5262_v53 = vunpack.i.h.bf16 %v8404_v12  ;;  %v5261_v46 = vunpack.i.l.bf16 %v8404_v12  ;;  %v1684_v26 = vsel %vm569_vm2, %v11855_v36, %v5257_v58  ;;  %v1683_v38 = vsel %vm569_vm2, %v11856_v15, %v5256_v18 }
 0x2e6   : > { %2682 = vmatprep.subr.bf16.mxu0 %v1597_v50  ;;  %v5265_v0 = vpop.permute.xlu0 %5264  ;;  %v1701_v11 = vpack.c.bf16 %v1684_v26, %v1683_v38 }
 0x2e7   : > { %5484 = vrot.lane.b32.xlu0 %v8239_v55, %s5860_s9  ;;  %2683 = vmatpush1.bf16.msra.mxu0 %v1596_v57  ;;  %v1679_v40 = vsel %vm569_vm2, %v5256_v18, %v5261_v46  ;;  %v1680_v33 = vsel %vm569_vm2, %v5257_v58, %v5262_v53  ;;  %v5267_v34 = vunpack.i.h.bf16 %v5265_v0  ;;  %v5266_v61 = vunpack.i.l.bf16 %v5265_v0 }
 0x2e8   : > { %5489 = vrot.lane.b32.xlu1 %v8242_v37, %s5860_s9  ;;  %v8428_v63 = vpop.permute.xlu1 %5269  ;;  %v1702_v4 = vpack.c.bf16 %v1680_v33, %v1679_v40  ;;  %v11859_v57 = vunpack.i.h.bf16 %v11857_v19 }
 0x2e9   : > { %v5272_v16 = vunpack.i.h.bf16 %v8428_v63  ;;  %v11227_v45 = vunpack.i.l.bf16 %v8428_v63  ;;  %v1685_v49 = vsel %vm569_vm2, %v11858_v32, %v5266_v61 }
 0x2ea   : > { %v1686_v58 = vsel %vm569_vm2, %v11859_v57, %v5267_v34  ;;  %2684 = vmatprep.subr.bf16.mxu0 %v1702_v4  ;;  %v5275_v18 = vpop.permute.xlu0 %5274 }
 0x2eb   : > { %5494 = vrot.lane.b32.xlu0 %v8229_v39, %s5862_s10  ;;  %2685 = vmatpush1.bf16.msra.mxu0 %v1701_v11  ;;  %v1681_v50 = vsel %vm569_vm2, %v5266_v61, %v11227_v45  ;;  %v1682_v30 = vsel %vm569_vm2, %v5267_v34, %v5272_v16  ;;  %v1708_v36 = vpack.c.bf16 %v1686_v58, %v1685_v49  ;;  %v5277_v15 = vunpack.i.h.bf16 %v5275_v18  ;;  %v11860_v11 = vld [vmem:[#allocation205_spill] sm:$0xff] }
 0x2ec   : > { %5499 = vrot.lane.b32.xlu1 %v8231_v27, %s5862_s10  ;;  %v8452_v26 = vpop.permute.xlu1 %5279  ;;  %v5276_v38 = vunpack.i.l.bf16 %v5275_v18  ;;  %v1709_v0 = vpack.c.bf16 %v1682_v30, %v1681_v50  ;;  %v11861_v61 = vunpack.i.h.bf16 %v11860_v11  ;;  %v11862_v34 = vunpack.i.l.bf16 %v11860_v11 }
 0x2ed   : > { %v11219_v40 = vunpack.i.h.bf16 %v8452_v26  ;;  %v11214_v33 = vunpack.i.l.bf16 %v8452_v26 }
 0x2ee   : > { %v1796_v4 = vsel %vm691_vm3, %v11861_v61, %v5277_v15  ;;  %v1795_v19 = vsel %vm691_vm3, %v11862_v34, %v5276_v38  ;;  %2686 = vmatprep.subr.bf16.mxu0 %v1709_v0  ;;  %v5285_v32 = vpop.permute.xlu0 %5284  ;;  %v11863_v61 = vld [vmem:[#allocation191_spill] sm:$0xff] }
 0x2ef   : > { %5504 = vrot.lane.b32.xlu0 %v8239_v55, %s5862_s10  ;;  %2687 = vmatpush1.bf16.msra.mxu0 %v1708_v36  ;;  %v1791_v49 = vsel %vm691_vm3, %v5276_v38, %v11214_v33  ;;  %v1792_v57 = vsel %vm691_vm3, %v5277_v15, %v11219_v40  ;;  %v1813_v58 = vpack.c.bf16 %v1796_v4, %v1795_v19  ;;  %v5287_v50 = vunpack.i.h.bf16 %v5285_v32  ;;  %v11866_v33 = vld [vmem:[#allocation155_spill] sm:$0xff] }
 0x2f0   : > { %5509 = vrot.lane.b32.xlu1 %v8242_v37, %s5862_s10  ;;  %v8476_v18 = vpop.permute.xlu1 %5289  ;;  %v5286_v30 = vunpack.i.l.bf16 %v5285_v32  ;;  %v1814_v36 = vpack.c.bf16 %v1792_v57, %v1791_v49  ;;  %v11864_v38 = vunpack.i.l.bf16 %v11863_v61  ;;  %v11865_v15 = vunpack.i.h.bf16 %v11863_v61 }
 0x2f1   : > { %v11218_v0 = vunpack.i.h.bf16 %v8476_v18  ;;  %v11215_v11 = vunpack.i.l.bf16 %v8476_v18 }
 0x2f2   : > { %v1797_v34 = vsel %vm691_vm3, %v11864_v38, %v5286_v30  ;;  %v1798_v4 = vsel %vm691_vm3, %v11865_v15, %v5287_v50  ;;  %2688 = vmatprep.subr.bf16.mxu0 %v1814_v36  ;;  %v5295_v19 = vpop.permute.xlu0 %5294 }
 0x2f3   : > { %5514 = vrot.lane.b32.xlu0 %v8229_v39, %s5864_s11  ;;  %2689 = vmatpush1.bf16.msra.mxu0 %v1813_v58  ;;  %v1793_v32 = vsel %vm691_vm3, %v5286_v30, %v11215_v11  ;;  %v1794_v49 = vsel %vm691_vm3, %v5287_v50, %v11218_v0  ;;  %v1820_v57 = vpack.c.bf16 %v1798_v4, %v1797_v34  ;;  %v5297_v61 = vunpack.i.h.bf16 %v5295_v19  ;;  %v11874_v0 = vld [vmem:[#allocation208_spill] sm:$0xff] }
 0x2f4   : > { %5519 = vrot.lane.b32.xlu1 %v8231_v27, %s5864_s11  ;;  %v8500_v36 = vpop.permute.xlu1 %5299  ;;  %v5296_v39 = vunpack.i.l.bf16 %v5295_v19  ;;  %v1821_v58 = vpack.c.bf16 %v1794_v49, %v1793_v32  ;;  %v11867_v30 = vunpack.i.h.bf16 %v11866_v33  ;;  %v11868_v50 = vunpack.i.l.bf16 %v11866_v33 }
 0x2f5   : > { %v11217_v38 = vunpack.i.h.bf16 %v8500_v36  ;;  %v11216_v15 = vunpack.i.l.bf16 %v8500_v36  ;;  %v11875_v40 = vunpack.i.h.bf16 %v11874_v0 }
 0x2f6   : > { %v1908_v11 = vsel %vm813_vm4, %v11867_v30, %v5297_v61  ;;  %v1907_v34 = vsel %vm813_vm4, %v11868_v50, %v5296_v39  ;;  %2690 = vmatprep.subr.bf16.mxu0 %v1821_v58  ;;  %v5305_v27 = vpop.permute.xlu0 %5304  ;;  %v11869_v50 = vld [vmem:[#allocation151_spill] sm:$0xff] }
 0x2f7   : > { %5524 = vrot.lane.b32.xlu0 %v8239_v55, %s5864_s11  ;;  %2691 = vmatpush1.bf16.msra.mxu0 %v1820_v57  ;;  %v1903_v4 = vsel %vm813_vm4, %v5296_v39, %v11216_v15  ;;  %v1904_v19 = vsel %vm813_vm4, %v5297_v61, %v11217_v38  ;;  %v1925_v33 = vpack.c.bf16 %v1908_v11, %v1907_v34  ;;  %v5307_v49 = vunpack.i.h.bf16 %v5305_v27 }
 0x2f8   : > { %5529 = vrot.lane.b32.xlu1 %v8242_v37, %s5864_s11  ;;  %v8524_v32 = vpop.permute.xlu1 %5309  ;;  %v5306_v55 = vunpack.i.l.bf16 %v5305_v27  ;;  %v1926_v57 = vpack.c.bf16 %v1904_v19, %v1903_v4  ;;  %v11870_v39 = vunpack.i.l.bf16 %v11869_v50  ;;  %v11871_v61 = vunpack.i.h.bf16 %v11869_v50  ;;  %v11872_v37 = vld [vmem:[#allocation26_spill] sm:$0xff]  ;;  %v11873_v50 = vld [vmem:[#allocation27_spill] sm:$0xff] }
 0x2f9   : > { %v11221_v58 = vunpack.i.h.bf16 %v8524_v32  ;;  %v11220_v30 = vunpack.i.l.bf16 %v8524_v32 }
 0x2fa   : > { %v1909_v15 = vsel %vm813_vm4, %v11870_v39, %v5306_v55  ;;  %v1910_v11 = vsel %vm813_vm4, %v11871_v61, %v5307_v49  ;;  %2692 = vmatprep.subr.bf16.mxu0 %v1926_v57  ;;  %v5315_v34 = vpop.permute.xlu0 %5314 }
 0x2fb   : > { %2415 = vperm.xlu0 %4972, %v11872_v37   ;;  %2693 = vmatpush1.bf16.msra.mxu0 %v1925_v33  ;;  %v1905_v27 = vsel %vm813_vm4, %v5306_v55, %v11220_v30  ;;  %v1906_v4 = vsel %vm813_vm4, %v5307_v49, %v11221_v58  ;;  %v1932_v19 = vpack.c.bf16 %v1910_v11, %v1909_v15  ;;  %v5317_v57 = vunpack.i.h.bf16 %v5315_v34  ;;  %v11877_v49 = vld [vmem:[#allocation28_spill] sm:$0xff]  ;;  %v11879_v58 = vld [vmem:[#allocation158_spill] sm:$0xff] }
 0x2fc   : > { %2420 = vperm.xlu1 %4971, %v11873_v50   ;;  %v8546_v39 = vpop.permute.xlu1 %5319  ;;  %v5316_v61 = vunpack.i.l.bf16 %v5315_v34  ;;  %v1933_v37 = vpack.c.bf16 %v1906_v4, %v1905_v27  ;;  %v11876_v30 = vunpack.i.l.bf16 %v11874_v0  ;;  %v11878_v0 = vld [vmem:[#allocation29_spill] sm:$0xff]  ;;  %v11880_v51 = vunpack.i.l.bf16 %v11879_v58 }
 0x2fd   : > { %v11224_v33 = vunpack.i.h.bf16 %v8546_v39  ;;  %v11223_v38 = vunpack.i.l.bf16 %v8546_v39  ;;  %v2020_v55 = vsel %vm935_vm5, %v11875_v40, %v5317_v57 }
 0x2fe   : > { %v2019_v15 = vsel %vm935_vm5, %v11876_v30, %v5316_v61  ;;  %2694 = vmatprep.subr.bf16.mxu0 %v1933_v37  ;;  %v5325_v11 = vpop.permute.xlu0 %5324 }
 0x2ff   : > { %2425 = vperm.xlu0 %4972, %v11877_v49   ;;  %2695 = vmatpush1.bf16.msra.mxu0 %v1932_v19  ;;  %v2015_v34 = vsel %vm935_vm5, %v5316_v61, %v11223_v38  ;;  %v2016_v40 = vsel %vm935_vm5, %v5317_v57, %v11224_v33  ;;  %v2037_v27 = vpack.c.bf16 %v2020_v55, %v2019_v15  ;;  %v5327_v30 = vunpack.i.h.bf16 %v5325_v11  ;;  %v11882_v55 = vld [vmem:[#allocation30_spill] sm:$0xff] }
 0x300   : > { %2430 = vperm.xlu1 %4971, %v11878_v0   ;;  %v8568_v4 = vpop.permute.xlu1 %5329  ;;  %v5326_v50 = vunpack.i.l.bf16 %v5325_v11  ;;  %v2038_v37 = vpack.c.bf16 %v2016_v40, %v2015_v34  ;;  %v11881_v38 = vunpack.i.h.bf16 %v11879_v58  ;;  %v11883_v58 = vld [vmem:[#allocation31_spill] sm:$0xff] }
 0x301   : > { %v11226_v19 = vunpack.i.h.bf16 %v8568_v4  ;;  %v11225_v49 = vunpack.i.l.bf16 %v8568_v4 }
 0x302   : > { %v2021_v61 = vsel %vm935_vm5, %v11880_v51, %v5326_v50  ;;  %v2022_v57 = vsel %vm935_vm5, %v11881_v38, %v5327_v30  ;;  %2696 = vmatprep.subr.bf16.mxu0 %v2038_v37  ;;  %v5335_v15 = vpop.permute.xlu0 %5334 }
 0x303   : > { %2435 = vperm.xlu0 %4972, %v11882_v55   ;;  %2697 = vmatpush1.bf16.msra.mxu0 %v2037_v27  ;;  %v2017_v11 = vsel %vm935_vm5, %v5326_v50, %v11225_v49  ;;  %v2018_v51 = vsel %vm935_vm5, %v5327_v30, %v11226_v19  ;;  %v2044_v34 = vpack.c.bf16 %v2022_v57, %v2021_v61  ;;  %v5337_v40 = vunpack.i.h.bf16 %v5335_v15  ;;  %v11884_v27 = vld [vmem:[#allocation211_spill] sm:$0xff]  ;;  %v11887_v30 = vld [vmem:[#allocation32_spill] sm:$0xff] }
 0x304   : > { %2440 = vperm.xlu1 %4971, %v11883_v58   ;;  %v5336_v38 = vunpack.i.l.bf16 %v5335_v15  ;;  %v2045_v0 = vpack.c.bf16 %v2018_v51, %v2017_v11  ;;  %v8590_v37 = vpop.permute.xlu1 %5339  ;;  %v11885_v55 = vunpack.i.h.bf16 %v11884_v27  ;;  %v11886_v50 = vunpack.i.l.bf16 %v11884_v27  ;;  %v11888_v11 = vld [vmem:[#allocation33_spill] sm:$0xff] }
 0x305   : > { %v5342_v61 = vunpack.i.h.bf16 %v8590_v37  ;;  %v11228_v57 = vunpack.i.l.bf16 %v8590_v37 }
 0x306   : > { %v2132_v33 = vsel %vm1057_vm7, %v11885_v55, %v5337_v40  ;;  %v2131_v49 = vsel %vm1057_vm7, %v11886_v50, %v5336_v38  ;;  %2698 = vmatprep.subr.bf16.mxu0 %v2045_v0  ;;  %v5345_v15 = vpop.permute.xlu0 %5344 }
 0x307   : > { %2445 = vperm.xlu0 %4972, %v11887_v30   ;;  %2699 = vmatpush1.bf16.msra.mxu0 %v2044_v34  ;;  %v5347_v51 = vunpack.i.h.bf16 %v5345_v15  ;;  %v5346_v58 = vunpack.i.l.bf16 %v5345_v15  ;;  %v2127_v27 = vsel %vm1057_vm7, %v5336_v38, %v11228_v57  ;;  %v2128_v0 = vsel %vm1057_vm7, %v5337_v40, %v5342_v61  ;;  %v11889_v30 = vld [vmem:[#allocation213_spill] sm:$0xff] }
 0x308   : > { %2450 = vperm.xlu1 %4971, %v11888_v11   ;;  %v2149_v55 = vpack.c.bf16 %v2132_v33, %v2131_v49  ;;  %v8612_v50 = vpop.permute.xlu1 %5349  ;;  %v11890_v34 = vunpack.i.l.bf16 %v11889_v30  ;;  %v11891_v15 = vunpack.i.h.bf16 %v11889_v30  ;;  %v2150_v45 = vpack.c.bf16 %v2128_v0, %v2127_v27 }
 0x309   : > { %v11232_v38 = vunpack.i.h.bf16 %v8612_v50  ;;  %v11229_v57 = vunpack.i.l.bf16 %v8612_v50 }
 0x30a   : > { %v2133_v11 = vsel %vm1057_vm7, %v11890_v34, %v5346_v58  ;;  %v2134_v19 = vsel %vm1057_vm7, %v11891_v15, %v5347_v51  ;;  %2700 = vmatprep.subr.bf16.mxu0 %v2150_v45  ;;  %v11892_v45 = vld [vmem:[#allocation210_spill] sm:$0xff] }
 0x30b   : > { %2701 = vmatpush1.bf16.msra.mxu0 %v2149_v55  ;;  %v2129_v33 = vsel %vm1057_vm7, %v5346_v58, %v11229_v57  ;;  %v2130_v49 = vsel %vm1057_vm7, %v5347_v51, %v11232_v38  ;;  %v2156_v40 = vpack.c.bf16 %v2134_v19, %v2133_v11  ;;  %v11893_v58 = vld [vmem:[#allocation212_spill] sm:$0xff] }
 0x30c   : > { %v2157_v30 = vpack.c.bf16 %v2130_v49, %v2129_v33 }
 0x30e   : > { %2702 = vmatprep.subr.bf16.mxu0 %v2157_v30 }
 0x30f   : > { %2703 = vmatpush1.bf16.msra.mxu0 %v2156_v40 }
 0x310   : > { %2818 = vmatprep.subr.bf16.mxu0 %v8254_v21 }
 0x312   : > { %2705 = vmatmul.mubr.bf16.vlgmr.msra.gmra.mrb[16].mxu0 %v7824_v2 }
 0x313   : > { %2819 = vmatpush1.bf16.msra.mxu0 %v11892_v45  ;;  %2714 = vmatprep.mubr.bf16.mxu0 %v7828_v6 }
 0x314   : > { %2820 = vmatprep.subr.bf16.mxu0 %v8256_v10 }
 0x317   : > { %2821 = vmatpush1.bf16.msra.mxu0 %v11893_v58 }
 0x31a   : > { %2715 = vmatmul.mubr.bf16.gmra.mrb[20].mxu0 %v7840_v56 }
 0x31b   : > { %2724 = vmatprep.mubr.bf16.mxu0 %v7844_v9 }
 0x322   : > { %2725 = vmatmul.mubr.bf16.gmra.mrb[24].mxu0 %v7854_v28 }
 0x323   : > { %2734 = vmatprep.mubr.bf16.mxu0 %v7858_v35 }
 0x324   : > { %v5355_v19 = vpop.permute.xlu0 %5354 }
 0x325   : > { %v8642_v21 = vpop.permute.xlu1 %5359  ;;  %v5357_v51 = vunpack.i.h.bf16 %v5355_v19  ;;  %v5356_v27 = vunpack.i.l.bf16 %v5355_v19 }
 0x326   : > { %v5362_v0 = vunpack.i.h.bf16 %v8642_v21  ;;  %v5361_v55 = vunpack.i.l.bf16 %v8642_v21 }
 0x327   : > { %v1452_v10 = vsel %vm325_vm0, %v5222_v20, %v5357_v51  ;;  %v1451_v34 = vsel %vm325_vm0, %v5221_v23, %v5356_v27 }
 0x328   : > { %v1447_v15 = vsel %vm325_vm0, %v5356_v27, %v5361_v55  ;;  %v1448_v33 = vsel %vm325_vm0, %v5357_v51, %v5362_v0  ;;  %v1479_v62 = vpack.c.bf16 %v1452_v10, %v1451_v34 }
 0x329   : > { %v5365_v11 = vpop.permute.xlu0 %5364  ;;  %v1480_v30 = vpack.c.bf16 %v1448_v33, %v1447_v15 }
 0x32a   : > { %v8662_v49 = vpop.permute.xlu1 %5369  ;;  %v5367_v40 = vunpack.i.h.bf16 %v5365_v11  ;;  %v5366_v20 = vunpack.i.l.bf16 %v5365_v11  ;;  %2735 = vmatmul.mubr.bf16.gmra.mrb[28].mxu0 %v8209_v14 }
 0x32b   : > { %v5372_v45 = vunpack.i.h.bf16 %v8662_v49  ;;  %v5371_v23 = vunpack.i.l.bf16 %v8662_v49  ;;  %2822 = vmatprep.subr.bf16.mxu0 %v1480_v30  ;;  %2850 = vmatprep.mubr.bf16.mxu0 %v11841_v24 }
 0x32c   : > { %v1454_v58 = vsel %vm325_vm0, %v5232_v29, %v5367_v40  ;;  %v1453_v19 = vsel %vm325_vm0, %v5231_v22, %v5366_v20  ;;  %2823 = vmatpush1.bf16.msra.mxu0 %v1479_v62 }
 0x32d   : > { %v5375_v51 = vpop.permute.xlu0 %5374  ;;  %v1449_v27 = vsel %vm325_vm0, %v5366_v20, %v5371_v23  ;;  %v1486_v10 = vpack.c.bf16 %v1454_v58, %v1453_v19  ;;  %v1450_v60 = vsel %vm325_vm0, %v5367_v40, %v5372_v45 }
 0x32e   : > { %v8679_v34 = vpop.permute.xlu1 %5379  ;;  %v5377_v11 = vunpack.i.h.bf16 %v5375_v51  ;;  %v5376_v29 = vunpack.i.l.bf16 %v5375_v51  ;;  %v1487_v33 = vpack.c.bf16 %v1450_v60, %v1449_v27 }
 0x32f   : > { %v5382_v22 = vunpack.i.h.bf16 %v8679_v34  ;;  %v5381_v15 = vunpack.i.l.bf16 %v8679_v34 }
 0x330   : > { %v1564_v20 = vsel %vm447_vm1, %v5242_v47, %v5377_v11  ;;  %v1563_v30 = vsel %vm447_vm1, %v5241_v59, %v5376_v29  ;;  %2824 = vmatprep.subr.bf16.mxu0 %v1487_v33 }
 0x331   : > { %v5385_v62 = vpop.permute.xlu0 %5384  ;;  %v1559_v40 = vsel %vm447_vm1, %v5376_v29, %v5381_v15  ;;  %v1591_v58 = vpack.c.bf16 %v1564_v20, %v1563_v30  ;;  %2825 = vmatpush1.bf16.msra.mxu0 %v1486_v10  ;;  %v1560_v1 = vsel %vm447_vm1, %v5377_v11, %v5382_v22 }
 0x332   : > { %v8700_v19 = vpop.permute.xlu1 %5389  ;;  %v5387_v51 = vunpack.i.h.bf16 %v5385_v62  ;;  %v5386_v27 = vunpack.i.l.bf16 %v5385_v62  ;;  %v1592_v60 = vpack.c.bf16 %v1560_v1, %v1559_v40 }
 0x333   : > { %v5392_v47 = vunpack.i.h.bf16 %v8700_v19  ;;  %v5391_v59 = vunpack.i.l.bf16 %v8700_v19 }
 0x334   : > { %v1566_v29 = vsel %vm447_vm1, %v5252_v48, %v5387_v51  ;;  %v1565_v10 = vsel %vm447_vm1, %v5251_v13, %v5386_v27  ;;  %2826 = vmatprep.subr.bf16.mxu0 %v1592_v60 }
 0x335   : > { %v5395_v33 = vpop.permute.xlu0 %5394  ;;  %v1561_v11 = vsel %vm447_vm1, %v5386_v27, %v5391_v59  ;;  %v1598_v20 = vpack.c.bf16 %v1566_v29, %v1565_v10  ;;  %2827 = vmatpush1.bf16.msra.mxu0 %v1591_v58  ;;  %v1562_v7 = vsel %vm447_vm1, %v5387_v51, %v5392_v47 }
 0x336   : > { %v8720_v30 = vpop.permute.xlu1 %5399  ;;  %v5397_v62 = vunpack.i.h.bf16 %v5395_v33  ;;  %v5396_v40 = vunpack.i.l.bf16 %v5395_v33  ;;  %v1599_v1 = vpack.c.bf16 %v1562_v7, %v1561_v11 }
 0x337   : > { %v5402_v48 = vunpack.i.h.bf16 %v8720_v30  ;;  %v5401_v13 = vunpack.i.l.bf16 %v8720_v30 }
 0x338   : > { %v1676_v27 = vsel %vm569_vm2, %v5262_v53, %v5397_v62  ;;  %v1675_v58 = vsel %vm569_vm2, %v5261_v46, %v5396_v40  ;;  %2828 = vmatprep.subr.bf16.mxu0 %v1599_v1  ;;  %v11894_v1 = vunpack.i.l.bf16 %v8016_v43 }
 0x339   : > { %v5405_v60 = vpop.permute.xlu0 %5404  ;;  %v1671_v51 = vsel %vm569_vm2, %v5396_v40, %v5401_v13  ;;  %v1703_v29 = vpack.c.bf16 %v1676_v27, %v1675_v58  ;;  %2829 = vmatpush1.bf16.msra.mxu0 %v1598_v20  ;;  %v1672_v12 = vsel %vm569_vm2, %v5397_v62, %v5402_v48  ;;  %v11895_v20 = vunpack.i.h.bf16 %v8016_v43 }
 0x33a   : > { %v8740_v10 = vpop.permute.xlu1 %5409  ;;  %v5407_v33 = vunpack.i.h.bf16 %v5405_v60  ;;  %v5406_v11 = vunpack.i.l.bf16 %v5405_v60  ;;  %v1704_v7 = vpack.c.bf16 %v1672_v12, %v1671_v51 }
 0x33b   : > { %v11231_v53 = vunpack.i.h.bf16 %v8740_v10  ;;  %v11230_v46 = vunpack.i.l.bf16 %v8740_v10 }
 0x33c   : > { %v2243_v40 = vsel %vm1179_vm6, %v11894_v1, %v5406_v11  ;;  %v2244_v27 = vsel %vm1179_vm6, %v11895_v20, %v5407_v33  ;;  %2830 = vmatprep.subr.bf16.mxu0 %v1704_v7 }
 0x33d   : > { %v5415_v58 = vpop.permute.xlu0 %5414  ;;  %v2239_v62 = vsel %vm1179_vm6, %v5406_v11, %v11230_v46  ;;  %v2240_v60 = vsel %vm1179_vm6, %v5407_v33, %v11231_v53  ;;  %v2261_v51 = vpack.c.bf16 %v2244_v27, %v2243_v40  ;;  %2831 = vmatpush1.bf16.msra.mxu0 %v1703_v29  ;;  %v11896_v46 = vunpack.i.l.bf16 %v8428_v63 }
 0x33e   : > { %v8764_v12 = vpop.permute.xlu1 %5419  ;;  %v5417_v43 = vunpack.i.h.bf16 %v5415_v58  ;;  %v5416_v1 = vunpack.i.l.bf16 %v5415_v58  ;;  %v2262_v57 = vpack.c.bf16 %v2240_v60, %v2239_v62 }
 0x33f   : > { %v11236_v7 = vunpack.i.h.bf16 %v8764_v12  ;;  %v11233_v20 = vunpack.i.l.bf16 %v8764_v12 }
 0x340   : > { %v1678_v11 = vsel %vm569_vm2, %v5272_v16, %v5417_v43  ;;  %v1677_v33 = vsel %vm569_vm2, %v11896_v46, %v5416_v1  ;;  %2745 = vmatprep.subr.bf16.mxu1 %v2262_v57 }
 0x341   : > { %2746 = vmatpush1.bf16.msra.mxu1 %v2261_v51  ;;  %v5425_v29 = vpop.permute.xlu0 %5424  ;;  %v1673_v40 = vsel %vm569_vm2, %v5416_v1, %v11233_v20  ;;  %v1710_v27 = vpack.c.bf16 %v1678_v11, %v1677_v33  ;;  %v1674_v63 = vsel %vm569_vm2, %v5417_v43, %v11236_v7  ;;  %v11897_v51 = vld [vmem:[#allocation152_spill] sm:$0xff]  ;;  %v11899_v11 = vunpack.i.l.bf16 %v8048_v52 }
 0x342   : > { %v8780_v58 = vpop.permute.xlu1 %5429  ;;  %v5427_v62 = vunpack.i.h.bf16 %v5425_v29  ;;  %v5426_v60 = vunpack.i.l.bf16 %v5425_v29  ;;  %v1711_v46 = vpack.c.bf16 %v1674_v63, %v1673_v40  ;;  %v11898_v53 = vunpack.i.l.bf16 %v11897_v51 }
 0x343   : > { %v11235_v16 = vunpack.i.h.bf16 %v8780_v58  ;;  %v11234_v57 = vunpack.i.l.bf16 %v8780_v58  ;;  %v11900_v43 = vunpack.i.h.bf16 %v8048_v52  ;;  %v11901_v40 = vunpack.i.h.bf16 %v11897_v51 }
 0x344   : > { %v8794_v1 = vsel %vm325_vm0, %v5361_v55, %v11898_v53  ;;  %v2245_v33 = vsel %vm1179_vm6, %v11899_v11, %v5426_v60  ;;  %2832 = vmatprep.subr.bf16.mxu0 %v1711_v46  ;;  %v11902_v46 = vunpack.i.h.bf16 %v8452_v26 }
 0x345   : > { %v2246_v29 = vsel %vm1179_vm6, %v11900_v43, %v5427_v62  ;;  %v8810_v63 = vsel %vm325_vm0, %v5362_v0, %v11901_v40  ;;  %v5435_v55 = vpop.permute.xlu0 %5434  ;;  %v2241_v53 = vsel %vm1179_vm6, %v5426_v60, %v11234_v57  ;;  %v2242_v52 = vsel %vm1179_vm6, %v5427_v62, %v11235_v16  ;;  %2833 = vmatpush1.bf16.msra.mxu0 %v1710_v27 }
 0x346   : > { %v2268_v11 = vpack.c.bf16 %v2246_v29, %v2245_v33  ;;  %v5440_v51 = vpop.permute.xlu1 %5439  ;;  %v5437_v21 = vunpack.i.h.bf16 %v5435_v55  ;;  %v5436_v43 = vunpack.i.l.bf16 %v5435_v55  ;;  %v2269_v38 = vpack.c.bf16 %v2242_v52, %v2241_v53  ;;  %v11904_v53 = vld [vmem:[#allocation189_spill] sm:$0xff] }
 0x347   : > { %v5442_v0 = vunpack.i.h.bf16 %v5440_v51  ;;  %v5441_v40 = vunpack.i.l.bf16 %v5440_v51  ;;  %v11903_v60 = vunpack.i.l.bf16 %v8452_v26  ;;  %v1481_v27 = vpack.c.bf16 %v8810_v63, %v8794_v1 }
 0x348   : > { %v1788_v20 = vsel %vm691_vm3, %v11902_v46, %v5437_v21  ;;  %2747 = vmatprep.subr.bf16.mxu1 %v2269_v38  ;;  %v11905_v52 = vunpack.i.l.bf16 %v11904_v53  ;;  %v11906_v16 = vunpack.i.h.bf16 %v11904_v53  ;;  %v11932_v63 = vunpack.i.l.bf16 %v8546_v39 }
 0x349   : > { %v1787_v57 = vsel %vm691_vm3, %v11903_v60, %v5436_v43  ;;  %2748 = vmatpush1.bf16.msra.mxu1 %v2268_v11  ;;  %v5445_v33 = vpop.permute.xlu0 %5444  ;;  %v1783_v29 = vsel %vm691_vm3, %v5436_v43, %v5441_v40  ;;  %v1784_v55 = vsel %vm691_vm3, %v5437_v21, %v5442_v0 }
 0x34a   : > { %v1815_v62 = vpack.c.bf16 %v1788_v20, %v1787_v57  ;;  %v1807_v26 = vsel %vm691_vm3, %v5441_v40, %v11905_v52  ;;  %v5450_v51 = vpop.permute.xlu1 %5449  ;;  %v5447_v46 = vunpack.i.h.bf16 %v5445_v33  ;;  %v5446_v38 = vunpack.i.l.bf16 %v5445_v33  ;;  %v11907_v57 = vld [vmem:[#allocation199_spill] sm:$0xff] }
 0x34b   : > { %v1816_v60 = vpack.c.bf16 %v1784_v55, %v1783_v29  ;;  %v1808_v20 = vsel %vm691_vm3, %v5442_v0, %v11906_v16  ;;  %v11908_v11 = vunpack.i.h.bf16 %v11907_v57  ;;  %v5452_v43 = vunpack.i.h.bf16 %v5450_v51 }
 0x34c   : > { %v5451_v7 = vunpack.i.l.bf16 %v5450_v51  ;;  %v1817_v40 = vpack.c.bf16 %v1808_v20, %v1807_v26  ;;  %v11909_v52 = vunpack.i.l.bf16 %v11907_v57  ;;  %v11910_v16 = vunpack.i.h.bf16 %v8476_v18  ;;  %4572 = vmatmul.mubr.msk.bf16.vlgmr.msra.gmra.mrb[0].mxu1 %vm2513_vm8, %v8227_v8  ;;  %v11912_v57 = vld [vmem:[#allocation206_spill] sm:$0xff] }
 0x34d   : > { %v8848_v21 = vsel %vm325_vm0, %v5372_v45, %v11908_v11  ;;  %v11911_v29 = vunpack.i.l.bf16 %v8476_v18  ;;  %2834 = vmatprep.subr.bf16.mxu0 %v1816_v60  ;;  %v5455_v49 = vpop.permute.xlu0 %5454  ;;  %v1786_v53 = vsel %vm691_vm3, %v5447_v46, %v5452_v43  ;;  %v11913_v11 = vunpack.i.l.bf16 %v11912_v57  ;;  %2787 = vmatprep.mubr.bf16.mxu1 %v11830_v31 }
 0x34e   : > { %v8856_v33 = vsel %vm325_vm0, %v5371_v23, %v11909_v52  ;;  %v1790_v0 = vsel %vm691_vm3, %v11910_v16, %v5447_v46  ;;  %4715 = vmatprep.subr.bf16.mxu1 %v1817_v40  ;;  %2835 = vmatpush1.bf16.msra.mxu0 %v1815_v62  ;;  %v1785_v23 = vsel %vm691_vm3, %v5446_v38, %v5451_v7  ;;  %v5460_v18 = vpop.permute.xlu1 %5459  ;;  %v5457_v26 = vunpack.i.h.bf16 %v5455_v49  ;;  %v11914_v62 = vld [vmem:[#allocation200_spill] sm:$0xff] }
 0x34f   : > { %v1789_v45 = vsel %vm691_vm3, %v11911_v29, %v5446_v38  ;;  %4716 = vmatpush3.bf16.msra.mxu1 %v8259_v41  ;;  %v5456_v51 = vunpack.i.l.bf16 %v5455_v49  ;;  %v1823_v20 = vpack.c.bf16 %v1786_v53, %v1785_v23  ;;  %v1809_v60 = vsel %vm691_vm3, %v5451_v7, %v11913_v11 }
 0x350   : > { %v1822_v55 = vpack.c.bf16 %v1790_v0, %v1789_v45  ;;  %v11915_v40 = vunpack.i.l.bf16 %v11914_v62  ;;  %v5462_v41 = vunpack.i.h.bf16 %v5460_v18  ;;  %v5461_v38 = vunpack.i.l.bf16 %v5460_v18  ;;  %v11920_v18 = vld [vmem:[#allocation207_spill] sm:$0xff] }
 0x351   : > { %v11916_v52 = vunpack.i.h.bf16 %v11912_v57  ;;  %v11917_v0 = vunpack.i.h.bf16 %v11914_v62  ;;  %v11918_v29 = vunpack.i.h.bf16 %v8500_v36  ;;  %v11919_v45 = vunpack.i.l.bf16 %v8500_v36  ;;  %2836 = vmatprep.subr.bf16.mxu0 %v1823_v20  ;;  %v5465_v53 = vpop.permute.xlu0 %5464 }
 0x352   : > { %v8884_v46 = vsel %vm447_vm1, %v5381_v15, %v11915_v40  ;;  %2837 = vmatpush1.bf16.msra.mxu0 %v1822_v55  ;;  %v1895_v34 = vsel %vm813_vm4, %v5456_v51, %v5461_v38  ;;  %v11921_v57 = vunpack.i.l.bf16 %v11920_v18  ;;  %v5470_v36 = vpop.permute.xlu1 %5469  ;;  %v5467_v62 = vunpack.i.h.bf16 %v5465_v53 }
 0x353   : > { %v1810_v16 = vsel %vm691_vm3, %v5452_v43, %v11916_v52  ;;  %v8896_v7 = vsel %vm447_vm1, %v5382_v22, %v11917_v0  ;;  %v1900_v15 = vsel %vm813_vm4, %v11918_v29, %v5457_v26  ;;  %v1899_v49 = vsel %vm813_vm4, %v11919_v45, %v5456_v51 }
 0x354   : > { %v1824_v43 = vpack.c.bf16 %v1810_v16, %v1809_v60  ;;  %v1927_v23 = vpack.c.bf16 %v1900_v15, %v1899_v49  ;;  %v1896_v22 = vsel %vm813_vm4, %v5457_v26, %v5462_v41  ;;  %v1919_v11 = vsel %vm813_vm4, %v5461_v38, %v11921_v57  ;;  %4573 = vmatmul.mubr.msk.bf16.gmra.mrb[4].mxu1 %vm2513_vm8, %v8252_v42 }
 0x355   : > { %v5466_v40 = vunpack.i.l.bf16 %v5465_v53  ;;  %v1928_v20 = vpack.c.bf16 %v1896_v22, %v1895_v34  ;;  %v11922_v60 = vunpack.i.h.bf16 %v11920_v18  ;;  %v1488_v51 = vpack.c.bf16 %v8848_v21, %v8856_v33  ;;  %v5475_v21 = vpop.permute.xlu0 %5474  ;;  %2797 = vmatprep.mubr.bf16.mxu1 %v11830_v31  ;;  %v11927_v22 = vld [vmem:[#allocation159_spill] sm:$0xff] }
 0x356   : > { %4717 = vmatprep.subr.bf16.mxu1 %v1824_v43  ;;  %v5472_v26 = vunpack.i.h.bf16 %v5470_v36  ;;  %v5471_v52 = vunpack.i.l.bf16 %v5470_v36  ;;  %v1593_v38 = vpack.c.bf16 %v8896_v7, %v8884_v46  ;;  %v11923_v0 = vunpack.i.h.bf16 %v8524_v32  ;;  %v5480_v7 = vpop.permute.xlu1 %5479  ;;  %v11925_v43 = vld [vmem:[#allocation153_spill] sm:$0xff] }
 0x357   : > { %v1920_v55 = vsel %vm813_vm4, %v5462_v41, %v11922_v60  ;;  %4718 = vmatpush3.bf16.msra.mxu1 %v8261_v17  ;;  %v11924_v15 = vunpack.i.l.bf16 %v8524_v32  ;;  %2838 = vmatprep.subr.bf16.mxu0 %v1928_v20  ;;  %v5477_v45 = vunpack.i.h.bf16 %v5475_v21  ;;  %v5476_v32 = vunpack.i.l.bf16 %v5475_v21 }
 0x358   : > { %v1929_v16 = vpack.c.bf16 %v1920_v55, %v1919_v11  ;;  %v1902_v29 = vsel %vm813_vm4, %v11923_v0, %v5467_v62  ;;  %2839 = vmatpush1.bf16.msra.mxu0 %v1927_v23  ;;  %v1897_v33 = vsel %vm813_vm4, %v5466_v40, %v5471_v52  ;;  %v1898_v46 = vsel %vm813_vm4, %v5467_v62, %v5472_v26 }
 0x359   : > { %v1901_v41 = vsel %vm813_vm4, %v11924_v15, %v5466_v40  ;;  %v1935_v49 = vpack.c.bf16 %v1898_v46, %v1897_v33  ;;  %v11926_v53 = vunpack.i.l.bf16 %v11925_v43  ;;  %v11928_v23 = vunpack.i.h.bf16 %v11927_v22  ;;  %v11936_v33 = vld [vmem:[#allocation150_spill] sm:$0xff] }
 0x35a   : > { %v1934_v17 = vpack.c.bf16 %v1902_v29, %v1901_v41  ;;  %4719 = vmatprep.subr.bf16.mxu1 %v1929_v16  ;;  %v5482_v57 = vunpack.i.h.bf16 %v5480_v7  ;;  %v5481_v11 = vunpack.i.l.bf16 %v5480_v7  ;;  %v11929_v36 = vunpack.i.h.bf16 %v11925_v43 }
 0x35b   : > { %v1921_v34 = vsel %vm813_vm4, %v5471_v52, %v11926_v53  ;;  %v8948_v18 = vsel %vm447_vm1, %v5392_v47, %v11928_v23  ;;  %4720 = vmatpush3.bf16.msra.mxu1 %v1481_v27  ;;  %v11930_v40 = vunpack.i.l.bf16 %v11927_v22  ;;  %v11931_v47 = vunpack.i.h.bf16 %v8546_v39  ;;  %2840 = vmatprep.subr.bf16.mxu0 %v1935_v49  ;;  %v11933_v52 = vld [vmem:[#allocation157_spill] sm:$0xff]  ;;  %v5490_v39 = vpop.permute.xlu1 %5489 }
 0x35c   : > { %v1922_v62 = vsel %vm813_vm4, %v5472_v26, %v11929_v36  ;;  %v2011_v27 = vsel %vm935_vm5, %v11932_v63, %v5476_v32  ;;  %2841 = vmatpush1.bf16.msra.mxu0 %v1934_v17  ;;  %v5485_v26 = vpop.permute.xlu0 %5484  ;;  %v2007_v19 = vsel %vm935_vm5, %v5476_v32, %v5481_v11  ;;  %v11934_v16 = vunpack.i.l.bf16 %v11933_v52  ;;  %4574 = vmatmul.mubr.msk.bf16.gmra.mrb[8].mxu1 %vm2513_vm8, %v8276_v25 }
 0x35d   : > { %v8963_v20 = vsel %vm447_vm1, %v5391_v59, %v11930_v40  ;;  %v2012_v1 = vsel %vm935_vm5, %v11931_v47, %v5477_v45  ;;  %v1936_v60 = vpack.c.bf16 %v1922_v62, %v1921_v34  ;;  %v2008_v59 = vsel %vm935_vm5, %v5477_v45, %v5482_v57  ;;  %v11941_v40 = vld [vmem:[#allocation160_spill] sm:$0xff]  ;;  %2807 = vmatprep.mubr.bf16.mxu1 %v11830_v31 }
 0x35e   : > { %v2039_v55 = vpack.c.bf16 %v2012_v1, %v2011_v27  ;;  %v2031_v0 = vsel %vm935_vm5, %v5481_v11, %v11934_v16  ;;  %v5487_v29 = vunpack.i.h.bf16 %v5485_v26  ;;  %v5486_v15 = vunpack.i.l.bf16 %v5485_v26 }
 0x35f   : > { %4721 = vmatprep.subr.bf16.mxu1 %v1936_v60  ;;  %v2040_v41 = vpack.c.bf16 %v2008_v59, %v2007_v19  ;;  %v11935_v21 = vunpack.i.h.bf16 %v11933_v52  ;;  %v11937_v46 = vunpack.i.l.bf16 %v11936_v33  ;;  %v5492_v45 = vunpack.i.h.bf16 %v5490_v39  ;;  %v5500_v11 = vpop.permute.xlu1 %5499 }
 0x360   : > { %4722 = vmatpush3.bf16.msra.mxu1 %v1488_v51  ;;  %v5491_v32 = vunpack.i.l.bf16 %v5490_v39  ;;  %v11938_v43 = vunpack.i.h.bf16 %v11936_v33  ;;  %v11939_v34 = vunpack.i.h.bf16 %v8568_v4  ;;  %v11940_v23 = vunpack.i.l.bf16 %v8568_v4  ;;  %v5495_v30 = vpop.permute.xlu0 %5494 }
 0x361   : > { %v2032_v17 = vsel %vm935_vm5, %v5482_v57, %v11935_v21  ;;  %v8991_v7 = vsel %vm569_vm2, %v5401_v13, %v11937_v46  ;;  %2842 = vmatprep.subr.bf16.mxu0 %v2040_v41  ;;  %v2010_v57 = vsel %vm935_vm5, %v5487_v29, %v5492_v45  ;;  %v5497_v36 = vunpack.i.h.bf16 %v5495_v30 }
 0x362   : > { %v2041_v49 = vpack.c.bf16 %v2032_v17, %v2031_v0  ;;  %v1696_v53 = vsel %vm569_vm2, %v5402_v48, %v11938_v43  ;;  %v2014_v22 = vsel %vm935_vm5, %v11939_v34, %v5487_v29  ;;  %v2013_v13 = vsel %vm935_vm5, %v11940_v23, %v5486_v15  ;;  %2843 = vmatpush1.bf16.msra.mxu0 %v2039_v55  ;;  %v11945_v29 = vld [vmem:[#allocation209_spill] sm:$0xff] }
 0x363   : > { %v2046_v51 = vpack.c.bf16 %v2014_v22, %v2013_v13  ;;  %v2009_v48 = vsel %vm935_vm5, %v5486_v15, %v5491_v32  ;;  %v5496_v4 = vunpack.i.l.bf16 %v5495_v30  ;;  %v11942_v47 = vunpack.i.l.bf16 %v11941_v40 }
 0x364   : > { %4723 = vmatprep.subr.bf16.mxu1 %v2041_v49  ;;  %v2047_v62 = vpack.c.bf16 %v2010_v57, %v2009_v48  ;;  %v1600_v63 = vpack.c.bf16 %v8948_v18, %v8963_v20  ;;  %v5502_v27 = vunpack.i.h.bf16 %v5500_v11  ;;  %v5501_v60 = vunpack.i.l.bf16 %v5500_v11  ;;  %v5505_v16 = vpop.permute.xlu0 %5504  ;;  %4575 = vmatmul.mubr.msk.bf16.gmra.mrb[12].mxu1 %vm2513_vm8, %v8291_v3 }
 0x365   : > { %v2033_v1 = vsel %vm935_vm5, %v5491_v32, %v11942_v47  ;;  %4724 = vmatpush3.bf16.msra.mxu1 %v1593_v38  ;;  %v11943_v55 = vunpack.i.h.bf16 %v11941_v40  ;;  %v1705_v19 = vpack.c.bf16 %v1696_v53, %v8991_v7  ;;  %v2124_v59 = vsel %vm1057_vm7, %v5342_v61, %v5497_v36  ;;  %v11948_v7 = vld [vmem:[#allocation182_spill] sm:$0xff]  ;;  %2996 = vmatprep.mubr.bf16.mxu1 %v11841_v24 }
 0x366   : > { %v11944_v52 = vunpack.i.l.bf16 %v8590_v37  ;;  %2844 = vmatprep.subr.bf16.mxu0 %v2047_v62  ;;  %v2119_v0 = vsel %vm1057_vm7, %v5496_v4, %v5501_v60  ;;  %v2120_v39 = vsel %vm1057_vm7, %v5497_v36, %v5502_v27  ;;  %v11946_v15 = vunpack.i.l.bf16 %v11945_v29  ;;  %v5510_v37 = vpop.permute.xlu1 %5509 }
 0x367   : > { %v2034_v26 = vsel %vm935_vm5, %v5492_v45, %v11943_v55  ;;  %2845 = vmatpush1.bf16.msra.mxu0 %v2046_v51  ;;  %v5507_v41 = vunpack.i.h.bf16 %v5505_v16  ;;  %v5506_v21 = vunpack.i.l.bf16 %v5505_v16  ;;  %v2152_v17 = vpack.c.bf16 %v2120_v39, %v2119_v0 }
 0x368   : > { %v2123_v18 = vsel %vm1057_vm7, %v11944_v52, %v5496_v4  ;;  %v2048_v38 = vpack.c.bf16 %v2034_v26, %v2033_v1  ;;  %v2143_v61 = vsel %vm1057_vm7, %v5501_v60, %v11946_v15  ;;  %v11947_v33 = vunpack.i.h.bf16 %v11945_v29 }
 0x369   : > { %v2151_v20 = vpack.c.bf16 %v2124_v59, %v2123_v18  ;;  %v11949_v45 = vunpack.i.h.bf16 %v11948_v7  ;;  %v11950_v32 = vunpack.i.h.bf16 %v8764_v12  ;;  %v5512_v43 = vunpack.i.h.bf16 %v5510_v37  ;;  %2846 = vmatprep.subr.bf16.mxu0 %v2152_v17 }
 0x36a   : > { %4725 = vmatprep.subr.bf16.mxu1 %v2048_v38  ;;  %v2144_v46 = vsel %vm1057_vm7, %v5502_v27, %v11947_v33  ;;  %v5511_v53 = vunpack.i.l.bf16 %v5510_v37  ;;  %v11951_v22 = vunpack.i.l.bf16 %v11948_v7  ;;  %v11952_v23 = vunpack.i.l.bf16 %v8764_v12  ;;  %v5515_v12 = vpop.permute.xlu0 %5514  ;;  %v5520_v62 = vpop.permute.xlu1 %5519 }
 0x36b   : > { %v1698_v49 = vsel %vm569_vm2, %v11950_v32, %v11949_v45  ;;  %4726 = vmatpush3.bf16.msra.mxu1 %v1600_v63  ;;  %v2153_v34 = vpack.c.bf16 %v2144_v46, %v2143_v61  ;;  %v11953_v51 = vunpack.i.h.bf16 %v8612_v50  ;;  %v11954_v48 = vunpack.i.l.bf16 %v8612_v50  ;;  %2847 = vmatpush1.bf16.msra.mxu0 %v2151_v20 }
 0x36c   : > { %v1697_v13 = vsel %vm569_vm2, %v11952_v23, %v11951_v22  ;;  %v2121_v36 = vsel %vm1057_vm7, %v5506_v21, %v5511_v53  ;;  %v2122_v4 = vsel %vm1057_vm7, %v5507_v41, %v5512_v43  ;;  %v5517_v40 = vunpack.i.h.bf16 %v5515_v12 }
 0x36d   : > { %v2126_v30 = vsel %vm1057_vm7, %v11953_v51, %v5507_v41  ;;  %v2125_v57 = vsel %vm1057_vm7, %v11954_v48, %v5506_v21  ;;  %4727 = vmatprep.subr.bf16.mxu1 %v2153_v34  ;;  %v5516_v50 = vunpack.i.l.bf16 %v5515_v12  ;;  %v2159_v47 = vpack.c.bf16 %v2122_v4, %v2121_v36 }
 0x36e   : > { %v2158_v11 = vpack.c.bf16 %v2126_v30, %v2125_v57  ;;  %v11955_v1 = vunpack.i.l.bf16 %v7968_v44  ;;  %v5522_v27 = vunpack.i.h.bf16 %v5520_v62  ;;  %v5521_v60 = vunpack.i.l.bf16 %v5520_v62  ;;  %v5525_v16 = vpop.permute.xlu0 %5524  ;;  %v5530_v39 = vpop.permute.xlu1 %5529 }
 0x36f   : > { %4728 = vmatpush3.bf16.msra.mxu1 %v1705_v19  ;;  %v11956_v55 = vunpack.i.h.bf16 %v7968_v44  ;;  %v11957_v59 = vunpack.i.h.bf16 %v8740_v10  ;;  %v11958_v18 = vunpack.i.l.bf16 %v8740_v10  ;;  %2848 = vmatprep.subr.bf16.mxu0 %v2159_v47  ;;  %v1712_v19 = vpack.c.bf16 %v1698_v49, %v1697_v13 }
 0x370   : > { %v2145_v63 = vsel %vm1057_vm7, %v5511_v53, %v11955_v1  ;;  %2849 = vmatpush1.bf16.msra.mxu0 %v2158_v11  ;;  %v2231_v44 = vsel %vm1179_vm6, %v5516_v50, %v5521_v60  ;;  %v2232_v0 = vsel %vm1179_vm6, %v5517_v40, %v5522_v27  ;;  %v5527_v29 = vunpack.i.h.bf16 %v5525_v16 }
 0x371   : > { %v2146_v26 = vsel %vm1057_vm7, %v5512_v43, %v11956_v55  ;;  %v2236_v52 = vsel %vm1179_vm6, %v11957_v59, %v5517_v40  ;;  %v2235_v38 = vsel %vm1179_vm6, %v11958_v18, %v5516_v50  ;;  %v5526_v15 = vunpack.i.l.bf16 %v5525_v16 }
 0x372   : > { %v2160_v24 = vpack.c.bf16 %v2146_v26, %v2145_v63  ;;  %v2263_v20 = vpack.c.bf16 %v2236_v52, %v2235_v38  ;;  %v2264_v10 = vpack.c.bf16 %v2232_v0, %v2231_v44  ;;  %v5532_v61 = vunpack.i.h.bf16 %v5530_v39 }
 0x373   : > { %v5531_v37 = vunpack.i.l.bf16 %v5530_v39  ;;  %v11959_v41 = vunpack.i.l.bf16 %v8042_v54  ;;  %v11960_v17 = vunpack.i.h.bf16 %v8780_v58  ;;  %v11961_v46 = vunpack.i.l.bf16 %v8780_v58  ;;  %2851 = vmatmul.mubr.bf16.vlgmr.msra.gmra.mrb[32].mxu0 %v7824_v2 }
 0x374   : > { %4729 = vmatprep.subr.bf16.mxu1 %v2160_v24  ;;  %2891 = vmatprep.subr.bf16.mxu0 %v2264_v10  ;;  %v11962_v45 = vunpack.i.h.bf16 %v8042_v54  ;;  %v2234_v53 = vsel %vm1179_vm6, %v5527_v29, %v5532_v61 }
 0x375   : > { %4730 = vmatpush3.bf16.msra.mxu1 %v1712_v19  ;;  %v2255_v21 = vsel %vm1179_vm6, %v5521_v60, %v11959_v41  ;;  %v2238_v33 = vsel %vm1179_vm6, %v11960_v17, %v5527_v29  ;;  %v2237_v7 = vsel %vm1179_vm6, %v11961_v46, %v5526_v15  ;;  %2892 = vmatpush1.bf16.msra.mxu0 %v2263_v20 }
 0x376   : > { %v2256_v32 = vsel %vm1179_vm6, %v5522_v27, %v11962_v45  ;;  %v2270_v49 = vpack.c.bf16 %v2238_v33, %v2237_v7  ;;  %v2233_v43 = vsel %vm1179_vm6, %v5526_v15, %v5531_v37  ;;  %2860 = vmatprep.mubr.bf16.mxu0 %v7828_v6 }
 0x377   : > { %v2271_v58 = vpack.c.bf16 %v2234_v53, %v2233_v43  ;;  %v2265_v54 = vpack.c.bf16 %v2256_v32, %v2255_v21 }
 0x378   : > { %2997 = vmatmul.mubr.bf16.vlgmr.msra.gmra.mrb[16].mxu1 %v7824_v2 }
 0x379   : > { %3004 = vmatprep.mubr.bf16.mxu1 %v7828_v6  ;;  %2893 = vmatprep.subr.bf16.mxu0 %v2271_v58 }
 0x37a   : > { %2894 = vmatpush1.bf16.msra.mxu0 %v2270_v49  ;;  %v9129_v2 = vpop.permute.xlu0 %2415 }
 0x37b   : > { %4761 = vmatprep.subr.bf16.mxu0 %v2265_v54  ;;  %2861 = vmatmul.mubr.bf16.gmra.mrb[36].mxu0 %v7840_v56 }
 0x37c   : > { %2870 = vmatprep.mubr.bf16.mxu0 %v7844_v9 }
 0x37e   : > { %v9215_v45 = vpop.permute.xlu0 %2425 }
 0x380   : > { %3005 = vmatmul.mubr.bf16.gmra.mrb[20].mxu1 %v7840_v56 }
 0x381   : > { %3012 = vmatprep.mubr.bf16.mxu1 %v7844_v9  ;;  %v11963_v9 = vld [vmem:[#allocation202_spill] sm:$0xff] }
 0x382   : > { %v11964_v34 = vunpack.i.l.bf16 %v11963_v9 }
 0x383   : > { %2871 = vmatmul.mubr.bf16.gmra.mrb[40].mxu0 %v7854_v28 }
 0x384   : > { %2880 = vmatprep.mubr.bf16.mxu0 %v7858_v35  ;;  %v2257_v22 = vsel %vm1179_vm6, %v5531_v37, %v11964_v34 }
 0x388   : > { %3013 = vmatmul.mubr.bf16.gmra.mrb[24].mxu1 %v7854_v28  ;;  %v9127_v6 = vpop.f32.mrb[0].mxu0  ;;  %v11965_v28 = vunpack.i.h.bf16 %v11963_v9 }
 0x389   : > { %3020 = vmatprep.mubr.bf16.mxu1 %v7858_v35  ;;  %v2635_v56 = vpop.f32.mrb[1].mxu0 }
 0x38a   : > { %v2258_v35 = vsel %vm1179_vm6, %v5532_v61, %v11965_v28  ;;  %v9140_v23 = vadd.f32 %v2635_v56, %v9129_v2  ;;  %v2637_v13 = vpop.f32.mrb[2].mxu0 }
 0x38b   : > { %2881 = vmatmul.mubr.bf16.gmra.mrb[44].mxu0 %v8209_v14  ;;  %v2639_v51 = vpop.f32.mrb[3].mxu0  ;;  %v2272_v48 = vpack.c.bf16 %v2258_v35, %v2257_v22 }
 0x38c   : > { %2923 = vmatprep.mubr.bf16.mxu0 %v11830_v31  ;;  %v11264_v57 = vmax.f32 %v9140_v23, 0.0 }
 0x390   : > { %3021 = vmatmul.mubr.bf16.gmra.mrb[28].mxu1 %v8209_v14  ;;  %v9142_v14 = vpop.permute.xlu1 %2420  ;;  %v9156_v36 = vpop.f32.mrb[4].mxu0 }
 0x391   : > { %v9145_v30 = vadd.f32 %v2639_v51, %v9142_v14  ;;  %v2645_v4 = vpop.f32.mrb[5].mxu0  ;;  %v9218_v32 = vadd.f32 %v2637_v13, %v9142_v14 }
 0x392   : > { %v2647_v62 = vpop.f32.mrb[6].mxu0  ;;  %v9234_v34 = vadd.f32 %v2645_v4, %v9215_v45 }
 0x393   : > { %4576 = vmatmul.mubr.msk.bf16.vlgmr.msra.gmra.mrb[32].mxu0 %vm2513_vm8, %v8227_v8  ;;  %v11261_v11 = vmax.f32 %v9145_v30, 0.0  ;;  %v2649_v40 = vpop.f32.mrb[7].mxu0  ;;  %v11266_v13 = vmax.f32 %v9218_v32, 0.0 }
 0x394   : > { %4762 = vmatpush3.bf16.msra.mxu0 %v2265_v54  ;;  %2933 = vmatprep.mubr.bf16.mxu0 %v11830_v31  ;;  %v9207_v37 = vpop.permute.xlu1 %2430  ;;  %v9229_v54 = vadd.f32 %v9127_v6, %v9129_v2 }
 0x395   : > { %4763 = vmatprep.subr.bf16.mxu0 %v2272_v48  ;;  %v5533_v12 = vpack.i.bf16 %v11261_v11, %v11264_v57  ;;  %v9223_v53 = vadd.f32 %v2649_v40, %v9207_v37  ;;  %v9242_v51 = vadd.f32 %v2647_v62, %v9207_v37  ;;  %v11981_v11 = vld [vmem:[#allocation36_spill] sm:$0xff] }
 0x397   : > { %5534 = vrot.lane.b32.xlu0 %v5533_v12, %s5851_s28  ;;  %v11242_v12 = vmax.f32 %v9223_v53, 0.0 }
 0x398   : > { %4764 = vmatpush3.bf16.msra.mxu0 %v2272_v48  ;;  %v9162_v50 = vpop.f32.mrb[8].mxu0  ;;  %v9238_v35 = vpop.permute.xlu1 %2440 }
 0x399   : > { %v9164_v47 = vpop.f32.mrb[9].mxu0 }
 0x39a   : > { %v9166_v1 = vpop.f32.mrb[10].mxu0 }
 0x39b   : > { %4577 = vmatmul.mubr.msk.bf16.gmra.mrb[36].mxu0 %vm2513_vm8, %v8252_v42  ;;  %v2659_v63 = vpop.f32.mrb[11].mxu0 }
 0x39c   : > { %2943 = vmatprep.mubr.bf16.mxu0 %v11830_v31  ;;  %v9251_v4 = vadd.f32 %v2659_v63, %v9238_v35 }
 0x3a0   : > { %v9171_v27 = vpop.f32.mrb[12].mxu0 }
 0x3a1   : > { %v9173_v60 = vpop.f32.mrb[13].mxu0 }
 0x3a2   : > { %v9175_v55 = vpop.f32.mrb[14].mxu0 }
 0x3a3   : > { %4578 = vmatmul.mubr.msk.bf16.gmra.mrb[40].mxu0 %vm2513_vm8, %v8276_v25  ;;  %v9177_v26 = vpop.f32.mrb[15].mxu0 }
 0x3a4   : > { %2953 = vmatprep.mubr.bf16.mxu0 %v11830_v31 }
 0x3ab   : > { %4579 = vmatmul.mubr.msk.bf16.gmra.mrb[44].mxu0 %vm2513_vm8, %v8291_v3 }
 0x3ac   : > { %4765 = vmatprep.mubr.msk.bf16.mxu0 %vm2513_vm8, %v8227_v8 }
 0x3b3   : > { %4766 = vmatmul.mubr.msk.bf16.vlgmr.msra.gmra.mrb[48].mxu0 %vm2513_vm8, %v8252_v42 }
 0x3b4   : > { %4769 = vmatprep.mubr.msk.bf16.mxu0 %vm2513_vm8, %v8276_v25 }
 0x3bb   : > { %4770 = vmatmul.mubr.msk.bf16.gmra.mrb[52].mxu0 %vm2513_vm8, %v8291_v3 }
 0x3e5   : > { %v2706_v59 = vpop.f32.mrb[16].mxu0 }
 0x3e6   : > { %v2708_v52 = vpop.f32.mrb[17].mxu0  ;;  %v2707_v15 = vadd.f32 %v2706_v59, %v9129_v2 }
 0x3e7   : > { %v2710_v18 = vpop.f32.mrb[18].mxu0  ;;  %v2709_v10 = vadd.f32 %v2708_v52, %v9129_v2  ;;  %v9258_v52 = vpop.permute.xlu0 %2435 }
 0x3e8   : > { %v2712_v38 = vpop.f32.mrb[19].mxu0  ;;  %v2711_v41 = vadd.f32 %v2710_v18, %v9142_v14  ;;  %v11265_v18 = vmax.f32 %v9229_v54, 0.0 }
 0x3e9   : > { %v2713_v33 = vadd.f32 %v2712_v38, %v9142_v14  ;;  %v9263_v38 = vadd.f32 %v9156_v36, %v9215_v45 }
 0x3ea   : > { %v5548_v36 = vpack.i.bf16 %v11266_v13, %v11265_v18 }
 0x3ed   : > { %v2716_v24 = vpop.f32.mrb[20].mxu0 }
 0x3ee   : > { %v2718_v19 = vpop.f32.mrb[21].mxu0  ;;  %v2717_v6 = vadd.f32 %v2716_v24, %v9215_v45 }
 0x3ef   : > { %v2720_v20 = vpop.f32.mrb[22].mxu0  ;;  %v2719_v40 = vadd.f32 %v2718_v19, %v9215_v45  ;;  %v11241_v19 = vmax.f32 %v9234_v34, 0.0 }
 0x3f0   : > { %v2722_v16 = vpop.f32.mrb[23].mxu0  ;;  %v2721_v24 = vadd.f32 %v2720_v20, %v9207_v37  ;;  %v11260_v20 = vmax.f32 %v9242_v51, 0.0 }
 0x3f5   : > { %v9189_v44 = vpop.f32.mrb[24].mxu0 }
 0x3f6   : > { %v9191_v8 = vpop.f32.mrb[25].mxu0 }
 0x3f7   : > { %v9193_v0 = vpop.f32.mrb[26].mxu0 }
 0x3f8   : > { %v9195_v42 = vpop.f32.mrb[27].mxu0 }
 0x3fd   : > { %v9197_v25 = vpop.f32.mrb[28].mxu0 }
 0x3fe   : > { %v9199_v39 = vpop.f32.mrb[29].mxu0 }
 0x3ff   : > { %v9201_v3 = vpop.f32.mrb[30].mxu0 }
 0x400   : > { %v9203_v29 = vpop.f32.mrb[31].mxu0 }
 0x41f   : > { %v2779_v61 = vpop.f32.mrb[0].mxu1 }
 0x420   : > { %v9210_v21 = vadd.f32 %v2779_v61, %v2707_v15  ;;  %v2781_v17 = vpop.f32.mrb[1].mxu1  ;;  %v2723_v61 = vadd.f32 %v2722_v16, %v9207_v37  ;;  %v11240_v16 = vmax.f32 %v9251_v4, 0.0 }
 0x421   : > { %v9213_v46 = vadd.f32 %v2781_v17, %v2709_v10  ;;  %v2783_v7 = vpop.f32.mrb[2].mxu1  ;;  %v9272_v10 = vadd.f32 %v9164_v47, %v9258_v52  ;;  %v5553_v47 = vpack.i.bf16 %v11242_v12, %v11241_v19 }
 0x422   : > { %v9220_v49 = vadd.f32 %v2783_v7, %v2711_v41  ;;  %v2785_v43 = vpop.f32.mrb[3].mxu1  ;;  %v11267_v56 = vmax.f32 %v9210_v21, 0.0 }
 0x423   : > { %11966 = vst [vmem:[#allocation162_spill] sm:$0xff] %v9213_v46  ;;  %v9225_v58 = vadd.f32 %v2785_v43, %v2713_v33  ;;  %v11237_v22 = vmax.f32 %v9213_v46, 0.0 }
 0x424   : > { %v11268_v9 = vmax.f32 %v9220_v49, 0.0 }
 0x425   : > { %11967 = vst [vmem:[#allocation154_spill] sm:$0xff] %v9225_v58  ;;  %v11238_v28 = vmax.f32 %v9225_v58, 0.0  ;;  %v12003_v58 = vld [vmem:[#allocation58_spill] sm:$0xff] }
 0x426   : > { %v5538_v48 = vpack.i.bf16 %v11268_v9, %v11267_v56  ;;  %v11985_v9 = vld [vmem:[#allocation40_spill] sm:$0xff] }
 0x427   : > { %v5543_v62 = vpack.i.bf16 %v11238_v28, %v11237_v22  ;;  %v2789_v59 = vpop.f32.mrb[4].mxu1  ;;  %v2731_v22 = vadd.f32 %v9193_v0, %v9238_v35 }
 0x428   : > { %v9266_v63 = vadd.f32 %v2789_v59, %v2717_v6  ;;  %v2791_v15 = vpop.f32.mrb[5].mxu1  ;;  %5539 = vrot.lane.b32.xlu1 %v5538_v48, %s5851_s28  ;;  %v11259_v6 = vmax.f32 %v9263_v38, 0.0  ;;  %v11239_v48 = vmax.f32 %v9272_v10, 0.0  ;;  %v9304_v59 = vadd.f32 %v9166_v1, %v9238_v35 }
 0x429   : > { %v9275_v41 = vadd.f32 %v2791_v15, %v2719_v40  ;;  %v2793_v17 = vpop.f32.mrb[6].mxu1  ;;  %5544 = vrot.lane.b32.xlu0 %v5543_v62, %s5851_s28  ;;  %v9296_v40 = vpop.permute.xlu1 %2450 }
 0x42a   : > { %v9283_v33 = vadd.f32 %v2793_v17, %v2721_v24  ;;  %v2795_v7 = vpop.f32.mrb[7].mxu1  ;;  %v5558_v62 = vpack.i.bf16 %v11260_v20, %v11259_v6  ;;  %v2727_v24 = vadd.f32 %v9189_v44, %v9258_v52  ;;  %v9315_v17 = vadd.f32 %v9177_v26, %v9296_v40  ;;  %v11980_v20 = vld [vmem:[#allocation37_spill] sm:$0xff] }
 0x42b   : > { %11968 = vst [vmem:[#allocation156_spill] sm:$0xff] %v9275_v41  ;;  %v9290_v43 = vadd.f32 %v2795_v7, %v2723_v61  ;;  %v5563_v61 = vpack.i.bf16 %v11240_v16, %v11239_v48  ;;  %v9324_v44 = vadd.f32 %v9162_v50, %v9258_v52  ;;  %v11250_v28 = vmax.f32 %v9266_v63, 0.0 }
 0x42c   : > { %5549 = vrot.lane.b32.xlu1 %v5548_v36, %s5851_s28  ;;  %v11247_v15 = vmax.f32 %v9283_v33, 0.0  ;;  %11970 = vst [vmem:[#allocation161_spill] sm:$0xff] %v9315_v17  ;;  %v2729_v36 = vadd.f32 %v9191_v8, %v9258_v52  ;;  %v2733_v16 = vadd.f32 %v9195_v42, %v9238_v35  ;;  %v11243_v50 = vmax.f32 %v9275_v41, 0.0 }
 0x42d   : > { %11969 = vst [vmem:[#allocation163_spill] sm:$0xff] %v9290_v43  ;;  %5554 = vrot.lane.b32.xlu0 %v5553_v47, %s5851_s28  ;;  %v11244_v1 = vmax.f32 %v9290_v43, 0.0  ;;  %v9320_v47 = vpop.permute.xlu0 %2445  ;;  %v11246_v0 = vmax.f32 %v9304_v59, 0.0 }
 0x42e   : > { %v9334_v8 = vadd.f32 %v9173_v60, %v9320_v47 }
 0x42f   : > { %v2799_v7 = vpop.f32.mrb[8].mxu1  ;;  %v5578_v42 = vpack.i.bf16 %v11244_v1, %v11243_v50 }
 0x430   : > { %v9329_v48 = vadd.f32 %v2799_v7, %v2727_v24  ;;  %v2801_v26 = vpop.f32.mrb[9].mxu1  ;;  %5559 = vrot.lane.b32.xlu1 %v5558_v62, %s5851_s28  ;;  %11971 = vst [vmem:[#allocation167_spill] sm:$0xff] %v9334_v8  ;;  %v5568_v62 = vpack.i.bf16 %v11247_v15, %v11250_v28  ;;  %v11249_v7 = vmax.f32 %v9315_v17, 0.0 }
 0x431   : > { %v9339_v19 = vadd.f32 %v2801_v26, %v2729_v36  ;;  %v2803_v12 = vpop.f32.mrb[10].mxu1  ;;  %5564 = vrot.lane.b32.xlu0 %v5563_v61, %s5851_s28  ;;  %v11245_v61 = vmax.f32 %v9324_v44, 0.0  ;;  %v11248_v26 = vmax.f32 %v9334_v8, 0.0 }
 0x432   : > { %v9347_v24 = vadd.f32 %v2803_v12, %v2731_v22  ;;  %v2805_v60 = vpop.f32.mrb[11].mxu1  ;;  %v9366_v12 = vadd.f32 %v9175_v55, %v9296_v40  ;;  %v9380_v55 = vadd.f32 %v9171_v27, %v9320_v47 }
 0x433   : > { %11972 = vst [vmem:[#allocation172_spill] sm:$0xff] %v9339_v19  ;;  %v9354_v36 = vadd.f32 %v2805_v60, %v2733_v16  ;;  %v5573_v22 = vpack.i.bf16 %v11246_v0, %v11245_v61  ;;  %v2737_v16 = vadd.f32 %v9197_v25, %v9320_v47  ;;  %v2741_v25 = vadd.f32 %v9201_v3, %v9296_v40 }
 0x434   : > { %5569 = vrot.lane.b32.xlu1 %v5568_v62, %s5851_s28  ;;  %v11257_v60 = vmax.f32 %v9347_v24, 0.0  ;;  %v5583_v62 = vpack.i.bf16 %v11249_v7, %v11248_v26  ;;  %v11258_v61 = vmax.f32 %v9329_v48, 0.0  ;;  %v11251_v26 = vmax.f32 %v9339_v19, 0.0 }
 0x435   : > { %11973 = vst [vmem:[#allocation169_spill] sm:$0xff] %v9354_v36  ;;  %5579 = vrot.lane.b32.xlu0 %v5578_v42, %s5851_s28  ;;  %v2739_v42 = vadd.f32 %v9199_v39, %v9320_v47  ;;  %v11252_v50 = vmax.f32 %v9354_v36, 0.0  ;;  %v2743_v39 = vadd.f32 %v9203_v29, %v9296_v40  ;;  %v11254_v27 = vmax.f32 %v9366_v12, 0.0  ;;  %v11999_v36 = vld [vmem:[#allocation54_spill] sm:$0xff] }
 0x436   : > { %v5588_v3 = vpack.i.bf16 %v11257_v60, %v11258_v61  ;;  %v11979_v61 = vld [vmem:[#allocation34_spill] sm:$0xff] }
 0x437   : > { %v2809_v1 = vpop.f32.mrb[12].mxu1  ;;  %v5598_v29 = vpack.i.bf16 %v11252_v50, %v11251_v26 }
 0x438   : > { %v9385_v0 = vadd.f32 %v2809_v1, %v2737_v16  ;;  %v2811_v15 = vpop.f32.mrb[13].mxu1  ;;  %5574 = vrot.lane.b32.xlu1 %v5573_v22, %s5851_s28  ;;  %v11253_v16 = vmax.f32 %v9380_v55, 0.0 }
 0x439   : > { %v9391_v7 = vadd.f32 %v2811_v15, %v2739_v42  ;;  %v2813_v28 = vpop.f32.mrb[14].mxu1  ;;  %5584 = vrot.lane.b32.xlu0 %v5583_v62, %s5851_s28 }
 0x43a   : > { %11974 = vst [vmem:[#allocation180_spill] sm:$0xff] %v9385_v0  ;;  %v9399_v1 = vadd.f32 %v2813_v28, %v2741_v25  ;;  %v2815_v22 = vpop.f32.mrb[15].mxu1  ;;  %v5593_v28 = vpack.i.bf16 %v11254_v27, %v11253_v16 }
 0x43b   : > { %11975 = vst [vmem:[#allocation166_spill] sm:$0xff] %v9391_v7  ;;  %v9405_v15 = vadd.f32 %v2815_v22, %v2743_v39  ;;  %v11255_v62 = vmax.f32 %v9391_v7, 0.0 }
 0x43c   : > { %11976 = vst [vmem:[#allocation165_spill] sm:$0xff] %v9399_v1  ;;  %5589 = vrot.lane.b32.xlu1 %v5588_v3, %s5851_s28  ;;  %v11263_v25 = vmax.f32 %v9399_v1, 0.0  ;;  %v11262_v3 = vmax.f32 %v9385_v0, 0.0 }
 0x43d   : > { %11977 = vst [vmem:[#allocation168_spill] sm:$0xff] %v9405_v15  ;;  %v11256_v42 = vmax.f32 %v9405_v15, 0.0  ;;  %5599 = vrot.lane.b32.xlu0 %v5598_v29, %s5851_s28 }
 0x43e   : > { %v5603_v29 = vpack.i.bf16 %v11263_v25, %v11262_v3  ;;  %v4587_v3 = vcombine.high %v11981_v11, %v11980_v20 }
 0x43f   : > { %v5608_v39 = vpack.i.bf16 %v11256_v42, %v11255_v62 }
 0x440   : > { %5594 = vrot.lane.b32.xlu1 %v5593_v28, %s5851_s28  ;;  %v11978_v28 = vld [vmem:[#allocation35_spill] sm:$0xff] }
 0x441   : > { %5609 = vrot.lane.b32.xlu0 %v5608_v39, %s5851_s28  ;;  %v4585_v6 = vcombine.high %v11979_v61, %v11978_v28  ;;  %v4584_v39 = vcombine.low %v11979_v61, %v11978_v28 }
 0x443   : > { %4186 = vmatprep.subr.bf16.mxu1 %v4585_v6 }
 0x444   : > { %5604 = vrot.lane.b32.xlu1 %v5603_v29, %s5851_s28  ;;  %4187 = vmatpush1.bf16.msra.mxu1 %v4584_v39  ;;  %v11983_v29 = vld [vmem:[#allocation38_spill] sm:$0xff] }
 0x445   : > { %4188 = vmatprep.subr.bf16.mxu1 %v4587_v3 }
 0x44b   : > { %v4731_v22 = vpop.f32.mrb[16].mxu1 }
 0x44c   : > { %v4732_v26 = vpop.f32.mrb[17].mxu1 }
 0x44d   : > { %v9428_v50 = vadd.f32 %v4732_v26, %v4731_v22  ;;  %v4734_v16 = vpop.f32.mrb[18].mxu1 }
 0x44e   : > { %v4735_v27 = vpop.f32.mrb[19].mxu1 }
 0x44f   : > { %v9431_v62 = vadd.f32 %v4735_v27, %v4734_v16  ;;  %v4586_v27 = vcombine.low %v11981_v11, %v11980_v20  ;;  %v11982_v16 = vld [vmem:[#allocation39_spill] sm:$0xff]  ;;  %v11987_v11 = vld [vmem:[#allocation42_spill] sm:$0xff] }
 0x450   : > { %v4589_v18 = vcombine.high %v11983_v29, %v11982_v16  ;;  %v4588_v56 = vcombine.low %v11983_v29, %v11982_v16 }
 0x451   : > { %4189 = vmatpush1.bf16.msra.mxu1 %v4586_v27  ;;  %v11986_v27 = vld [vmem:[#allocation43_spill] sm:$0xff] }
 0x452   : > { %4190 = vmatprep.subr.bf16.mxu1 %v4589_v18  ;;  %v4593_v20 = vcombine.high %v11987_v11, %v11986_v27  ;;  %v4592_v18 = vcombine.low %v11987_v11, %v11986_v27  ;;  %v11995_v27 = vld [vmem:[#allocation50_spill] sm:$0xff] }
 0x453   : > { %v4737_v42 = vpop.f32.mrb[20].mxu1 }
 0x454   : > { %v4738_v60 = vpop.f32.mrb[21].mxu1 }
 0x455   : > { %v9439_v25 = vadd.f32 %v4738_v60, %v4737_v42  ;;  %v4740_v26 = vpop.f32.mrb[22].mxu1  ;;  %v11984_v42 = vld [vmem:[#allocation41_spill] sm:$0xff]  ;;  %4191 = vmatpush1.bf16.msra.mxu1 %v4588_v56 }
 0x456   : > { %v4741_v22 = vpop.f32.mrb[23].mxu1  ;;  %v4591_v6 = vcombine.high %v11985_v9, %v11984_v42  ;;  %v4590_v3 = vcombine.low %v11985_v9, %v11984_v42  ;;  %v11990_v9 = vld [vmem:[#allocation47_spill] sm:$0xff] }
 0x457   : > { %v9441_v57 = vadd.f32 %v4741_v22, %v4740_v26 }
 0x458   : > { %4192 = vmatprep.subr.bf16.mxu1 %v4591_v6 }
 0x459   : > { %4193 = vmatpush1.bf16.msra.mxu1 %v4590_v3  ;;  %v11991_v3 = vld [vmem:[#allocation46_spill] sm:$0xff] }
 0x45a   : > { %4194 = vmatprep.subr.bf16.mxu1 %v4593_v20  ;;  %v4597_v42 = vcombine.high %v11991_v3, %v11990_v9 }
 0x45b   : > { %v4743_v13 = vpop.f32.mrb[24].mxu1 }
 0x45c   : > { %v4744_v60 = vpop.f32.mrb[25].mxu1 }
 0x45d   : > { %v9451_v26 = vadd.f32 %v4744_v60, %v4743_v13  ;;  %v4746_v39 = vpop.f32.mrb[26].mxu1  ;;  %v11988_v13 = vld [vmem:[#allocation45_spill] sm:$0xff]  ;;  %v11989_v60 = vld [vmem:[#allocation44_spill] sm:$0xff]  ;;  %4195 = vmatpush1.bf16.msra.mxu1 %v4592_v18 }
 0x45e   : > { %v4747_v22 = vpop.f32.mrb[27].mxu1  ;;  %v4595_v61 = vcombine.high %v11989_v60, %v11988_v13  ;;  %v4594_v6 = vcombine.low %v11989_v60, %v11988_v13  ;;  %v11992_v18 = vld [vmem:[#allocation49_spill] sm:$0xff]  ;;  %v11994_v13 = vld [vmem:[#allocation51_spill] sm:$0xff] }
 0x45f   : > { %v9453_v28 = vadd.f32 %v4747_v22, %v4746_v39  ;;  %v4601_v60 = vcombine.high %v11995_v27, %v11994_v13 }
 0x460   : > { %4196 = vmatprep.subr.bf16.mxu1 %v4595_v61 }
 0x461   : > { %4197 = vmatpush1.bf16.msra.mxu1 %v4594_v6 }
 0x462   : > { %4198 = vmatprep.subr.bf16.mxu1 %v4597_v42  ;;  %v4600_v42 = vcombine.low %v11995_v27, %v11994_v13  ;;  %v12001_v27 = vld [vmem:[#allocation56_spill] sm:$0xff] }
 0x463   : > { %v4749_v16 = vpop.f32.mrb[28].mxu1 }
 0x464   : > { %v4750_v29 = vpop.f32.mrb[29].mxu1 }
 0x465   : > { %v4751_v39 = vadd.f32 %v4750_v29, %v4749_v16  ;;  %v4752_v22 = vpop.f32.mrb[30].mxu1  ;;  %v4596_v16 = vcombine.low %v11991_v3, %v11990_v9  ;;  %v11997_v9 = vld [vmem:[#allocation52_spill] sm:$0xff] }
 0x466   : > { %v4753_v56 = vpop.f32.mrb[31].mxu1  ;;  %v9469_v7 = vpop.f32.mrb[32].mxu0 }
 0x467   : > { %v9463_v31 = vadd.f32 %v4753_v56, %v4752_v22  ;;  %v9471_v11 = vpop.f32.mrb[33].mxu0  ;;  %v11993_v22 = vld [vmem:[#allocation48_spill] sm:$0xff]  ;;  %4199 = vmatpush1.bf16.msra.mxu1 %v4596_v16  ;;  %v11996_v16 = vld [vmem:[#allocation53_spill] sm:$0xff]  ;;  %v3023_v17 = vadd.f32 %v4751_v39, %v9320_v47 }
 0x468   : > { %v9473_v20 = vpop.f32.mrb[34].mxu0  ;;  %v4599_v56 = vcombine.high %v11993_v22, %v11992_v18  ;;  %v4598_v61 = vcombine.low %v11993_v22, %v11992_v18  ;;  %v4603_v18 = vcombine.high %v11997_v9, %v11996_v16  ;;  %v11998_v22 = vld [vmem:[#allocation55_spill] sm:$0xff] }
 0x469   : > { %v9477_v29 = vpop.f32.mrb[35].mxu0  ;;  %v4605_v41 = vcombine.high %v11999_v36, %v11998_v22 }
 0x46a   : > { %4200 = vmatprep.subr.bf16.mxu1 %v4599_v56  ;;  %v4602_v56 = vcombine.low %v11997_v9, %v11996_v16  ;;  %v12002_v16 = vld [vmem:[#allocation59_spill] sm:$0xff] }
 0x46b   : > { %4201 = vmatpush1.bf16.msra.mxu1 %v4598_v61  ;;  %v4609_v0 = vcombine.high %v12003_v58, %v12002_v16 }
 0x46c   : > { %4202 = vmatprep.subr.bf16.mxu1 %v4601_v60  ;;  %v4604_v60 = vcombine.low %v11999_v36, %v11998_v22 }
 0x46e   : > { %v9485_v15 = vpop.f32.mrb[36].mxu0 }
 0x46f   : > { %v9487_v6 = vpop.f32.mrb[37].mxu0  ;;  %4203 = vmatpush1.bf16.msra.mxu1 %v4600_v42  ;;  %v12000_v42 = vld [vmem:[#allocation57_spill] sm:$0xff] }
 0x470   : > { %v9489_v19 = vpop.f32.mrb[38].mxu0  ;;  %4204 = vmatprep.subr.bf16.mxu1 %v4603_v18  ;;  %v4607_v9 = vcombine.high %v12001_v27, %v12000_v42  ;;  %v4606_v18 = vcombine.low %v12001_v27, %v12000_v42  ;;  %v3010_v42 = vadd.f32 %v9441_v57, %v9207_v37 }
 0x471   : > { %v9493_v3 = vpop.f32.mrb[39].mxu0 }
 0x473   : > { %4205 = vmatpush1.bf16.msra.mxu1 %v4602_v56 }
 0x474   : > { %4206 = vmatprep.subr.bf16.mxu1 %v4605_v41  ;;  %v3007_v41 = vadd.f32 %v9439_v25, %v9215_v45 }
 0x476   : > { %v9501_v43 = vpop.f32.mrb[40].mxu0 }
 0x477   : > { %v9503_v61 = vpop.f32.mrb[41].mxu0  ;;  %4207 = vmatpush1.bf16.msra.mxu1 %v4604_v60 }
 0x478   : > { %v9505_v46 = vpop.f32.mrb[42].mxu0  ;;  %4208 = vmatprep.subr.bf16.mxu1 %v4607_v9  ;;  %v2999_v9 = vadd.f32 %v9428_v50, %v9129_v2 }
 0x479   : > { %v9509_v13 = vpop.f32.mrb[43].mxu0 }
 0x47b   : > { %4209 = vmatpush1.bf16.msra.mxu1 %v4606_v18  ;;  %v3002_v18 = vadd.f32 %v9431_v62, %v9142_v14 }
 0x47c   : > { %4210 = vmatprep.subr.bf16.mxu1 %v4609_v0 }
 0x47e   : > { %v9517_v1 = vpop.f32.mrb[44].mxu0 }
 0x47f   : > { %12004 = vst [vmem:[#allocation176_spill] sm:$0xff] %v9517_v1  ;;  %v9519_v56 = vpop.f32.mrb[45].mxu0 }
 0x480   : > { %12005 = vst [vmem:[#allocation175_spill] sm:$0xff] %v9519_v56  ;;  %v9521_v8 = vpop.f32.mrb[46].mxu0 }
 0x481   : > { %12006 = vst [vmem:[#allocation187_spill] sm:$0xff] %v9521_v8  ;;  %v9523_v22 = vpop.f32.mrb[47].mxu0 }
 0x486   : > { %v4767_v60 = vpop.f32.mrb[48].mxu0 }
 0x487   : > { %v9529_v27 = vadd.f32 %v4767_v60, %v3007_v41  ;;  %v3063_v36 = vpop.f32.mrb[49].mxu0  ;;  %v3015_v41 = vadd.f32 %v9451_v26, %v9258_v52  ;;  %v4608_v26 = vcombine.low %v12003_v58, %v12002_v16 }
 0x488   : > { %v9533_v1 = vadd.f32 %v3063_v36, %v2999_v9  ;;  %v4768_v8 = vpop.f32.mrb[50].mxu0  ;;  %v3026_v36 = vadd.f32 %v9463_v31, %v9296_v40  ;;  %v12011_v31 = vld [vmem:[#allocation61_spill] sm:$0xff] }
 0x489   : > { %v9537_v0 = vadd.f32 %v4768_v8, %v3010_v42  ;;  %v3066_v56 = vpop.f32.mrb[51].mxu0  ;;  %v3018_v8 = vadd.f32 %v9453_v28, %v9238_v35  ;;  %4211 = vmatpush1.bf16.msra.mxu1 %v4608_v26  ;;  %v9566_v28 = vadd.f32 %v9469_v7, %v9129_v2 }
 0x48a   : > { %v9539_v25 = vadd.f32 %v3066_v56, %v3002_v18  ;;  %v9560_v18 = vadd.f32 %v9473_v20, %v9142_v14 }
 0x48e   : > { %v4771_v50 = vpop.f32.mrb[52].mxu0 }
 0x48f   : > { %v9544_v60 = vadd.f32 %v4771_v50, %v3023_v17  ;;  %v3079_v57 = vpop.f32.mrb[53].mxu0  ;;  %v5535_v17 = vpop.permute.xlu0 %5534  ;;  %v12012_v50 = vld [vmem:[#allocation60_spill] sm:$0xff] }
 0x490   : > { %v9548_v9 = vadd.f32 %v3079_v57, %v3015_v41  ;;  %v4772_v62 = vpop.f32.mrb[54].mxu0  ;;  %v4611_v41 = vcombine.high %v12012_v50, %v12011_v31  ;;  %v5537_v26 = vunpack.i.h.bf16 %v5535_v17  ;;  %v4610_v58 = vcombine.low %v12012_v50, %v12011_v31 }
 0x491   : > { %12007 = vst [vmem:[#allocation177_spill] sm:$0xff] %v9544_v60  ;;  %v9552_v42 = vadd.f32 %v4772_v62, %v3026_v36  ;;  %v3082_v56 = vpop.f32.mrb[55].mxu0  ;;  %v12014_v60 = vmax.f32 %v9220_v49, 0.0  ;;  %v12018_v49 = vmax.f32 %v9560_v18, 0.0 }
 0x492   : > { %12008 = vst [vmem:[#allocation171_spill] sm:$0xff] %v9548_v9  ;;  %v9554_v39 = vadd.f32 %v3082_v56, %v3018_v8  ;;  %4212 = vmatprep.subr.bf16.mxu1 %v4611_v41  ;;  %v9598_v9 = vadd.f32 %v9471_v11, %v9129_v2 }
 0x493   : > { %12009 = vst [vmem:[#allocation170_spill] sm:$0xff] %v9552_v42  ;;  %v5536_v42 = vunpack.i.l.bf16 %v5535_v17  ;;  %v12015_v17 = vmax.f32 %v9210_v21, 0.0  ;;  %4213 = vmatpush1.bf16.msra.mxu1 %v4610_v58  ;;  %v9606_v21 = vadd.f32 %v9477_v29, %v9142_v14  ;;  %v12019_v58 = vmax.f32 %v9218_v32, 0.0 }
 0x494   : > { %12010 = vst [vmem:[#allocation173_spill] sm:$0xff] %v9554_v39  ;;  %v9655_v32 = vadd.f32 %v9493_v3, %v9207_v37  ;;  %v9670_v3 = vadd.f32 %v9489_v19, %v9207_v37  ;;  %v9687_v37 = vadd.f32 %v9487_v6, %v9215_v45 }
 0x496   : > { %12028 = vst [vmem:[#allocation190_spill] sm:$0xff] %v9655_v32  ;;  %12033 = vst [vmem:[#allocation192_spill] sm:$0xff] %v9687_v37 }
 0x49a   : > { %v5540_v57 = vpop.permute.xlu1 %5539 }
 0x49b   : > { %v5542_v36 = vunpack.i.h.bf16 %v5540_v57  ;;  %v5541_v62 = vunpack.i.l.bf16 %v5540_v57  ;;  %v9568_v8 = vpop.permute.xlu0 %5544 }
 0x49c   : > { %v11313_v16 = vunpack.i.h.bf16 %v9568_v8  ;;  %v11315_v20 = vunpack.i.l.bf16 %v9568_v8 }
 0x49e   : > { %v3287_v57 = vsel %vm325_vm0, %v5542_v36, %v11313_v16  ;;  %v3286_v41 = vsel %vm325_vm0, %v5541_v62, %v11315_v20  ;;  %v9584_v56 = vpop.permute.xlu1 %5549  ;;  %v12017_v20 = vmax.f32 %v9566_v28, 0.0 }
 0x49f   : > { %12013 = vst [vmem:[#allocation184_spill] sm:$0xff] %v9584_v56  ;;  %v9588_v39 = vmax.f32 %v12014_v60, %v3287_v57  ;;  %v9592_v31 = vmax.f32 %v12015_v17, %v3286_v41  ;;  %v11316_v7 = vunpack.i.h.bf16 %v9584_v56  ;;  %v11317_v50 = vunpack.i.l.bf16 %v9584_v56  ;;  %v5555_v16 = vpop.permute.xlu0 %5554  ;;  %v12022_v17 = vld [vmem:[#allocation63_spill] sm:$0xff] }
 0x4a0   : > { %v5628_v60 = vpack.i.bf16 %v12018_v49, %v12017_v20  ;;  %v3294_v57 = vsel %vm325_vm0, %v5536_v42, %v5541_v62  ;;  %v3295_v41 = vsel %vm325_vm0, %v5537_v26, %v5542_v36  ;;  %v12020_v62 = vmax.f32 %v9229_v54, 0.0 }
 0x4a1   : > { %12016 = vst [vmem:[#allocation194_spill] sm:$0xff] %v9592_v31  ;;  %v3303_v2 = vsel %vm325_vm0, %v11316_v7, %v5537_v26  ;;  %v3302_v11 = vsel %vm325_vm0, %v11317_v50, %v5536_v42  ;;  %v5623_v14 = vpack.i.bf16 %v9588_v39, %v9592_v31  ;;  %v12023_v26 = vld [vmem:[#allocation62_spill] sm:$0xff]  ;;  %v5557_v42 = vunpack.i.h.bf16 %v5555_v16  ;;  %v12027_v31 = vld [vmem:[#allocation64_spill] sm:$0xff] }
 0x4a2   : > { %v9624_v29 = vmax.f32 %v12019_v58, %v3303_v2  ;;  %v9628_v36 = vmax.f32 %v12020_v62, %v3302_v11  ;;  %v9630_v20 = vpop.permute.xlu1 %5559  ;;  %v4613_v49 = vcombine.high %v12023_v26, %v12022_v17  ;;  %v4612_v7 = vcombine.low %v12023_v26, %v12022_v17 }
 0x4a3   : > { %12021 = vst [vmem:[#allocation195_spill] sm:$0xff] %v9630_v20  ;;  %v5556_v50 = vunpack.i.l.bf16 %v5555_v16  ;;  %v9638_v2 = vpop.permute.xlu0 %5564  ;;  %5624 = vrot.lane.b32.xlu1 %v5623_v14, %s5854_s30  ;;  %v12024_v54 = vmax.f32 %v9140_v23, 0.0  ;;  %v12025_v58 = vmax.f32 %v9145_v30, 0.0  ;;  %v12026_v16 = vld [vmem:[#allocation65_spill] sm:$0xff]  ;;  %v12029_v14 = vunpack.i.h.bf16 %v9630_v20 }
 0x4a4   : > { %v5613_v17 = vpack.i.bf16 %v9624_v29, %v9628_v36  ;;  %4214 = vmatprep.subr.bf16.mxu1 %v4613_v49  ;;  %v4615_v26 = vcombine.high %v12027_v31, %v12026_v16  ;;  %v12030_v30 = vunpack.i.l.bf16 %v9630_v20  ;;  %v11325_v49 = vmax.f32 %v9606_v21, 0.0 }
 0x4a5   : > { %v9643_v11 = vmax.f32 %v12024_v54, %v3294_v57  ;;  %v9647_v62 = vmax.f32 %v12025_v58, %v3295_v41  ;;  %v3305_v23 = vsel %vm325_vm0, %v12029_v14, %v5557_v42  ;;  %4215 = vmatpush1.bf16.msra.mxu1 %v4612_v7  ;;  %v4614_v41 = vcombine.low %v12027_v31, %v12026_v16 }
 0x4a6   : > { %v3304_v57 = vsel %vm325_vm0, %v12030_v30, %v5556_v50  ;;  %v12031_v54 = vmax.f32 %v9242_v51, 0.0  ;;  %v12032_v14 = vmax.f32 %v9263_v38, 0.0  ;;  %v5570_v56 = vpop.permute.xlu1 %5569  ;;  %5614 = vrot.lane.b32.xlu0 %v5613_v17, %s5854_s30  ;;  %4216 = vmatprep.subr.bf16.mxu1 %v4615_v26  ;;  %v9683_v7 = vadd.f32 %v9485_v15, %v9215_v45 }
 0x4a7   : > { %v5572_v19 = vunpack.i.h.bf16 %v5570_v56  ;;  %v5571_v51 = vunpack.i.l.bf16 %v5570_v56  ;;  %5629 = vrot.lane.b32.xlu1 %v5628_v60, %s5851_s28  ;;  %v5618_v17 = vpack.i.bf16 %v9647_v62, %v9643_v11  ;;  %v11326_v26 = vmax.f32 %v9598_v9, 0.0 }
 0x4a8   : > { %v9674_v58 = vmax.f32 %v12031_v54, %v3305_v23  ;;  %v9678_v20 = vmax.f32 %v12032_v14, %v3304_v57  ;;  %v9689_v23 = vpop.permute.xlu0 %5579  ;;  %v11331_v45 = vmax.f32 %v9655_v32, 0.0  ;;  %v9703_v56 = vadd.f32 %v9505_v46, %v9238_v35 }
 0x4a9   : > { %v11328_v38 = vunpack.i.h.bf16 %v9689_v23  ;;  %v11327_v30 = vunpack.i.l.bf16 %v9689_v23  ;;  %4217 = vmatpush1.bf16.msra.mxu1 %v4614_v41  ;;  %v3297_v60 = vsel %vm325_vm0, %v5557_v42, %v5572_v19  ;;  %v3296_v57 = vsel %vm325_vm0, %v5556_v50, %v5571_v51 }
 0x4aa   : > { %v5638_v15 = vpack.i.bf16 %v9674_v58, %v9678_v20  ;;  %v9709_v54 = vpop.permute.xlu1 %5574  ;;  %5619 = vrot.lane.b32.xlu0 %v5618_v17, %s5854_s30  ;;  %v5633_v41 = vpack.i.bf16 %v11325_v49, %v11326_v26  ;;  %v11330_v46 = vmax.f32 %v9687_v37, 0.0  ;;  %v12036_v14 = vmax.f32 %v9234_v34, 0.0 }
 0x4ab   : > { %12034 = vst [vmem:[#allocation188_spill] sm:$0xff] %v9709_v54  ;;  %v3288_v50 = vsel %vm325_vm0, %v5571_v51, %v11327_v30  ;;  %v3289_v42 = vsel %vm325_vm0, %v5572_v19, %v11328_v38  ;;  %v12035_v51 = vmax.f32 %v9223_v53, 0.0  ;;  %v12037_v38 = vmax.f32 %v9683_v7, 0.0 }
 0x4ac   : > { %v9718_v6 = vpop.permute.xlu0 %5584  ;;  %5639 = vrot.lane.b32.xlu1 %v5638_v15, %s5854_s30  ;;  %v5648_v26 = vpack.i.bf16 %v11331_v45, %v11330_v46  ;;  %v9737_v15 = vadd.f32 %v9501_v43, %v9258_v52  ;;  %v9745_v19 = vmax.f32 %v12036_v14, %v3296_v57  ;;  %v12038_v49 = vmax.f32 %v9670_v3, 0.0 }
 0x4ad   : > { %v9741_v30 = vmax.f32 %v12035_v51, %v3297_v60  ;;  %v5567_v46 = vunpack.i.h.bf16 %v9638_v2  ;;  %v5566_v43 = vunpack.i.l.bf16 %v9638_v2  ;;  %v12039_v53 = vmax.f32 %v9266_v63, 0.0 }
 0x4ae   : > { %v5643_v17 = vpack.i.bf16 %v12038_v49, %v12037_v38  ;;  %v5590_v45 = vpop.permute.xlu1 %5589  ;;  %5634 = vrot.lane.b32.xlu0 %v5633_v41, %s5851_s28  ;;  %v12041_v34 = vmax.f32 %v9283_v33, 0.0  ;;  %v12043_v38 = vunpack.i.h.bf16 %v9709_v54  ;;  %v12044_v41 = vunpack.i.l.bf16 %v9709_v54 }
 0x4af   : > { %v9757_v60 = vmax.f32 %v12039_v53, %v3288_v50  ;;  %v5592_v14 = vunpack.i.h.bf16 %v5590_v45  ;;  %v5591_v51 = vunpack.i.l.bf16 %v5590_v45  ;;  %v5586_v53 = vunpack.i.l.bf16 %v9718_v6 }
 0x4b0   : > { %v9761_v57 = vmax.f32 %v12041_v34, %v3289_v42  ;;  %v9763_v49 = vpop.permute.xlu0 %5599  ;;  %5649 = vrot.lane.b32.xlu1 %v5648_v26, %s5851_s28  ;;  %v3307_v2 = vsel %vm325_vm0, %v12043_v38, %v5567_v46  ;;  %v3306_v63 = vsel %vm325_vm0, %v12044_v41, %v5566_v43  ;;  %v5653_v42 = vpack.i.bf16 %v9741_v30, %v9745_v19 }
 0x4b1   : > { %12040 = vst [vmem:[#allocation178_spill] sm:$0xff] %v9757_v60  ;;  %v11335_v33 = vunpack.i.h.bf16 %v9763_v49  ;;  %v11334_v50 = vunpack.i.l.bf16 %v9763_v49  ;;  %v5587_v26 = vunpack.i.h.bf16 %v9718_v6  ;;  %v12046_v16 = vmax.f32 %v9304_v59, 0.0 }
 0x4b2   : > { %12042 = vst [vmem:[#allocation193_spill] sm:$0xff] %v9761_v57  ;;  %v9789_v41 = vpop.permute.xlu1 %5594  ;;  %5644 = vrot.lane.b32.xlu0 %v5643_v17, %s5851_s28  ;;  %v12047_v6 = vmax.f32 %v9324_v44, 0.0  ;;  %v12049_v32 = vmax.f32 %v9703_v56, 0.0  ;;  %v3299_v59 = vsel %vm325_vm0, %v5567_v46, %v5592_v14  ;;  %v5658_v44 = vpack.i.bf16 %v9761_v57, %v9757_v60 }
 0x4b3   : > { %v3290_v34 = vsel %vm325_vm0, %v5591_v51, %v11334_v50  ;;  %v3291_v38 = vsel %vm325_vm0, %v5592_v14, %v11335_v33  ;;  %12045 = vst [vmem:[#allocation174_spill] sm:$0xff] %v9789_v41  ;;  %v9794_v45 = vmax.f32 %v12046_v16, %v3307_v2  ;;  %v11343_v37 = vunpack.i.h.bf16 %v9789_v41 }
 0x4b4   : > { %v9798_v31 = vmax.f32 %v12047_v6, %v3306_v63  ;;  %v11339_v50 = vunpack.i.l.bf16 %v9789_v41  ;;  %5654 = vrot.lane.b32.xlu1 %v5653_v42, %s5854_s30  ;;  %v12048_v33 = vmax.f32 %v9737_v15, 0.0  ;;  %v3298_v16 = vsel %vm325_vm0, %v5566_v43, %v5591_v51 }
 0x4b5   : > { %v12050_v17 = vmax.f32 %v9329_v48, 0.0  ;;  %v12052_v63 = vmax.f32 %v9347_v24, 0.0  ;;  %v9832_v48 = vadd.f32 %v9509_v13, %v9238_v35  ;;  %v12058_v35 = vmax.f32 %v9380_v55, 0.0 }
 0x4b6   : > { %v5668_v54 = vpack.i.bf16 %v12049_v32, %v12048_v33  ;;  %v3309_v32 = vsel %vm325_vm0, %v11343_v37, %v5587_v26  ;;  %v3308_v46 = vsel %vm325_vm0, %v11339_v50, %v5586_v53  ;;  %v5605_v43 = vpop.permute.xlu1 %5604  ;;  %5659 = vrot.lane.b32.xlu0 %v5658_v44, %s5854_s30  ;;  %v5663_v51 = vpack.i.bf16 %v9794_v45, %v9798_v31  ;;  %v12074_v50 = vld [vmem:[#allocation176_spill] sm:$0xff] }
 0x4b7   : > { %v9815_v2 = vmax.f32 %v12050_v17, %v3290_v34  ;;  %v9819_v42 = vmax.f32 %v12052_v63, %v3291_v38  ;;  %12054 = vst [vmem:[#allocation179_spill] sm:$0xff] %v9832_v48  ;;  %v5607_v24 = vunpack.i.h.bf16 %v5605_v43  ;;  %v5606_v14 = vunpack.i.l.bf16 %v5605_v43 }
 0x4b8   : > { %5669 = vrot.lane.b32.xlu1 %v5668_v54, %s5851_s28  ;;  %v12055_v33 = vmax.f32 %v9251_v4, 0.0  ;;  %v12056_v38 = vmax.f32 %v9272_v10, 0.0  ;;  %v12057_v44 = vmax.f32 %v9366_v12, 0.0  ;;  %v9851_v13 = vmax.f32 %v12058_v35, %v3308_v46  ;;  %v9853_v54 = vpop.permute.xlu0 %5609  ;;  %v12065_v35 = vld [vmem:[#allocation175_spill] sm:$0xff] }
 0x4b9   : > { %12051 = vst [vmem:[#allocation183_spill] sm:$0xff] %v9815_v2  ;;  %12053 = vst [vmem:[#allocation186_spill] sm:$0xff] %v9819_v42  ;;  %v5683_v63 = vpack.i.bf16 %v9819_v42, %v9815_v2  ;;  %v9859_v4 = vadd.f32 %v9503_v61, %v9258_v52  ;;  %v3301_v10 = vsel %vm325_vm0, %v5587_v26, %v5607_v24  ;;  %v11348_v55 = vunpack.i.h.bf16 %v9853_v54 }
 0x4ba   : > { %v9839_v34 = vmax.f32 %v12055_v33, %v3299_v59  ;;  %v9843_v6 = vmax.f32 %v12056_v38, %v3298_v16  ;;  %v9847_v17 = vmax.f32 %v12057_v44, %v3309_v32  ;;  %v3300_v12 = vsel %vm325_vm0, %v5586_v53, %v5606_v14  ;;  %5664 = vrot.lane.b32.xlu0 %v5663_v51, %s5854_s30  ;;  %v12061_v32 = vld [vmem:[#allocation161_spill] sm:$0xff]  ;;  %v12063_v51 = vld [vmem:[#allocation167_spill] sm:$0xff] }
 0x4bb   : > { %12059 = vst [vmem:[#allocation181_spill] sm:$0xff] %v9859_v4  ;;  %v11347_v59 = vunpack.i.l.bf16 %v9853_v54  ;;  %v11340_v16 = vmax.f32 %v9832_v48, 0.0  ;;  %v9872_v52 = vadd.f32 %v9523_v22, %v9296_v40  ;;  %v3293_v53 = vsel %vm325_vm0, %v5607_v24, %v11348_v55 }
 0x4bc   : > { %5684 = vrot.lane.b32.xlu1 %v5683_v63, %s5854_s30  ;;  %v5673_v61 = vpack.i.bf16 %v9839_v34, %v9843_v6  ;;  %v5688_v26 = vpack.i.bf16 %v9847_v17, %v9851_v13  ;;  %v12062_v46 = vmax.f32 %v12061_v32, 0.0  ;;  %v12064_v33 = vmax.f32 %v12063_v51, 0.0 }
 0x4bd   : > { %12060 = vst [vmem:[#allocation185_spill] sm:$0xff] %v9872_v52  ;;  %v3292_v22 = vsel %vm325_vm0, %v5606_v14, %v11347_v59  ;;  %v11344_v44 = vmax.f32 %v9859_v4, 0.0  ;;  %v9898_v24 = vadd.f32 %v12065_v35, %v9320_v47  ;;  %v12067_v14 = vld [vmem:[#allocation187_spill] sm:$0xff]  ;;  %v11342_v35 = vmax.f32 %v9872_v52, 0.0 }
 0x4be   : > { %v9884_v43 = vmax.f32 %v12062_v46, %v3301_v10  ;;  %v9892_v38 = vmax.f32 %v12064_v33, %v3300_v12  ;;  %5674 = vrot.lane.b32.xlu0 %v5673_v61, %s5854_s30  ;;  %v9907_v10 = vadd.f32 %v12067_v14, %v9296_v40  ;;  %v12068_v12 = vld [vmem:[#allocation165_spill] sm:$0xff]  ;;  %v12071_v61 = vld [vmem:[#allocation180_spill] sm:$0xff]  ;;  %v12075_v14 = vld [vmem:[#allocation67_spill] sm:$0xff]  ;;  %v12079_v55 = vunpack.i.l.bf16 %v9568_v8 }
 0x4bf   : > { %12066 = vst [vmem:[#allocation198_spill] sm:$0xff] %v9898_v24  ;;  %v5678_v63 = vpack.i.bf16 %v11340_v16, %v11344_v44  ;;  %v12069_v32 = vmax.f32 %v12068_v12, 0.0  ;;  %v12072_v51 = vmax.f32 %v12071_v61, 0.0  ;;  %v9922_v16 = vadd.f32 %v12074_v50, %v9320_v47  ;;  %v12076_v12 = vld [vmem:[#allocation66_spill] sm:$0xff] }
 0x4c0   : > { %5689 = vrot.lane.b32.xlu1 %v5688_v26, %s5854_s30  ;;  %v5693_v26 = vpack.i.bf16 %v9884_v43, %v9892_v38  ;;  %v11341_v40 = vmax.f32 %v9898_v24, 0.0  ;;  %v12082_v44 = vld [vmem:[#allocation162_spill] sm:$0xff]  ;;  %v12086_v2 = vmax.f32 %v9537_v0, 0.0  ;;  %v12087_v24 = vld [vmem:[#allocation171_spill] sm:$0xff]  ;;  %v12093_v60 = vmax.f32 %v9533_v1, 0.0 }
 0x4c1   : > { %v9911_v46 = vmax.f32 %v12069_v32, %v3293_v53  ;;  %v9915_v33 = vmax.f32 %v12072_v51, %v3292_v22  ;;  %v11346_v53 = vmax.f32 %v9907_v10, 0.0  ;;  %v4617_v32 = vcombine.high %v12076_v12, %v12075_v14 }
 0x4c2   : > { %5679 = vrot.lane.b32.xlu0 %v5678_v63, %s5851_s28  ;;  %v5708_v47 = vpack.i.bf16 %v11342_v35, %v11341_v40  ;;  %v11345_v50 = vmax.f32 %v9922_v16, 0.0  ;;  %v12097_v41 = vmax.f32 %v12087_v24, 0.0  ;;  %v12099_v48 = vmax.f32 %v9560_v18, 0.0 }
 0x4c3   : > { %12070 = vst [vmem:[#allocation196_spill] sm:$0xff] %v9911_v46  ;;  %12073 = vst [vmem:[#allocation197_spill] sm:$0xff] %v9915_v33  ;;  %v5698_v22 = vpack.i.bf16 %v9911_v46, %v9915_v33  ;;  %4259 = vmatprep.subr.bf16.mxu1 %v4617_v32  ;;  %v12080_v32 = vld [vmem:[#allocation154_spill] sm:$0xff]  ;;  %v12083_v46 = vmax.f32 %v12082_v44, 0.0 }
 0x4c4   : > { %5694 = vrot.lane.b32.xlu1 %v5693_v26, %s5854_s30  ;;  %v5703_v63 = vpack.i.bf16 %v11346_v53, %v11345_v50  ;;  %v12078_v53 = vunpack.i.h.bf16 %v9568_v8  ;;  %v12085_v8 = vmax.f32 %v9529_v27, 0.0 }
 0x4c6   : > { %5699 = vrot.lane.b32.xlu0 %v5698_v22, %s5854_s30  ;;  %v12081_v22 = vmax.f32 %v12080_v32, 0.0 }
 0x4c8   : > { %5709 = vrot.lane.b32.xlu1 %v5708_v47, %s5851_s28 }
 0x4ca   : > { %5704 = vrot.lane.b32.xlu0 %v5703_v63, %s5851_s28 }
 0x515   : > { %v9944_v61 = vpop.permute.xlu1 %5624 }
 0x516   : > { %v12089_v44 = vunpack.i.h.bf16 %v9944_v61 }
 0x518   : > { %v9946_v51 = vpop.permute.xlu0 %5614 }
 0x519   : > { %12077 = vst [vmem:[#allocation201_spill] sm:$0xff] %v9946_v51  ;;  %v5630_v26 = vpop.permute.xlu1 %5629 }
 0x51a   : > { %v5632_v35 = vunpack.i.h.bf16 %v5630_v26  ;;  %v5631_v37 = vunpack.i.l.bf16 %v5630_v26 }
 0x51c   : > { %v3279_v59 = vsel %vm325_vm0, %v12078_v53, %v5632_v35  ;;  %v3278_v26 = vsel %vm325_vm0, %v12079_v55, %v5631_v37  ;;  %v5620_v40 = vpop.permute.xlu0 %5619  ;;  %v9978_v55 = vpack.i.bf16 %v12086_v2, %v12085_v8  ;;  %v12091_v53 = vunpack.i.l.bf16 %v9946_v51 }
 0x51d   : > { %v9965_v47 = vmax.f32 %v12081_v22, %v3279_v59  ;;  %v9969_v50 = vmax.f32 %v12083_v46, %v3278_v26  ;;  %v5622_v63 = vunpack.i.h.bf16 %v5620_v40  ;;  %v5621_v33 = vunpack.i.l.bf16 %v5620_v40  ;;  %v12088_v59 = vld [vmem:[#allocation173_spill] sm:$0xff] }
 0x51e   : > { %v9971_v42 = vpop.permute.xlu1 %5639  ;;  %v12090_v40 = vunpack.i.l.bf16 %v9944_v61  ;;  %v12092_v8 = vunpack.i.h.bf16 %v9946_v51 }
 0x51f   : > { %12084 = vst [vmem:[#allocation203_spill] sm:$0xff] %v9971_v42  ;;  %v3519_v46 = vsel %vm569_vm2, %v5622_v63, %v12089_v44  ;;  %v3526_v2 = vsel %vm569_vm2, %v12091_v53, %v5621_v33  ;;  %v5713_v57 = vpack.i.bf16 %v9965_v47, %v9969_v50 }
 0x520   : > { %v3518_v26 = vsel %vm569_vm2, %v5621_v33, %v12090_v40  ;;  %v3527_v22 = vsel %vm569_vm2, %v12092_v8, %v5622_v63  ;;  %v3542_v32 = vmax.f32 %v9628_v36, %v3526_v2  ;;  %v10000_v44 = vpop.permute.xlu0 %5634  ;;  %v12094_v33 = vmax.f32 %v9539_v25, 0.0  ;;  %v12095_v36 = vld [vmem:[#allocation177_spill] sm:$0xff]  ;;  %v12096_v2 = vld [vmem:[#allocation170_spill] sm:$0xff] }
 0x521   : > { %v3549_v52 = vmax.f32 %v9624_v29, %v3527_v22  ;;  %v3543_v40 = vmax.f32 %v9643_v11, %v3518_v26  ;;  %v11363_v51 = vunpack.i.h.bf16 %v10000_v44  ;;  %v11364_v63 = vunpack.i.l.bf16 %v10000_v44  ;;  %5714 = vrot.lane.b32.xlu0 %v5713_v57, %s5854_s30 }
 0x522   : > { %v5723_v53 = vpack.i.bf16 %v12094_v33, %v12093_v60  ;;  %v10011_v8 = vpop.permute.xlu1 %5649  ;;  %v3550_v29 = vmax.f32 %v9647_v62, %v3519_v46  ;;  %v12098_v11 = vmax.f32 %v12088_v59, 0.0  ;;  %v4616_v33 = vcombine.low %v12076_v12, %v12075_v14  ;;  %v12105_v12 = vld [vmem:[#allocation70_spill] sm:$0xff] }
 0x523   : > { %v3598_v4 = vpack.c.bf16 %v3549_v52, %v3542_v32  ;;  %v3271_v60 = vsel %vm325_vm0, %v5632_v35, %v11363_v51  ;;  %v3270_v62 = vsel %vm325_vm0, %v5631_v37, %v11364_v63  ;;  %v12100_v57 = vmax.f32 %v9566_v28, 0.0  ;;  %v12103_v35 = vld [vmem:[#allocation68_spill] sm:$0xff]  ;;  %v12104_v63 = vld [vmem:[#allocation71_spill] sm:$0xff] }
 0x524   : > { %v5733_v26 = vpack.i.bf16 %v12098_v11, %v12097_v41  ;;  %v3599_v46 = vpack.c.bf16 %v3550_v29, %v3543_v40  ;;  %v10033_v41 = vmax.f32 %v12099_v48, %v3271_v60  ;;  %v5645_v32 = vpop.permute.xlu0 %5644  ;;  %v12102_v11 = vld [vmem:[#allocation69_spill] sm:$0xff]  ;;  %v4621_v18 = vcombine.high %v12105_v12, %v12104_v63 }
 0x525   : > { %v10037_v52 = vmax.f32 %v12100_v57, %v3270_v62  ;;  %v4619_v51 = vcombine.high %v12103_v35, %v12102_v11  ;;  %v4618_v22 = vcombine.low %v12103_v35, %v12102_v11  ;;  %v5647_v37 = vunpack.i.h.bf16 %v5645_v32  ;;  %5724 = vrot.lane.b32.xlu0 %v5723_v53, %s5851_s28 }
 0x526   : > { %v5646_v40 = vunpack.i.l.bf16 %v5645_v32  ;;  %4218 = vmatprep.mubr.bf16.mxu1 %v3599_v46  ;;  %v5655_v29 = vpop.permute.xlu1 %5654  ;;  %v4620_v48 = vcombine.low %v12105_v12, %v12104_v63  ;;  %v11372_v28 = vunpack.i.h.bf16 %v10011_v8  ;;  %v12106_v11 = vunpack.i.h.bf16 %v9689_v23  ;;  %v12108_v32 = vld [vmem:[#allocation163_spill] sm:$0xff]  ;;  %v12110_v63 = vld [vmem:[#allocation156_spill] sm:$0xff] }
 0x527   : > { %12101 = vst [vmem:[#allocation164_spill] sm:$0xff] %v10037_v52  ;;  %v5657_v60 = vunpack.i.h.bf16 %v5655_v29  ;;  %v5656_v62 = vunpack.i.l.bf16 %v5655_v29  ;;  %4219 = vmatmul.mubr.bf16.vlgmr.msra.gmra.mrb[32].mxu1 %v3598_v4  ;;  %v5718_v57 = vpack.i.bf16 %v10033_v41, %v10037_v52  ;;  %v12107_v12 = vunpack.i.l.bf16 %v9689_v23 }
 0x528   : > { %v3281_v14 = vsel %vm325_vm0, %v12106_v11, %v5647_v37  ;;  %4260 = vmatpush1.bf16.msra.mxu1 %v4616_v33  ;;  %v3273_v53 = vsel %vm325_vm0, %v5647_v37, %v11372_v28  ;;  %v12109_v46 = vmax.f32 %v12108_v32, 0.0  ;;  %v12111_v52 = vmax.f32 %v12110_v63, 0.0  ;;  %v10074_v23 = vpop.permute.xlu0 %5659 }
 0x529   : > { %v3280_v29 = vsel %vm325_vm0, %v12107_v12, %v5646_v40  ;;  %5719 = vrot.lane.b32.xlu1 %v5718_v57, %s5854_s30  ;;  %v12112_v12 = vunpack.i.l.bf16 %v9971_v42  ;;  %v12113_v4 = vunpack.i.h.bf16 %v9971_v42  ;;  %v11374_v63 = vunpack.i.l.bf16 %v10074_v23  ;;  %4261 = vmatprep.subr.bf16.mxu1 %v4619_v51 }
 0x52a   : > { %v10068_v35 = vmax.f32 %v12109_v46, %v3281_v14  ;;  %v10072_v11 = vmax.f32 %v12111_v52, %v3280_v29  ;;  %v11373_v14 = vunpack.i.h.bf16 %v10074_v23  ;;  %v10087_v52 = vpop.permute.xlu1 %5669  ;;  %v12114_v32 = vunpack.i.l.bf16 %v10011_v8  ;;  %5734 = vrot.lane.b32.xlu0 %v5733_v26, %s5851_s28 }
 0x52b   : > { %v3528_v33 = vsel %vm569_vm2, %v12112_v12, %v5656_v62  ;;  %v3529_v37 = vsel %vm569_vm2, %v12113_v4, %v5657_v60  ;;  %v11375_v46 = vunpack.i.h.bf16 %v10087_v52  ;;  %v11376_v29 = vunpack.i.l.bf16 %v10087_v52 }
 0x52c   : > { %v3272_v57 = vsel %vm325_vm0, %v5646_v40, %v12114_v32  ;;  %v5743_v4 = vpack.i.bf16 %v10068_v35, %v10072_v11  ;;  %v3521_v12 = vsel %vm569_vm2, %v5657_v60, %v11373_v14  ;;  %v3520_v51 = vsel %vm569_vm2, %v5656_v62, %v11374_v63  ;;  %4262 = vmatpush1.bf16.msra.mxu1 %v4618_v22  ;;  %v10120_v62 = vpop.permute.xlu0 %5664  ;;  %v12117_v22 = vld [vmem:[#allocation169_spill] sm:$0xff] }
 0x52d   : > { %v3556_v40 = vmax.f32 %v9678_v20, %v3528_v33  ;;  %v3563_v32 = vmax.f32 %v9674_v58, %v3529_v37  ;;  %v12115_v26 = vunpack.i.h.bf16 %v9763_v49  ;;  %v12116_v60 = vunpack.i.l.bf16 %v9763_v49  ;;  %5729 = vrot.lane.b32.xlu1 %v9978_v55, %s5851_s28  ;;  %4263 = vmatprep.subr.bf16.mxu1 %v4621_v18 }
 0x52e   : > { %v3557_v20 = vmax.f32 %v9745_v19, %v3520_v51  ;;  %v3564_v58 = vmax.f32 %v9741_v30, %v3521_v12  ;;  %v12118_v33 = vmax.f32 %v12117_v22, 0.0  ;;  %v10134_v49 = vpop.permute.xlu1 %5684  ;;  %v12123_v55 = vmax.f32 %v12095_v36, 0.0  ;;  %5744 = vrot.lane.b32.xlu0 %v5743_v4, %s5854_s30 }
 0x52f   : > { %v3283_v28 = vsel %vm325_vm0, %v12115_v26, %v11375_v46  ;;  %v3282_v14 = vsel %vm325_vm0, %v12116_v60, %v11376_v29  ;;  %v12119_v26 = vld [vmem:[#allocation172_spill] sm:$0xff]  ;;  %v12121_v60 = vld [vmem:[#allocation73_spill] sm:$0xff]  ;;  %v12124_v19 = vmax.f32 %v12096_v2, 0.0  ;;  %v12125_v30 = vmax.f32 %v9670_v3, 0.0 }
 0x530   : > { %v10128_v37 = vmax.f32 %v12118_v33, %v3283_v28  ;;  %v12120_v63 = vmax.f32 %v12119_v26, 0.0  ;;  %v12122_v29 = vld [vmem:[#allocation72_spill] sm:$0xff]  ;;  %v12126_v28 = vmax.f32 %v9683_v7, 0.0  ;;  %4264 = vmatpush1.bf16.msra.mxu1 %v4620_v48  ;;  %v11385_v26 = vunpack.i.h.bf16 %v10120_v62  ;;  %v12127_v7 = vld [vmem:[#allocation75_spill] sm:$0xff] }
 0x531   : > { %v4623_v42 = vcombine.high %v12122_v29, %v12121_v60  ;;  %v5738_v51 = vpack.i.bf16 %v12124_v19, %v12123_v55  ;;  %v10144_v12 = vmax.f32 %v12125_v30, %v3273_v53  ;;  %v4622_v33 = vcombine.low %v12122_v29, %v12121_v60  ;;  %v5675_v53 = vpop.permute.xlu0 %5674  ;;  %v12130_v30 = vld [vmem:[#allocation76_spill] sm:$0xff] }
 0x532   : > { %v10132_v46 = vmax.f32 %v12120_v63, %v3282_v14  ;;  %v10148_v22 = vmax.f32 %v12126_v28, %v3272_v57  ;;  %v3606_v14 = vpack.c.bf16 %v3564_v58, %v3557_v20  ;;  %v3605_v63 = vpack.c.bf16 %v3563_v32, %v3556_v40  ;;  %v12128_v57 = vld [vmem:[#allocation74_spill] sm:$0xff]  ;;  %v10162_v32 = vpop.permute.xlu1 %5689 }
 0x533   : > { %v11383_v3 = vunpack.i.l.bf16 %v10120_v62  ;;  %5739 = vrot.lane.b32.xlu1 %v5738_v51, %s5851_s28  ;;  %v4625_v4 = vcombine.high %v12128_v57, %v12127_v7  ;;  %v11379_v20 = vunpack.i.h.bf16 %v10134_v49  ;;  %v11381_v58 = vunpack.i.l.bf16 %v10134_v49  ;;  %4265 = vmatprep.subr.bf16.mxu1 %v4623_v42  ;;  %v12129_v51 = vld [vmem:[#allocation77_spill] sm:$0xff] }
 0x534   : > { %v5753_v18 = vpack.i.bf16 %v10128_v37, %v10132_v46  ;;  %4228 = vmatprep.mubr.bf16.mxu1 %v3606_v14  ;;  %v5677_v40 = vunpack.i.h.bf16 %v5675_v53  ;;  %v5676_v48 = vunpack.i.l.bf16 %v5675_v53  ;;  %v5748_v55 = vpack.i.bf16 %v10144_v12, %v10148_v22  ;;  %4266 = vmatpush1.bf16.msra.mxu1 %v4622_v33 }
 0x535   : > { %4229 = vmatmul.mubr.bf16.gmra.mrb[36].mxu1 %v3605_v63  ;;  %v4624_v19 = vcombine.low %v12128_v57, %v12127_v7  ;;  %v4627_v28 = vcombine.high %v12130_v30, %v12129_v51  ;;  %v10187_v53 = vpop.permute.xlu0 %5679  ;;  %4267 = vmatprep.subr.bf16.mxu1 %v4625_v4  ;;  %v4626_v4 = vcombine.low %v12130_v30, %v12129_v51  ;;  %v12169_v30 = vunpack.i.l.bf16 %v10000_v44  ;;  %v12181_v51 = vld [vmem:[#allocation188_spill] sm:$0xff] }
 0x536   : > { %5754 = vrot.lane.b32.xlu0 %v5753_v18, %s5854_s30  ;;  %v3523_v14 = vsel %vm569_vm2, %v5677_v40, %v11379_v20  ;;  %v3522_v42 = vsel %vm569_vm2, %v5676_v48, %v11381_v58  ;;  %v3530_v18 = vsel %vm569_vm2, %v11383_v3, %v5676_v48  ;;  %v3531_v63 = vsel %vm569_vm2, %v11385_v26, %v5677_v40  ;;  %v5695_v40 = vpop.permute.xlu1 %5694 }
 0x537   : > { %5749 = vrot.lane.b32.xlu1 %v5748_v55, %s5854_s30  ;;  %v3571_v20 = vmax.f32 %v9843_v6, %v3522_v42  ;;  %v3578_v7 = vmax.f32 %v9839_v34, %v3523_v14  ;;  %v3570_v58 = vmax.f32 %v9798_v31, %v3530_v18  ;;  %v3577_v29 = vmax.f32 %v9794_v45, %v3531_v63 }
 0x538   : > { %v11388_v48 = vunpack.i.h.bf16 %v10162_v32  ;;  %v11387_v3 = vunpack.i.l.bf16 %v10162_v32  ;;  %v11393_v57 = vunpack.i.h.bf16 %v10187_v53  ;;  %v11394_v33 = vunpack.i.l.bf16 %v10187_v53  ;;  %4268 = vmatpush1.bf16.msra.mxu1 %v4624_v19 }
 0x539   : > { %v5697_v26 = vunpack.i.h.bf16 %v5695_v40  ;;  %v5696_v55 = vunpack.i.l.bf16 %v5695_v40  ;;  %v3613_v60 = vpack.c.bf16 %v3578_v7, %v3571_v20  ;;  %v3612_v6 = vpack.c.bf16 %v3577_v29, %v3570_v58  ;;  %v12133_v7 = vld [vmem:[#allocation79_spill] sm:$0xff]  ;;  %v12134_v29 = vld [vmem:[#allocation78_spill] sm:$0xff]  ;;  %v10230_v40 = vpop.permute.xlu0 %5699  ;;  %4269 = vmatprep.subr.bf16.mxu1 %v4627_v28 }
 0x53a   : > { %v12131_v31 = vunpack.i.h.bf16 %v10087_v52  ;;  %v12132_v34 = vunpack.i.l.bf16 %v10087_v52  ;;  %v4629_v20 = vcombine.high %v12134_v29, %v12133_v7  ;;  %v12135_v58 = vmax.f32 %v9703_v56, 0.0 }
 0x53b   : > { %v12136_v18 = vmax.f32 %v9737_v15, 0.0  ;;  %v3532_v52 = vsel %vm569_vm2, %v11387_v3, %v5696_v55  ;;  %v3533_v19 = vsel %vm569_vm2, %v11388_v48, %v5697_v26  ;;  %4238 = vmatprep.mubr.bf16.mxu1 %v3613_v60  ;;  %v11390_v56 = vunpack.i.h.bf16 %v10230_v40  ;;  %v10234_v15 = vpop.permute.xlu1 %5709 }
 0x53c   : > { %v3275_v45 = vsel %vm325_vm0, %v12131_v31, %v11393_v57  ;;  %v3274_v14 = vsel %vm325_vm0, %v12132_v34, %v11394_v33  ;;  %v11389_v31 = vunpack.i.l.bf16 %v10230_v40  ;;  %v3584_v34 = vmax.f32 %v9851_v13, %v3532_v52  ;;  %4270 = vmatpush1.bf16.msra.mxu1 %v4626_v4  ;;  %v12138_v52 = vld [vmem:[#allocation80_spill] sm:$0xff] }
 0x53d   : > { %v10216_v42 = vmax.f32 %v12135_v58, %v3275_v45  ;;  %v10220_v63 = vmax.f32 %v12136_v18, %v3274_v14  ;;  %4239 = vmatmul.mubr.bf16.gmra.mrb[40].mxu1 %v3612_v6  ;;  %v3591_v14 = vmax.f32 %v9847_v17, %v3533_v19  ;;  %v3525_v60 = vsel %vm569_vm2, %v5697_v26, %v11390_v56  ;;  %v5705_v58 = vpop.permute.xlu0 %5704  ;;  %v12137_v18 = vld [vmem:[#allocation81_spill] sm:$0xff] }
 0x53e   : > { %v3524_v6 = vsel %vm569_vm2, %v5696_v55, %v11389_v31  ;;  %v4628_v28 = vcombine.low %v12134_v29, %v12133_v7  ;;  %v3592_v17 = vmax.f32 %v9884_v43, %v3525_v60  ;;  %4271 = vmatprep.subr.bf16.mxu1 %v4629_v20  ;;  %v4631_v26 = vcombine.high %v12138_v52, %v12137_v18  ;;  %v12141_v60 = vld [vmem:[#allocation168_spill] sm:$0xff] }
 0x53f   : > { %v5758_v45 = vpack.i.bf16 %v10216_v42, %v10220_v63  ;;  %v3585_v13 = vmax.f32 %v9892_v38, %v3524_v6  ;;  %v11391_v19 = vunpack.i.h.bf16 %v10234_v15  ;;  %v11392_v3 = vunpack.i.l.bf16 %v10234_v15 }
 0x540   : > { %v5707_v55 = vunpack.i.h.bf16 %v5705_v58  ;;  %v5706_v4 = vunpack.i.l.bf16 %v5705_v58  ;;  %v3619_v31 = vpack.c.bf16 %v3591_v14, %v3584_v34  ;;  %v4630_v56 = vcombine.low %v12138_v52, %v12137_v18  ;;  %4272 = vmatpush1.bf16.msra.mxu1 %v4628_v28  ;;  %v12148_v28 = vld [vmem:[#allocation82_spill] sm:$0xff] }
 0x541   : > { %5759 = vrot.lane.b32.xlu1 %v5758_v45, %s5854_s30  ;;  %v3620_v48 = vpack.c.bf16 %v3592_v17, %v3585_v13  ;;  %v12139_v38 = vunpack.i.h.bf16 %v9853_v54  ;;  %v12140_v34 = vunpack.i.l.bf16 %v9853_v54  ;;  %v12142_v6 = vmax.f32 %v12141_v60, 0.0  ;;  %4273 = vmatprep.subr.bf16.mxu1 %v4631_v26  ;;  %v12147_v54 = vld [vmem:[#allocation83_spill] sm:$0xff]  ;;  %v12154_v60 = vld [vmem:[#allocation88_spill] sm:$0xff] }
 0x542   : > { %v3277_v43 = vsel %vm325_vm0, %v5707_v55, %v11391_v19  ;;  %v3276_v45 = vsel %vm325_vm0, %v5706_v4, %v11392_v3  ;;  %v12143_v13 = vmax.f32 %v9907_v10, 0.0  ;;  %v12146_v3 = vmax.f32 %v9922_v16, 0.0  ;;  %v12149_v16 = vld [vmem:[#allocation85_spill] sm:$0xff]  ;;  %v12151_v26 = vld [vmem:[#allocation87_spill] sm:$0xff] }
 0x543   : > { %v3285_v20 = vsel %vm325_vm0, %v12139_v38, %v5707_v55  ;;  %v3284_v14 = vsel %vm325_vm0, %v12140_v34, %v5706_v4  ;;  %v12144_v55 = vld [vmem:[#allocation166_spill] sm:$0xff]  ;;  %4248 = vmatprep.mubr.bf16.mxu1 %v3620_v48  ;;  %v4633_v4 = vcombine.high %v12148_v28, %v12147_v54  ;;  %v12165_v18 = vunpack.i.h.bf16 %v9944_v61 }
 0x544   : > { %v10277_v58 = vmax.f32 %v12142_v6, %v3285_v20  ;;  %v10281_v17 = vmax.f32 %v12143_v13, %v3277_v43  ;;  %v12145_v38 = vmax.f32 %v12144_v55, 0.0  ;;  %v10289_v57 = vmax.f32 %v12146_v3, %v3276_v45  ;;  %4274 = vmatpush1.bf16.msra.mxu1 %v4630_v56  ;;  %v12150_v3 = vld [vmem:[#allocation84_spill] sm:$0xff]  ;;  %v12152_v45 = vld [vmem:[#allocation86_spill] sm:$0xff]  ;;  %v12155_v55 = vld [vmem:[#allocation91_spill] sm:$0xff] }
 0x545   : > { %4249 = vmatmul.mubr.bf16.gmra.mrb[44].mxu1 %v3619_v31  ;;  %v4632_v43 = vcombine.low %v12148_v28, %v12147_v54  ;;  %v4635_v48 = vcombine.high %v12150_v3, %v12149_v16  ;;  %4275 = vmatprep.subr.bf16.mxu1 %v4633_v4  ;;  %v4634_v31 = vcombine.low %v12150_v3, %v12149_v16  ;;  %v12162_v3 = vld [vmem:[#allocation96_spill] sm:$0xff]  ;;  %v12182_v52 = vunpack.i.h.bf16 %v12181_v51 }
 0x546   : > { %v10285_v19 = vmax.f32 %v12145_v38, %v3284_v14  ;;  %v5768_v10 = vpack.i.bf16 %v10281_v17, %v10289_v57  ;;  %v4637_v34 = vcombine.high %v12152_v45, %v12151_v26  ;;  %v4636_v56 = vcombine.low %v12152_v45, %v12151_v26  ;;  %v12153_v14 = vld [vmem:[#allocation89_spill] sm:$0xff]  ;;  %v12156_v38 = vld [vmem:[#allocation90_spill] sm:$0xff] }
 0x547   : > { %v4639_v6 = vcombine.high %v12154_v60, %v12153_v14  ;;  %v4638_v13 = vcombine.low %v12154_v60, %v12153_v14  ;;  %v4641_v4 = vcombine.high %v12156_v38, %v12155_v55  ;;  %v12164_v14 = vld [vmem:[#allocation98_spill] sm:$0xff] }
 0x548   : > { %v5763_v20 = vpack.i.bf16 %v10277_v58, %v10285_v19  ;;  %5769 = vrot.lane.b32.xlu1 %v5768_v10, %s5854_s30  ;;  %4276 = vmatpush1.bf16.msra.mxu1 %v4632_v43  ;;  %v12157_v10 = vld [vmem:[#allocation93_spill] sm:$0xff]  ;;  %v12158_v43 = vld [vmem:[#allocation92_spill] sm:$0xff] }
 0x549   : > { %4277 = vmatprep.subr.bf16.mxu1 %v4635_v48  ;;  %v4643_v48 = vcombine.high %v12158_v43, %v12157_v10 }
 0x54a   : > { %5764 = vrot.lane.b32.xlu0 %v5763_v20, %s5854_s30  ;;  %v4640_v20 = vcombine.low %v12156_v38, %v12155_v55 }
 0x54c   : > { %4278 = vmatpush1.bf16.msra.mxu1 %v4634_v31  ;;  %v4642_v31 = vcombine.low %v12158_v43, %v12157_v10 }
 0x54d   : > { %4279 = vmatprep.subr.bf16.mxu1 %v4637_v34  ;;  %v12159_v34 = vld [vmem:[#allocation95_spill] sm:$0xff] }
 0x550   : > { %4280 = vmatpush1.bf16.msra.mxu1 %v4636_v56  ;;  %v12160_v56 = vld [vmem:[#allocation94_spill] sm:$0xff] }
 0x551   : > { %4281 = vmatprep.subr.bf16.mxu1 %v4639_v6  ;;  %v4645_v33 = vcombine.high %v12160_v56, %v12159_v34  ;;  %v4644_v6 = vcombine.low %v12160_v56, %v12159_v34 }
 0x554   : > { %4282 = vmatpush1.bf16.msra.mxu1 %v4638_v13  ;;  %v12161_v13 = vld [vmem:[#allocation97_spill] sm:$0xff] }
 0x555   : > { %4283 = vmatprep.subr.bf16.mxu1 %v4641_v4  ;;  %v4647_v7 = vcombine.high %v12162_v3, %v12161_v13  ;;  %v4646_v4 = vcombine.low %v12162_v3, %v12161_v13 }
 0x558   : > { %4284 = vmatpush1.bf16.msra.mxu1 %v4640_v20  ;;  %v12163_v20 = vld [vmem:[#allocation99_spill] sm:$0xff] }
 0x559   : > { %4285 = vmatprep.subr.bf16.mxu1 %v4643_v48  ;;  %v4649_v10 = vcombine.high %v12164_v14, %v12163_v20 }
 0x55c   : > { %4286 = vmatpush1.bf16.msra.mxu1 %v4642_v31 }
 0x55d   : > { %4287 = vmatprep.subr.bf16.mxu1 %v4645_v33 }
 0x560   : > { %4288 = vmatpush1.bf16.msra.mxu1 %v4644_v6 }
 0x561   : > { %4289 = vmatprep.subr.bf16.mxu1 %v4647_v7  ;;  %v12166_v7 = vunpack.i.l.bf16 %v9944_v61 }
 0x564   : > { %4290 = vmatpush1.bf16.msra.mxu1 %v4646_v4 }
 0x565   : > { %4332 = vmatprep.subr.bf16.mxu1 %v4649_v10  ;;  %v12167_v10 = vld [vmem:[#allocation184_spill] sm:$0xff] }
 0x566   : > { %v12168_v13 = vunpack.i.h.bf16 %v12167_v10  ;;  %v12171_v61 = vunpack.i.l.bf16 %v12167_v10 }
 0x593   : > { %v5715_v48 = vpop.permute.xlu0 %5714 }
 0x594   : > { %v5717_v16 = vunpack.i.h.bf16 %v5715_v48  ;;  %v5716_v31 = vunpack.i.l.bf16 %v5715_v48 }
 0x596   : > { %v3511_v33 = vsel %vm569_vm2, %v12165_v18, %v5717_v16  ;;  %v3510_v3 = vsel %vm569_vm2, %v12166_v7, %v5716_v31  ;;  %v12172_v7 = vmax.f32 %v9539_v25, 0.0 }
 0x597   : > { %v5725_v26 = vpop.permute.xlu0 %5724  ;;  %v3551_v29 = vmax.f32 %v9588_v39, %v3511_v33 }
 0x598   : > { %v5727_v28 = vunpack.i.h.bf16 %v5725_v26  ;;  %v5726_v6 = vunpack.i.l.bf16 %v5725_v26  ;;  %v12170_v26 = vunpack.i.h.bf16 %v10000_v44  ;;  %v12175_v44 = vmax.f32 %v9606_v21, 0.0 }
 0x59a   : > { %v3311_v48 = vsel %vm325_vm0, %v5727_v28, %v12168_v13  ;;  %v3262_v18 = vsel %vm325_vm0, %v12169_v30, %v5726_v6  ;;  %v3263_v39 = vsel %vm325_vm0, %v12170_v26, %v5727_v28  ;;  %v3310_v33 = vsel %vm325_vm0, %v5726_v6, %v12171_v61  ;;  %v12176_v26 = vld [vmem:[#allocation194_spill] sm:$0xff] }
 0x59b   : > { %v10340_v4 = vpop.permute.xlu1 %5719  ;;  %v10360_v34 = vmax.f32 %v12172_v7, %v3311_v48  ;;  %v12173_v13 = vmax.f32 %v9598_v9, 0.0  ;;  %v12174_v30 = vmax.f32 %v9533_v1, 0.0  ;;  %v10372_v28 = vmax.f32 %v12175_v44, %v3263_v39  ;;  %v12177_v7 = vld [vmem:[#allocation101_spill] sm:$0xff] }
 0x59c   : > { %v5735_v10 = vpop.permute.xlu0 %5734  ;;  %v3544_v45 = vmax.f32 %v12176_v26, %v3510_v3  ;;  %v11411_v6 = vunpack.i.h.bf16 %v10340_v4  ;;  %v11414_v25 = vunpack.i.l.bf16 %v10340_v4  ;;  %v12180_v26 = vld [vmem:[#allocation102_spill] sm:$0xff]  ;;  %v12184_v44 = vunpack.i.l.bf16 %v12181_v51 }
 0x59d   : > { %v10364_v38 = vmax.f32 %v12173_v13, %v3262_v18  ;;  %v10368_v43 = vmax.f32 %v12174_v30, %v3310_v33  ;;  %v5737_v48 = vunpack.i.h.bf16 %v5735_v10  ;;  %v5736_v61 = vunpack.i.l.bf16 %v5735_v10  ;;  %v12178_v13 = vld [vmem:[#allocation100_spill] sm:$0xff]  ;;  %v12179_v10 = vld [vmem:[#allocation103_spill] sm:$0xff] }
 0x59e   : > { %v3503_v21 = vsel %vm569_vm2, %v5717_v16, %v11411_v6  ;;  %v3502_v3 = vsel %vm569_vm2, %v5716_v31, %v11414_v25  ;;  %v4648_v33 = vcombine.low %v12164_v14, %v12163_v20  ;;  %v4651_v30 = vcombine.high %v12178_v13, %v12177_v7 }
 0x59f   : > { %v5730_v9 = vpop.permute.xlu1 %5729  ;;  %v5778_v18 = vpack.i.bf16 %v10360_v34, %v10368_v43  ;;  %v5773_v1 = vpack.i.bf16 %v10372_v28, %v10364_v38  ;;  %v3600_v6 = vpack.c.bf16 %v3551_v29, %v3544_v45  ;;  %v3315_v31 = vsel %vm325_vm0, %v5737_v48, %v12182_v52 }
 0x5a0   : > { %v5745_v39 = vpop.permute.xlu0 %5744  ;;  %v5732_v25 = vunpack.i.h.bf16 %v5730_v9  ;;  %v12183_v14 = vunpack.i.l.bf16 %v10187_v53  ;;  %v3314_v16 = vsel %vm325_vm0, %v5736_v61, %v12184_v44  ;;  %v3545_v45 = vmax.f32 %v9969_v50, %v3502_v3 }
 0x5a1   : > { %5779 = vrot.lane.b32.xlu1 %v5778_v18, %s5854_s30  ;;  %v5731_v18 = vunpack.i.l.bf16 %v5730_v9  ;;  %5774 = vrot.lane.b32.xlu0 %v5773_v1, %s5854_s30  ;;  %v3552_v54 = vmax.f32 %v9965_v47, %v3503_v21  ;;  %v12185_v52 = vunpack.i.h.bf16 %v10011_v8  ;;  %v12186_v1 = vld [vmem:[#allocation195_spill] sm:$0xff]  ;;  %v12188_v51 = vunpack.i.l.bf16 %v10011_v8 }
 0x5a2   : > { %v3266_v20 = vsel %vm325_vm0, %v12183_v14, %v5736_v61  ;;  %v12187_v55 = vunpack.i.h.bf16 %v12186_v1  ;;  %v12189_v44 = vunpack.i.l.bf16 %v12186_v1  ;;  %v12190_v47 = vmax.f32 %v9537_v0, 0.0 }
 0x5a3   : > { %v3265_v9 = vsel %vm325_vm0, %v12185_v52, %v5732_v25  ;;  %v3264_v61 = vsel %vm325_vm0, %v12188_v51, %v5731_v18  ;;  %v12191_v3 = vmax.f32 %v9529_v27, 0.0  ;;  %v5747_v56 = vunpack.i.h.bf16 %v5745_v39  ;;  %v12196_v27 = vld [vmem:[#allocation192_spill] sm:$0xff] }
 0x5a4   : > { %v3313_v14 = vsel %vm325_vm0, %v5732_v25, %v12187_v55  ;;  %v3312_v50 = vsel %vm325_vm0, %v5731_v18, %v12189_v44  ;;  %v5746_v55 = vunpack.i.l.bf16 %v5745_v39  ;;  %v12192_v8 = vmax.f32 %v12088_v59, 0.0 }
 0x5a5   : > { %v5740_v29 = vpop.permute.xlu1 %5739  ;;  %v10431_v21 = vmax.f32 %v12190_v47, %v3313_v14  ;;  %v10435_v52 = vmax.f32 %v12191_v3, %v3312_v50  ;;  %v12193_v51 = vunpack.i.h.bf16 %v10187_v53  ;;  %v12194_v14 = vld [vmem:[#allocation190_spill] sm:$0xff]  ;;  %v12197_v50 = vmax.f32 %v12196_v27, 0.0 }
 0x5a6   : > { %v10439_v25 = vmax.f32 %v12192_v8, %v3315_v31  ;;  %v5742_v18 = vunpack.i.h.bf16 %v5740_v29  ;;  %v5741_v44 = vunpack.i.l.bf16 %v5740_v29  ;;  %v12195_v47 = vmax.f32 %v12194_v14, 0.0  ;;  %v12198_v31 = vld [vmem:[#allocation181_spill] sm:$0xff] }
 0x5a7   : > { %v3267_v1 = vsel %vm325_vm0, %v12193_v51, %v5737_v48  ;;  %v10451_v3 = vmax.f32 %v12197_v50, %v3264_v61  ;;  %v3601_v39 = vpack.c.bf16 %v3552_v54, %v3545_v45  ;;  %v5788_v53 = vpack.i.bf16 %v10431_v21, %v10435_v52 }
 0x5a8   : > { %v5755_v0 = vpop.permute.xlu0 %5754  ;;  %v10447_v60 = vmax.f32 %v12195_v47, %v3265_v9  ;;  %v12199_v8 = vmax.f32 %v12198_v31, 0.0  ;;  %v12200_v29 = vmax.f32 %v12087_v24, 0.0  ;;  %v12201_v9 = vld [vmem:[#allocation174_spill] sm:$0xff]  ;;  %v12204_v47 = vld [vmem:[#allocation179_spill] sm:$0xff] }
 0x5a9   : > { %v10453_v59 = vpop.permute.xlu1 %5749  ;;  %v12202_v14 = vunpack.i.h.bf16 %v12201_v9  ;;  %v12203_v54 = vunpack.i.l.bf16 %v12201_v9  ;;  %v12205_v27 = vmax.f32 %v12204_v47, 0.0  ;;  %4291 = vmatprep.mubr.bf16.mxu1 %v3601_v39  ;;  %5789 = vrot.lane.b32.xlu1 %v5788_v53, %s5854_s30  ;;  %v12210_v39 = vunpack.i.l.bf16 %v10234_v15 }
 0x5aa   : > { %v10459_v48 = vmax.f32 %v12199_v8, %v3266_v20  ;;  %v10463_v51 = vmax.f32 %v12200_v29, %v3314_v16  ;;  %v12206_v20 = vunpack.i.h.bf16 %v10074_v23  ;;  %v12207_v16 = vunpack.i.l.bf16 %v10074_v23  ;;  %4292 = vmatmul.mubr.bf16.vlgmr.msra.gmra.mrb[32].mxu1 %v3600_v6 }
 0x5ab   : > { %v3317_v61 = vsel %vm325_vm0, %v5742_v18, %v12202_v14  ;;  %v3316_v45 = vsel %vm325_vm0, %v5741_v44, %v12203_v54  ;;  %v10475_v50 = vmax.f32 %v12205_v27, %v3267_v1  ;;  %v5757_v8 = vunpack.i.h.bf16 %v5755_v0  ;;  %4333 = vmatpush1.bf16.msra.mxu1 %v4648_v33 }
 0x5ac   : > { %v3513_v24 = vsel %vm569_vm2, %v12206_v20, %v5747_v56  ;;  %v3512_v31 = vsel %vm569_vm2, %v12207_v16, %v5746_v55  ;;  %v12208_v29 = vunpack.i.h.bf16 %v10234_v15  ;;  %v5756_v14 = vunpack.i.l.bf16 %v5755_v0  ;;  %4334 = vmatprep.subr.bf16.mxu1 %v4651_v30 }
 0x5ad   : > { %v11426_v1 = vunpack.i.h.bf16 %v10453_v59  ;;  %v11423_v54 = vunpack.i.l.bf16 %v10453_v59  ;;  %v12209_v23 = vmax.f32 %v12096_v2, 0.0  ;;  %v3268_v27 = vsel %vm325_vm0, %v12210_v39, %v5741_v44 }
 0x5ae   : > { %v3269_v9 = vsel %vm325_vm0, %v12208_v29, %v5742_v18  ;;  %v12211_v20 = vmax.f32 %v12095_v36, 0.0  ;;  %v5783_v6 = vpack.i.bf16 %v10447_v60, %v10451_v3  ;;  %v5798_v44 = vpack.i.bf16 %v10439_v25, %v10463_v51  ;;  %v12212_v36 = vld [vmem:[#allocation178_spill] sm:$0xff] }
 0x5af   : > { %v10494_v47 = vmax.f32 %v12209_v23, %v3317_v61  ;;  %v3505_v2 = vsel %vm569_vm2, %v5747_v56, %v11426_v1  ;;  %v3504_v15 = vsel %vm569_vm2, %v5746_v55, %v11423_v54  ;;  %v3558_v0 = vmax.f32 %v12212_v36, %v3512_v31  ;;  %v12213_v61 = vld [vmem:[#allocation193_spill] sm:$0xff]  ;;  %v12216_v23 = vld [vmem:[#allocation198_spill] sm:$0xff] }
 0x5b0   : > { %v10502_v18 = vmax.f32 %v12211_v20, %v3316_v45  ;;  %5784 = vrot.lane.b32.xlu0 %v5783_v6, %s5854_s30  ;;  %v3559_v33 = vmax.f32 %v10072_v11, %v3504_v15  ;;  %v3566_v53 = vmax.f32 %v10068_v35, %v3505_v2  ;;  %v3565_v45 = vmax.f32 %v12213_v61, %v3513_v24  ;;  %v12214_v56 = vld [vmem:[#allocation185_spill] sm:$0xff]  ;;  %v12219_v20 = vld [vmem:[#allocation104_spill] sm:$0xff]  ;;  %v12251_v1 = vld [vmem:[#allocation126_spill] sm:$0xff] }
 0x5b1   : > { %v12215_v16 = vmax.f32 %v12214_v56, 0.0  ;;  %v12217_v55 = vmax.f32 %v12216_v23, 0.0  ;;  %5799 = vrot.lane.b32.xlu1 %v5798_v44, %s5854_s30  ;;  %v4652_v30 = vcombine.low %v12180_v26, %v12179_v10  ;;  %v12218_v31 = vld [vmem:[#allocation105_spill] sm:$0xff]  ;;  %v12220_v35 = vunpack.i.h.bf16 %v10134_v49 }
 0x5b2   : > { %v4655_v11 = vcombine.high %v12219_v20, %v12218_v31  ;;  %v3608_v15 = vpack.c.bf16 %v3566_v53, %v3559_v33  ;;  %v12222_v44 = vcombine.low %v12178_v13, %v12177_v7  ;;  %v3607_v56 = vpack.c.bf16 %v3565_v45, %v3558_v0  ;;  %v12253_v7 = vld [vmem:[#allocation128_spill] sm:$0xff] }
 0x5b3   : > { %v10523_v29 = vmax.f32 %v12215_v16, %v3269_v9  ;;  %v10527_v39 = vmax.f32 %v12217_v55, %v3268_v27  ;;  %v3515_v24 = vsel %vm569_vm2, %v12220_v35, %v5757_v8  ;;  %v12221_v9 = vunpack.i.l.bf16 %v10134_v49  ;;  %v10544_v2 = vpop.permute.xlu1 %5759  ;;  %v12224_v35 = vld [vmem:[#allocation183_spill] sm:$0xff] }
 0x5b4   : > { %v5793_v27 = vpack.i.bf16 %v10475_v50, %v10459_v48  ;;  %4335 = vmatpush1.bf16.msra.mxu1 %v12222_v44  ;;  %v11422_v36 = vunpack.i.h.bf16 %v10544_v2  ;;  %v11421_v61 = vunpack.i.l.bf16 %v10544_v2  ;;  %v5808_v49 = vpack.i.bf16 %v10494_v47, %v10502_v18  ;;  %4301 = vmatprep.mubr.bf16.mxu1 %v3608_v15  ;;  %v12227_v44 = vld [vmem:[#allocation106_spill] sm:$0xff] }
 0x5b5   : > { %v3514_v6 = vsel %vm569_vm2, %v12221_v9, %v5756_v14  ;;  %v12223_v16 = vcombine.high %v12180_v26, %v12179_v10  ;;  %v4654_v33 = vcombine.low %v12219_v20, %v12218_v31  ;;  %v5803_v45 = vpack.i.bf16 %v10523_v29, %v10527_v39  ;;  %4302 = vmatmul.mubr.bf16.gmra.mrb[36].mxu1 %v3607_v56 }
 0x5b6   : > { %5794 = vrot.lane.b32.xlu0 %v5793_v27, %s5854_s30  ;;  %v3507_v53 = vsel %vm569_vm2, %v5757_v8, %v11422_v36  ;;  %v3506_v0 = vsel %vm569_vm2, %v5756_v14, %v11421_v61  ;;  %5809 = vrot.lane.b32.xlu1 %v5808_v49, %s5854_s30  ;;  %v3572_v9 = vmax.f32 %v12224_v35, %v3514_v6  ;;  %v12225_v27 = vld [vmem:[#allocation186_spill] sm:$0xff]  ;;  %v12226_v8 = vld [vmem:[#allocation107_spill] sm:$0xff]  ;;  %v12229_v6 = vld [vmem:[#allocation108_spill] sm:$0xff] }
 0x5b7   : > { %4336 = vmatprep.subr.bf16.mxu1 %v12223_v16  ;;  %v3573_v23 = vmax.f32 %v10132_v46, %v3506_v0  ;;  %v3580_v55 = vmax.f32 %v10128_v37, %v3507_v53  ;;  %v3579_v15 = vmax.f32 %v12225_v27, %v3515_v24  ;;  %v4657_v16 = vcombine.high %v12227_v44, %v12226_v8  ;;  %v12228_v37 = vld [vmem:[#allocation109_spill] sm:$0xff]  ;;  %v12235_v36 = vld [vmem:[#allocation110_spill] sm:$0xff] }
 0x5b8   : > { %4337 = vmatpush1.bf16.msra.mxu1 %v4652_v30  ;;  %v4656_v46 = vcombine.low %v12227_v44, %v12226_v8  ;;  %v4659_v24 = vcombine.high %v12229_v6, %v12228_v37 }
 0x5b9   : > { %4338 = vmatprep.subr.bf16.mxu1 %v4655_v11  ;;  %v3615_v14 = vpack.c.bf16 %v3580_v55, %v3573_v23  ;;  %v3614_v56 = vpack.c.bf16 %v3579_v15, %v3572_v9  ;;  %v12230_v23 = vunpack.i.h.bf16 %v10230_v40  ;;  %v12231_v55 = vunpack.i.l.bf16 %v10230_v40 }
 0x5ba   : > { %5804 = vrot.lane.b32.xlu0 %v5803_v45, %s5854_s30  ;;  %v10577_v61 = vpop.permute.xlu1 %5769  ;;  %v4658_v45 = vcombine.low %v12229_v6, %v12228_v37 }
 0x5bb   : > { %4311 = vmatprep.mubr.bf16.mxu1 %v3615_v14  ;;  %v11424_v53 = vunpack.i.h.bf16 %v10577_v61  ;;  %v11425_v0 = vunpack.i.l.bf16 %v10577_v61  ;;  %v12232_v14 = vld [vmem:[#allocation197_spill] sm:$0xff] }
 0x5bc   : > { %v5765_v49 = vpop.permute.xlu0 %5764  ;;  %4339 = vmatpush1.bf16.msra.mxu1 %v4654_v33 }
 0x5bd   : > { %v5767_v30 = vunpack.i.h.bf16 %v5765_v49  ;;  %v5766_v11 = vunpack.i.l.bf16 %v5765_v49  ;;  %4340 = vmatprep.subr.bf16.mxu1 %v4657_v16  ;;  %4312 = vmatmul.mubr.bf16.gmra.mrb[40].mxu1 %v3614_v56  ;;  %v12233_v49 = vld [vmem:[#allocation196_spill] sm:$0xff] }
 0x5bf   : > { %v3517_v33 = vsel %vm569_vm2, %v12230_v23, %v5767_v30  ;;  %v3516_v35 = vsel %vm569_vm2, %v12231_v55, %v5766_v11  ;;  %v3509_v9 = vsel %vm569_vm2, %v5767_v30, %v11424_v53  ;;  %v3508_v27 = vsel %vm569_vm2, %v5766_v11, %v11425_v0  ;;  %v12234_v55 = vld [vmem:[#allocation111_spill] sm:$0xff]  ;;  %v12237_v11 = vld [vmem:[#allocation112_spill] sm:$0xff] }
 0x5c0   : > { %v3587_v15 = vmax.f32 %v10285_v19, %v3508_v27  ;;  %v3594_v16 = vmax.f32 %v10277_v58, %v3509_v9  ;;  %v3586_v40 = vmax.f32 %v12232_v14, %v3516_v35  ;;  %v3593_v23 = vmax.f32 %v12233_v49, %v3517_v33  ;;  %4341 = vmatpush1.bf16.msra.mxu1 %v4656_v46  ;;  %v12236_v19 = vld [vmem:[#allocation113_spill] sm:$0xff]  ;;  %v12239_v33 = vld [vmem:[#allocation114_spill] sm:$0xff]  ;;  %v12241_v27 = vld [vmem:[#allocation116_spill] sm:$0xff] }
 0x5c1   : > { %4342 = vmatprep.subr.bf16.mxu1 %v4659_v24  ;;  %v4661_v54 = vcombine.high %v12235_v36, %v12234_v55  ;;  %v4660_v56 = vcombine.low %v12235_v36, %v12234_v55  ;;  %v4663_v58 = vcombine.high %v12237_v11, %v12236_v19  ;;  %v4662_v46 = vcombine.low %v12237_v11, %v12236_v19  ;;  %v12238_v24 = vld [vmem:[#allocation115_spill] sm:$0xff]  ;;  %v12240_v9 = vld [vmem:[#allocation117_spill] sm:$0xff] }
 0x5c2   : > { %v3622_v30 = vpack.c.bf16 %v3594_v16, %v3587_v15  ;;  %v3621_v53 = vpack.c.bf16 %v3593_v23, %v3586_v40  ;;  %v4665_v35 = vcombine.high %v12239_v33, %v12238_v24  ;;  %v12242_v15 = vld [vmem:[#allocation119_spill] sm:$0xff]  ;;  %v12243_v16 = vld [vmem:[#allocation118_spill] sm:$0xff]  ;;  %v12244_v49 = vld [vmem:[#allocation121_spill] sm:$0xff] }
 0x5c3   : > { %v4669_v14 = vcombine.high %v12243_v16, %v12242_v15  ;;  %v4668_v40 = vcombine.low %v12243_v16, %v12242_v15  ;;  %v12245_v23 = vld [vmem:[#allocation120_spill] sm:$0xff]  ;;  %v12257_v15 = vunpack.i.l.bf16 %v10340_v4 }
 0x5c4   : > { %4321 = vmatprep.mubr.bf16.mxu1 %v3622_v30  ;;  %4343 = vmatpush1.bf16.msra.mxu1 %v4658_v45  ;;  %v4664_v45 = vcombine.low %v12239_v33, %v12238_v24  ;;  %v4671_v30 = vcombine.high %v12245_v23, %v12244_v49 }
 0x5c5   : > { %4344 = vmatprep.subr.bf16.mxu1 %v4661_v54  ;;  %4322 = vmatmul.mubr.bf16.gmra.mrb[44].mxu1 %v3621_v53  ;;  %v4667_v54 = vcombine.high %v12241_v27, %v12240_v9  ;;  %v4666_v53 = vcombine.low %v12241_v27, %v12240_v9  ;;  %v12255_v9 = vld [vmem:[#allocation130_spill] sm:$0xff] }
 0x5c8   : > { %4345 = vmatpush1.bf16.msra.mxu1 %v4660_v56  ;;  %v4670_v56 = vcombine.low %v12245_v23, %v12244_v49 }
 0x5c9   : > { %4346 = vmatprep.subr.bf16.mxu1 %v4663_v58  ;;  %v12246_v58 = vld [vmem:[#allocation123_spill] sm:$0xff] }
 0x5cc   : > { %4347 = vmatpush1.bf16.msra.mxu1 %v4662_v46  ;;  %v12247_v46 = vld [vmem:[#allocation122_spill] sm:$0xff] }
 0x5cd   : > { %4348 = vmatprep.subr.bf16.mxu1 %v4665_v35  ;;  %v4673_v35 = vcombine.high %v12247_v46, %v12246_v58 }
 0x5d0   : > { %4349 = vmatpush1.bf16.msra.mxu1 %v4664_v45  ;;  %v4672_v45 = vcombine.low %v12247_v46, %v12246_v58 }
 0x5d1   : > { %4350 = vmatprep.subr.bf16.mxu1 %v4667_v54  ;;  %v12248_v54 = vld [vmem:[#allocation125_spill] sm:$0xff] }
 0x5d4   : > { %4351 = vmatpush1.bf16.msra.mxu1 %v4666_v53  ;;  %v12249_v53 = vld [vmem:[#allocation124_spill] sm:$0xff] }
 0x5d5   : > { %4352 = vmatprep.subr.bf16.mxu1 %v4669_v14  ;;  %v4675_v0 = vcombine.high %v12249_v53, %v12248_v54  ;;  %v4674_v14 = vcombine.low %v12249_v53, %v12248_v54 }
 0x5d8   : > { %4353 = vmatpush1.bf16.msra.mxu1 %v4668_v40  ;;  %v12250_v40 = vld [vmem:[#allocation127_spill] sm:$0xff] }
 0x5d9   : > { %4354 = vmatprep.subr.bf16.mxu1 %v4671_v30  ;;  %v4677_v6 = vcombine.high %v12251_v1, %v12250_v40  ;;  %v4676_v30 = vcombine.low %v12251_v1, %v12250_v40 }
 0x5dc   : > { %4355 = vmatpush1.bf16.msra.mxu1 %v4670_v56  ;;  %v12252_v56 = vld [vmem:[#allocation129_spill] sm:$0xff] }
 0x5dd   : > { %4356 = vmatprep.subr.bf16.mxu1 %v4673_v35  ;;  %v4679_v8 = vcombine.high %v12253_v7, %v12252_v56  ;;  %v4678_v35 = vcombine.low %v12253_v7, %v12252_v56 }
 0x5e0   : > { %4357 = vmatpush1.bf16.msra.mxu1 %v4672_v45  ;;  %v12254_v45 = vld [vmem:[#allocation131_spill] sm:$0xff] }
 0x5e1   : > { %4358 = vmatprep.subr.bf16.mxu1 %v4675_v0  ;;  %v4681_v10 = vcombine.high %v12255_v9, %v12254_v45 }
 0x5e4   : > { %4359 = vmatpush1.bf16.msra.mxu1 %v4674_v14 }
 0x5e5   : > { %4360 = vmatprep.subr.bf16.mxu1 %v4677_v6 }
 0x5e8   : > { %4361 = vmatpush1.bf16.msra.mxu1 %v4676_v30 }
 0x5e9   : > { %4362 = vmatprep.subr.bf16.mxu1 %v4679_v8  ;;  %v12256_v8 = vunpack.i.h.bf16 %v10340_v4 }
 0x5ec   : > { %4363 = vmatpush1.bf16.msra.mxu1 %v4678_v35 }
 0x5ed   : > { %4405 = vmatprep.subr.bf16.mxu1 %v4681_v10 }
 0x613   : > { %v10649_v0 = vpop.permute.xlu1 %5779  ;;  %v5775_v6 = vpop.permute.xlu0 %5774 }
 0x614   : > { %v11438_v14 = vunpack.i.h.bf16 %v10649_v0  ;;  %v11442_v1 = vunpack.i.l.bf16 %v10649_v0  ;;  %v5777_v11 = vunpack.i.h.bf16 %v5775_v6  ;;  %v5776_v13 = vunpack.i.l.bf16 %v5775_v6 }
 0x616   : > { %v3487_v30 = vsel %vm569_vm2, %v5777_v11, %v11438_v14  ;;  %v3495_v35 = vsel %vm569_vm2, %v12256_v8, %v5777_v11  ;;  %v3486_v7 = vsel %vm569_vm2, %v5776_v13, %v11442_v1  ;;  %v3494_v6 = vsel %vm569_vm2, %v12257_v15, %v5776_v13  ;;  %v12258_v14 = vld [vmem:[#allocation164_spill] sm:$0xff]  ;;  %v12261_v15 = vld [vmem:[#allocation135_spill] sm:$0xff] }
 0x617   : > { %v3553_v10 = vmax.f32 %v10033_v41, %v3495_v35  ;;  %v3554_v16 = vmax.f32 %v10372_v28, %v3487_v30  ;;  %v3546_v19 = vmax.f32 %v12258_v14, %v3494_v6  ;;  %v3547_v20 = vmax.f32 %v10364_v38, %v3486_v7  ;;  %v12259_v35 = vld [vmem:[#allocation133_spill] sm:$0xff]  ;;  %v12260_v1 = vld [vmem:[#allocation132_spill] sm:$0xff] }
 0x618   : > { %v4680_v41 = vcombine.low %v12255_v9, %v12254_v45  ;;  %v4683_v24 = vcombine.high %v12260_v1, %v12259_v35  ;;  %v4682_v38 = vcombine.low %v12260_v1, %v12259_v35  ;;  %v12263_v6 = vunpack.i.h.bf16 %v10453_v59 }
 0x619   : > { %v3602_v23 = vpack.c.bf16 %v3553_v10, %v3546_v19  ;;  %v3603_v11 = vpack.c.bf16 %v3554_v16, %v3547_v20  ;;  %v12262_v16 = vld [vmem:[#allocation134_spill] sm:$0xff] }
 0x61a   : > { %v4685_v14 = vcombine.high %v12262_v16, %v12261_v15  ;;  %v4684_v1 = vcombine.low %v12262_v16, %v12261_v15 }
 0x61b   : > { %v10675_v8 = vpop.permute.xlu1 %5789  ;;  %4364 = vmatprep.mubr.bf16.mxu1 %v3603_v11 }
 0x61c   : > { %v11444_v4 = vunpack.i.h.bf16 %v10675_v8  ;;  %v11449_v13 = vunpack.i.l.bf16 %v10675_v8  ;;  %4365 = vmatmul.mubr.bf16.vlgmr.msra.gmra.mrb[32].mxu1 %v3602_v23 }
 0x61d   : > { %4406 = vmatpush1.bf16.msra.mxu1 %v4680_v41  ;;  %v12264_v41 = vunpack.i.l.bf16 %v10453_v59 }
 0x61e   : > { %4407 = vmatprep.subr.bf16.mxu1 %v4683_v24 }
 0x621   : > { %4408 = vmatpush1.bf16.msra.mxu1 %v4682_v38 }
 0x622   : > { %v5785_v28 = vpop.permute.xlu0 %5784  ;;  %4409 = vmatprep.subr.bf16.mxu1 %v4685_v14 }
 0x623   : > { %v5787_v7 = vunpack.i.h.bf16 %v5785_v28  ;;  %v5786_v20 = vunpack.i.l.bf16 %v5785_v28  ;;  %v10683_v19 = vpop.permute.xlu1 %5799 }
 0x625   : > { %v3489_v23 = vsel %vm569_vm2, %v5787_v7, %v11444_v4  ;;  %v3497_v11 = vsel %vm569_vm2, %v12263_v6, %v5787_v7  ;;  %v3488_v24 = vsel %vm569_vm2, %v5786_v20, %v11449_v13  ;;  %v3496_v28 = vsel %vm569_vm2, %v12264_v41, %v5786_v20  ;;  %v12265_v7 = vld [vmem:[#allocation137_spill] sm:$0xff]  ;;  %v12266_v6 = vld [vmem:[#allocation136_spill] sm:$0xff]  ;;  %4410 = vmatpush1.bf16.msra.mxu1 %v4684_v1 }
 0x626   : > { %v3561_v30 = vmax.f32 %v10451_v3, %v3488_v24  ;;  %v3568_v4 = vmax.f32 %v10447_v60, %v3489_v23  ;;  %v4687_v9 = vcombine.high %v12266_v6, %v12265_v7  ;;  %v3560_v59 = vmax.f32 %v10148_v22, %v3496_v28  ;;  %v12267_v60 = vld [vmem:[#allocation139_spill] sm:$0xff]  ;;  %v12268_v23 = vld [vmem:[#allocation138_spill] sm:$0xff] }
 0x627   : > { %v3567_v20 = vmax.f32 %v10144_v12, %v3497_v11  ;;  %v4686_v3 = vcombine.low %v12266_v6, %v12265_v7  ;;  %v4689_v24 = vcombine.high %v12268_v23, %v12267_v60  ;;  %v12269_v41 = vunpack.i.h.bf16 %v10683_v19 }
 0x628   : > { %v5795_v10 = vpop.permute.xlu0 %5794  ;;  %v10711_v13 = vpop.permute.xlu1 %5809  ;;  %v3610_v38 = vpack.c.bf16 %v3568_v4, %v3561_v30  ;;  %v12271_v4 = vunpack.i.h.bf16 %v10544_v2  ;;  %v12272_v11 = vunpack.i.l.bf16 %v10544_v2  ;;  %4411 = vmatprep.subr.bf16.mxu1 %v4687_v9 }
 0x629   : > { %v5797_v26 = vunpack.i.h.bf16 %v5795_v10  ;;  %v5796_v27 = vunpack.i.l.bf16 %v5795_v10  ;;  %v12270_v10 = vunpack.i.l.bf16 %v10683_v19  ;;  %v3609_v6 = vpack.c.bf16 %v3567_v20, %v3560_v59  ;;  %4412 = vmatpush1.bf16.msra.mxu1 %v4686_v3 }
 0x62a   : > { %4374 = vmatprep.mubr.bf16.mxu1 %v3610_v38  ;;  %v12273_v16 = vunpack.i.h.bf16 %v10711_v13  ;;  %v12274_v2 = vunpack.i.l.bf16 %v10711_v13  ;;  %4413 = vmatprep.subr.bf16.mxu1 %v4689_v24  ;;  %v12278_v24 = vunpack.i.l.bf16 %v10577_v61 }
 0x62b   : > { %v3491_v15 = vsel %vm569_vm2, %v5797_v26, %v12269_v41  ;;  %v3490_v14 = vsel %vm569_vm2, %v5796_v27, %v12270_v10  ;;  %v3499_v30 = vsel %vm569_vm2, %v12271_v4, %v5797_v26  ;;  %v3498_v28 = vsel %vm569_vm2, %v12272_v11, %v5796_v27  ;;  %4375 = vmatmul.mubr.bf16.gmra.mrb[36].mxu1 %v3609_v6  ;;  %v12276_v6 = vld [vmem:[#allocation140_spill] sm:$0xff] }
 0x62c   : > { %v5805_v41 = vpop.permute.xlu0 %5804  ;;  %v3575_v22 = vmax.f32 %v10459_v48, %v3490_v14  ;;  %v3582_v12 = vmax.f32 %v10475_v50, %v3491_v15  ;;  %v3574_v1 = vmax.f32 %v10220_v63, %v3498_v28  ;;  %v3581_v48 = vmax.f32 %v10216_v42, %v3499_v30  ;;  %v12279_v14 = vld [vmem:[#allocation143_spill] sm:$0xff]  ;;  %v12282_v11 = vld [vmem:[#allocation144_spill] sm:$0xff] }
 0x62d   : > { %v5807_v7 = vunpack.i.h.bf16 %v5805_v41  ;;  %v5806_v10 = vunpack.i.l.bf16 %v5805_v41  ;;  %v4688_v50 = vcombine.low %v12268_v23, %v12267_v60  ;;  %v12277_v63 = vunpack.i.h.bf16 %v10577_v61  ;;  %v12281_v61 = vld [vmem:[#allocation145_spill] sm:$0xff] }
 0x62e   : > { %v3617_v59 = vpack.c.bf16 %v3582_v12, %v3575_v22  ;;  %v3616_v38 = vpack.c.bf16 %v3581_v48, %v3574_v1  ;;  %v12280_v22 = vld [vmem:[#allocation142_spill] sm:$0xff]  ;;  %v4695_v28 = vcombine.high %v12282_v11, %v12281_v61  ;;  %v12288_v48 = vmov 0  }
 0x62f   : > { %v3493_v26 = vsel %vm569_vm2, %v5807_v7, %v12273_v16  ;;  %v3492_v27 = vsel %vm569_vm2, %v5806_v10, %v12274_v2  ;;  %v12275_v16 = vld [vmem:[#allocation141_spill] sm:$0xff]  ;;  %4414 = vmatpush1.bf16.msra.mxu1 %v4688_v50  ;;  %v3501_v42 = vsel %vm569_vm2, %v12277_v63, %v5807_v7  ;;  %v4693_v12 = vcombine.high %v12280_v22, %v12279_v14 }
 0x630   : > { %v3589_v9 = vmax.f32 %v10527_v39, %v3492_v27  ;;  %v3596_v15 = vmax.f32 %v10523_v29, %v3493_v26  ;;  %v4691_v20 = vcombine.high %v12276_v6, %v12275_v16  ;;  %4384 = vmatprep.mubr.bf16.mxu1 %v3617_v59  ;;  %v4690_v3 = vcombine.low %v12276_v6, %v12275_v16  ;;  %v12283_v26 = vld [vmem:[#allocation201_spill] sm:$0xff] }
 0x631   : > { %v3500_v39 = vsel %vm569_vm2, %v12278_v24, %v5806_v10  ;;  %v3595_v30 = vmax.f32 %v10281_v17, %v3501_v42  ;;  %v4692_v7 = vcombine.low %v12280_v22, %v12279_v14  ;;  %v4694_v10 = vcombine.low %v12282_v11, %v12281_v61 }
 0x632   : > { %v3624_v29 = vpack.c.bf16 %v3596_v15, %v3589_v9  ;;  %4415 = vmatprep.subr.bf16.mxu1 %v4691_v20  ;;  %v3588_v4 = vmax.f32 %v10289_v57, %v3500_v39  ;;  %v12284_v2 = vunpack.i.l.bf16 %v12283_v26  ;;  %v12285_v27 = vunpack.i.l.bf16 %v10649_v0  ;;  %v12289_v20 = vld [vmem:[#allocation203_spill] sm:$0xff] }
 0x633   : > { %4385 = vmatmul.mubr.bf16.gmra.mrb[40].mxu1 %v3616_v38  ;;  %v12286_v17 = vunpack.i.h.bf16 %v12283_v26  ;;  %v12287_v59 = vunpack.i.h.bf16 %v10649_v0  ;;  %v12290_v38 = vunpack.i.h.bf16 %v12289_v20  ;;  %v12292_v63 = vunpack.i.l.bf16 %v12289_v20 }
 0x634   : > { %4394 = vmatprep.mubr.bf16.mxu1 %v3624_v29  ;;  %4416 = vmatpush1.bf16.msra.mxu1 %v4690_v3  ;;  %v3623_v41 = vpack.c.bf16 %v3595_v30, %v3588_v4  ;;  %v3534_v57 = vsel %vm569_vm2, %v12285_v27, %v12284_v2  ;;  %v12291_v3 = vunpack.i.h.bf16 %v10675_v8  ;;  %v12293_v42 = vunpack.i.l.bf16 %v10675_v8 }
 0x635   : > { %4417 = vmatprep.subr.bf16.mxu1 %v4693_v12  ;;  %v3535_v1 = vsel %vm569_vm2, %v12287_v59, %v12286_v17  ;;  %v3548_v50 = vmax.f32 %v10368_v43, %v3534_v57  ;;  %v12294_v29 = vunpack.i.h.bf16 %v10120_v62  ;;  %v12295_v12 = vunpack.i.h.bf16 %v10683_v19 }
 0x636   : > { %v3555_v9 = vmax.f32 %v10360_v34, %v3535_v1  ;;  %v3537_v0 = vsel %vm569_vm2, %v12291_v3, %v12290_v38  ;;  %v3536_v24 = vsel %vm569_vm2, %v12293_v42, %v12292_v63  ;;  %v12296_v8 = vunpack.i.l.bf16 %v10120_v62 }
 0x637   : > { %v3562_v43 = vmax.f32 %v10435_v52, %v3536_v24  ;;  %v3569_v34 = vmax.f32 %v10431_v21, %v3537_v0  ;;  %v3539_v4 = vsel %vm569_vm2, %v12295_v12, %v12294_v29  ;;  %v12297_v30 = vunpack.i.l.bf16 %v10683_v19 }
 0x638   : > { %4418 = vmatpush1.bf16.msra.mxu1 %v4692_v7  ;;  %v3604_v15 = vpack.c.bf16 %v3555_v9, %v3548_v50  ;;  %v3583_v52 = vmax.f32 %v10439_v25, %v3539_v4  ;;  %v12300_v19 = vunpack.i.l.bf16 %v10162_v32  ;;  %v12301_v26 = vunpack.i.l.bf16 %v10711_v13 }
 0x639   : > { %4419 = vmatprep.subr.bf16.mxu1 %v4695_v28  ;;  %v3611_v39 = vpack.c.bf16 %v3569_v34, %v3562_v43  ;;  %v3538_v7 = vsel %vm569_vm2, %v12297_v30, %v12296_v8 }
 0x63a   : > { %v3576_v21 = vmax.f32 %v10463_v51, %v3538_v7  ;;  %v3540_v2 = vsel %vm569_vm2, %v12301_v26, %v12300_v19 }
 0x63b   : > { %4395 = vmatmul.mubr.bf16.gmra.mrb[44].mxu1 %v3623_v41  ;;  %v12298_v41 = vunpack.i.h.bf16 %v10162_v32  ;;  %v3590_v25 = vmax.f32 %v10502_v18, %v3540_v2 }
 0x63c   : > { %4437 = vmatprep.mubr.bf16.mxu1 %v12288_v48  ;;  %4420 = vmatpush1.bf16.msra.mxu1 %v4694_v10  ;;  %v3618_v28 = vpack.c.bf16 %v3583_v52, %v3576_v21  ;;  %v12299_v10 = vunpack.i.h.bf16 %v10711_v13 }
 0x63e   : > { %v3541_v62 = vsel %vm569_vm2, %v12299_v10, %v12298_v41 }
 0x63f   : > { %v3597_v51 = vmax.f32 %v10494_v47, %v3541_v62 }
 0x641   : > { %v3625_v27 = vpack.c.bf16 %v3597_v51, %v3590_v25 }
 0x643   : > { %4438 = vmatmul.mubr.bf16.vlgmr.msra.gmra.mrb[32].mxu1 %v3604_v15 }
 0x644   : > { %4447 = vmatprep.mubr.bf16.mxu1 %v12288_v48 }
 0x64b   : > { %4448 = vmatmul.mubr.bf16.gmra.mrb[36].mxu1 %v3611_v39 }
 0x64c   : > { %4457 = vmatprep.mubr.bf16.mxu1 %v12288_v48 }
 0x653   : > { %4458 = vmatmul.mubr.bf16.gmra.mrb[40].mxu1 %v3618_v28 }
 0x654   : > { %4467 = vmatprep.mubr.bf16.mxu1 %v12288_v48 }
 0x65b   : > { %4468 = vmatmul.mubr.bf16.gmra.mrb[44].mxu1 %v3625_v27 }
 0x716   : > { %v4439_v57 = vpop.f32.mrb[32].mxu1 }
 0x717   : > { %v4441_v17 = vpop.f32.mrb[33].mxu1 }
 0x718   : > { %v4706_v32 = vpack.c.bf16 %v4441_v17, %v4439_v57  ;;  %v4443_v47 = vpop.f32.mrb[34].mxu1 }
 0x719   : > { %v4445_v18 = vpop.f32.mrb[35].mxu1 }
 0x71a   : > { %4532 = vst.msk [vmem:[%s10839_s15] sm:$0xff] %vm10841_vm11, %v4706_v32  ;;  %v4707_v13 = vpack.c.bf16 %v4445_v18, %v4443_v47 }
 0x71c   : > { %4533 = vst.msk [vmem:[%s10839_s15 + $0x8] sm:$0xff] %vm10841_vm11, %v4707_v13 }
 0x71e   : > { %v4449_v59 = vpop.f32.mrb[36].mxu1 }
 0x71f   : > { %v4451_v1 = vpop.f32.mrb[37].mxu1 }
 0x720   : > { %v4708_v48 = vpack.c.bf16 %v4451_v1, %v4449_v59  ;;  %v4453_v50 = vpop.f32.mrb[38].mxu1 }
 0x721   : > { %v4455_v9 = vpop.f32.mrb[39].mxu1 }
 0x722   : > { %4534 = vst.msk [vmem:[%s10839_s15 + $0x10] sm:$0xff] %vm10841_vm11, %v4708_v48  ;;  %v4709_v15 = vpack.c.bf16 %v4455_v9, %v4453_v50 }
 0x724   : > { %4535 = vst.msk [vmem:[%s10839_s15 + $0x18] sm:$0xff] %vm10841_vm11, %v4709_v15 }
 0x726   : > { %v4459_v20 = vpop.f32.mrb[40].mxu1 }
 0x727   : > { %v4461_v38 = vpop.f32.mrb[41].mxu1 }
 0x728   : > { %v4710_v3 = vpack.c.bf16 %v4461_v38, %v4459_v20  ;;  %v4463_v0 = vpop.f32.mrb[42].mxu1 }
 0x729   : > { %v4465_v63 = vpop.f32.mrb[43].mxu1 }
 0x72a   : > { %4536 = vst.msk [vmem:[%s10839_s15 + $0x20] sm:$0xff] %vm10841_vm11, %v4710_v3  ;;  %v4711_v42 = vpack.c.bf16 %v4465_v63, %v4463_v0 }
 0x72c   : > { %4537 = vst.msk [vmem:[%s10839_s15 + $0x28] sm:$0xff] %vm10841_vm11, %v4711_v42 }
 0x72e   : > { %v4469_v24 = vpop.f32.mrb[44].mxu1  ;;  %186 = sbr.rel (!%p184_p8) target bundleno = 91 (0x5b), region = 57 }
 0x72f   : > { %v4471_v43 = vpop.f32.mrb[45].mxu1 }
 0x730   : > { %v4712_v34 = vpack.c.bf16 %v4471_v43, %v4469_v24  ;;  %v4473_v39 = vpop.f32.mrb[46].mxu1 }
 0x731   : > { %v4475_v29 = vpop.f32.mrb[47].mxu1 }
 0x732   : > { %4538 = vst.msk [vmem:[%s10839_s15 + $0x30] sm:$0xff] %vm10841_vm11, %v4712_v34  ;;  %v4713_v12 = vpack.c.bf16 %v4475_v29, %v4473_v39 }
 0x734   : > { %4539 = vst.msk [vmem:[%s10839_s15 + $0x38] sm:$0xff] %vm10841_vm11, %v4713_v12 }
 0x735   :  { %4544 = vsyncpa [#allocation4], 1 }

// kernel: net_forward.3
= control target key start
LH: loop header
LB: loop body
LE: loop exit
PB: predicated region body
PF: predicated region fallthrough
CT: control target
= control target key end

     0   :  { %10 = vsyncpa [#allocation3], 0  ;;  %s9200_s0 = inlined_call_operand.vmem [shape: bf16[2,9216], index: 0, kind: input, shape index: {}]   ;;  %s9201_s1 = inlined_call_operand.hbm [shape: bf16[9216,128], index: 1, kind: input, shape index: {}]   ;;  %s9202_s2 = inlined_call_operand.hbm [shape: f32[1,128], index: 2, kind: input, shape index: {}]   ;;  %s9203_s3 = inlined_call_operand.hbm [shape: bf16[128,128], index: 3, kind: input, shape index: {}]   ;;  %s9204_s4 = inlined_call_operand.hbm [shape: f32[1,128], index: 4, kind: input, shape index: {}]   ;;  %s9205_s5 = inlined_call_operand.hbm [shape: f32[2,128], index: 5, kind: output, shape index: {}]  }
   0x1   :  { %11 = vsyncpa [#allocation6], 0 }
   0x2   :  { %12 = vsyncpa [#allocation9], 0 }
   0x3   :  { %13 = vsyncpa [#allocation4], 0  ;;  %s8935_s18 = smov [#allocation5]   ;;  %s8936_s20 = smov [#allocation2]  }
   0x4   :  { %s34_s19 = sshll.u32 %s8935_s18, 4  ;;  %s21_s21 = sshll.u32 %s8936_s20, 4  ;;  %s35_s19 = int_to_ptr.vmem [resolvable:$true] %s34_s19  ;;  %s8975_s21 = int_to_ptr.vmem [resolvable:$true] %s21_s21 }
   0x5   :  { %s8817_s24 = scalar_lea.hbm %s9202_s2, 16 }
   0x6   :  { %p8818_p0 = scmp.ne.s32.totalorder %s9202_s2, %s8817_s24  ;;  %p8821_p1 = scmp.lt.u32.totalorder %s8817_s24, %s9202_s2 }
   0x8   :  { %p8823_p2 = pnand %p8821_p1, %p8818_p0 }
   0xa   :  { %8826 = shalt.err (!%p8823_p2)
}
   0xb   :  { %s8827_s29 = scalar_lea.vmem %s35_s19, 16  ;;  %s8831_s30 = scalar_lea.vmem %s35_s19, 32 }
   0xc   :  { %p8828_p3 = scmp.ne.s32.totalorder %s35_s19, %s8827_s29  ;;  %p8832_p4 = scmp.lt.s32.totalorder %s35_s19, %s35_s19 }
   0xd   :  { %p8833_p5 = scmp.lt.s32.totalorder %s8831_s30, %s8827_s29 }
   0xf   :  { %p8834_p6 = por %p8833_p5, %p8832_p4 }
  0x11   :  { %p8835_p7 = pnand %p8834_p6, %p8828_p3 }
  0x13   :  { %8838 = shalt.err (!%p8835_p7)
}
  0x14   :  { %37 = dma.hbm_to_vmem [thread:$0]  %s9202_s2, 16, %s35_s19, [#allocation6]  }
  0x15   :  { %s8839_s10 = scalar_lea.hbm %s9201_s1, 73728 }
  0x16   :  { %p8840_p8 = scmp.ne.s32.totalorder %s9201_s1, %s8839_s10  ;;  %p8843_p9 = scmp.lt.u32.totalorder %s8839_s10, %s9201_s1 }
  0x18   :  { %p8845_p10 = pnand %p8843_p9, %p8840_p8 }
  0x1a   :  { %8848 = shalt.err (!%p8845_p10)
}
  0x1b   :  { %s8849_s15 = scalar_lea.vmem %s8975_s21, 73728  ;;  %p8854_p12 = scmp.lt.s32.totalorder %s8975_s21, %s8975_s21 }
  0x1c   :  { %p8850_p11 = scmp.ne.s32.totalorder %s8975_s21, %s8849_s15  ;;  %p8855_p13 = scmp.lt.s32.totalorder %s8849_s15, %s8849_s15 }
  0x1e   :  { %p8856_p0 = por %p8855_p13, %p8854_p12 }
  0x20   :  { %p8857_p1 = pnand %p8856_p0, %p8850_p11 }
  0x22   :  { %8860 = shalt.err (!%p8857_p1)
}
  0x23   :  { %s8937_s2 = smov 64   ;;  %s8938_s16 = smov 4  }
  0x24   :  { %27 = dma.hbm_to_vmem [thread:$0]  %s9201_s1, 73728, %s8975_s21, [#allocation3], %s8937_s2, %s8937_s2, %s8938_s16  }
  0x25   :  { %s8939_s19 = smov [#allocation7]   ;;  %s8940_s22 = smov [#allocation8]  }
  0x26   :  { %s43_s20 = sshll.u32 %s8939_s19, 4  ;;  %s56_s23 = sshll.u32 %s8940_s22, 4  ;;  %s44_s20 = int_to_ptr.vmem [resolvable:$true] %s43_s20  ;;  %s57_s23 = int_to_ptr.vmem [resolvable:$true] %s56_s23 }
  0x27   :  { %s8861_s26 = scalar_lea.hbm %s9203_s3, 1024 }
  0x28   :  { %p8862_p2 = scmp.ne.s32.totalorder %s9203_s3, %s8861_s26  ;;  %p8865_p3 = scmp.lt.u32.totalorder %s8861_s26, %s9203_s3 }
  0x2a   :  { %p8867_p4 = pnand %p8865_p3, %p8862_p2 }
  0x2c   :  { %8870 = shalt.err (!%p8867_p4)
}
  0x2d   :  { %s8871_s1 = scalar_lea.vmem %s44_s20, 1024  ;;  %p8876_p6 = scmp.lt.s32.totalorder %s44_s20, %s44_s20 }
  0x2e   :  { %p8872_p5 = scmp.ne.s32.totalorder %s44_s20, %s8871_s1  ;;  %p8877_p7 = scmp.lt.s32.totalorder %s8871_s1, %s8871_s1 }
  0x30   :  { %p8878_p8 = por %p8877_p7, %p8876_p6 }
  0x32   :  { %p8879_p9 = pnand %p8878_p8, %p8872_p5 }
  0x34   :  { %8882 = shalt.err (!%p8879_p9)
}
  0x35   :  { %49 = dma.hbm_to_vmem [thread:$0]  %s9203_s3, 1024, %s44_s20, [#allocation6], %s8937_s2, %s8937_s2, %s8938_s16  }
  0x36   :  { %s8883_s9 = scalar_lea.hbm %s9204_s4, 16 }
  0x37   :  { %p8884_p10 = scmp.ne.s32.totalorder %s9204_s4, %s8883_s9  ;;  %p8887_p11 = scmp.lt.u32.totalorder %s8883_s9, %s9204_s4 }
  0x39   :  { %p8889_p12 = pnand %p8887_p11, %p8884_p10 }
  0x3b   :  { %8892 = shalt.err (!%p8889_p12)
}
  0x3c   :  { %s8893_s14 = scalar_lea.vmem %s57_s23, 16  ;;  %s8897_s15 = scalar_lea.vmem %s57_s23, 32 }
  0x3d   :  { %p8894_p13 = scmp.ne.s32.totalorder %s57_s23, %s8893_s14  ;;  %p8898_p0 = scmp.lt.s32.totalorder %s57_s23, %s57_s23 }
  0x3e   :  { %p8899_p1 = scmp.lt.s32.totalorder %s8897_s15, %s8893_s14 }
  0x40   :  { %p8900_p2 = por %p8899_p1, %p8898_p0 }
  0x42   :  { %p8901_p3 = pnand %p8900_p2, %p8894_p13 }
  0x44   :  { %8904 = shalt.err (!%p8901_p3)
}
  0x45   :  { %59 = dma.hbm_to_vmem [thread:$0]  %s9204_s4, 16, %s57_s23, [#allocation9]  }
  0x46   :  { %8927 = dma.done.wait [#allocation3], 73728  }
  0x47   :  { %8928 = vsyncadd [#allocation3], 4294893568 }
  0x48   :  { %8929 = dma.done.wait [#allocation6], 1040  }
  0x49   :  { %8930 = vsyncadd [#allocation6], 4294966256 }
  0x4a   :  { %8931 = dma.done.wait [#allocation9], 16  }
  0x4b   :  { %8932 = vsyncadd [#allocation9], 4294967280  ;;  %v8220_v0 = vld [vmem:[#allocation2 + $0x40] sm:$0xff]   ;;  %v8224_v4 = vld [vmem:[#allocation2 + $0x48] sm:$0xff]   ;;  %v8941_v22 = vmov 1966171168   ;;  %v1254_v24 = vlaneseq }
  0x4c   :  { %v8221_v1 = vld [vmem:[#allocation2 + $0xc0] sm:$0xff]   ;;  %7389 = vmatprep.subr.bf16.mxu0 %v8220_v0  ;;  %v8225_v5 = vld [vmem:[#allocation2 + $0xc8] sm:$0xff]   ;;  %v8228_v8 = vld [vmem:[#allocation2 + $0x50] sm:$0xff]   ;;  %v1252_v23 = vunpack.c.l.s4 %v8941_v22  ;;  %vm8943_vm0 = vmmov 0   ;;  %vm6772_vm1 = vcmask 1041408  }
  0x4d   :  { %v8222_v2 = vld [vmem:[#allocation2] sm:$0xff]   ;;  %7411 = vmatprep.subr.bf16.mxu1 %v8221_v1  ;;  %v8226_v6 = vld [vmem:[#allocation2 + $0x8] sm:$0xff]   ;;  %v8229_v9 = vld [vmem:[#allocation2 + $0xd0] sm:$0xff]   ;;  %v1255_v30 = vshrl.u32 %v1254_v24, 7 }
  0x4e   :  { %v8223_v3 = vld [vmem:[#allocation2 + $0x80] sm:$0xff]   ;;  %7390 = vmatpush3.bf16.msra.mxu0 %v8222_v2  ;;  %v8227_v7 = vld [vmem:[#allocation2 + $0x88] sm:$0xff]   ;;  %v8230_v10 = vld [vmem:[#allocation2 + $0x10] sm:$0xff]   ;;  %v1253_v29 = vunpack.c.0.s8 %v1252_v23 }
  0x4f   :  { %7412 = vmatpush3.bf16.msra.mxu1 %v8223_v3  ;;  %7391 = vmatprep.subr.bf16.mxu0 %v8224_v4  ;;  %v8231_v11 = vld [vmem:[#allocation2 + $0x90] sm:$0xff]   ;;  %v8232_v12 = vld [vmem:[#allocation2 + $0x58] sm:$0xff]   ;;  %v8236_v16 = vld [vmem:[#allocation2 + $0x60] sm:$0xff]  }
  0x50   :  { %7413 = vmatprep.subr.bf16.mxu1 %v8225_v5  ;;  %v8233_v13 = vld [vmem:[#allocation2 + $0xd8] sm:$0xff]   ;;  %v8237_v17 = vld [vmem:[#allocation2 + $0xe0] sm:$0xff]   ;;  %v8240_v20 = vld [vmem:[#allocation2 + $0x68] sm:$0xff]   ;;  %v9030_v35 = vsub.s32 %v1253_v29, %v1255_v30 }
  0x51   :  { %v8234_v14 = vld [vmem:[#allocation2 + $0x18] sm:$0xff]   ;;  %v8238_v18 = vld [vmem:[#allocation2 + $0x20] sm:$0xff]   ;;  %v8241_v21 = vld [vmem:[#allocation2 + $0xe8] sm:$0xff]  }
  0x52   :  { %7392 = vmatpush3.bf16.msra.mxu0 %v8226_v6  ;;  %v8235_v15 = vld [vmem:[#allocation2 + $0x98] sm:$0xff]   ;;  %v8239_v19 = vld [vmem:[#allocation2 + $0xa0] sm:$0xff]   ;;  %v8242_v25 = vld [vmem:[#allocation2 + $0x28] sm:$0xff]  }
  0x53   :  { %7414 = vmatpush3.bf16.msra.mxu1 %v8227_v7  ;;  %7393 = vmatprep.subr.bf16.mxu0 %v8228_v8  ;;  %v8243_v26 = vld [vmem:[#allocation2 + $0xa8] sm:$0xff]   ;;  %v8244_v27 = vld [vmem:[#allocation2 + $0x70] sm:$0xff]   ;;  %v8248_v33 = vld [vmem:[#allocation2 + $0x78] sm:$0xff]  }
  0x54   :  { %7415 = vmatprep.subr.bf16.mxu1 %v8229_v9  ;;  %v8245_v28 = vld [vmem:[#allocation2 + $0xf0] sm:$0xff]   ;;  %v8249_v34 = vld [vmem:[#allocation2 + $0xf8] sm:$0xff]   ;;  %v73_v38 = vld [vmem:[%s9200_s0] sm:$0xff] }
  0x55   :  { %v8246_v31 = vld [vmem:[#allocation2 + $0x30] sm:$0xff]   ;;  %v8250_v36 = vld [vmem:[#allocation2 + $0x38] sm:$0xff]   ;;  %v1250_v39 = vcombine.high %v73_v38, %v73_v38  ;;  %v1257_v40 = vrot.slane %v73_v38, %v9030_v35  ;;  %v8253_v41 = vld [vmem:[#allocation2 + $0x140] sm:$0xff]  }
  0x56   :  { %7394 = vmatpush3.bf16.msra.mxu0 %v8230_v10  ;;  %v8247_v32 = vld [vmem:[#allocation2 + $0xb0] sm:$0xff]   ;;  %v8251_v37 = vld [vmem:[#allocation2 + $0xb8] sm:$0xff]   ;;  %v8254_v42 = vld [vmem:[#allocation2 + $0x1c0] sm:$0xff]  }
  0x57   :  { %7416 = vmatpush3.bf16.msra.mxu1 %v8231_v11  ;;  %7395 = vmatprep.subr.bf16.mxu0 %v8232_v12  ;;  %v1265_v43 = vcombine.high %v1257_v40, %v1257_v40  ;;  %v1273_v44 = vrot.slane %v1257_v40, %v9030_v35  ;;  %v9038_v45 = vrot.slane %v1250_v39, %v9030_v35  ;;  %v8255_v46 = vld [vmem:[#allocation2 + $0x100] sm:$0xff]   ;;  %v8257_v51 = vld [vmem:[#allocation2 + $0x148] sm:$0xff]   ;;  %v8261_v58 = vld [vmem:[#allocation2 + $0x150] sm:$0xff]  }
  0x58   :  { %7417 = vmatprep.subr.bf16.mxu1 %v8233_v13  ;;  %v8256_v48 = vld [vmem:[#allocation2 + $0x180] sm:$0xff]   ;;  %v8258_v53 = vld [vmem:[#allocation2 + $0x1c8] sm:$0xff]   ;;  %v8262_v59 = vld [vmem:[#allocation2 + $0x1d0] sm:$0xff]  }
  0x59   :  { %v1287_v47 = vrot.slane %v1265_v43, %v9030_v35  ;;  %v1266_v49 = vcombine.high %v9038_v45, %v9038_v45  ;;  %v1295_v50 = vcombine.high %v1273_v44, %v1273_v44  ;;  %v8259_v55 = vld [vmem:[#allocation2 + $0x108] sm:$0xff]   ;;  %v8263_v60 = vld [vmem:[#allocation2 + $0x110] sm:$0xff]   ;;  %v8265_v62 = vld [vmem:[#allocation2 + $0x158] sm:$0xff]  }
  0x5a   :  { %7396 = vmatpush3.bf16.msra.mxu0 %v8234_v14  ;;  %v8260_v56 = vld [vmem:[#allocation2 + $0x188] sm:$0xff]   ;;  %v8264_v61 = vld [vmem:[#allocation2 + $0x190] sm:$0xff]   ;;  %v8266_v63 = vld [vmem:[#allocation2 + $0x1d8] sm:$0xff]  }
  0x5b   :  { %7418 = vmatpush3.bf16.msra.mxu1 %v8235_v15  ;;  %7397 = vmatprep.subr.bf16.mxu0 %v8236_v16  ;;  %v1297_v52 = vcombine.high %v1287_v47, %v1287_v47  ;;  %v1294_v54 = vrot.slane %v1266_v49, %v9030_v35  ;;  %v8267_v0 = vld [vmem:[#allocation2 + $0x118] sm:$0xff]   ;;  %v8269_v2 = vld [vmem:[#allocation2 + $0x160] sm:$0xff]   ;;  %v8273_v6 = vld [vmem:[#allocation2 + $0x168] sm:$0xff]  }
  0x5c   :  { %7419 = vmatprep.subr.bf16.mxu1 %v8237_v17  ;;  %5251 = vmatprep.mubr.bf16.mxu0 %v1287_v47  ;;  %v8268_v1 = vld [vmem:[#allocation2 + $0x198] sm:$0xff]   ;;  %v8270_v3 = vld [vmem:[#allocation2 + $0x1e0] sm:$0xff]   ;;  %v8274_v7 = vld [vmem:[#allocation2 + $0x1e8] sm:$0xff]  }
  0x5d   :  { %5291 = vmatprep.mubr.bf16.mxu1 %v1297_v52  ;;  %v1298_v57 = vcombine.high %v1294_v54, %v1294_v54  ;;  %v8271_v4 = vld [vmem:[#allocation2 + $0x120] sm:$0xff]   ;;  %v8275_v8 = vld [vmem:[#allocation2 + $0x128] sm:$0xff]   ;;  %v8277_v10 = vld [vmem:[#allocation2 + $0x170] sm:$0xff]  }
  0x5e   :  { %7398 = vmatpush3.bf16.msra.mxu0 %v8238_v18  ;;  %v8272_v5 = vld [vmem:[#allocation2 + $0x1a0] sm:$0xff]   ;;  %v8276_v9 = vld [vmem:[#allocation2 + $0x1a8] sm:$0xff]   ;;  %v8278_v11 = vld [vmem:[#allocation2 + $0x1f0] sm:$0xff]   ;;  %v1280_v18 = vrot.slane %v9038_v45, %v9030_v35 }
  0x5f   :  { %7420 = vmatpush3.bf16.msra.mxu1 %v8239_v19  ;;  %7399 = vmatprep.subr.bf16.mxu0 %v8240_v20  ;;  %v8279_v12 = vld [vmem:[#allocation2 + $0x130] sm:$0xff]   ;;  %v8281_v14 = vld [vmem:[#allocation2 + $0x178] sm:$0xff]   ;;  %v8285_v19 = vld [vmem:[#allocation2 + $0x240] sm:$0xff]  }
  0x60   :  { %7421 = vmatprep.subr.bf16.mxu1 %v8241_v21  ;;  %v8280_v13 = vld [vmem:[#allocation2 + $0x1b0] sm:$0xff]   ;;  %v8282_v15 = vld [vmem:[#allocation2 + $0x1f8] sm:$0xff]   ;;  %v8286_v20 = vld [vmem:[#allocation2 + $0x2c0] sm:$0xff]   ;;  %v1296_v23 = vcombine.high %v1280_v18, %v1280_v18 }
  0x61   :  { %v8283_v16 = vld [vmem:[#allocation2 + $0x138] sm:$0xff]   ;;  %v8287_v21 = vld [vmem:[#allocation2 + $0x200] sm:$0xff]   ;;  %v8289_v24 = vld [vmem:[#allocation2 + $0x248] sm:$0xff]  }
  0x62   :  { %7400 = vmatpush3.bf16.msra.mxu0 %v8242_v25  ;;  %v8284_v17 = vld [vmem:[#allocation2 + $0x1b8] sm:$0xff]   ;;  %v8288_v22 = vld [vmem:[#allocation2 + $0x280] sm:$0xff]   ;;  %v8290_v25 = vld [vmem:[#allocation2 + $0x2c8] sm:$0xff]  }
  0x63   :  { %7422 = vmatpush3.bf16.msra.mxu1 %v8243_v26  ;;  %7401 = vmatprep.subr.bf16.mxu0 %v8244_v27  ;;  %v8291_v26 = vld [vmem:[#allocation2 + $0x208] sm:$0xff]   ;;  %v8294_v29 = vld [vmem:[#allocation2 + $0x2d0] sm:$0xff]   ;;  %v8302_v38 = vld [vmem:[#allocation2 + $0x2e0] sm:$0xff]  }
  0x64   :  { %7423 = vmatprep.subr.bf16.mxu1 %v8245_v28  ;;  %v8292_v27 = vld [vmem:[#allocation2 + $0x288] sm:$0xff]   ;;  %v8293_v28 = vld [vmem:[#allocation2 + $0x250] sm:$0xff]   ;;  %v8303_v39 = vld [vmem:[#allocation2 + $0x220] sm:$0xff]  }
  0x65   :  { %v8295_v30 = vld [vmem:[#allocation2 + $0x210] sm:$0xff]   ;;  %v8304_v40 = vld [vmem:[#allocation2 + $0x2a0] sm:$0xff]   ;;  %v8307_v43 = vld [vmem:[#allocation2 + $0x228] sm:$0xff]  }
  0x66   :  { %7402 = vmatpush3.bf16.msra.mxu0 %v8246_v31  ;;  %v8296_v31 = vld [vmem:[#allocation2 + $0x290] sm:$0xff]   ;;  %v8313_v49 = vld [vmem:[#allocation2 + $0x278] sm:$0xff]   ;;  %v74_v52 = vld [vmem:[%s9200_s0 + $0x8] sm:$0xff] }
  0x67   :  { %7424 = vmatpush3.bf16.msra.mxu1 %v8247_v32  ;;  %7403 = vmatprep.subr.bf16.mxu0 %v8248_v33  ;;  %v8297_v32 = vld [vmem:[#allocation2 + $0x258] sm:$0xff]   ;;  %v8309_v45 = vld [vmem:[#allocation2 + $0x270] sm:$0xff]  }
  0x68   :  { %7425 = vmatprep.subr.bf16.mxu1 %v8249_v34  ;;  %v8298_v33 = vld [vmem:[#allocation2 + $0x2d8] sm:$0xff]   ;;  %v8311_v47 = vld [vmem:[#allocation2 + $0x230] sm:$0xff]  }
  0x69   :  { %v8299_v34 = vld [vmem:[#allocation2 + $0x218] sm:$0xff]  }
  0x6a   :  { %7404 = vmatpush3.bf16.msra.mxu0 %v8250_v36  ;;  %v8300_v36 = vld [vmem:[#allocation2 + $0x298] sm:$0xff]  }
  0x6b   :  { %7426 = vmatpush3.bf16.msra.mxu1 %v8251_v37  ;;  %7433 = vmatprep.subr.bf16.mxu0 %v8253_v41  ;;  %v8301_v37 = vld [vmem:[#allocation2 + $0x260] sm:$0xff]   ;;  %v8305_v41 = vld [vmem:[#allocation2 + $0x268] sm:$0xff]  }
  0x6c   :  { %7455 = vmatprep.subr.bf16.mxu1 %v8254_v42  ;;  %v8306_v42 = vld [vmem:[#allocation2 + $0x2e8] sm:$0xff]  }
  0x6d   :  { %5252 = vmatmul.mubr.bf16.vlgmr.msra.gmra.mrb[0].mxu0 %v1273_v44  ;;  %v8308_v44 = vld [vmem:[#allocation2 + $0x2a8] sm:$0xff]  }
  0x6e   :  { %7434 = vmatpush3.bf16.msra.mxu0 %v8255_v46  ;;  %5292 = vmatmul.mubr.bf16.vlgmr.msra.gmra.mrb[0].mxu1 %v1295_v50  ;;  %v8310_v46 = vld [vmem:[#allocation2 + $0x2f0] sm:$0xff]   ;;  %v8314_v50 = vld [vmem:[#allocation2 + $0x2f8] sm:$0xff]  }
  0x6f   :  { %7435 = vmatprep.subr.bf16.mxu0 %v8257_v51  ;;  %7456 = vmatpush3.bf16.msra.mxu1 %v8256_v48  ;;  %v8312_v48 = vld [vmem:[#allocation2 + $0x2b0] sm:$0xff]   ;;  %v8315_v51 = vld [vmem:[#allocation2 + $0x238] sm:$0xff]  }
  0x70   :  { %5331 = vmatprep.mubr.bf16.mxu0 %v1294_v54  ;;  %7457 = vmatprep.subr.bf16.mxu1 %v8258_v53  ;;  %v8316_v53 = vld [vmem:[#allocation2 + $0x2b8] sm:$0xff]   ;;  %v1306_v54 = vrot.slane %v74_v52, %v9030_v35 }
  0x71   :  { %5371 = vmatprep.mubr.bf16.mxu1 %v1298_v57 }
  0x72   :  { %7436 = vmatpush3.bf16.msra.mxu0 %v8259_v55  ;;  %v1299_v55 = vcombine.high %v74_v52, %v74_v52  ;;  %v1314_v57 = vcombine.high %v1306_v54, %v1306_v54  ;;  %v8366_v52 = vld [vmem:[#allocation2 + $0x460] sm:$0xff]  }
  0x73   :  { %7437 = vmatprep.subr.bf16.mxu0 %v8261_v58  ;;  %7458 = vmatpush3.bf16.msra.mxu1 %v8260_v56  ;;  %v8317_v56 = vld [vmem:[#allocation2 + $0x340] sm:$0xff]   ;;  %v1322_v58 = vrot.slane %v1306_v54, %v9030_v35 }
  0x74   :  { %7459 = vmatprep.subr.bf16.mxu1 %v8262_v59  ;;  %v8318_v59 = vld [vmem:[#allocation2 + $0x3c0] sm:$0xff]  }
  0x75   :  { %v8368_v54 = vld [vmem:[#allocation2 + $0x420] sm:$0xff]  }
  0x76   :  { %7438 = vmatpush3.bf16.msra.mxu0 %v8263_v60  ;;  %v9052_v60 = vrot.slane %v1299_v55, %v9030_v35  ;;  %v8369_v55 = vld [vmem:[#allocation2 + $0x4a0] sm:$0xff]  }
  0x77   :  { %7439 = vmatprep.subr.bf16.mxu0 %v8265_v62  ;;  %7460 = vmatpush3.bf16.msra.mxu1 %v8264_v61  ;;  %v8319_v61 = vld [vmem:[#allocation2 + $0x300] sm:$0xff]   ;;  %v1336_v62 = vrot.slane %v1314_v57, %v9030_v35  ;;  %v8371_v57 = vld [vmem:[#allocation2 + $0x4e8] sm:$0xff]  }
  0x78   :  { %7461 = vmatprep.subr.bf16.mxu1 %v8266_v63  ;;  %v8320_v63 = vld [vmem:[#allocation2 + $0x380] sm:$0xff]  }
  0x7a   :  { %7440 = vmatpush3.bf16.msra.mxu0 %v8267_v0  ;;  %v1315_v0 = vcombine.high %v9052_v60, %v9052_v60 }
  0x7b   :  { %7441 = vmatprep.subr.bf16.mxu0 %v8269_v2  ;;  %7462 = vmatpush3.bf16.msra.mxu1 %v8268_v1  ;;  %v1344_v1 = vcombine.high %v1322_v58, %v1322_v58  ;;  %v8321_v2 = vld [vmem:[#allocation2 + $0x348] sm:$0xff]  }
  0x7c   :  { %7463 = vmatprep.subr.bf16.mxu1 %v8270_v3  ;;  %v1346_v3 = vcombine.high %v1336_v62, %v1336_v62 }
  0x7e   :  { %7442 = vmatpush3.bf16.msra.mxu0 %v8271_v4  ;;  %v8322_v4 = vld [vmem:[#allocation2 + $0x3c8] sm:$0xff]  }
  0x7f   :  { %7443 = vmatprep.subr.bf16.mxu0 %v8273_v6  ;;  %7464 = vmatpush3.bf16.msra.mxu1 %v8272_v5  ;;  %v1343_v5 = vrot.slane %v1315_v0, %v9030_v35  ;;  %v8323_v6 = vld [vmem:[#allocation2 + $0x308] sm:$0xff]   ;;  %v8378_v0 = vld [vmem:[#allocation2 + $0x478] sm:$0xff]  }
  0x80   :  { %7465 = vmatprep.subr.bf16.mxu1 %v8274_v7  ;;  %v8324_v7 = vld [vmem:[#allocation2 + $0x388] sm:$0xff]  }
  0x82   :  { %7444 = vmatpush3.bf16.msra.mxu0 %v8275_v8  ;;  %v1347_v8 = vcombine.high %v1343_v5, %v1343_v5 }
  0x83   :  { %7445 = vmatprep.subr.bf16.mxu0 %v8277_v10  ;;  %7466 = vmatpush3.bf16.msra.mxu1 %v8276_v9  ;;  %v8325_v9 = vld [vmem:[#allocation2 + $0x350] sm:$0xff]  }
  0x84   :  { %7467 = vmatprep.subr.bf16.mxu1 %v8278_v11  ;;  %v8326_v10 = vld [vmem:[#allocation2 + $0x3d0] sm:$0xff]  }
  0x85   :  { %v8327_v11 = vld [vmem:[#allocation2 + $0x310] sm:$0xff]  }
  0x86   :  { %7446 = vmatpush3.bf16.msra.mxu0 %v8279_v12  ;;  %v8328_v12 = vld [vmem:[#allocation2 + $0x390] sm:$0xff]  }
  0x87   :  { %7447 = vmatprep.subr.bf16.mxu0 %v8281_v14  ;;  %7468 = vmatpush3.bf16.msra.mxu1 %v8280_v13  ;;  %v8329_v13 = vld [vmem:[#allocation2 + $0x358] sm:$0xff]  }
  0x88   :  { %7469 = vmatprep.subr.bf16.mxu1 %v8282_v15  ;;  %v8330_v14 = vld [vmem:[#allocation2 + $0x3d8] sm:$0xff]  }
  0x89   :  { %v8331_v15 = vld [vmem:[#allocation2 + $0x318] sm:$0xff]  }
  0x8a   :  { %7448 = vmatpush3.bf16.msra.mxu0 %v8283_v16  ;;  %v8332_v16 = vld [vmem:[#allocation2 + $0x398] sm:$0xff]  }
  0x8b   :  { %7477 = vmatprep.subr.bf16.mxu0 %v8285_v19  ;;  %7470 = vmatpush3.bf16.msra.mxu1 %v8284_v17  ;;  %v8333_v17 = vld [vmem:[#allocation2 + $0x360] sm:$0xff]  }
  0x8c   :  { %7499 = vmatprep.subr.bf16.mxu1 %v8286_v20  ;;  %v8335_v19 = vld [vmem:[#allocation2 + $0x320] sm:$0xff]  }
  0x8d   :  { %5332 = vmatmul.mubr.bf16.vlgmr.msra.gmra.mrb[4].mxu0 %v1280_v18  ;;  %v8334_v18 = vld [vmem:[#allocation2 + $0x3e0] sm:$0xff]  }
  0x8e   :  { %7478 = vmatpush3.bf16.msra.mxu0 %v8287_v21  ;;  %5372 = vmatmul.mubr.bf16.vlgmr.msra.gmra.mrb[4].mxu1 %v1296_v23  ;;  %v8336_v20 = vld [vmem:[#allocation2 + $0x3a0] sm:$0xff]   ;;  %v8337_v21 = vld [vmem:[#allocation2 + $0x368] sm:$0xff]  }
  0x8f   :  { %7479 = vmatprep.subr.bf16.mxu0 %v8289_v24  ;;  %7500 = vmatpush3.bf16.msra.mxu1 %v8288_v22  ;;  %v8338_v22 = vld [vmem:[#allocation2 + $0x3e8] sm:$0xff]  }
  0x90   :  { %7501 = vmatprep.subr.bf16.mxu1 %v8290_v25  ;;  %5411 = vmatprep.mubr.bf16.mxu0 %v1336_v62  ;;  %v8339_v23 = vld [vmem:[#allocation2 + $0x328] sm:$0xff]   ;;  %v8341_v25 = vld [vmem:[#allocation2 + $0x370] sm:$0xff]  }
  0x91   :  { %5451 = vmatprep.mubr.bf16.mxu1 %v1346_v3  ;;  %v8340_v24 = vld [vmem:[#allocation2 + $0x3a8] sm:$0xff]   ;;  %v8376_v62 = vld [vmem:[#allocation2 + $0x430] sm:$0xff]  }
  0x92   :  { %7480 = vmatpush3.bf16.msra.mxu0 %v8291_v26  ;;  %v8342_v26 = vld [vmem:[#allocation2 + $0x3f0] sm:$0xff]  }
  0x93   :  { %7481 = vmatprep.subr.bf16.mxu0 %v8293_v28  ;;  %7502 = vmatpush3.bf16.msra.mxu1 %v8292_v27  ;;  %v8343_v27 = vld [vmem:[#allocation2 + $0x330] sm:$0xff]  }
  0x94   :  { %7503 = vmatprep.subr.bf16.mxu1 %v8294_v29  ;;  %v8344_v28 = vld [vmem:[#allocation2 + $0x3b0] sm:$0xff]   ;;  %v8345_v29 = vld [vmem:[#allocation2 + $0x378] sm:$0xff]  }
  0x95   :  { %v75_v3 = vld [vmem:[%s9200_s0 + $0x10] sm:$0xff] }
  0x96   :  { %7482 = vmatpush3.bf16.msra.mxu0 %v8295_v30  ;;  %v8346_v30 = vld [vmem:[#allocation2 + $0x3f8] sm:$0xff]  }
  0x97   :  { %7483 = vmatprep.subr.bf16.mxu0 %v8297_v32  ;;  %7504 = vmatpush3.bf16.msra.mxu1 %v8296_v31  ;;  %v8347_v31 = vld [vmem:[#allocation2 + $0x338] sm:$0xff]  }
  0x98   :  { %7505 = vmatprep.subr.bf16.mxu1 %v8298_v33  ;;  %v8348_v32 = vld [vmem:[#allocation2 + $0x3b8] sm:$0xff]   ;;  %v1329_v33 = vrot.slane %v9052_v60, %v9030_v35  ;;  %v8374_v60 = vld [vmem:[#allocation2 + $0x470] sm:$0xff]  }
  0x9a   :  { %7484 = vmatpush3.bf16.msra.mxu0 %v8299_v34  ;;  %v8350_v34 = vld [vmem:[#allocation2 + $0x440] sm:$0xff]  }
  0x9b   :  { %7485 = vmatprep.subr.bf16.mxu0 %v8301_v37  ;;  %7506 = vmatpush3.bf16.msra.mxu1 %v8300_v36  ;;  %v8351_v36 = vld [vmem:[#allocation2 + $0x4c0] sm:$0xff]  }
  0x9c   :  { %7507 = vmatprep.subr.bf16.mxu1 %v8302_v38  ;;  %v8352_v37 = vld [vmem:[#allocation2 + $0x400] sm:$0xff]  }
  0x9d   :  { %v8353_v38 = vld [vmem:[#allocation2 + $0x480] sm:$0xff]  }
  0x9e   :  { %7486 = vmatpush3.bf16.msra.mxu0 %v8303_v39  ;;  %v1345_v39 = vcombine.high %v1329_v33, %v1329_v33 }
  0x9f   :  { %7487 = vmatprep.subr.bf16.mxu0 %v8305_v41  ;;  %7508 = vmatpush3.bf16.msra.mxu1 %v8304_v40  ;;  %v8354_v40 = vld [vmem:[#allocation2 + $0x448] sm:$0xff]  }
  0xa0   :  { %7509 = vmatprep.subr.bf16.mxu1 %v8306_v42  ;;  %v8355_v41 = vld [vmem:[#allocation2 + $0x4c8] sm:$0xff]  }
  0xa1   :  { %v8356_v42 = vld [vmem:[#allocation2 + $0x408] sm:$0xff]  }
  0xa2   :  { %7488 = vmatpush3.bf16.msra.mxu0 %v8307_v43  ;;  %v8357_v43 = vld [vmem:[#allocation2 + $0x488] sm:$0xff]  }
  0xa3   :  { %7489 = vmatprep.subr.bf16.mxu0 %v8309_v45  ;;  %7510 = vmatpush3.bf16.msra.mxu1 %v8308_v44  ;;  %v8358_v44 = vld [vmem:[#allocation2 + $0x450] sm:$0xff]  }
  0xa4   :  { %7511 = vmatprep.subr.bf16.mxu1 %v8310_v46  ;;  %v8359_v45 = vld [vmem:[#allocation2 + $0x4d0] sm:$0xff]  }
  0xa5   :  { %v8360_v46 = vld [vmem:[#allocation2 + $0x410] sm:$0xff]  }
  0xa6   :  { %7490 = vmatpush3.bf16.msra.mxu0 %v8311_v47  ;;  %v8361_v47 = vld [vmem:[#allocation2 + $0x490] sm:$0xff]  }
  0xa7   :  { %7491 = vmatprep.subr.bf16.mxu0 %v8313_v49  ;;  %7512 = vmatpush3.bf16.msra.mxu1 %v8312_v48  ;;  %v8362_v48 = vld [vmem:[#allocation2 + $0x458] sm:$0xff]  }
  0xa8   :  { %7513 = vmatprep.subr.bf16.mxu1 %v8314_v50  ;;  %v8363_v49 = vld [vmem:[#allocation2 + $0x4d8] sm:$0xff]  }
  0xa9   :  { %v8364_v50 = vld [vmem:[#allocation2 + $0x418] sm:$0xff]  }
  0xaa   :  { %7492 = vmatpush3.bf16.msra.mxu0 %v8315_v51  ;;  %v8365_v51 = vld [vmem:[#allocation2 + $0x498] sm:$0xff]  }
  0xab   :  { %7521 = vmatprep.subr.bf16.mxu0 %v8317_v56  ;;  %7514 = vmatpush3.bf16.msra.mxu1 %v8316_v53  ;;  %v8367_v53 = vld [vmem:[#allocation2 + $0x4e0] sm:$0xff]   ;;  %v8370_v56 = vld [vmem:[#allocation2 + $0x468] sm:$0xff]  }
  0xac   :  { %7543 = vmatprep.subr.bf16.mxu1 %v8318_v59  ;;  %v8373_v59 = vld [vmem:[#allocation2 + $0x4a8] sm:$0xff]  }
  0xad   :  { %5412 = vmatmul.mubr.bf16.vlgmr.msra.gmra.mrb[8].mxu0 %v1322_v58  ;;  %v8372_v58 = vld [vmem:[#allocation2 + $0x428] sm:$0xff]  }
  0xae   :  { %7522 = vmatpush3.bf16.msra.mxu0 %v8319_v61  ;;  %5452 = vmatmul.mubr.bf16.vlgmr.msra.gmra.mrb[8].mxu1 %v1344_v1  ;;  %v8375_v61 = vld [vmem:[#allocation2 + $0x4f0] sm:$0xff]   ;;  %v8379_v1 = vld [vmem:[#allocation2 + $0x4f8] sm:$0xff]  }
  0xaf   :  { %7523 = vmatprep.subr.bf16.mxu0 %v8321_v2  ;;  %7544 = vmatpush3.bf16.msra.mxu1 %v8320_v63  ;;  %v8377_v63 = vld [vmem:[#allocation2 + $0x4b0] sm:$0xff]   ;;  %v8380_v2 = vld [vmem:[#allocation2 + $0x438] sm:$0xff]  }
  0xb0   :  { %5491 = vmatprep.mubr.bf16.mxu0 %v1343_v5  ;;  %7545 = vmatprep.subr.bf16.mxu1 %v8322_v4  ;;  %v8381_v4 = vld [vmem:[#allocation2 + $0x4b8] sm:$0xff]   ;;  %v1355_v5 = vrot.slane %v75_v3, %v9030_v35 }
  0xb1   :  { %5531 = vmatprep.mubr.bf16.mxu1 %v1347_v8 }
  0xb2   :  { %7524 = vmatpush3.bf16.msra.mxu0 %v8323_v6  ;;  %v1348_v6 = vcombine.high %v75_v3, %v75_v3  ;;  %v1363_v8 = vcombine.high %v1355_v5, %v1355_v5  ;;  %v8431_v3 = vld [vmem:[#allocation2 + $0x660] sm:$0xff]  }
  0xb3   :  { %7525 = vmatprep.subr.bf16.mxu0 %v8325_v9  ;;  %7546 = vmatpush3.bf16.msra.mxu1 %v8324_v7  ;;  %v8382_v7 = vld [vmem:[#allocation2 + $0x540] sm:$0xff]   ;;  %v1371_v9 = vrot.slane %v1355_v5, %v9030_v35 }
  0xb4   :  { %7547 = vmatprep.subr.bf16.mxu1 %v8326_v10  ;;  %v8383_v10 = vld [vmem:[#allocation2 + $0x5c0] sm:$0xff]  }
  0xb5   :  { %v8433_v5 = vld [vmem:[#allocation2 + $0x620] sm:$0xff]  }
  0xb6   :  { %7526 = vmatpush3.bf16.msra.mxu0 %v8327_v11  ;;  %v9066_v11 = vrot.slane %v1348_v6, %v9030_v35  ;;  %v8434_v6 = vld [vmem:[#allocation2 + $0x6a0] sm:$0xff]  }
  0xb7   :  { %7527 = vmatprep.subr.bf16.mxu0 %v8329_v13  ;;  %7548 = vmatpush3.bf16.msra.mxu1 %v8328_v12  ;;  %v8384_v12 = vld [vmem:[#allocation2 + $0x500] sm:$0xff]   ;;  %v1385_v13 = vrot.slane %v1363_v8, %v9030_v35  ;;  %v8436_v8 = vld [vmem:[#allocation2 + $0x6e8] sm:$0xff]  }
  0xb8   :  { %7549 = vmatprep.subr.bf16.mxu1 %v8330_v14  ;;  %v8385_v14 = vld [vmem:[#allocation2 + $0x580] sm:$0xff]  }
  0xba   :  { %7528 = vmatpush3.bf16.msra.mxu0 %v8331_v15  ;;  %v1364_v15 = vcombine.high %v9066_v11, %v9066_v11 }
  0xbb   :  { %7529 = vmatprep.subr.bf16.mxu0 %v8333_v17  ;;  %7550 = vmatpush3.bf16.msra.mxu1 %v8332_v16  ;;  %v1393_v16 = vcombine.high %v1371_v9, %v1371_v9  ;;  %v8386_v17 = vld [vmem:[#allocation2 + $0x548] sm:$0xff]  }
  0xbc   :  { %7551 = vmatprep.subr.bf16.mxu1 %v8334_v18  ;;  %v1395_v18 = vcombine.high %v1385_v13, %v1385_v13 }
  0xbe   :  { %7530 = vmatpush3.bf16.msra.mxu0 %v8335_v19  ;;  %v8387_v19 = vld [vmem:[#allocation2 + $0x5c8] sm:$0xff]  }
  0xbf   :  { %7531 = vmatprep.subr.bf16.mxu0 %v8337_v21  ;;  %7552 = vmatpush3.bf16.msra.mxu1 %v8336_v20  ;;  %v1392_v20 = vrot.slane %v1364_v15, %v9030_v35  ;;  %v8388_v21 = vld [vmem:[#allocation2 + $0x508] sm:$0xff]   ;;  %v8443_v15 = vld [vmem:[#allocation2 + $0x678] sm:$0xff]  }
  0xc0   :  { %7553 = vmatprep.subr.bf16.mxu1 %v8338_v22  ;;  %v8389_v22 = vld [vmem:[#allocation2 + $0x588] sm:$0xff]  }
  0xc2   :  { %7532 = vmatpush3.bf16.msra.mxu0 %v8339_v23  ;;  %v1396_v23 = vcombine.high %v1392_v20, %v1392_v20 }
  0xc3   :  { %7533 = vmatprep.subr.bf16.mxu0 %v8341_v25  ;;  %7554 = vmatpush3.bf16.msra.mxu1 %v8340_v24  ;;  %v8390_v24 = vld [vmem:[#allocation2 + $0x550] sm:$0xff]  }
  0xc4   :  { %7555 = vmatprep.subr.bf16.mxu1 %v8342_v26  ;;  %v8391_v25 = vld [vmem:[#allocation2 + $0x5d0] sm:$0xff]  }
  0xc5   :  { %v8392_v26 = vld [vmem:[#allocation2 + $0x510] sm:$0xff]  }
  0xc6   :  { %7534 = vmatpush3.bf16.msra.mxu0 %v8343_v27  ;;  %v8393_v27 = vld [vmem:[#allocation2 + $0x590] sm:$0xff]  }
  0xc7   :  { %7535 = vmatprep.subr.bf16.mxu0 %v8345_v29  ;;  %7556 = vmatpush3.bf16.msra.mxu1 %v8344_v28  ;;  %v8394_v28 = vld [vmem:[#allocation2 + $0x558] sm:$0xff]  }
  0xc8   :  { %7557 = vmatprep.subr.bf16.mxu1 %v8346_v30  ;;  %v8395_v29 = vld [vmem:[#allocation2 + $0x5d8] sm:$0xff]  }
  0xc9   :  { %v8396_v30 = vld [vmem:[#allocation2 + $0x518] sm:$0xff]  }
  0xca   :  { %7536 = vmatpush3.bf16.msra.mxu0 %v8347_v31  ;;  %v8397_v31 = vld [vmem:[#allocation2 + $0x598] sm:$0xff]  }
  0xcb   :  { %7565 = vmatprep.subr.bf16.mxu0 %v8350_v34  ;;  %7558 = vmatpush3.bf16.msra.mxu1 %v8348_v32  ;;  %v8398_v32 = vld [vmem:[#allocation2 + $0x560] sm:$0xff]  }
  0xcc   :  { %7587 = vmatprep.subr.bf16.mxu1 %v8351_v36  ;;  %v8400_v34 = vld [vmem:[#allocation2 + $0x520] sm:$0xff]  }
  0xcd   :  { %5492 = vmatmul.mubr.bf16.vlgmr.msra.gmra.mrb[12].mxu0 %v1329_v33  ;;  %v8399_v33 = vld [vmem:[#allocation2 + $0x5e0] sm:$0xff]  }
  0xce   :  { %7566 = vmatpush3.bf16.msra.mxu0 %v8352_v37  ;;  %5532 = vmatmul.mubr.bf16.vlgmr.msra.gmra.mrb[12].mxu1 %v1345_v39  ;;  %v8401_v36 = vld [vmem:[#allocation2 + $0x5a0] sm:$0xff]   ;;  %v8402_v37 = vld [vmem:[#allocation2 + $0x568] sm:$0xff]  }
  0xcf   :  { %7567 = vmatprep.subr.bf16.mxu0 %v8354_v40  ;;  %7588 = vmatpush3.bf16.msra.mxu1 %v8353_v38  ;;  %v8403_v38 = vld [vmem:[#allocation2 + $0x5e8] sm:$0xff]  }
  0xd0   :  { %7589 = vmatprep.subr.bf16.mxu1 %v8355_v41  ;;  %5571 = vmatprep.mubr.bf16.mxu0 %v1385_v13  ;;  %v8404_v39 = vld [vmem:[#allocation2 + $0x528] sm:$0xff]   ;;  %v8406_v41 = vld [vmem:[#allocation2 + $0x570] sm:$0xff]  }
  0xd1   :  { %5611 = vmatprep.mubr.bf16.mxu1 %v1395_v18  ;;  %v8405_v40 = vld [vmem:[#allocation2 + $0x5a8] sm:$0xff]   ;;  %v8441_v13 = vld [vmem:[#allocation2 + $0x630] sm:$0xff]   ;;  %v76_v18 = vld [vmem:[%s9200_s0 + $0x18] sm:$0xff] }
  0xd2   :  { %7568 = vmatpush3.bf16.msra.mxu0 %v8356_v42  ;;  %v8407_v42 = vld [vmem:[#allocation2 + $0x5f0] sm:$0xff]  }
  0xd3   :  { %7569 = vmatprep.subr.bf16.mxu0 %v8358_v44  ;;  %7590 = vmatpush3.bf16.msra.mxu1 %v8357_v43  ;;  %v8408_v43 = vld [vmem:[#allocation2 + $0x530] sm:$0xff]  }
  0xd4   :  { %7591 = vmatprep.subr.bf16.mxu1 %v8359_v45  ;;  %v8409_v44 = vld [vmem:[#allocation2 + $0x5b0] sm:$0xff]   ;;  %v8410_v45 = vld [vmem:[#allocation2 + $0x578] sm:$0xff]  }
  0xd6   :  { %7570 = vmatpush3.bf16.msra.mxu0 %v8360_v46  ;;  %v8411_v46 = vld [vmem:[#allocation2 + $0x5f8] sm:$0xff]  }
  0xd7   :  { %7571 = vmatprep.subr.bf16.mxu0 %v8362_v48  ;;  %7592 = vmatpush3.bf16.msra.mxu1 %v8361_v47  ;;  %v8412_v47 = vld [vmem:[#allocation2 + $0x538] sm:$0xff]  }
  0xd8   :  { %7593 = vmatprep.subr.bf16.mxu1 %v8363_v49  ;;  %v8413_v48 = vld [vmem:[#allocation2 + $0x5b8] sm:$0xff]   ;;  %v1378_v49 = vrot.slane %v9066_v11, %v9030_v35  ;;  %v8439_v11 = vld [vmem:[#allocation2 + $0x670] sm:$0xff]  }
  0xda   :  { %7572 = vmatpush3.bf16.msra.mxu0 %v8364_v50  ;;  %v8415_v50 = vld [vmem:[#allocation2 + $0x640] sm:$0xff]  }
  0xdb   :  { %7573 = vmatprep.subr.bf16.mxu0 %v8366_v52  ;;  %7594 = vmatpush3.bf16.msra.mxu1 %v8365_v51  ;;  %v8416_v51 = vld [vmem:[#allocation2 + $0x6c0] sm:$0xff]  }
  0xdc   :  { %7595 = vmatprep.subr.bf16.mxu1 %v8367_v53  ;;  %v8417_v52 = vld [vmem:[#allocation2 + $0x600] sm:$0xff]  }
  0xdd   :  { %v8418_v53 = vld [vmem:[#allocation2 + $0x680] sm:$0xff]  }
  0xde   :  { %7574 = vmatpush3.bf16.msra.mxu0 %v8368_v54  ;;  %v1394_v54 = vcombine.high %v1378_v49, %v1378_v49 }
  0xdf   :  { %7575 = vmatprep.subr.bf16.mxu0 %v8370_v56  ;;  %7596 = vmatpush3.bf16.msra.mxu1 %v8369_v55  ;;  %v8419_v55 = vld [vmem:[#allocation2 + $0x648] sm:$0xff]  }
  0xe0   :  { %7597 = vmatprep.subr.bf16.mxu1 %v8371_v57  ;;  %v8420_v56 = vld [vmem:[#allocation2 + $0x6c8] sm:$0xff]  }
  0xe1   :  { %v8421_v57 = vld [vmem:[#allocation2 + $0x608] sm:$0xff]  }
  0xe2   :  { %7576 = vmatpush3.bf16.msra.mxu0 %v8372_v58  ;;  %v8422_v58 = vld [vmem:[#allocation2 + $0x688] sm:$0xff]  }
  0xe3   :  { %7577 = vmatprep.subr.bf16.mxu0 %v8374_v60  ;;  %7598 = vmatpush3.bf16.msra.mxu1 %v8373_v59  ;;  %v8423_v59 = vld [vmem:[#allocation2 + $0x650] sm:$0xff]  }
  0xe4   :  { %7599 = vmatprep.subr.bf16.mxu1 %v8375_v61  ;;  %v8424_v60 = vld [vmem:[#allocation2 + $0x6d0] sm:$0xff]  }
  0xe5   :  { %v8425_v61 = vld [vmem:[#allocation2 + $0x610] sm:$0xff]  }
  0xe6   :  { %7578 = vmatpush3.bf16.msra.mxu0 %v8376_v62  ;;  %v8426_v62 = vld [vmem:[#allocation2 + $0x690] sm:$0xff]  }
  0xe7   :  { %7579 = vmatprep.subr.bf16.mxu0 %v8378_v0  ;;  %7600 = vmatpush3.bf16.msra.mxu1 %v8377_v63  ;;  %v8427_v63 = vld [vmem:[#allocation2 + $0x658] sm:$0xff]  }
  0xe8   :  { %7601 = vmatprep.subr.bf16.mxu1 %v8379_v1  ;;  %v8428_v0 = vld [vmem:[#allocation2 + $0x6d8] sm:$0xff]  }
  0xe9   :  { %v8429_v1 = vld [vmem:[#allocation2 + $0x618] sm:$0xff]  }
  0xea   :  { %7580 = vmatpush3.bf16.msra.mxu0 %v8380_v2  ;;  %v8430_v2 = vld [vmem:[#allocation2 + $0x698] sm:$0xff]  }
  0xeb   :  { %7609 = vmatprep.subr.bf16.mxu0 %v8382_v7  ;;  %7602 = vmatpush3.bf16.msra.mxu1 %v8381_v4  ;;  %v8432_v4 = vld [vmem:[#allocation2 + $0x6e0] sm:$0xff]   ;;  %v8435_v7 = vld [vmem:[#allocation2 + $0x668] sm:$0xff]  }
  0xec   :  { %7631 = vmatprep.subr.bf16.mxu1 %v8383_v10  ;;  %v8438_v10 = vld [vmem:[#allocation2 + $0x6a8] sm:$0xff]  }
  0xed   :  { %5572 = vmatmul.mubr.bf16.vlgmr.msra.gmra.mrb[16].mxu0 %v1371_v9  ;;  %v8437_v9 = vld [vmem:[#allocation2 + $0x628] sm:$0xff]  }
  0xee   :  { %7610 = vmatpush3.bf16.msra.mxu0 %v8384_v12  ;;  %5612 = vmatmul.mubr.bf16.vlgmr.msra.gmra.mrb[16].mxu1 %v1393_v16  ;;  %v8440_v12 = vld [vmem:[#allocation2 + $0x6f0] sm:$0xff]   ;;  %v8444_v16 = vld [vmem:[#allocation2 + $0x6f8] sm:$0xff]  }
  0xef   :  { %7611 = vmatprep.subr.bf16.mxu0 %v8386_v17  ;;  %7632 = vmatpush3.bf16.msra.mxu1 %v8385_v14  ;;  %v8442_v14 = vld [vmem:[#allocation2 + $0x6b0] sm:$0xff]   ;;  %v8445_v17 = vld [vmem:[#allocation2 + $0x638] sm:$0xff]  }
  0xf0   :  { %5651 = vmatprep.mubr.bf16.mxu0 %v1392_v20  ;;  %7633 = vmatprep.subr.bf16.mxu1 %v8387_v19  ;;  %v1404_v19 = vrot.slane %v76_v18, %v9030_v35  ;;  %v8447_v20 = vld [vmem:[#allocation2 + $0x740] sm:$0xff]  }
  0xf1   :  { %5691 = vmatprep.mubr.bf16.mxu1 %v1396_v23 }
  0xf2   :  { %7612 = vmatpush3.bf16.msra.mxu0 %v8388_v21  ;;  %v1397_v21 = vcombine.high %v76_v18, %v76_v18  ;;  %v1412_v23 = vcombine.high %v1404_v19, %v1404_v19 }
  0xf3   :  { %7613 = vmatprep.subr.bf16.mxu0 %v8390_v24  ;;  %7634 = vmatpush3.bf16.msra.mxu1 %v8389_v22  ;;  %v8446_v22 = vld [vmem:[#allocation2 + $0x6b8] sm:$0xff]   ;;  %v1420_v24 = vrot.slane %v1404_v19, %v9030_v35  ;;  %v8484_v19 = vld [vmem:[#allocation2 + $0x848] sm:$0xff]  }
  0xf4   :  { %7635 = vmatprep.subr.bf16.mxu1 %v8391_v25  ;;  %v8448_v25 = vld [vmem:[#allocation2 + $0x7c0] sm:$0xff]  }
  0xf6   :  { %7614 = vmatpush3.bf16.msra.mxu0 %v8392_v26  ;;  %v9080_v26 = vrot.slane %v1397_v21, %v9030_v35  ;;  %v8486_v21 = vld [vmem:[#allocation2 + $0x808] sm:$0xff]  }
  0xf7   :  { %7615 = vmatprep.subr.bf16.mxu0 %v8394_v28  ;;  %7636 = vmatpush3.bf16.msra.mxu1 %v8393_v27  ;;  %v1434_v27 = vrot.slane %v1412_v23, %v9030_v35  ;;  %v8449_v28 = vld [vmem:[#allocation2 + $0x700] sm:$0xff]   ;;  %v8488_v23 = vld [vmem:[#allocation2 + $0x850] sm:$0xff]  }
  0xf8   :  { %7637 = vmatprep.subr.bf16.mxu1 %v8395_v29  ;;  %v1413_v29 = vcombine.high %v9080_v26, %v9080_v26 }
  0xfa   :  { %7616 = vmatpush3.bf16.msra.mxu0 %v8396_v30  ;;  %v1442_v30 = vcombine.high %v1420_v24, %v1420_v24 }
  0xfb   :  { %7617 = vmatprep.subr.bf16.mxu0 %v8398_v32  ;;  %7638 = vmatpush3.bf16.msra.mxu1 %v8397_v31  ;;  %v8451_v31 = vld [vmem:[#allocation2 + $0x748] sm:$0xff]   ;;  %v1444_v32 = vcombine.high %v1434_v27, %v1434_v27 }
  0xfc   :  { %7639 = vmatprep.subr.bf16.mxu1 %v8399_v33  ;;  %v8450_v33 = vld [vmem:[#allocation2 + $0x780] sm:$0xff]  }
  0xfe   :  { %7618 = vmatpush3.bf16.msra.mxu0 %v8400_v34  ;;  %v1441_v34 = vrot.slane %v1413_v29, %v9030_v35  ;;  %v8494_v29 = vld [vmem:[#allocation2 + $0x818] sm:$0xff]  }
  0xff   :  { %7619 = vmatprep.subr.bf16.mxu0 %v8402_v37  ;;  %7640 = vmatpush3.bf16.msra.mxu1 %v8401_v36  ;;  %v8452_v36 = vld [vmem:[#allocation2 + $0x7c8] sm:$0xff]  }
 0x100   :  { %7641 = vmatprep.subr.bf16.mxu1 %v8403_v38  ;;  %v8453_v37 = vld [vmem:[#allocation2 + $0x708] sm:$0xff]   ;;  %v1445_v38 = vcombine.high %v1441_v34, %v1441_v34 }
 0x102   :  { %7620 = vmatpush3.bf16.msra.mxu0 %v8404_v39  ;;  %v8455_v39 = vld [vmem:[#allocation2 + $0x750] sm:$0xff]  }
 0x103   :  { %7621 = vmatprep.subr.bf16.mxu0 %v8406_v41  ;;  %7642 = vmatpush3.bf16.msra.mxu1 %v8405_v40  ;;  %v8454_v40 = vld [vmem:[#allocation2 + $0x788] sm:$0xff]   ;;  %v8456_v41 = vld [vmem:[#allocation2 + $0x7d0] sm:$0xff]  }
 0x104   :  { %7643 = vmatprep.subr.bf16.mxu1 %v8407_v42  ;;  %v8457_v42 = vld [vmem:[#allocation2 + $0x710] sm:$0xff]  }
 0x106   :  { %7622 = vmatpush3.bf16.msra.mxu0 %v8408_v43  ;;  %v8459_v43 = vld [vmem:[#allocation2 + $0x758] sm:$0xff]  }
 0x107   :  { %7623 = vmatprep.subr.bf16.mxu0 %v8410_v45  ;;  %7644 = vmatpush3.bf16.msra.mxu1 %v8409_v44  ;;  %v8458_v44 = vld [vmem:[#allocation2 + $0x790] sm:$0xff]   ;;  %v8460_v45 = vld [vmem:[#allocation2 + $0x7d8] sm:$0xff]  }
 0x108   :  { %7645 = vmatprep.subr.bf16.mxu1 %v8411_v46  ;;  %v8461_v46 = vld [vmem:[#allocation2 + $0x718] sm:$0xff]  }
 0x10a   :  { %7624 = vmatpush3.bf16.msra.mxu0 %v8412_v47  ;;  %v8463_v47 = vld [vmem:[#allocation2 + $0x760] sm:$0xff]  }
 0x10b   :  { %7653 = vmatprep.subr.bf16.mxu0 %v8415_v50  ;;  %7646 = vmatpush3.bf16.msra.mxu1 %v8413_v48  ;;  %v8462_v48 = vld [vmem:[#allocation2 + $0x798] sm:$0xff]   ;;  %v8465_v50 = vld [vmem:[#allocation2 + $0x720] sm:$0xff]  }
 0x10c   :  { %7675 = vmatprep.subr.bf16.mxu1 %v8416_v51  ;;  %v8467_v51 = vld [vmem:[#allocation2 + $0x768] sm:$0xff]  }
 0x10d   :  { %5652 = vmatmul.mubr.bf16.vlgmr.msra.gmra.mrb[20].mxu0 %v1378_v49  ;;  %v8464_v49 = vld [vmem:[#allocation2 + $0x7e0] sm:$0xff]  }
 0x10e   :  { %7654 = vmatpush3.bf16.msra.mxu0 %v8417_v52  ;;  %5692 = vmatmul.mubr.bf16.vlgmr.msra.gmra.mrb[20].mxu1 %v1394_v54  ;;  %v8466_v52 = vld [vmem:[#allocation2 + $0x7a0] sm:$0xff]  }
 0x10f   :  { %7655 = vmatprep.subr.bf16.mxu0 %v8419_v55  ;;  %7676 = vmatpush3.bf16.msra.mxu1 %v8418_v53  ;;  %v8468_v53 = vld [vmem:[#allocation2 + $0x7e8] sm:$0xff]   ;;  %v6803_v54 = vld [vmem:[#allocation5] ss:$0 sm:$0xff] }
 0x110   :  { %7677 = vmatprep.subr.bf16.mxu1 %v8420_v56  ;;  %5731 = vmatprep.mubr.bf16.mxu0 %v1434_v27  ;;  %v8469_v55 = vld [vmem:[#allocation2 + $0x728] sm:$0xff]   ;;  %v8492_v27 = vld [vmem:[#allocation2 + $0x858] sm:$0xff]  }
 0x111   :  { %5771 = vmatprep.mubr.bf16.mxu1 %v1444_v32  ;;  %v8497_v32 = vld [vmem:[#allocation2 + $0x8e0] sm:$0xff]  }
 0x112   :  { %7656 = vmatpush3.bf16.msra.mxu0 %v8421_v57  ;;  %v8471_v57 = vld [vmem:[#allocation2 + $0x770] sm:$0xff]  }
 0x113   :  { %7657 = vmatprep.subr.bf16.mxu0 %v8423_v59  ;;  %7678 = vmatpush3.bf16.msra.mxu1 %v8422_v58  ;;  %v8470_v59 = vld [vmem:[#allocation2 + $0x7a8] sm:$0xff]  }
 0x114   :  { %7679 = vmatprep.subr.bf16.mxu1 %v8424_v60 }
 0x116   :  { %7658 = vmatpush3.bf16.msra.mxu0 %v8425_v61 }
 0x117   :  { %7659 = vmatprep.subr.bf16.mxu0 %v8427_v63  ;;  %7680 = vmatpush3.bf16.msra.mxu1 %v8426_v62  ;;  %v8472_v63 = vld [vmem:[#allocation2 + $0x7f0] sm:$0xff]  }
 0x118   :  { %7681 = vmatprep.subr.bf16.mxu1 %v8428_v0  ;;  %v8473_v0 = vld [vmem:[#allocation2 + $0x730] sm:$0xff]  }
 0x11a   :  { %7660 = vmatpush3.bf16.msra.mxu0 %v8429_v1 }
 0x11b   :  { %7661 = vmatprep.subr.bf16.mxu0 %v8431_v3  ;;  %7682 = vmatpush3.bf16.msra.mxu1 %v8430_v2  ;;  %v8474_v3 = vld [vmem:[#allocation2 + $0x7b0] sm:$0xff]  }
 0x11c   :  { %7683 = vmatprep.subr.bf16.mxu1 %v8432_v4 }
 0x11e   :  { %7662 = vmatpush3.bf16.msra.mxu0 %v8433_v5 }
 0x11f   :  { %7663 = vmatprep.subr.bf16.mxu0 %v8435_v7  ;;  %7684 = vmatpush3.bf16.msra.mxu1 %v8434_v6  ;;  %v8475_v7 = vld [vmem:[#allocation2 + $0x778] sm:$0xff]  }
 0x120   :  { %7685 = vmatprep.subr.bf16.mxu1 %v8436_v8 }
 0x122   :  { %7664 = vmatpush3.bf16.msra.mxu0 %v8437_v9  ;;  %v8476_v9 = vld [vmem:[#allocation2 + $0x7f8] sm:$0xff]  }
 0x123   :  { %7665 = vmatprep.subr.bf16.mxu0 %v8439_v11  ;;  %7686 = vmatpush3.bf16.msra.mxu1 %v8438_v10  ;;  %v8477_v11 = vld [vmem:[#allocation2 + $0x738] sm:$0xff]  }
 0x124   :  { %7687 = vmatprep.subr.bf16.mxu1 %v8440_v12  ;;  %v8478_v12 = vld [vmem:[#allocation2 + $0x7b8] sm:$0xff]  }
 0x126   :  { %7666 = vmatpush3.bf16.msra.mxu0 %v8441_v13  ;;  %v1427_v13 = vrot.slane %v9080_v26, %v9030_v35  ;;  %v8491_v26 = vld [vmem:[#allocation2 + $0x890] sm:$0xff]  }
 0x127   :  { %7667 = vmatprep.subr.bf16.mxu0 %v8443_v15  ;;  %7688 = vmatpush3.bf16.msra.mxu1 %v8442_v14  ;;  %v8480_v14 = vld [vmem:[#allocation2 + $0x840] sm:$0xff]  }
 0x128   :  { %7689 = vmatprep.subr.bf16.mxu1 %v8444_v16  ;;  %v8481_v15 = vld [vmem:[#allocation2 + $0x8c0] sm:$0xff]   ;;  %v1443_v18 = vcombine.high %v1427_v13, %v1427_v13 }
 0x129   :  { %v8482_v16 = vld [vmem:[#allocation2 + $0x800] sm:$0xff]  }
 0x12a   :  { %7668 = vmatpush3.bf16.msra.mxu0 %v8445_v17  ;;  %v8483_v17 = vld [vmem:[#allocation2 + $0x880] sm:$0xff]  }
 0x12b   :  { %7697 = vmatprep.subr.bf16.mxu0 %v8447_v20  ;;  %7690 = vmatpush3.bf16.msra.mxu1 %v8446_v22  ;;  %v8485_v20 = vld [vmem:[#allocation2 + $0x8c8] sm:$0xff]  }
 0x12c   :  { %7719 = vmatprep.subr.bf16.mxu1 %v8448_v25  ;;  %v8487_v22 = vld [vmem:[#allocation2 + $0x888] sm:$0xff]   ;;  %v8490_v25 = vld [vmem:[#allocation2 + $0x810] sm:$0xff]  }
 0x12d   :  { %5732 = vmatmul.mubr.bf16.vlgmr.msra.gmra.mrb[24].mxu0 %v1420_v24  ;;  %v8489_v24 = vld [vmem:[#allocation2 + $0x8d0] sm:$0xff]  }
 0x12e   :  { %7698 = vmatpush3.bf16.msra.mxu0 %v8449_v28  ;;  %5772 = vmatmul.mubr.bf16.vlgmr.msra.gmra.mrb[24].mxu1 %v1442_v30  ;;  %v8493_v28 = vld [vmem:[#allocation2 + $0x8d8] sm:$0xff]  }
 0x12f   :  { %7699 = vmatprep.subr.bf16.mxu0 %v8451_v31  ;;  %7720 = vmatpush3.bf16.msra.mxu1 %v8450_v33  ;;  %v8495_v30 = vld [vmem:[#allocation2 + $0x898] sm:$0xff]   ;;  %v8496_v31 = vld [vmem:[#allocation2 + $0x860] sm:$0xff]  }
 0x130   :  { %5811 = vmatprep.mubr.bf16.mxu0 %v1441_v34  ;;  %7721 = vmatprep.subr.bf16.mxu1 %v8452_v36  ;;  %v8498_v33 = vld [vmem:[#allocation2 + $0x820] sm:$0xff]   ;;  %v8500_v36 = vld [vmem:[#allocation2 + $0x868] sm:$0xff]  }
 0x131   :  { %5851 = vmatprep.mubr.bf16.mxu1 %v1445_v38  ;;  %v8499_v34 = vld [vmem:[#allocation2 + $0x8a0] sm:$0xff]   ;;  %v8502_v38 = vld [vmem:[#allocation2 + $0x828] sm:$0xff]  }
 0x132   :  { %7700 = vmatpush3.bf16.msra.mxu0 %v8453_v37  ;;  %v8501_v37 = vld [vmem:[#allocation2 + $0x8e8] sm:$0xff]  }
 0x133   :  { %7701 = vmatprep.subr.bf16.mxu0 %v8455_v39  ;;  %7722 = vmatpush3.bf16.msra.mxu1 %v8454_v40  ;;  %v8503_v39 = vld [vmem:[#allocation2 + $0x8a8] sm:$0xff]  }
 0x134   :  { %7723 = vmatprep.subr.bf16.mxu1 %v8456_v41  ;;  %v8504_v41 = vld [vmem:[#allocation2 + $0x870] sm:$0xff]  }
 0x136   :  { %7702 = vmatpush3.bf16.msra.mxu0 %v8457_v42 }
 0x137   :  { %7703 = vmatprep.subr.bf16.mxu0 %v8459_v43  ;;  %7724 = vmatpush3.bf16.msra.mxu1 %v8458_v44  ;;  %v8505_v43 = vld [vmem:[#allocation2 + $0x8f0] sm:$0xff]  }
 0x138   :  { %7725 = vmatprep.subr.bf16.mxu1 %v8460_v45 }
 0x13a   :  { %7704 = vmatpush3.bf16.msra.mxu0 %v8461_v46 }
 0x13b   :  { %7705 = vmatprep.subr.bf16.mxu0 %v8463_v47  ;;  %7726 = vmatpush3.bf16.msra.mxu1 %v8462_v48 }
 0x13c   :  { %7727 = vmatprep.subr.bf16.mxu1 %v8464_v49  ;;  %v8506_v49 = vld [vmem:[#allocation2 + $0x830] sm:$0xff]  }
 0x13e   :  { %7706 = vmatpush3.bf16.msra.mxu0 %v8465_v50  ;;  %v8507_v50 = vld [vmem:[#allocation2 + $0x8b0] sm:$0xff]  }
 0x13f   :  { %7707 = vmatprep.subr.bf16.mxu0 %v8467_v51  ;;  %7728 = vmatpush3.bf16.msra.mxu1 %v8466_v52 }
 0x140   :  { %v7405_v56 = vpop.f32.mrb[0].mxu0  ;;  %7729 = vmatprep.subr.bf16.mxu1 %v8468_v53 }
 0x141   :  { %v7406_v58 = vpop.f32.mrb[1].mxu0  ;;  %v7427_v60 = vpop.f32.mrb[0].mxu1 }
 0x142   :  { %v7407_v61 = vadd.f32 %v7406_v58, %v7405_v56  ;;  %v7408_v62 = vpop.f32.mrb[2].mxu0  ;;  %v7428_v1 = vpop.f32.mrb[1].mxu1  ;;  %7708 = vmatpush3.bf16.msra.mxu0 %v8469_v55  ;;  %v8509_v56 = vld [vmem:[#allocation2 + $0x8f8] sm:$0xff]  }
 0x143   :  { %v7409_v2 = vpop.f32.mrb[3].mxu0  ;;  %v7429_v5 = vadd.f32 %v7428_v1, %v7427_v60  ;;  %v7430_v6 = vpop.f32.mrb[2].mxu1  ;;  %7709 = vmatprep.subr.bf16.mxu0 %v8471_v57  ;;  %7730 = vmatpush3.bf16.msra.mxu1 %v8470_v59  ;;  %v8510_v58 = vld [vmem:[#allocation2 + $0x838] sm:$0xff]   ;;  %v77_v59 = vld [vmem:[%s9200_s0 + $0x20] sm:$0xff] }
 0x144   :  { %v5254_v4 = vadd.f32 %v7407_v61, %v6803_v54  ;;  %v7431_v8 = vpop.f32.mrb[3].mxu1  ;;  %7731 = vmatprep.subr.bf16.mxu1 %v8472_v63  ;;  %v8508_v54 = vld [vmem:[#allocation2 + $0x878] sm:$0xff]   ;;  %v1453_v60 = vrot.slane %v77_v59, %v9030_v35  ;;  %v8512_v61 = vld [vmem:[#allocation2 + $0x940] sm:$0xff]   ;;  %v1446_v62 = vcombine.high %v77_v59, %v77_v59  ;;  %v8549_v59 = vld [vmem:[#allocation2 + $0xa48] sm:$0xff]  }
 0x145   :  { %v8511_v63 = vld [vmem:[#allocation2 + $0x8b8] sm:$0xff]   ;;  %v8513_v2 = vld [vmem:[#allocation2 + $0x9c0] sm:$0xff]  }
 0x146   :  { %v9086_v10 = vadd.f32 %v7429_v5, %v5254_v4  ;;  %7710 = vmatpush3.bf16.msra.mxu0 %v8473_v0  ;;  %v1461_v0 = vcombine.high %v1453_v60, %v1453_v60  ;;  %v1469_v1 = vrot.slane %v1453_v60, %v9030_v35  ;;  %v8514_v4 = vld [vmem:[#allocation2 + $0x900] sm:$0xff]   ;;  %v8550_v60 = vld [vmem:[#allocation2 + $0xac8] sm:$0xff]  }
 0x147   :  { %7711 = vmatprep.subr.bf16.mxu0 %v8475_v7  ;;  %7732 = vmatpush3.bf16.msra.mxu1 %v8474_v3  ;;  %v9099_v3 = vrot.slane %v1446_v62, %v9030_v35  ;;  %v8515_v6 = vld [vmem:[#allocation2 + $0x980] sm:$0xff]   ;;  %v8552_v62 = vld [vmem:[#allocation2 + $0xa88] sm:$0xff]  }
 0x148   :  { %7733 = vmatprep.subr.bf16.mxu1 %v8476_v9  ;;  %v1483_v5 = vrot.slane %v1461_v0, %v9030_v35  ;;  %v1491_v8 = vcombine.high %v1469_v1, %v1469_v1  ;;  %v8516_v9 = vld [vmem:[#allocation2 + $0x948] sm:$0xff]   ;;  %v8554_v0 = vld [vmem:[#allocation2 + $0xad0] sm:$0xff]  }
 0x149   :  { %v1462_v7 = vcombine.high %v9099_v3, %v9099_v3 }
 0x14a   :  { %7712 = vmatpush3.bf16.msra.mxu0 %v8477_v11  ;;  %v8517_v11 = vld [vmem:[#allocation2 + $0x9c8] sm:$0xff]  }
 0x14b   :  { %7741 = vmatprep.subr.bf16.mxu0 %v8480_v14  ;;  %7734 = vmatpush3.bf16.msra.mxu1 %v8478_v12  ;;  %v1490_v12 = vrot.slane %v1462_v7, %v9030_v35  ;;  %v8519_v14 = vld [vmem:[#allocation2 + $0x988] sm:$0xff]   ;;  %v8561_v7 = vld [vmem:[#allocation2 + $0xa60] sm:$0xff]  }
 0x14c   :  { %7763 = vmatprep.subr.bf16.mxu1 %v8481_v15 }
 0x14d   :  { %5812 = vmatmul.mubr.bf16.vlgmr.msra.gmra.mrb[28].mxu0 %v1427_v13  ;;  %v8518_v13 = vld [vmem:[#allocation2 + $0x908] sm:$0xff]   ;;  %v1494_v15 = vcombine.high %v1490_v12, %v1490_v12 }
 0x14e   :  { %7742 = vmatpush3.bf16.msra.mxu0 %v8482_v16  ;;  %5852 = vmatmul.mubr.bf16.vlgmr.msra.gmra.mrb[28].mxu1 %v1443_v18  ;;  %v8520_v16 = vld [vmem:[#allocation2 + $0x950] sm:$0xff]  }
 0x14f   :  { %7743 = vmatprep.subr.bf16.mxu0 %v8484_v19  ;;  %7764 = vmatpush3.bf16.msra.mxu1 %v8483_v17  ;;  %v8521_v17 = vld [vmem:[#allocation2 + $0x9d0] sm:$0xff]  }
 0x150   :  { %7765 = vmatprep.subr.bf16.mxu1 %v8485_v20  ;;  %5891 = vmatprep.mubr.bf16.mxu0 %v1483_v5  ;;  %v8522_v18 = vld [vmem:[#allocation2 + $0x910] sm:$0xff]   ;;  %v8524_v20 = vld [vmem:[#allocation2 + $0x958] sm:$0xff]  }
 0x151   :  { %v8523_v19 = vld [vmem:[#allocation2 + $0x990] sm:$0xff]  }
 0x152   :  { %7744 = vmatpush3.bf16.msra.mxu0 %v8486_v21  ;;  %v8525_v21 = vld [vmem:[#allocation2 + $0x9d8] sm:$0xff]  }
 0x153   :  { %7745 = vmatprep.subr.bf16.mxu0 %v8488_v23  ;;  %7766 = vmatpush3.bf16.msra.mxu1 %v8487_v22  ;;  %v8526_v22 = vld [vmem:[#allocation2 + $0x918] sm:$0xff]  }
 0x154   :  { %7767 = vmatprep.subr.bf16.mxu1 %v8489_v24  ;;  %v8527_v23 = vld [vmem:[#allocation2 + $0x998] sm:$0xff]   ;;  %v8528_v24 = vld [vmem:[#allocation2 + $0x960] sm:$0xff]  }
 0x156   :  { %7746 = vmatpush3.bf16.msra.mxu0 %v8490_v25  ;;  %v8529_v25 = vld [vmem:[#allocation2 + $0x9e0] sm:$0xff]  }
 0x157   :  { %7747 = vmatprep.subr.bf16.mxu0 %v8492_v27  ;;  %7768 = vmatpush3.bf16.msra.mxu1 %v8491_v26  ;;  %v8530_v26 = vld [vmem:[#allocation2 + $0x920] sm:$0xff]  }
 0x158   :  { %7769 = vmatprep.subr.bf16.mxu1 %v8493_v28  ;;  %v8531_v27 = vld [vmem:[#allocation2 + $0x9a0] sm:$0xff]   ;;  %v8532_v28 = vld [vmem:[#allocation2 + $0x968] sm:$0xff]  }
 0x15a   :  { %7748 = vmatpush3.bf16.msra.mxu0 %v8494_v29  ;;  %v8533_v29 = vld [vmem:[#allocation2 + $0x9e8] sm:$0xff]  }
 0x15b   :  { %7749 = vmatprep.subr.bf16.mxu0 %v8496_v31  ;;  %7770 = vmatpush3.bf16.msra.mxu1 %v8495_v30  ;;  %v8534_v30 = vld [vmem:[#allocation2 + $0x928] sm:$0xff]  }
 0x15c   :  { %7771 = vmatprep.subr.bf16.mxu1 %v8497_v32  ;;  %v8535_v32 = vld [vmem:[#allocation2 + $0x9a8] sm:$0xff]  }
 0x15e   :  { %7750 = vmatpush3.bf16.msra.mxu0 %v8498_v33 }
 0x15f   :  { %7751 = vmatprep.subr.bf16.mxu0 %v8500_v36  ;;  %7772 = vmatpush3.bf16.msra.mxu1 %v8499_v34  ;;  %v8536_v34 = vld [vmem:[#allocation2 + $0x970] sm:$0xff]  }
 0x160   :  { %v7449_v40 = vpop.f32.mrb[4].mxu0  ;;  %7773 = vmatprep.subr.bf16.mxu1 %v8501_v37 }
 0x161   :  { %v7450_v42 = vpop.f32.mrb[5].mxu0  ;;  %v7471_v44 = vpop.f32.mrb[4].mxu1 }
 0x162   :  { %v7451_v45 = vadd.f32 %v7450_v42, %v7449_v40  ;;  %v7452_v46 = vpop.f32.mrb[6].mxu0  ;;  %v7472_v47 = vpop.f32.mrb[5].mxu1  ;;  %7752 = vmatpush3.bf16.msra.mxu0 %v8502_v38  ;;  %v8538_v40 = vld [vmem:[#allocation2 + $0x930] sm:$0xff]  }
 0x163   :  { %v7453_v48 = vpop.f32.mrb[7].mxu0  ;;  %v7473_v52 = vadd.f32 %v7472_v47, %v7471_v44  ;;  %v7474_v53 = vpop.f32.mrb[6].mxu1  ;;  %7753 = vmatprep.subr.bf16.mxu0 %v8504_v41  ;;  %7774 = vmatpush3.bf16.msra.mxu1 %v8503_v39  ;;  %v8537_v39 = vld [vmem:[#allocation2 + $0x9f0] sm:$0xff]  }
 0x164   :  { %v5334_v51 = vadd.f32 %v7451_v45, %v9086_v10  ;;  %v7475_v55 = vpop.f32.mrb[7].mxu1  ;;  %7775 = vmatprep.subr.bf16.mxu1 %v8505_v43  ;;  %v1493_v10 = vcombine.high %v1483_v5, %v1483_v5  ;;  %v8539_v46 = vld [vmem:[#allocation2 + $0x9b0] sm:$0xff]   ;;  %v8540_v48 = vld [vmem:[#allocation2 + $0x978] sm:$0xff]   ;;  %v1476_v53 = vrot.slane %v9099_v3, %v9030_v35 }
 0x165   :  { %v8546_v55 = vld [vmem:[#allocation2 + $0xac0] sm:$0xff]   ;;  %v8557_v3 = vld [vmem:[#allocation2 + $0xa58] sm:$0xff]  }
 0x166   :  { %v9091_v57 = vadd.f32 %v7473_v52, %v5334_v51  ;;  %7754 = vmatpush3.bf16.msra.mxu0 %v8506_v49  ;;  %5931 = vmatprep.mubr.bf16.mxu1 %v1493_v10  ;;  %v8542_v51 = vld [vmem:[#allocation2 + $0x938] sm:$0xff]   ;;  %v8564_v10 = vld [vmem:[#allocation2 + $0xaa0] sm:$0xff]  }
 0x167   :  { %7755 = vmatprep.subr.bf16.mxu0 %v8508_v54  ;;  %7776 = vmatpush3.bf16.msra.mxu1 %v8507_v50  ;;  %v8541_v50 = vld [vmem:[#allocation2 + $0x9f8] sm:$0xff]   ;;  %v8545_v54 = vld [vmem:[#allocation2 + $0xa40] sm:$0xff]  }
 0x168   :  { %7777 = vmatprep.subr.bf16.mxu1 %v8509_v56  ;;  %v8543_v52 = vld [vmem:[#allocation2 + $0x9b8] sm:$0xff]   ;;  %v8547_v56 = vld [vmem:[#allocation2 + $0xa00] sm:$0xff]  }
 0x169   :  { %v8559_v5 = vld [vmem:[#allocation2 + $0xa18] sm:$0xff]  }
 0x16a   :  { %7756 = vmatpush3.bf16.msra.mxu0 %v8510_v58  ;;  %v1492_v58 = vcombine.high %v1476_v53, %v1476_v53 }
 0x16b   :  { %7785 = vmatprep.subr.bf16.mxu0 %v8512_v61  ;;  %7778 = vmatpush3.bf16.msra.mxu1 %v8511_v63  ;;  %v8551_v61 = vld [vmem:[#allocation2 + $0xa08] sm:$0xff]   ;;  %v8553_v63 = vld [vmem:[#allocation2 + $0xa50] sm:$0xff]  }
 0x16c   :  { %7807 = vmatprep.subr.bf16.mxu1 %v8513_v2  ;;  %v8556_v2 = vld [vmem:[#allocation2 + $0xa90] sm:$0xff]  }
 0x16d   :  { %5892 = vmatmul.mubr.bf16.vlgmr.msra.gmra.mrb[32].mxu0 %v1469_v1  ;;  %v8555_v1 = vld [vmem:[#allocation2 + $0xa10] sm:$0xff]  }
 0x16e   :  { %7786 = vmatpush3.bf16.msra.mxu0 %v8514_v4  ;;  %5932 = vmatmul.mubr.bf16.vlgmr.msra.gmra.mrb[32].mxu1 %v1491_v8  ;;  %v8558_v4 = vld [vmem:[#allocation2 + $0xad8] sm:$0xff]   ;;  %v8562_v8 = vld [vmem:[#allocation2 + $0xae0] sm:$0xff]  }
 0x16f   :  { %7787 = vmatprep.subr.bf16.mxu0 %v8516_v9  ;;  %7808 = vmatpush3.bf16.msra.mxu1 %v8515_v6  ;;  %v8560_v6 = vld [vmem:[#allocation2 + $0xa98] sm:$0xff]   ;;  %v8563_v9 = vld [vmem:[#allocation2 + $0xa20] sm:$0xff]  }
 0x170   :  { %5971 = vmatprep.mubr.bf16.mxu0 %v1490_v12  ;;  %7809 = vmatprep.subr.bf16.mxu1 %v8517_v11  ;;  %v8565_v11 = vld [vmem:[#allocation2 + $0xa68] sm:$0xff]  }
 0x171   :  { %6011 = vmatprep.mubr.bf16.mxu1 %v1494_v15  ;;  %v8566_v12 = vld [vmem:[#allocation2 + $0xae8] sm:$0xff]  }
 0x172   :  { %7788 = vmatpush3.bf16.msra.mxu0 %v8518_v13  ;;  %v8567_v13 = vld [vmem:[#allocation2 + $0xa28] sm:$0xff]  }
 0x173   :  { %7789 = vmatprep.subr.bf16.mxu0 %v8520_v16  ;;  %7810 = vmatpush3.bf16.msra.mxu1 %v8519_v14  ;;  %v8568_v15 = vld [vmem:[#allocation2 + $0xaa8] sm:$0xff]  }
 0x174   :  { %7811 = vmatprep.subr.bf16.mxu1 %v8521_v17  ;;  %v8569_v17 = vld [vmem:[#allocation2 + $0xa70] sm:$0xff]  }
 0x176   :  { %7790 = vmatpush3.bf16.msra.mxu0 %v8522_v18 }
 0x177   :  { %7791 = vmatprep.subr.bf16.mxu0 %v8524_v20  ;;  %7812 = vmatpush3.bf16.msra.mxu1 %v8523_v19 }
 0x178   :  { %7813 = vmatprep.subr.bf16.mxu1 %v8525_v21 }
 0x17a   :  { %7792 = vmatpush3.bf16.msra.mxu0 %v8526_v22 }
 0x17b   :  { %7793 = vmatprep.subr.bf16.mxu0 %v8528_v24  ;;  %7814 = vmatpush3.bf16.msra.mxu1 %v8527_v23  ;;  %v8570_v23 = vld [vmem:[#allocation2 + $0xaf0] sm:$0xff]  }
 0x17c   :  { %7815 = vmatprep.subr.bf16.mxu1 %v8529_v25  ;;  %v8571_v24 = vld [vmem:[#allocation2 + $0xa30] sm:$0xff]  }
 0x17e   :  { %7794 = vmatpush3.bf16.msra.mxu0 %v8530_v26 }
 0x17f   :  { %7795 = vmatprep.subr.bf16.mxu0 %v8532_v28  ;;  %7816 = vmatpush3.bf16.msra.mxu1 %v8531_v27  ;;  %v8572_v28 = vld [vmem:[#allocation2 + $0xab0] sm:$0xff]  }
 0x180   :  { %v7493_v31 = vpop.f32.mrb[8].mxu0  ;;  %7817 = vmatprep.subr.bf16.mxu1 %v8533_v29 }
 0x181   :  { %v7494_v33 = vpop.f32.mrb[9].mxu0  ;;  %v7515_v36 = vpop.f32.mrb[8].mxu1 }
 0x182   :  { %v7495_v37 = vadd.f32 %v7494_v33, %v7493_v31  ;;  %v7496_v38 = vpop.f32.mrb[10].mxu0  ;;  %v7516_v41 = vpop.f32.mrb[9].mxu1  ;;  %7796 = vmatpush3.bf16.msra.mxu0 %v8534_v30  ;;  %v8573_v30 = vld [vmem:[#allocation2 + $0xa78] sm:$0xff]  }
 0x183   :  { %v7497_v42 = vpop.f32.mrb[11].mxu0  ;;  %v7517_v44 = vadd.f32 %v7516_v41, %v7515_v36  ;;  %v7518_v45 = vpop.f32.mrb[10].mxu1  ;;  %7797 = vmatprep.subr.bf16.mxu0 %v8536_v34  ;;  %7818 = vmatpush3.bf16.msra.mxu1 %v8535_v32  ;;  %v8574_v32 = vld [vmem:[#allocation2 + $0xaf8] sm:$0xff]   ;;  %v78_v34 = vld [vmem:[%s9200_s0 + $0x28] sm:$0xff] }
 0x184   :  { %v5414_v43 = vadd.f32 %v7495_v37, %v9091_v57  ;;  %v7519_v47 = vpop.f32.mrb[11].mxu1  ;;  %7819 = vmatprep.subr.bf16.mxu1 %v8537_v39  ;;  %v8548_v57 = vld [vmem:[#allocation2 + $0xa80] sm:$0xff]   ;;  %v8575_v33 = vld [vmem:[#allocation2 + $0xa38] sm:$0xff]   ;;  %v1502_v36 = vrot.slane %v78_v34, %v9030_v35  ;;  %v1495_v38 = vcombine.high %v78_v34, %v78_v34  ;;  %v8614_v34 = vld [vmem:[#allocation2 + $0xc48] sm:$0xff]  }
 0x185   :  { %v8577_v37 = vld [vmem:[#allocation2 + $0xb40] sm:$0xff]   ;;  %v8576_v39 = vld [vmem:[#allocation2 + $0xab8] sm:$0xff]  }
 0x186   :  { %v9106_v49 = vadd.f32 %v7517_v44, %v5414_v43  ;;  %7798 = vmatpush3.bf16.msra.mxu0 %v8538_v40  ;;  %v1510_v40 = vcombine.high %v1502_v36, %v1502_v36  ;;  %v1518_v41 = vrot.slane %v1502_v36, %v9030_v35  ;;  %v8578_v42 = vld [vmem:[#allocation2 + $0xbc0] sm:$0xff]   ;;  %v9119_v43 = vrot.slane %v1495_v38, %v9030_v35  ;;  %v8615_v36 = vld [vmem:[#allocation2 + $0xcc8] sm:$0xff]  }
 0x187   :  { %7799 = vmatprep.subr.bf16.mxu0 %v8540_v48  ;;  %7820 = vmatpush3.bf16.msra.mxu1 %v8539_v46  ;;  %v8579_v44 = vld [vmem:[#allocation2 + $0xb00] sm:$0xff]   ;;  %v8617_v38 = vld [vmem:[#allocation2 + $0xc88] sm:$0xff]  }
 0x188   :  { %7821 = vmatprep.subr.bf16.mxu1 %v8541_v50  ;;  %v1532_v45 = vrot.slane %v1510_v40, %v9030_v35  ;;  %v8580_v46 = vld [vmem:[#allocation2 + $0xb80] sm:$0xff]   ;;  %v1511_v47 = vcombine.high %v9119_v43, %v9119_v43  ;;  %v1540_v48 = vcombine.high %v1518_v41, %v1518_v41  ;;  %v8619_v40 = vld [vmem:[#allocation2 + $0xcd0] sm:$0xff]  }
 0x18a   :  { %7800 = vmatpush3.bf16.msra.mxu0 %v8542_v51  ;;  %v1542_v50 = vcombine.high %v1532_v45, %v1532_v45  ;;  %v8582_v51 = vld [vmem:[#allocation2 + $0xbc8] sm:$0xff]  }
 0x18b   :  { %7829 = vmatprep.subr.bf16.mxu0 %v8545_v54  ;;  %7822 = vmatpush3.bf16.msra.mxu1 %v8543_v52  ;;  %v1539_v52 = vrot.slane %v1511_v47, %v9030_v35  ;;  %v8584_v54 = vld [vmem:[#allocation2 + $0xb88] sm:$0xff]   ;;  %v8626_v47 = vld [vmem:[#allocation2 + $0xc60] sm:$0xff]  }
 0x18c   :  { %7851 = vmatprep.subr.bf16.mxu1 %v8546_v55 }
 0x18d   :  { %5972 = vmatmul.mubr.bf16.vlgmr.msra.gmra.mrb[36].mxu0 %v1476_v53  ;;  %v8583_v53 = vld [vmem:[#allocation2 + $0xb08] sm:$0xff]   ;;  %v1543_v55 = vcombine.high %v1539_v52, %v1539_v52 }
 0x18e   :  { %7830 = vmatpush3.bf16.msra.mxu0 %v8547_v56  ;;  %6012 = vmatmul.mubr.bf16.vlgmr.msra.gmra.mrb[36].mxu1 %v1492_v58  ;;  %v8585_v56 = vld [vmem:[#allocation2 + $0xb50] sm:$0xff]  }
 0x18f   :  { %7831 = vmatprep.subr.bf16.mxu0 %v8549_v59  ;;  %7852 = vmatpush3.bf16.msra.mxu1 %v8548_v57  ;;  %v8586_v57 = vld [vmem:[#allocation2 + $0xbd0] sm:$0xff]  }
 0x190   :  { %7853 = vmatprep.subr.bf16.mxu1 %v8550_v60  ;;  %6051 = vmatprep.mubr.bf16.mxu0 %v1532_v45  ;;  %v8587_v58 = vld [vmem:[#allocation2 + $0xb10] sm:$0xff]   ;;  %v8589_v60 = vld [vmem:[#allocation2 + $0xb58] sm:$0xff]  }
 0x191   :  { %6091 = vmatprep.mubr.bf16.mxu1 %v1542_v50  ;;  %v8588_v59 = vld [vmem:[#allocation2 + $0xb90] sm:$0xff]   ;;  %v8624_v45 = vld [vmem:[#allocation2 + $0xc18] sm:$0xff]   ;;  %v8629_v50 = vld [vmem:[#allocation2 + $0xca0] sm:$0xff]  }
 0x192   :  { %7832 = vmatpush3.bf16.msra.mxu0 %v8551_v61  ;;  %v8590_v61 = vld [vmem:[#allocation2 + $0xbd8] sm:$0xff]  }
 0x193   :  { %7833 = vmatprep.subr.bf16.mxu0 %v8553_v63  ;;  %7854 = vmatpush3.bf16.msra.mxu1 %v8552_v62  ;;  %v8591_v62 = vld [vmem:[#allocation2 + $0xb18] sm:$0xff]  }
 0x194   :  { %7855 = vmatprep.subr.bf16.mxu1 %v8554_v0  ;;  %v8592_v63 = vld [vmem:[#allocation2 + $0xb98] sm:$0xff]   ;;  %v8593_v0 = vld [vmem:[#allocation2 + $0xb60] sm:$0xff]  }
 0x196   :  { %7834 = vmatpush3.bf16.msra.mxu0 %v8555_v1  ;;  %v8594_v1 = vld [vmem:[#allocation2 + $0xbe0] sm:$0xff]  }
 0x197   :  { %7835 = vmatprep.subr.bf16.mxu0 %v8557_v3  ;;  %7856 = vmatpush3.bf16.msra.mxu1 %v8556_v2  ;;  %v8595_v2 = vld [vmem:[#allocation2 + $0xb20] sm:$0xff]  }
 0x198   :  { %7857 = vmatprep.subr.bf16.mxu1 %v8558_v4  ;;  %v8596_v3 = vld [vmem:[#allocation2 + $0xba0] sm:$0xff]   ;;  %v8597_v4 = vld [vmem:[#allocation2 + $0xb68] sm:$0xff]  }
 0x19a   :  { %7836 = vmatpush3.bf16.msra.mxu0 %v8559_v5  ;;  %v8598_v5 = vld [vmem:[#allocation2 + $0xbe8] sm:$0xff]  }
 0x19b   :  { %7837 = vmatprep.subr.bf16.mxu0 %v8561_v7  ;;  %7858 = vmatpush3.bf16.msra.mxu1 %v8560_v6  ;;  %v8599_v7 = vld [vmem:[#allocation2 + $0xb28] sm:$0xff]  }
 0x19c   :  { %7859 = vmatprep.subr.bf16.mxu1 %v8562_v8 }
 0x19e   :  { %7838 = vmatpush3.bf16.msra.mxu0 %v8563_v9  ;;  %v8600_v9 = vld [vmem:[#allocation2 + $0xba8] sm:$0xff]  }
 0x19f   :  { %7839 = vmatprep.subr.bf16.mxu0 %v8565_v11  ;;  %7860 = vmatpush3.bf16.msra.mxu1 %v8564_v10 }
 0x1a0   :  { %v7537_v14 = vpop.f32.mrb[12].mxu0  ;;  %7861 = vmatprep.subr.bf16.mxu1 %v8566_v12 }
 0x1a1   :  { %v7538_v16 = vpop.f32.mrb[13].mxu0  ;;  %v7559_v18 = vpop.f32.mrb[12].mxu1 }
 0x1a2   :  { %v7539_v19 = vadd.f32 %v7538_v16, %v7537_v14  ;;  %v7540_v20 = vpop.f32.mrb[14].mxu0  ;;  %v7560_v21 = vpop.f32.mrb[13].mxu1  ;;  %7840 = vmatpush3.bf16.msra.mxu0 %v8567_v13  ;;  %v8601_v13 = vld [vmem:[#allocation2 + $0xb70] sm:$0xff]  }
 0x1a3   :  { %v7541_v22 = vpop.f32.mrb[15].mxu0  ;;  %v7561_v26 = vadd.f32 %v7560_v21, %v7559_v18  ;;  %v7562_v27 = vpop.f32.mrb[14].mxu1  ;;  %7841 = vmatprep.subr.bf16.mxu0 %v8569_v17  ;;  %7862 = vmatpush3.bf16.msra.mxu1 %v8568_v15  ;;  %v8602_v14 = vld [vmem:[#allocation2 + $0xbf0] sm:$0xff]  }
 0x1a4   :  { %v5494_v25 = vadd.f32 %v7539_v19, %v9106_v49  ;;  %v7563_v29 = vpop.f32.mrb[15].mxu1  ;;  %7863 = vmatprep.subr.bf16.mxu1 %v8570_v23  ;;  %v8581_v49 = vld [vmem:[#allocation2 + $0xb48] sm:$0xff]   ;;  %v8603_v20 = vld [vmem:[#allocation2 + $0xb30] sm:$0xff]   ;;  %v8608_v27 = vld [vmem:[#allocation2 + $0xbb8] sm:$0xff]  }
 0x1a5   :  { %v8604_v22 = vld [vmem:[#allocation2 + $0xbb0] sm:$0xff]   ;;  %v8610_v29 = vld [vmem:[#allocation2 + $0xc40] sm:$0xff]  }
 0x1a6   :  { %v9111_v31 = vadd.f32 %v7561_v26, %v5494_v25  ;;  %7842 = vmatpush3.bf16.msra.mxu0 %v8571_v24  ;;  %v8605_v24 = vld [vmem:[#allocation2 + $0xb78] sm:$0xff]  }
 0x1a7   :  { %7843 = vmatprep.subr.bf16.mxu0 %v8573_v30  ;;  %7864 = vmatpush3.bf16.msra.mxu1 %v8572_v28  ;;  %v8606_v25 = vld [vmem:[#allocation2 + $0xbf8] sm:$0xff]   ;;  %v1525_v28 = vrot.slane %v9119_v43, %v9030_v35  ;;  %v8611_v30 = vld [vmem:[#allocation2 + $0xcc0] sm:$0xff]  }
 0x1a8   :  { %7865 = vmatprep.subr.bf16.mxu1 %v8574_v32  ;;  %v8607_v26 = vld [vmem:[#allocation2 + $0xb38] sm:$0xff]   ;;  %v8613_v32 = vld [vmem:[#allocation2 + $0xc80] sm:$0xff]  }
 0x1a9   :  { %v8622_v43 = vld [vmem:[#allocation2 + $0xc58] sm:$0xff]  }
 0x1aa   :  { %7844 = vmatpush3.bf16.msra.mxu0 %v8575_v33  ;;  %v1541_v33 = vcombine.high %v1525_v28, %v1525_v28 }
 0x1ab   :  { %7873 = vmatprep.subr.bf16.mxu0 %v8577_v37  ;;  %7866 = vmatpush3.bf16.msra.mxu1 %v8576_v39  ;;  %v8616_v37 = vld [vmem:[#allocation2 + $0xc08] sm:$0xff]   ;;  %v8618_v39 = vld [vmem:[#allocation2 + $0xc50] sm:$0xff]  }
 0x1ac   :  { %7895 = vmatprep.subr.bf16.mxu1 %v8578_v42  ;;  %v8621_v42 = vld [vmem:[#allocation2 + $0xc90] sm:$0xff]  }
 0x1ad   :  { %6052 = vmatmul.mubr.bf16.vlgmr.msra.gmra.mrb[40].mxu0 %v1518_v41  ;;  %v8620_v41 = vld [vmem:[#allocation2 + $0xc10] sm:$0xff]  }
 0x1ae   :  { %7874 = vmatpush3.bf16.msra.mxu0 %v8579_v44  ;;  %6092 = vmatmul.mubr.bf16.vlgmr.msra.gmra.mrb[40].mxu1 %v1540_v48  ;;  %v8623_v44 = vld [vmem:[#allocation2 + $0xcd8] sm:$0xff]   ;;  %v8627_v48 = vld [vmem:[#allocation2 + $0xce0] sm:$0xff]  }
 0x1af   :  { %7875 = vmatprep.subr.bf16.mxu0 %v8581_v49  ;;  %7896 = vmatpush3.bf16.msra.mxu1 %v8580_v46  ;;  %v8625_v46 = vld [vmem:[#allocation2 + $0xc98] sm:$0xff]   ;;  %v8628_v49 = vld [vmem:[#allocation2 + $0xc20] sm:$0xff]  }
 0x1b0   :  { %6131 = vmatprep.mubr.bf16.mxu0 %v1539_v52  ;;  %7897 = vmatprep.subr.bf16.mxu1 %v8582_v51  ;;  %v8630_v51 = vld [vmem:[#allocation2 + $0xc68] sm:$0xff]  }
 0x1b1   :  { %6171 = vmatprep.mubr.bf16.mxu1 %v1543_v55  ;;  %v8631_v52 = vld [vmem:[#allocation2 + $0xce8] sm:$0xff]  }
 0x1b2   :  { %7876 = vmatpush3.bf16.msra.mxu0 %v8583_v53 }
 0x1b3   :  { %7877 = vmatprep.subr.bf16.mxu0 %v8585_v56  ;;  %7898 = vmatpush3.bf16.msra.mxu1 %v8584_v54  ;;  %v8632_v54 = vld [vmem:[#allocation2 + $0xc28] sm:$0xff]   ;;  %v8634_v56 = vld [vmem:[#allocation2 + $0xc70] sm:$0xff]  }
 0x1b4   :  { %7899 = vmatprep.subr.bf16.mxu1 %v8586_v57 }
 0x1b6   :  { %7878 = vmatpush3.bf16.msra.mxu0 %v8587_v58 }
 0x1b7   :  { %7879 = vmatprep.subr.bf16.mxu0 %v8589_v60  ;;  %7900 = vmatpush3.bf16.msra.mxu1 %v8588_v59 }
 0x1b8   :  { %7901 = vmatprep.subr.bf16.mxu1 %v8590_v61  ;;  %v8633_v61 = vld [vmem:[#allocation2 + $0xca8] sm:$0xff]  }
 0x1ba   :  { %7880 = vmatpush3.bf16.msra.mxu0 %v8591_v62 }
 0x1bb   :  { %7881 = vmatprep.subr.bf16.mxu0 %v8593_v0  ;;  %7902 = vmatpush3.bf16.msra.mxu1 %v8592_v63  ;;  %v8635_v63 = vld [vmem:[#allocation2 + $0xcf0] sm:$0xff]  }
 0x1bc   :  { %7903 = vmatprep.subr.bf16.mxu1 %v8594_v1 }
 0x1be   :  { %7882 = vmatpush3.bf16.msra.mxu0 %v8595_v2 }
 0x1bf   :  { %7883 = vmatprep.subr.bf16.mxu0 %v8597_v4  ;;  %7904 = vmatpush3.bf16.msra.mxu1 %v8596_v3  ;;  %v8636_v3 = vld [vmem:[#allocation2 + $0xc30] sm:$0xff]  }
 0x1c0   :  { %v7581_v6 = vpop.f32.mrb[16].mxu0  ;;  %7905 = vmatprep.subr.bf16.mxu1 %v8598_v5  ;;  %v8638_v5 = vld [vmem:[#allocation2 + $0xc78] sm:$0xff]  }
 0x1c1   :  { %v7582_v8 = vpop.f32.mrb[17].mxu0  ;;  %v7603_v10 = vpop.f32.mrb[16].mxu1 }
 0x1c2   :  { %v7583_v11 = vadd.f32 %v7582_v8, %v7581_v6  ;;  %v7584_v12 = vpop.f32.mrb[18].mxu0  ;;  %v7604_v15 = vpop.f32.mrb[17].mxu1  ;;  %7884 = vmatpush3.bf16.msra.mxu0 %v8599_v7  ;;  %v8637_v7 = vld [vmem:[#allocation2 + $0xcb0] sm:$0xff]   ;;  %v8639_v8 = vld [vmem:[#allocation2 + $0xcf8] sm:$0xff]  }
 0x1c3   :  { %v7585_v16 = vpop.f32.mrb[19].mxu0  ;;  %v7605_v18 = vadd.f32 %v7604_v15, %v7603_v10  ;;  %v7606_v19 = vpop.f32.mrb[18].mxu1  ;;  %7885 = vmatprep.subr.bf16.mxu0 %v8601_v13  ;;  %7906 = vmatpush3.bf16.msra.mxu1 %v8600_v9  ;;  %v8640_v9 = vld [vmem:[#allocation2 + $0xc38] sm:$0xff]   ;;  %v79_v10 = vld [vmem:[%s9200_s0 + $0x30] sm:$0xff]  ;;  %v8642_v12 = vld [vmem:[#allocation2 + $0xd40] sm:$0xff]  }
 0x1c4   :  { %v5574_v17 = vadd.f32 %v7583_v11, %v9111_v31  ;;  %v7607_v21 = vpop.f32.mrb[19].mxu1  ;;  %7907 = vmatprep.subr.bf16.mxu1 %v8602_v14  ;;  %v8612_v31 = vld [vmem:[#allocation2 + $0xc00] sm:$0xff]   ;;  %v1551_v11 = vrot.slane %v79_v10, %v9030_v35  ;;  %v1544_v13 = vcombine.high %v79_v10, %v79_v10  ;;  %v8641_v14 = vld [vmem:[#allocation2 + $0xcb8] sm:$0xff]   ;;  %v8679_v10 = vld [vmem:[#allocation2 + $0xe48] sm:$0xff]  }
 0x1c5   :  { %v8644_v19 = vld [vmem:[#allocation2 + $0xd00] sm:$0xff]  }
 0x1c6   :  { %v9126_v23 = vadd.f32 %v7605_v18, %v5574_v17  ;;  %7886 = vmatpush3.bf16.msra.mxu0 %v8603_v20  ;;  %v1559_v15 = vcombine.high %v1551_v11, %v1551_v11  ;;  %v1567_v16 = vrot.slane %v1551_v11, %v9030_v35  ;;  %v8643_v17 = vld [vmem:[#allocation2 + $0xdc0] sm:$0xff]   ;;  %v9139_v18 = vrot.slane %v1544_v13, %v9030_v35  ;;  %v8680_v11 = vld [vmem:[#allocation2 + $0xec8] sm:$0xff]  }
 0x1c7   :  { %7887 = vmatprep.subr.bf16.mxu0 %v8605_v24  ;;  %7908 = vmatpush3.bf16.msra.mxu1 %v8604_v22  ;;  %v8645_v21 = vld [vmem:[#allocation2 + $0xd80] sm:$0xff]   ;;  %v8646_v24 = vld [vmem:[#allocation2 + $0xd48] sm:$0xff]  }
 0x1c8   :  { %7909 = vmatprep.subr.bf16.mxu1 %v8606_v25  ;;  %v1581_v20 = vrot.slane %v1559_v15, %v9030_v35  ;;  %v1560_v22 = vcombine.high %v9139_v18, %v9139_v18  ;;  %v8682_v13 = vld [vmem:[#allocation2 + $0xe88] sm:$0xff]   ;;  %v8684_v15 = vld [vmem:[#allocation2 + $0xed0] sm:$0xff]  }
 0x1ca   :  { %7888 = vmatpush3.bf16.msra.mxu0 %v8607_v26  ;;  %v1591_v25 = vcombine.high %v1581_v20, %v1581_v20  ;;  %v8647_v26 = vld [vmem:[#allocation2 + $0xdc8] sm:$0xff]  }
 0x1cb   :  { %7917 = vmatprep.subr.bf16.mxu0 %v8610_v29  ;;  %7910 = vmatpush3.bf16.msra.mxu1 %v8608_v27  ;;  %v1588_v27 = vrot.slane %v1560_v22, %v9030_v35  ;;  %v8649_v29 = vld [vmem:[#allocation2 + $0xd88] sm:$0xff]   ;;  %v8691_v22 = vld [vmem:[#allocation2 + $0xe60] sm:$0xff]  }
 0x1cc   :  { %7939 = vmatprep.subr.bf16.mxu1 %v8611_v30 }
 0x1cd   :  { %6132 = vmatmul.mubr.bf16.vlgmr.msra.gmra.mrb[44].mxu0 %v1525_v28  ;;  %v8648_v28 = vld [vmem:[#allocation2 + $0xd08] sm:$0xff]   ;;  %v1592_v30 = vcombine.high %v1588_v27, %v1588_v27 }
 0x1ce   :  { %7918 = vmatpush3.bf16.msra.mxu0 %v8612_v31  ;;  %6172 = vmatmul.mubr.bf16.vlgmr.msra.gmra.mrb[44].mxu1 %v1541_v33  ;;  %v8650_v31 = vld [vmem:[#allocation2 + $0xd50] sm:$0xff]  }
 0x1cf   :  { %7919 = vmatprep.subr.bf16.mxu0 %v8614_v34  ;;  %7940 = vmatpush3.bf16.msra.mxu1 %v8613_v32  ;;  %v8651_v32 = vld [vmem:[#allocation2 + $0xdd0] sm:$0xff]  }
 0x1d0   :  { %7941 = vmatprep.subr.bf16.mxu1 %v8615_v36  ;;  %6211 = vmatprep.mubr.bf16.mxu0 %v1581_v20  ;;  %v8652_v33 = vld [vmem:[#allocation2 + $0xd10] sm:$0xff]   ;;  %v8654_v36 = vld [vmem:[#allocation2 + $0xd58] sm:$0xff]  }
 0x1d1   :  { %6251 = vmatprep.mubr.bf16.mxu1 %v1591_v25  ;;  %v8653_v34 = vld [vmem:[#allocation2 + $0xd90] sm:$0xff]   ;;  %v8689_v20 = vld [vmem:[#allocation2 + $0xe18] sm:$0xff]   ;;  %v8694_v25 = vld [vmem:[#allocation2 + $0xea0] sm:$0xff]  }
 0x1d2   :  { %7920 = vmatpush3.bf16.msra.mxu0 %v8616_v37  ;;  %v8655_v37 = vld [vmem:[#allocation2 + $0xdd8] sm:$0xff]  }
 0x1d3   :  { %7921 = vmatprep.subr.bf16.mxu0 %v8618_v39  ;;  %7942 = vmatpush3.bf16.msra.mxu1 %v8617_v38  ;;  %v8656_v38 = vld [vmem:[#allocation2 + $0xd18] sm:$0xff]  }
 0x1d4   :  { %7943 = vmatprep.subr.bf16.mxu1 %v8619_v40  ;;  %v8657_v39 = vld [vmem:[#allocation2 + $0xd98] sm:$0xff]   ;;  %v8658_v40 = vld [vmem:[#allocation2 + $0xd60] sm:$0xff]  }
 0x1d6   :  { %7922 = vmatpush3.bf16.msra.mxu0 %v8620_v41  ;;  %v8659_v41 = vld [vmem:[#allocation2 + $0xde0] sm:$0xff]  }
 0x1d7   :  { %7923 = vmatprep.subr.bf16.mxu0 %v8622_v43  ;;  %7944 = vmatpush3.bf16.msra.mxu1 %v8621_v42  ;;  %v8660_v42 = vld [vmem:[#allocation2 + $0xd20] sm:$0xff]  }
 0x1d8   :  { %7945 = vmatprep.subr.bf16.mxu1 %v8623_v44  ;;  %v8661_v43 = vld [vmem:[#allocation2 + $0xda0] sm:$0xff]   ;;  %v8662_v44 = vld [vmem:[#allocation2 + $0xd68] sm:$0xff]  }
 0x1da   :  { %7924 = vmatpush3.bf16.msra.mxu0 %v8624_v45  ;;  %v8663_v45 = vld [vmem:[#allocation2 + $0xde8] sm:$0xff]  }
 0x1db   :  { %7925 = vmatprep.subr.bf16.mxu0 %v8626_v47  ;;  %7946 = vmatpush3.bf16.msra.mxu1 %v8625_v46  ;;  %v8664_v47 = vld [vmem:[#allocation2 + $0xd28] sm:$0xff]  }
 0x1dc   :  { %7947 = vmatprep.subr.bf16.mxu1 %v8627_v48 }
 0x1de   :  { %7926 = vmatpush3.bf16.msra.mxu0 %v8628_v49  ;;  %v8665_v49 = vld [vmem:[#allocation2 + $0xda8] sm:$0xff]  }
 0x1df   :  { %7927 = vmatprep.subr.bf16.mxu0 %v8630_v51  ;;  %7948 = vmatpush3.bf16.msra.mxu1 %v8629_v50 }
 0x1e0   :  { %v7625_v53 = vpop.f32.mrb[20].mxu0  ;;  %7949 = vmatprep.subr.bf16.mxu1 %v8631_v52 }
 0x1e1   :  { %v7626_v55 = vpop.f32.mrb[21].mxu0  ;;  %v7647_v57 = vpop.f32.mrb[20].mxu1 }
 0x1e2   :  { %v7627_v58 = vadd.f32 %v7626_v55, %v7625_v53  ;;  %v7628_v59 = vpop.f32.mrb[22].mxu0  ;;  %v7648_v60 = vpop.f32.mrb[21].mxu1  ;;  %7928 = vmatpush3.bf16.msra.mxu0 %v8632_v54  ;;  %v8666_v53 = vld [vmem:[#allocation2 + $0xd70] sm:$0xff]  }
 0x1e3   :  { %v7629_v62 = vpop.f32.mrb[23].mxu0  ;;  %v7649_v1 = vadd.f32 %v7648_v60, %v7647_v57  ;;  %v7650_v2 = vpop.f32.mrb[22].mxu1  ;;  %7929 = vmatprep.subr.bf16.mxu0 %v8634_v56  ;;  %7950 = vmatpush3.bf16.msra.mxu1 %v8633_v61  ;;  %v8667_v54 = vld [vmem:[#allocation2 + $0xdf0] sm:$0xff]  }
 0x1e4   :  { %v5654_v0 = vadd.f32 %v7627_v58, %v9126_v23  ;;  %v7651_v4 = vpop.f32.mrb[23].mxu1  ;;  %7951 = vmatprep.subr.bf16.mxu1 %v8635_v63  ;;  %v1589_v23 = vcombine.high %v1567_v16, %v1567_v16  ;;  %v8668_v60 = vld [vmem:[#allocation2 + $0xd30] sm:$0xff]   ;;  %v8672_v2 = vld [vmem:[#allocation2 + $0xd38] sm:$0xff]  }
 0x1e5   :  { %v8669_v62 = vld [vmem:[#allocation2 + $0xdb0] sm:$0xff]   ;;  %v1574_v4 = vrot.slane %v9139_v18, %v9030_v35  ;;  %v8687_v18 = vld [vmem:[#allocation2 + $0xe58] sm:$0xff]  }
 0x1e6   :  { %v9131_v6 = vadd.f32 %v7649_v1, %v5654_v0  ;;  %7930 = vmatpush3.bf16.msra.mxu0 %v8636_v3  ;;  %v8670_v0 = vld [vmem:[#allocation2 + $0xd78] sm:$0xff]  }
 0x1e7   :  { %7931 = vmatprep.subr.bf16.mxu0 %v8638_v5  ;;  %7952 = vmatpush3.bf16.msra.mxu1 %v8637_v7  ;;  %v8671_v1 = vld [vmem:[#allocation2 + $0xdf8] sm:$0xff]   ;;  %v8675_v5 = vld [vmem:[#allocation2 + $0xe40] sm:$0xff]  }
 0x1e8   :  { %7953 = vmatprep.subr.bf16.mxu1 %v8639_v8  ;;  %v8673_v3 = vld [vmem:[#allocation2 + $0xdb8] sm:$0xff]   ;;  %v8677_v7 = vld [vmem:[#allocation2 + $0xe00] sm:$0xff]  }
 0x1e9   :  { %v8678_v8 = vld [vmem:[#allocation2 + $0xe80] sm:$0xff]  }
 0x1ea   :  { %7932 = vmatpush3.bf16.msra.mxu0 %v8640_v9  ;;  %v1590_v9 = vcombine.high %v1574_v4, %v1574_v4 }
 0x1eb   :  { %7961 = vmatprep.subr.bf16.mxu0 %v8642_v12  ;;  %7954 = vmatpush3.bf16.msra.mxu1 %v8641_v14  ;;  %v8681_v12 = vld [vmem:[#allocation2 + $0xe08] sm:$0xff]   ;;  %v8683_v14 = vld [vmem:[#allocation2 + $0xe50] sm:$0xff]  }
 0x1ec   :  { %7983 = vmatprep.subr.bf16.mxu1 %v8643_v17  ;;  %v8686_v17 = vld [vmem:[#allocation2 + $0xe90] sm:$0xff]  }
 0x1ed   :  { %6212 = vmatmul.mubr.bf16.vlgmr.msra.gmra.mrb[48].mxu0 %v1567_v16  ;;  %v8685_v16 = vld [vmem:[#allocation2 + $0xe10] sm:$0xff]  }
 0x1ee   :  { %7962 = vmatpush3.bf16.msra.mxu0 %v8644_v19  ;;  %6252 = vmatmul.mubr.bf16.vlgmr.msra.gmra.mrb[48].mxu1 %v1589_v23  ;;  %v8688_v19 = vld [vmem:[#allocation2 + $0xed8] sm:$0xff]   ;;  %v8692_v23 = vld [vmem:[#allocation2 + $0xee0] sm:$0xff]  }
 0x1ef   :  { %7963 = vmatprep.subr.bf16.mxu0 %v8646_v24  ;;  %7984 = vmatpush3.bf16.msra.mxu1 %v8645_v21  ;;  %v8690_v21 = vld [vmem:[#allocation2 + $0xe98] sm:$0xff]   ;;  %v8693_v24 = vld [vmem:[#allocation2 + $0xe20] sm:$0xff]  }
 0x1f0   :  { %6291 = vmatprep.mubr.bf16.mxu0 %v1588_v27  ;;  %7985 = vmatprep.subr.bf16.mxu1 %v8647_v26  ;;  %v8695_v26 = vld [vmem:[#allocation2 + $0xe68] sm:$0xff]  }
 0x1f1   :  { %6331 = vmatprep.mubr.bf16.mxu1 %v1592_v30  ;;  %v8696_v27 = vld [vmem:[#allocation2 + $0xee8] sm:$0xff]  }
 0x1f2   :  { %7964 = vmatpush3.bf16.msra.mxu0 %v8648_v28 }
 0x1f3   :  { %7965 = vmatprep.subr.bf16.mxu0 %v8650_v31  ;;  %7986 = vmatpush3.bf16.msra.mxu1 %v8649_v29  ;;  %v8697_v29 = vld [vmem:[#allocation2 + $0xe28] sm:$0xff]   ;;  %v8699_v31 = vld [vmem:[#allocation2 + $0xe70] sm:$0xff]  }
 0x1f4   :  { %7987 = vmatprep.subr.bf16.mxu1 %v8651_v32 }
 0x1f6   :  { %7966 = vmatpush3.bf16.msra.mxu0 %v8652_v33 }
 0x1f7   :  { %7967 = vmatprep.subr.bf16.mxu0 %v8654_v36  ;;  %7988 = vmatpush3.bf16.msra.mxu1 %v8653_v34 }
 0x1f8   :  { %7989 = vmatprep.subr.bf16.mxu1 %v8655_v37  ;;  %v8698_v37 = vld [vmem:[#allocation2 + $0xea8] sm:$0xff]  }
 0x1fa   :  { %7968 = vmatpush3.bf16.msra.mxu0 %v8656_v38 }
 0x1fb   :  { %7969 = vmatprep.subr.bf16.mxu0 %v8658_v40  ;;  %7990 = vmatpush3.bf16.msra.mxu1 %v8657_v39  ;;  %v8700_v39 = vld [vmem:[#allocation2 + $0xef0] sm:$0xff]  }
 0x1fc   :  { %7991 = vmatprep.subr.bf16.mxu1 %v8659_v41 }
 0x1fe   :  { %7970 = vmatpush3.bf16.msra.mxu0 %v8660_v42 }
 0x1ff   :  { %7971 = vmatprep.subr.bf16.mxu0 %v8662_v44  ;;  %7992 = vmatpush3.bf16.msra.mxu1 %v8661_v43  ;;  %v8701_v43 = vld [vmem:[#allocation2 + $0xe30] sm:$0xff]  }
 0x200   :  { %v7669_v46 = vpop.f32.mrb[24].mxu0  ;;  %7993 = vmatprep.subr.bf16.mxu1 %v8663_v45  ;;  %v8703_v45 = vld [vmem:[#allocation2 + $0xe78] sm:$0xff]  }
 0x201   :  { %v7670_v48 = vpop.f32.mrb[25].mxu0  ;;  %v7691_v50 = vpop.f32.mrb[24].mxu1 }
 0x202   :  { %v7671_v51 = vadd.f32 %v7670_v48, %v7669_v46  ;;  %v7672_v52 = vpop.f32.mrb[26].mxu0  ;;  %v7692_v55 = vpop.f32.mrb[25].mxu1  ;;  %7972 = vmatpush3.bf16.msra.mxu0 %v8664_v47  ;;  %v8702_v47 = vld [vmem:[#allocation2 + $0xeb0] sm:$0xff]   ;;  %v8704_v48 = vld [vmem:[#allocation2 + $0xef8] sm:$0xff]  }
 0x203   :  { %v7673_v56 = vpop.f32.mrb[27].mxu0  ;;  %v7693_v58 = vadd.f32 %v7692_v55, %v7691_v50  ;;  %v7694_v59 = vpop.f32.mrb[26].mxu1  ;;  %7973 = vmatprep.subr.bf16.mxu0 %v8666_v53  ;;  %7994 = vmatpush3.bf16.msra.mxu1 %v8665_v49  ;;  %v8705_v49 = vld [vmem:[#allocation2 + $0xe38] sm:$0xff]   ;;  %v8707_v52 = vld [vmem:[#allocation2 + $0xf40] sm:$0xff]  }
 0x204   :  { %v5734_v57 = vadd.f32 %v7671_v51, %v9131_v6  ;;  %v7695_v61 = vpop.f32.mrb[27].mxu1  ;;  %7995 = vmatprep.subr.bf16.mxu1 %v8667_v54  ;;  %v8676_v6 = vld [vmem:[#allocation2 + $0xec0] sm:$0xff]   ;;  %v80_v50 = vld [vmem:[%s9200_s0 + $0x38] sm:$0xff] }
 0x205   :  { %v1600_v51 = vrot.slane %v80_v50, %v9030_v35  ;;  %v1593_v53 = vcombine.high %v80_v50, %v80_v50  ;;  %v8706_v54 = vld [vmem:[#allocation2 + $0xeb8] sm:$0xff]   ;;  %v8709_v59 = vld [vmem:[#allocation2 + $0xf00] sm:$0xff]   ;;  %v8744_v50 = vld [vmem:[#allocation2 + $0x1048] sm:$0xff]  }
 0x206   :  { %v9146_v63 = vadd.f32 %v7693_v58, %v5734_v57  ;;  %7974 = vmatpush3.bf16.msra.mxu0 %v8668_v60  ;;  %v8708_v57 = vld [vmem:[#allocation2 + $0xfc0] sm:$0xff]  }
 0x207   :  { %7975 = vmatprep.subr.bf16.mxu0 %v8670_v0  ;;  %7996 = vmatpush3.bf16.msra.mxu1 %v8669_v62  ;;  %v1608_v55 = vcombine.high %v1600_v51, %v1600_v51  ;;  %v1616_v56 = vrot.slane %v1600_v51, %v9030_v35  ;;  %v9159_v58 = vrot.slane %v1593_v53, %v9030_v35  ;;  %v8710_v61 = vld [vmem:[#allocation2 + $0xf80] sm:$0xff]   ;;  %v8711_v0 = vld [vmem:[#allocation2 + $0xf48] sm:$0xff]  }
 0x208   :  { %7997 = vmatprep.subr.bf16.mxu1 %v8671_v1  ;;  %v8745_v51 = vld [vmem:[#allocation2 + $0x10c8] sm:$0xff]  }
 0x209   :  { %v1630_v60 = vrot.slane %v1608_v55, %v9030_v35  ;;  %v1609_v62 = vcombine.high %v9159_v58, %v9159_v58  ;;  %v8747_v53 = vld [vmem:[#allocation2 + $0x1088] sm:$0xff]   ;;  %v8749_v55 = vld [vmem:[#allocation2 + $0x10d0] sm:$0xff]  }
 0x20a   :  { %7976 = vmatpush3.bf16.msra.mxu0 %v8672_v2  ;;  %v8712_v2 = vld [vmem:[#allocation2 + $0xfc8] sm:$0xff]  }
 0x20b   :  { %8005 = vmatprep.subr.bf16.mxu0 %v8675_v5  ;;  %7998 = vmatpush3.bf16.msra.mxu1 %v8673_v3  ;;  %v1640_v1 = vcombine.high %v1630_v60, %v1630_v60  ;;  %v1637_v3 = vrot.slane %v1609_v62, %v9030_v35  ;;  %v8714_v5 = vld [vmem:[#allocation2 + $0xf88] sm:$0xff]   ;;  %v8756_v62 = vld [vmem:[#allocation2 + $0x1060] sm:$0xff]  }
 0x20c   :  { %8027 = vmatprep.subr.bf16.mxu1 %v8676_v6 }
 0x20d   :  { %6292 = vmatmul.mubr.bf16.vlgmr.msra.gmra.mrb[52].mxu0 %v1574_v4  ;;  %v8713_v4 = vld [vmem:[#allocation2 + $0xf08] sm:$0xff]   ;;  %v1641_v6 = vcombine.high %v1637_v3, %v1637_v3 }
 0x20e   :  { %8006 = vmatpush3.bf16.msra.mxu0 %v8677_v7  ;;  %6332 = vmatmul.mubr.bf16.vlgmr.msra.gmra.mrb[52].mxu1 %v1590_v9  ;;  %v8715_v7 = vld [vmem:[#allocation2 + $0xf50] sm:$0xff]  }
 0x20f   :  { %8007 = vmatprep.subr.bf16.mxu0 %v8679_v10  ;;  %8028 = vmatpush3.bf16.msra.mxu1 %v8678_v8  ;;  %v8716_v8 = vld [vmem:[#allocation2 + $0xfd0] sm:$0xff]  }
 0x210   :  { %8029 = vmatprep.subr.bf16.mxu1 %v8680_v11  ;;  %6371 = vmatprep.mubr.bf16.mxu0 %v1630_v60  ;;  %v8717_v9 = vld [vmem:[#allocation2 + $0xf10] sm:$0xff]   ;;  %v8719_v11 = vld [vmem:[#allocation2 + $0xf58] sm:$0xff]  }
 0x211   :  { %6411 = vmatprep.mubr.bf16.mxu1 %v1640_v1  ;;  %v8718_v10 = vld [vmem:[#allocation2 + $0xf90] sm:$0xff]   ;;  %v8754_v60 = vld [vmem:[#allocation2 + $0x1018] sm:$0xff]   ;;  %v8759_v1 = vld [vmem:[#allocation2 + $0x10a0] sm:$0xff]  }
 0x212   :  { %8008 = vmatpush3.bf16.msra.mxu0 %v8681_v12  ;;  %v8720_v12 = vld [vmem:[#allocation2 + $0xfd8] sm:$0xff]  }
 0x213   :  { %8009 = vmatprep.subr.bf16.mxu0 %v8683_v14  ;;  %8030 = vmatpush3.bf16.msra.mxu1 %v8682_v13  ;;  %v8721_v13 = vld [vmem:[#allocation2 + $0xf18] sm:$0xff]  }
 0x214   :  { %8031 = vmatprep.subr.bf16.mxu1 %v8684_v15  ;;  %v8722_v14 = vld [vmem:[#allocation2 + $0xf98] sm:$0xff]   ;;  %v8723_v15 = vld [vmem:[#allocation2 + $0xf60] sm:$0xff]  }
 0x216   :  { %8010 = vmatpush3.bf16.msra.mxu0 %v8685_v16  ;;  %v8724_v16 = vld [vmem:[#allocation2 + $0xfe0] sm:$0xff]  }
 0x217   :  { %8011 = vmatprep.subr.bf16.mxu0 %v8687_v18  ;;  %8032 = vmatpush3.bf16.msra.mxu1 %v8686_v17  ;;  %v8725_v17 = vld [vmem:[#allocation2 + $0xf20] sm:$0xff]  }
 0x218   :  { %8033 = vmatprep.subr.bf16.mxu1 %v8688_v19  ;;  %v8726_v18 = vld [vmem:[#allocation2 + $0xfa0] sm:$0xff]   ;;  %v8727_v19 = vld [vmem:[#allocation2 + $0xf68] sm:$0xff]  }
 0x21a   :  { %8012 = vmatpush3.bf16.msra.mxu0 %v8689_v20  ;;  %v8728_v20 = vld [vmem:[#allocation2 + $0xfe8] sm:$0xff]  }
 0x21b   :  { %8013 = vmatprep.subr.bf16.mxu0 %v8691_v22  ;;  %8034 = vmatpush3.bf16.msra.mxu1 %v8690_v21  ;;  %v8729_v22 = vld [vmem:[#allocation2 + $0xf28] sm:$0xff]  }
 0x21c   :  { %8035 = vmatprep.subr.bf16.mxu1 %v8692_v23 }
 0x21e   :  { %8014 = vmatpush3.bf16.msra.mxu0 %v8693_v24  ;;  %v8730_v24 = vld [vmem:[#allocation2 + $0xfa8] sm:$0xff]  }
 0x21f   :  { %8015 = vmatprep.subr.bf16.mxu0 %v8695_v26  ;;  %8036 = vmatpush3.bf16.msra.mxu1 %v8694_v25 }
 0x220   :  { %v7713_v28 = vpop.f32.mrb[28].mxu0  ;;  %8037 = vmatprep.subr.bf16.mxu1 %v8696_v27 }
 0x221   :  { %v7714_v30 = vpop.f32.mrb[29].mxu0  ;;  %v7735_v32 = vpop.f32.mrb[28].mxu1 }
 0x222   :  { %v7715_v33 = vadd.f32 %v7714_v30, %v7713_v28  ;;  %v7716_v34 = vpop.f32.mrb[30].mxu0  ;;  %v7736_v36 = vpop.f32.mrb[29].mxu1  ;;  %8016 = vmatpush3.bf16.msra.mxu0 %v8697_v29  ;;  %v8731_v28 = vld [vmem:[#allocation2 + $0xf70] sm:$0xff]  }
 0x223   :  { %v7717_v38 = vpop.f32.mrb[31].mxu0  ;;  %v7737_v41 = vadd.f32 %v7736_v36, %v7735_v32  ;;  %v7738_v42 = vpop.f32.mrb[30].mxu1  ;;  %8017 = vmatprep.subr.bf16.mxu0 %v8699_v31  ;;  %8038 = vmatpush3.bf16.msra.mxu1 %v8698_v37  ;;  %v8732_v29 = vld [vmem:[#allocation2 + $0xff0] sm:$0xff]  }
 0x224   :  { %v5814_v40 = vadd.f32 %v7715_v33, %v9146_v63  ;;  %v7739_v44 = vpop.f32.mrb[31].mxu1  ;;  %8039 = vmatprep.subr.bf16.mxu1 %v8700_v39  ;;  %v1638_v63 = vcombine.high %v1616_v56, %v1616_v56  ;;  %v8733_v36 = vld [vmem:[#allocation2 + $0xf30] sm:$0xff]   ;;  %v8737_v42 = vld [vmem:[#allocation2 + $0xf38] sm:$0xff]  }
 0x225   :  { %v8734_v38 = vld [vmem:[#allocation2 + $0xfb0] sm:$0xff]   ;;  %v1623_v44 = vrot.slane %v9159_v58, %v9030_v35  ;;  %v8752_v58 = vld [vmem:[#allocation2 + $0x1058] sm:$0xff]  }
 0x226   :  { %v9151_v46 = vadd.f32 %v7737_v41, %v5814_v40  ;;  %8018 = vmatpush3.bf16.msra.mxu0 %v8701_v43  ;;  %v8735_v40 = vld [vmem:[#allocation2 + $0xf78] sm:$0xff]  }
 0x227   :  { %8019 = vmatprep.subr.bf16.mxu0 %v8703_v45  ;;  %8040 = vmatpush3.bf16.msra.mxu1 %v8702_v47  ;;  %v8736_v41 = vld [vmem:[#allocation2 + $0xff8] sm:$0xff]   ;;  %v8740_v45 = vld [vmem:[#allocation2 + $0x1040] sm:$0xff]  }
 0x228   :  { %8041 = vmatprep.subr.bf16.mxu1 %v8704_v48  ;;  %v8738_v43 = vld [vmem:[#allocation2 + $0xfb8] sm:$0xff]   ;;  %v8742_v47 = vld [vmem:[#allocation2 + $0x1000] sm:$0xff]  }
 0x229   :  { %v8743_v48 = vld [vmem:[#allocation2 + $0x1080] sm:$0xff]  }
 0x22a   :  { %8020 = vmatpush3.bf16.msra.mxu0 %v8705_v49  ;;  %v1639_v49 = vcombine.high %v1623_v44, %v1623_v44 }
 0x22b   :  { %8049 = vmatprep.subr.bf16.mxu0 %v8707_v52  ;;  %8042 = vmatpush3.bf16.msra.mxu1 %v8706_v54  ;;  %v8746_v52 = vld [vmem:[#allocation2 + $0x1008] sm:$0xff]   ;;  %v8748_v54 = vld [vmem:[#allocation2 + $0x1050] sm:$0xff]  }
 0x22c   :  { %8071 = vmatprep.subr.bf16.mxu1 %v8708_v57  ;;  %v8751_v57 = vld [vmem:[#allocation2 + $0x1090] sm:$0xff]  }
 0x22d   :  { %6372 = vmatmul.mubr.bf16.vlgmr.msra.gmra.mrb[56].mxu0 %v1616_v56  ;;  %v8750_v56 = vld [vmem:[#allocation2 + $0x1010] sm:$0xff]  }
 0x22e   :  { %8050 = vmatpush3.bf16.msra.mxu0 %v8709_v59  ;;  %6412 = vmatmul.mubr.bf16.vlgmr.msra.gmra.mrb[56].mxu1 %v1638_v63  ;;  %v8753_v59 = vld [vmem:[#allocation2 + $0x10d8] sm:$0xff]   ;;  %v8757_v63 = vld [vmem:[#allocation2 + $0x10e0] sm:$0xff]  }
 0x22f   :  { %8051 = vmatprep.subr.bf16.mxu0 %v8711_v0  ;;  %8072 = vmatpush3.bf16.msra.mxu1 %v8710_v61  ;;  %v8755_v61 = vld [vmem:[#allocation2 + $0x1098] sm:$0xff]   ;;  %v8758_v0 = vld [vmem:[#allocation2 + $0x1020] sm:$0xff]  }
 0x230   :  { %6451 = vmatprep.mubr.bf16.mxu0 %v1637_v3  ;;  %8073 = vmatprep.subr.bf16.mxu1 %v8712_v2  ;;  %v8760_v2 = vld [vmem:[#allocation2 + $0x1068] sm:$0xff]  }
 0x231   :  { %6491 = vmatprep.mubr.bf16.mxu1 %v1641_v6  ;;  %v8761_v3 = vld [vmem:[#allocation2 + $0x10e8] sm:$0xff]  }
 0x232   :  { %8052 = vmatpush3.bf16.msra.mxu0 %v8713_v4 }
 0x233   :  { %8053 = vmatprep.subr.bf16.mxu0 %v8715_v7  ;;  %8074 = vmatpush3.bf16.msra.mxu1 %v8714_v5  ;;  %v8762_v5 = vld [vmem:[#allocation2 + $0x1028] sm:$0xff]   ;;  %v8764_v7 = vld [vmem:[#allocation2 + $0x1070] sm:$0xff]  }
 0x234   :  { %8075 = vmatprep.subr.bf16.mxu1 %v8716_v8 }
 0x236   :  { %8054 = vmatpush3.bf16.msra.mxu0 %v8717_v9 }
 0x237   :  { %8055 = vmatprep.subr.bf16.mxu0 %v8719_v11  ;;  %8076 = vmatpush3.bf16.msra.mxu1 %v8718_v10 }
 0x238   :  { %8077 = vmatprep.subr.bf16.mxu1 %v8720_v12  ;;  %v8763_v12 = vld [vmem:[#allocation2 + $0x10a8] sm:$0xff]  }
 0x23a   :  { %8056 = vmatpush3.bf16.msra.mxu0 %v8721_v13 }
 0x23b   :  { %8057 = vmatprep.subr.bf16.mxu0 %v8723_v15  ;;  %8078 = vmatpush3.bf16.msra.mxu1 %v8722_v14  ;;  %v8765_v14 = vld [vmem:[#allocation2 + $0x10f0] sm:$0xff]  }
 0x23c   :  { %8079 = vmatprep.subr.bf16.mxu1 %v8724_v16 }
 0x23e   :  { %8058 = vmatpush3.bf16.msra.mxu0 %v8725_v17 }
 0x23f   :  { %8059 = vmatprep.subr.bf16.mxu0 %v8727_v19  ;;  %8080 = vmatpush3.bf16.msra.mxu1 %v8726_v18  ;;  %v8766_v18 = vld [vmem:[#allocation2 + $0x1030] sm:$0xff]  }
 0x240   :  { %v7757_v21 = vpop.f32.mrb[32].mxu0  ;;  %8081 = vmatprep.subr.bf16.mxu1 %v8728_v20  ;;  %v8768_v20 = vld [vmem:[#allocation2 + $0x1078] sm:$0xff]  }
 0x241   :  { %v7758_v23 = vpop.f32.mrb[33].mxu0  ;;  %v7779_v25 = vpop.f32.mrb[32].mxu1 }
 0x242   :  { %v7759_v26 = vadd.f32 %v7758_v23, %v7757_v21  ;;  %v7760_v27 = vpop.f32.mrb[34].mxu0  ;;  %v7780_v30 = vpop.f32.mrb[33].mxu1  ;;  %8060 = vmatpush3.bf16.msra.mxu0 %v8729_v22  ;;  %v8767_v22 = vld [vmem:[#allocation2 + $0x10b0] sm:$0xff]   ;;  %v8769_v23 = vld [vmem:[#allocation2 + $0x10f8] sm:$0xff]  }
 0x243   :  { %v7761_v31 = vpop.f32.mrb[35].mxu0  ;;  %v7781_v33 = vadd.f32 %v7780_v30, %v7779_v25  ;;  %v7782_v34 = vpop.f32.mrb[34].mxu1  ;;  %8061 = vmatprep.subr.bf16.mxu0 %v8731_v28  ;;  %8082 = vmatpush3.bf16.msra.mxu1 %v8730_v24  ;;  %v8770_v24 = vld [vmem:[#allocation2 + $0x1038] sm:$0xff]   ;;  %v81_v25 = vld [vmem:[%s9200_s0 + $0x40] sm:$0xff]  ;;  %s8944_s0 = smov [#allocation10]  }
 0x244   :  { %v5894_v32 = vadd.f32 %v7759_v26, %v9151_v46  ;;  %v7783_v37 = vpop.f32.mrb[35].mxu1  ;;  %8083 = vmatprep.subr.bf16.mxu1 %v8732_v29  ;;  %v8741_v46 = vld [vmem:[#allocation2 + $0x10c0] sm:$0xff]   ;;  %v1649_v26 = vrot.slane %v81_v25, %v9030_v35  ;;  %v1642_v28 = vcombine.high %v81_v25, %v81_v25  ;;  %v8771_v29 = vld [vmem:[#allocation2 + $0x10b8] sm:$0xff]   ;;  %s6792_s7 = sshll.u32 %s8944_s0, 4  ;;  %s6793_s7 = int_to_ptr.vmem [resolvable:$true] %s6792_s7 }
 0x245   :  { %v8772_v27 = vld [vmem:[#allocation2 + $0x1140] sm:$0xff]   ;;  %s8905_s8 = scalar_lea.vmem %s6793_s7, 32  ;;  %p8910_p5 = scmp.lt.s32.totalorder %s6793_s7, %s6793_s7 }
 0x246   :  { %v9166_v39 = vadd.f32 %v7781_v33, %v5894_v32  ;;  %8062 = vmatpush3.bf16.msra.mxu0 %v8733_v36  ;;  %v1657_v30 = vcombine.high %v1649_v26, %v1649_v26  ;;  %v1665_v31 = vrot.slane %v1649_v26, %v9030_v35  ;;  %v8773_v32 = vld [vmem:[#allocation2 + $0x11c0] sm:$0xff]   ;;  %v9179_v33 = vrot.slane %v1642_v28, %v9030_v35  ;;  %p8906_p4 = scmp.ne.s32.totalorder %s6793_s7, %s8905_s8  ;;  %p8911_p6 = scmp.lt.s32.totalorder %s8905_s8, %s8905_s8 }
 0x247   :  { %8063 = vmatprep.subr.bf16.mxu0 %v8735_v40  ;;  %8084 = vmatpush3.bf16.msra.mxu1 %v8734_v38  ;;  %v8774_v34 = vld [vmem:[#allocation2 + $0x1100] sm:$0xff]   ;;  %v8776_v40 = vld [vmem:[#allocation2 + $0x1148] sm:$0xff]  }
 0x248   :  { %8085 = vmatprep.subr.bf16.mxu1 %v8736_v41  ;;  %v1679_v36 = vrot.slane %v1657_v30, %v9030_v35  ;;  %v8775_v37 = vld [vmem:[#allocation2 + $0x1180] sm:$0xff]   ;;  %v1658_v38 = vcombine.high %v9179_v33, %v9179_v33  ;;  %p8912_p7 = por %p8911_p6, %p8910_p5 }
 0x24a   :  { %8064 = vmatpush3.bf16.msra.mxu0 %v8737_v42  ;;  %v1689_v41 = vcombine.high %v1679_v36, %v1679_v36  ;;  %v8777_v42 = vld [vmem:[#allocation2 + $0x11c8] sm:$0xff]   ;;  %p8913_p8 = pnand %p8912_p7, %p8906_p4 }
 0x24b   :  { %8093 = vmatprep.subr.bf16.mxu0 %v8740_v45  ;;  %8086 = vmatpush3.bf16.msra.mxu1 %v8738_v43  ;;  %v1686_v43 = vrot.slane %v1658_v38, %v9030_v35  ;;  %v8779_v45 = vld [vmem:[#allocation2 + $0x1188] sm:$0xff]  }
 0x24c   :  { %8115 = vmatprep.subr.bf16.mxu1 %v8741_v46 }
 0x24d   :  { %6452 = vmatmul.mubr.bf16.vlgmr.msra.gmra.mrb[60].mxu0 %v1623_v44  ;;  %v8778_v44 = vld [vmem:[#allocation2 + $0x1108] sm:$0xff]   ;;  %v1690_v46 = vcombine.high %v1686_v43, %v1686_v43 }
 0x24e   :  { %8094 = vmatpush3.bf16.msra.mxu0 %v8742_v47  ;;  %6492 = vmatmul.mubr.bf16.vlgmr.msra.gmra.mrb[60].mxu1 %v1639_v49  ;;  %v8780_v47 = vld [vmem:[#allocation2 + $0x1150] sm:$0xff]  }
 0x24f   :  { %8095 = vmatprep.subr.bf16.mxu0 %v8744_v50  ;;  %8116 = vmatpush3.bf16.msra.mxu1 %v8743_v48  ;;  %v8781_v48 = vld [vmem:[#allocation2 + $0x11d0] sm:$0xff]  }
 0x250   :  { %8117 = vmatprep.subr.bf16.mxu1 %v8745_v51  ;;  %6531 = vmatprep.mubr.bf16.mxu0 %v1679_v36  ;;  %v8782_v49 = vld [vmem:[#allocation2 + $0x1110] sm:$0xff]   ;;  %v8784_v51 = vld [vmem:[#allocation2 + $0x1158] sm:$0xff]  }
 0x251   :  { %6571 = vmatprep.mubr.bf16.mxu1 %v1689_v41  ;;  %v8783_v50 = vld [vmem:[#allocation2 + $0x1190] sm:$0xff]  }
 0x252   :  { %8096 = vmatpush3.bf16.msra.mxu0 %v8746_v52  ;;  %v8785_v52 = vld [vmem:[#allocation2 + $0x11d8] sm:$0xff]  }
 0x253   :  { %8097 = vmatprep.subr.bf16.mxu0 %v8748_v54  ;;  %8118 = vmatpush3.bf16.msra.mxu1 %v8747_v53  ;;  %v8786_v53 = vld [vmem:[#allocation2 + $0x1118] sm:$0xff]  }
 0x254   :  { %8119 = vmatprep.subr.bf16.mxu1 %v8749_v55  ;;  %v8787_v54 = vld [vmem:[#allocation2 + $0x1198] sm:$0xff]   ;;  %v8788_v55 = vld [vmem:[#allocation2 + $0x1160] sm:$0xff]  }
 0x256   :  { %8098 = vmatpush3.bf16.msra.mxu0 %v8750_v56  ;;  %v8789_v56 = vld [vmem:[#allocation2 + $0x11e0] sm:$0xff]  }
 0x257   :  { %8099 = vmatprep.subr.bf16.mxu0 %v8752_v58  ;;  %8120 = vmatpush3.bf16.msra.mxu1 %v8751_v57  ;;  %v8790_v57 = vld [vmem:[#allocation2 + $0x1120] sm:$0xff]  }
 0x258   :  { %8121 = vmatprep.subr.bf16.mxu1 %v8753_v59  ;;  %v8791_v58 = vld [vmem:[#allocation2 + $0x11a0] sm:$0xff]   ;;  %v8792_v59 = vld [vmem:[#allocation2 + $0x1168] sm:$0xff]  }
 0x25a   :  { %8100 = vmatpush3.bf16.msra.mxu0 %v8754_v60  ;;  %v8793_v60 = vld [vmem:[#allocation2 + $0x11e8] sm:$0xff]  }
 0x25b   :  { %8101 = vmatprep.subr.bf16.mxu0 %v8756_v62  ;;  %8122 = vmatpush3.bf16.msra.mxu1 %v8755_v61  ;;  %v8794_v62 = vld [vmem:[#allocation2 + $0x1128] sm:$0xff]  }
 0x25c   :  { %8123 = vmatprep.subr.bf16.mxu1 %v8757_v63 }
 0x25e   :  { %8102 = vmatpush3.bf16.msra.mxu0 %v8758_v0  ;;  %v8795_v0 = vld [vmem:[#allocation2 + $0x11a8] sm:$0xff]  }
 0x25f   :  { %8103 = vmatprep.subr.bf16.mxu0 %v8760_v2  ;;  %8124 = vmatpush3.bf16.msra.mxu1 %v8759_v1 }
 0x260   :  { %v7801_v4 = vpop.f32.mrb[36].mxu0  ;;  %8125 = vmatprep.subr.bf16.mxu1 %v8761_v3 }
 0x261   :  { %v7802_v6 = vpop.f32.mrb[37].mxu0  ;;  %v7823_v8 = vpop.f32.mrb[36].mxu1 }
 0x262   :  { %v7803_v9 = vadd.f32 %v7802_v6, %v7801_v4  ;;  %v7804_v10 = vpop.f32.mrb[38].mxu0  ;;  %v7824_v11 = vpop.f32.mrb[37].mxu1  ;;  %8104 = vmatpush3.bf16.msra.mxu0 %v8762_v5  ;;  %v8796_v4 = vld [vmem:[#allocation2 + $0x1170] sm:$0xff]  }
 0x263   :  { %v7805_v13 = vpop.f32.mrb[39].mxu0  ;;  %v7825_v16 = vadd.f32 %v7824_v11, %v7823_v8  ;;  %v7826_v17 = vpop.f32.mrb[38].mxu1  ;;  %8105 = vmatprep.subr.bf16.mxu0 %v8764_v7  ;;  %8126 = vmatpush3.bf16.msra.mxu1 %v8763_v12  ;;  %v8797_v5 = vld [vmem:[#allocation2 + $0x11f0] sm:$0xff]  }
 0x264   :  { %v5974_v15 = vadd.f32 %v7803_v9, %v9166_v39  ;;  %v7827_v19 = vpop.f32.mrb[39].mxu1  ;;  %8127 = vmatprep.subr.bf16.mxu1 %v8765_v14  ;;  %v1687_v39 = vcombine.high %v1665_v31, %v1665_v31  ;;  %v8798_v11 = vld [vmem:[#allocation2 + $0x1130] sm:$0xff]   ;;  %v8802_v17 = vld [vmem:[#allocation2 + $0x1138] sm:$0xff]  }
 0x265   :  { %v8799_v13 = vld [vmem:[#allocation2 + $0x11b0] sm:$0xff]   ;;  %v1672_v19 = vrot.slane %v9179_v33, %v9030_v35 }
 0x266   :  { %v9171_v21 = vadd.f32 %v7825_v16, %v5974_v15  ;;  %8106 = vmatpush3.bf16.msra.mxu0 %v8766_v18  ;;  %v8800_v15 = vld [vmem:[#allocation2 + $0x1178] sm:$0xff]  }
 0x267   :  { %8107 = vmatprep.subr.bf16.mxu0 %v8768_v20  ;;  %8128 = vmatpush3.bf16.msra.mxu1 %v8767_v22  ;;  %v8801_v16 = vld [vmem:[#allocation2 + $0x11f8] sm:$0xff]   ;;  %v1688_v20 = vcombine.high %v1672_v19, %v1672_v19 }
 0x268   :  { %8129 = vmatprep.subr.bf16.mxu1 %v8769_v23  ;;  %v8803_v18 = vld [vmem:[#allocation2 + $0x11b8] sm:$0xff]  }
 0x26a   :  { %8108 = vmatpush3.bf16.msra.mxu0 %v8770_v24 }
 0x26b   :  { %8137 = vmatprep.subr.bf16.mxu0 %v8772_v27  ;;  %8130 = vmatpush3.bf16.msra.mxu1 %v8771_v29 }
 0x26c   :  { %8159 = vmatprep.subr.bf16.mxu1 %v8773_v32 }
 0x26d   :  { %6532 = vmatmul.mubr.bf16.vlgmr.msra.gmra.mrb[64].mxu0 %v1665_v31 }
 0x26e   :  { %8138 = vmatpush3.bf16.msra.mxu0 %v8774_v34  ;;  %6572 = vmatmul.mubr.bf16.vlgmr.msra.gmra.mrb[64].mxu1 %v1687_v39 }
 0x26f   :  { %8139 = vmatprep.subr.bf16.mxu0 %v8776_v40  ;;  %8160 = vmatpush3.bf16.msra.mxu1 %v8775_v37 }
 0x270   :  { %6611 = vmatprep.mubr.bf16.mxu0 %v1686_v43  ;;  %8161 = vmatprep.subr.bf16.mxu1 %v8777_v42 }
 0x271   :  { %6651 = vmatprep.mubr.bf16.mxu1 %v1690_v46  ;;  %v8942_v46 = vmov 0.0  }
 0x272   :  { %8140 = vmatpush3.bf16.msra.mxu0 %v8778_v44 }
 0x273   :  { %8141 = vmatprep.subr.bf16.mxu0 %v8780_v47  ;;  %8162 = vmatpush3.bf16.msra.mxu1 %v8779_v45  ;;  %v8805_v45 = vld [vmem:[#allocation7] sm:$0xff]   ;;  %v8806_v47 = vld [vmem:[#allocation7 + $0x8] sm:$0xff]  }
 0x274   :  { %8163 = vmatprep.subr.bf16.mxu1 %v8781_v48  ;;  %v8807_v48 = vld [vmem:[#allocation7 + $0x10] sm:$0xff]  }
 0x276   :  { %8142 = vmatpush3.bf16.msra.mxu0 %v8782_v49  ;;  %v8808_v49 = vld [vmem:[#allocation7 + $0x18] sm:$0xff]  }
 0x277   :  { %8143 = vmatprep.subr.bf16.mxu0 %v8784_v51  ;;  %8164 = vmatpush3.bf16.msra.mxu1 %v8783_v50  ;;  %v8809_v50 = vld [vmem:[#allocation7 + $0x20] sm:$0xff]  }
 0x278   :  { %8165 = vmatprep.subr.bf16.mxu1 %v8785_v52 }
 0x27a   :  { %8144 = vmatpush3.bf16.msra.mxu0 %v8786_v53 }
 0x27b   :  { %8145 = vmatprep.subr.bf16.mxu0 %v8788_v55  ;;  %8166 = vmatpush3.bf16.msra.mxu1 %v8787_v54 }
 0x27c   :  { %8167 = vmatprep.subr.bf16.mxu1 %v8789_v56 }
 0x27e   :  { %8146 = vmatpush3.bf16.msra.mxu0 %v8790_v57 }
 0x27f   :  { %8147 = vmatprep.subr.bf16.mxu0 %v8792_v59  ;;  %8168 = vmatpush3.bf16.msra.mxu1 %v8791_v58  ;;  %v8810_v58 = vld [vmem:[#allocation7 + $0x28] sm:$0xff]  }
 0x280   :  { %v7845_v61 = vpop.f32.mrb[40].mxu0  ;;  %8169 = vmatprep.subr.bf16.mxu1 %v8793_v60 }
 0x281   :  { %v7846_v63 = vpop.f32.mrb[41].mxu0  ;;  %v7867_v1 = vpop.f32.mrb[40].mxu1 }
 0x282   :  { %v7847_v2 = vadd.f32 %v7846_v63, %v7845_v61  ;;  %v7848_v3 = vpop.f32.mrb[42].mxu0  ;;  %v7868_v6 = vpop.f32.mrb[41].mxu1  ;;  %8148 = vmatpush3.bf16.msra.mxu0 %v8794_v62 }
 0x283   :  { %v7849_v7 = vpop.f32.mrb[43].mxu0  ;;  %v7869_v9 = vadd.f32 %v7868_v6, %v7867_v1  ;;  %v7870_v10 = vpop.f32.mrb[42].mxu1  ;;  %8149 = vmatprep.subr.bf16.mxu0 %v8796_v4  ;;  %8170 = vmatpush3.bf16.msra.mxu1 %v8795_v0  ;;  %v8811_v0 = vld [vmem:[#allocation7 + $0x30] sm:$0xff]   ;;  %v8812_v1 = vld [vmem:[#allocation7 + $0x38] sm:$0xff]  }
 0x284   :  { %v6054_v8 = vadd.f32 %v7847_v2, %v9171_v21  ;;  %v7871_v12 = vpop.f32.mrb[43].mxu1  ;;  %8171 = vmatprep.subr.bf16.mxu1 %v8797_v5 }
 0x286   :  { %v6094_v14 = vadd.f32 %v7869_v9, %v6054_v8  ;;  %8150 = vmatpush3.bf16.msra.mxu0 %v8798_v11 }
 0x287   :  { %8151 = vmatprep.subr.bf16.mxu0 %v8800_v15  ;;  %8172 = vmatpush3.bf16.msra.mxu1 %v8799_v13 }
 0x288   :  { %8173 = vmatprep.subr.bf16.mxu1 %v8801_v16 }
 0x28a   :  { %8152 = vmatpush3.bf16.msra.mxu0 %v8802_v17 }
 0x28b   :  { %8174 = vmatpush3.bf16.msra.mxu1 %v8803_v18  ;;  %8190 = vmatprep.subr.bf16.mxu0 %v8942_v46 }
 0x28d   :  { %6612 = vmatmul.mubr.bf16.vlgmr.msra.gmra.mrb[68].mxu0 %v1672_v19 }
 0x28e   :  { %6652 = vmatmul.mubr.bf16.vlgmr.msra.gmra.mrb[68].mxu1 %v1688_v20  ;;  %8191 = vmatpush3.bf16.msra.mxu0 %v8805_v45 }
 0x28f   :  { %8192 = vmatprep.subr.bf16.mxu0 %v8942_v46  ;;  %8206 = vmatprep.mubr.msk.bf16.mxu0 %vm8943_vm0, %v8942_v46 }
 0x292   :  { %8193 = vmatpush3.bf16.msra.mxu0 %v8806_v47 }
 0x293   :  { %8194 = vmatprep.subr.bf16.mxu0 %v8942_v46 }
 0x296   :  { %8195 = vmatpush3.bf16.msra.mxu0 %v8807_v48 }
 0x297   :  { %8196 = vmatprep.subr.bf16.mxu0 %v8942_v46 }
 0x29a   :  { %8197 = vmatpush3.bf16.msra.mxu0 %v8808_v49 }
 0x29b   :  { %8198 = vmatprep.subr.bf16.mxu0 %v8942_v46 }
 0x29e   :  { %8199 = vmatpush3.bf16.msra.mxu0 %v8809_v50 }
 0x29f   :  { %8200 = vmatprep.subr.bf16.mxu0 %v8942_v46 }
 0x2a0   :  { %v7889_v21 = vpop.f32.mrb[44].mxu0 }
 0x2a1   :  { %v7890_v22 = vpop.f32.mrb[45].mxu0  ;;  %v7911_v23 = vpop.f32.mrb[44].mxu1 }
 0x2a2   :  { %v7891_v24 = vadd.f32 %v7890_v22, %v7889_v21  ;;  %v7892_v25 = vpop.f32.mrb[46].mxu0  ;;  %v7912_v26 = vpop.f32.mrb[45].mxu1  ;;  %8201 = vmatpush3.bf16.msra.mxu0 %v8810_v58 }
 0x2a3   :  { %v7893_v27 = vpop.f32.mrb[47].mxu0  ;;  %v7913_v29 = vadd.f32 %v7912_v26, %v7911_v23  ;;  %v7914_v30 = vpop.f32.mrb[46].mxu1  ;;  %8202 = vmatprep.subr.bf16.mxu0 %v8942_v46 }
 0x2a4   :  { %v6134_v28 = vadd.f32 %v7891_v24, %v6094_v14  ;;  %v7915_v31 = vpop.f32.mrb[47].mxu1 }
 0x2a6   :  { %v6174_v32 = vadd.f32 %v7913_v29, %v6134_v28  ;;  %8203 = vmatpush3.bf16.msra.mxu0 %v8811_v0 }
 0x2a7   :  { %8204 = vmatprep.subr.bf16.mxu0 %v8942_v46 }
 0x2aa   :  { %8205 = vmatpush3.bf16.msra.mxu0 %v8812_v1 }
 0x2c0   :  { %v7933_v35 = vpop.f32.mrb[48].mxu0 }
 0x2c1   :  { %v7934_v33 = vpop.f32.mrb[49].mxu0  ;;  %v7955_v34 = vpop.f32.mrb[48].mxu1 }
 0x2c2   :  { %v7935_v36 = vadd.f32 %v7934_v33, %v7933_v35  ;;  %v7936_v37 = vpop.f32.mrb[50].mxu0  ;;  %v7956_v38 = vpop.f32.mrb[49].mxu1 }
 0x2c3   :  { %v7937_v39 = vpop.f32.mrb[51].mxu0  ;;  %v7957_v41 = vadd.f32 %v7956_v38, %v7955_v34  ;;  %v7958_v42 = vpop.f32.mrb[50].mxu1 }
 0x2c4   :  { %v6214_v40 = vadd.f32 %v7935_v36, %v6174_v32  ;;  %v7959_v43 = vpop.f32.mrb[51].mxu1 }
 0x2c6   :  { %v6254_v44 = vadd.f32 %v7957_v41, %v6214_v40 }
 0x2e0   :  { %v7977_v51 = vpop.f32.mrb[52].mxu0 }
 0x2e1   :  { %v7978_v52 = vpop.f32.mrb[53].mxu0  ;;  %v7999_v53 = vpop.f32.mrb[52].mxu1 }
 0x2e2   :  { %v7979_v54 = vadd.f32 %v7978_v52, %v7977_v51  ;;  %v7980_v55 = vpop.f32.mrb[54].mxu0  ;;  %v8000_v56 = vpop.f32.mrb[53].mxu1  ;;  %v7380_v52 = vld [vmem:[#allocation8] ss:$0 sm:$0xff] }
 0x2e3   :  { %v7981_v57 = vpop.f32.mrb[55].mxu0  ;;  %v8001_v60 = vadd.f32 %v8000_v56, %v7999_v53  ;;  %v8002_v61 = vpop.f32.mrb[54].mxu1 }
 0x2e4   :  { %v6294_v59 = vadd.f32 %v7979_v54, %v6254_v44  ;;  %v8003_v62 = vpop.f32.mrb[55].mxu1 }
 0x2e6   :  { %v6334_v63 = vadd.f32 %v8001_v60, %v6294_v59 }
 0x300   :  { %v8021_v2 = vpop.f32.mrb[56].mxu0 }
 0x301   :  { %v8022_v3 = vpop.f32.mrb[57].mxu0  ;;  %v8043_v4 = vpop.f32.mrb[56].mxu1 }
 0x302   :  { %v8023_v5 = vadd.f32 %v8022_v3, %v8021_v2  ;;  %v8024_v6 = vpop.f32.mrb[58].mxu0  ;;  %v8044_v7 = vpop.f32.mrb[57].mxu1 }
 0x303   :  { %v8025_v8 = vpop.f32.mrb[59].mxu0  ;;  %v8045_v10 = vadd.f32 %v8044_v7, %v8043_v4  ;;  %v8046_v11 = vpop.f32.mrb[58].mxu1 }
 0x304   :  { %v6374_v9 = vadd.f32 %v8023_v5, %v6334_v63  ;;  %v8047_v12 = vpop.f32.mrb[59].mxu1 }
 0x306   :  { %v6414_v13 = vadd.f32 %v8045_v10, %v6374_v9 }
 0x320   :  { %v8065_v14 = vpop.f32.mrb[60].mxu0 }
 0x321   :  { %v8066_v15 = vpop.f32.mrb[61].mxu0  ;;  %v8087_v16 = vpop.f32.mrb[60].mxu1 }
 0x322   :  { %v8067_v17 = vadd.f32 %v8066_v15, %v8065_v14  ;;  %v8068_v18 = vpop.f32.mrb[62].mxu0  ;;  %v8088_v19 = vpop.f32.mrb[61].mxu1 }
 0x323   :  { %v8069_v20 = vpop.f32.mrb[63].mxu0  ;;  %v8089_v22 = vadd.f32 %v8088_v19, %v8087_v16  ;;  %v8090_v23 = vpop.f32.mrb[62].mxu1 }
 0x324   :  { %v6454_v21 = vadd.f32 %v8067_v17, %v6414_v13  ;;  %v8091_v24 = vpop.f32.mrb[63].mxu1 }
 0x326   :  { %v6494_v25 = vadd.f32 %v8089_v22, %v6454_v21 }
 0x340   :  { %v8109_v26 = vpop.f32.mrb[64].mxu0 }
 0x341   :  { %v8110_v27 = vpop.f32.mrb[65].mxu0  ;;  %v8131_v28 = vpop.f32.mrb[64].mxu1 }
 0x342   :  { %v8111_v29 = vadd.f32 %v8110_v27, %v8109_v26  ;;  %v8112_v30 = vpop.f32.mrb[66].mxu0  ;;  %v8132_v31 = vpop.f32.mrb[65].mxu1 }
 0x343   :  { %v8113_v32 = vpop.f32.mrb[67].mxu0  ;;  %v8133_v33 = vadd.f32 %v8132_v31, %v8131_v28  ;;  %v8134_v34 = vpop.f32.mrb[66].mxu1 }
 0x344   :  { %v6534_v35 = vadd.f32 %v8111_v29, %v6494_v25  ;;  %v8135_v36 = vpop.f32.mrb[67].mxu1 }
 0x346   :  { %v6574_v37 = vadd.f32 %v8133_v33, %v6534_v35 }
 0x360   :  { %v8153_v38 = vpop.f32.mrb[68].mxu0 }
 0x361   :  { %v8154_v39 = vpop.f32.mrb[69].mxu0  ;;  %v8175_v40 = vpop.f32.mrb[68].mxu1 }
 0x362   :  { %v8155_v41 = vadd.f32 %v8154_v39, %v8153_v38  ;;  %v8156_v42 = vpop.f32.mrb[70].mxu0  ;;  %v8176_v43 = vpop.f32.mrb[69].mxu1 }
 0x363   :  { %v8157_v44 = vpop.f32.mrb[71].mxu0  ;;  %v8177_v46 = vadd.f32 %v8176_v43, %v8175_v40  ;;  %v8178_v47 = vpop.f32.mrb[70].mxu1 }
 0x364   :  { %v6614_v45 = vadd.f32 %v8155_v41, %v6574_v37  ;;  %v8179_v48 = vpop.f32.mrb[71].mxu1 }
 0x366   :  { %v6654_v49 = vadd.f32 %v8177_v46, %v6614_v45 }
 0x368   :  { %v6659_v50 = vmax.f32 %v6654_v49, 0.0 }
 0x36a   :  { %v6660_v51 = vpack.c.bf16 %v6659_v50, %v6659_v50 }
 0x36c   :  { %8207 = vmatmul.mubr.bf16.vlgmr.msra.gmra.mrb[72].mxu0 %v6660_v51 }
 0x43f   :  { %v6766_v53 = vpop.f32.mrb[72].mxu0 }
 0x440   :  { %v6767_v54 = vadd.f32 %v7380_v52, %v6766_v53  ;;  %v8208_v55 = vpop.f32.mrb[73].mxu0 }
 0x441   :  { %v6769_v56 = vpop.f32.mrb[74].mxu0 }
 0x442   :  { %v8209_v57 = vpop.f32.mrb[75].mxu0  ;;  %v6773_v58 = vsel %vm6772_vm1, %v6767_v54, -inf }
 0x443   :  { %6774 = vmax.xlane.f32.xlu0 %v6773_v58 }
 0x4d0   :  { %v6775_v59 = vpop.xlane.xlu0 %6774 }
 0x4d1   :  { %v6776_v60 = vsub.f32 %v6767_v54, %v6775_v59 }
 0x4d3   :  { %v6777_v61 = vmul.f32 1.442695, %v6776_v60 }
 0x4d5   :  { %8813 = vpow2.f32 %v6777_v61 }
 0x4df   :  { %v8814_v62 = vpop.eup %8813 }
 0x4e0   :  { %v6779_v63 = vsel %vm6772_vm1, %v8814_v62, 0.0 }
 0x4e1   :  { %6780 = vadd.xlane.f32.xlu0 %v6779_v63 }
 0x56e   :  { %v6781_v0 = vpop.xlane.xlu0 %6780 }
 0x56f   :  { %8815 = vlog2.f32 %v6781_v0 }
 0x579   :  { %v8816_v1 = vpop.eup %8815 }
 0x57a   :  { %v6783_v2 = vmul.f32 0.6931472, %v8816_v1 }
 0x57c   :  { %v6784_v3 = vsub.f32 %v6776_v60, %v6783_v2 }
 0x57e   :  { %6785 = vst [vmem:[#allocation10] sm:$0x3] %v6784_v3 }
 0x57f   :  { %8916 = shalt.err (!%p8913_p8)
}
 0x580   :  { %s8917_s11 = scalar_lea.hbm %s9205_s5, 32 }
 0x581   :  { %p8918_p9 = scmp.ne.s32.totalorder %s9205_s5, %s8917_s11  ;;  %p8921_p10 = scmp.lt.u32.totalorder %s8917_s11, %s9205_s5 }
 0x583   :  { %p8923_p11 = pnand %p8921_p10, %p8918_p9 }
 0x585   :  { %8926 = shalt.err (!%p8923_p11)
}
 0x586   :  { %6795 = dma.vmem_to_hbm [thread:$0]  %s6793_s7, 32, %s9205_s5, [#allocation4]  }
 0x587   :  { %8933 = dma.done.wait [#allocation4], 32  }
 0x588   :  { %8934 = vsyncadd [#allocation4], 4294967264 }
 0x589   :  { %6799 = vsyncpa [#allocation3], 1 }
 0x58a   :  { %6800 = vsyncpa [#allocation6], 1 }
 0x58b   :  { %6801 = vsyncpa [#allocation9], 1 }
 0x58c   :  { %6802 = vsyncpa [#allocation4], 1 }

</bundles_post_ra>
